<compile_context>
chip_gen: v7x
topology: tpu7x:2x2x1
jax: 0.10.0
libtpu: 0.0.40
codegen_flags: <defaults>
</compile_context>

<pallas_src>
import functools

import jax
import jax.numpy as jnp
from jax import lax
from jax.experimental import pallas as pl
from jax.experimental.pallas import tpu as pltpu

OUT_DIM = {2: 39, 4: 35, 6: 31}

_VMEM_LIMIT_BYTES = 32 * 1024 * 1024


# ---------------------------------------------------------------------------
# Kernel 1: fused fc   y = relu(x @ w + b)   (columns pre-permuted/padded at init)
# ---------------------------------------------------------------------------
def _fc_kernel(x_ref, w_ref, b_ref, o_ref):
    acc = jnp.dot(x_ref[...], w_ref[...], preferred_element_type=jnp.float32)
    o_ref[...] = jnp.maximum(acc + b_ref[...], 0.0).astype(o_ref.dtype)


def fc_relu(h, w_pad, b_pad, n_split):
    B, K = h.shape
    K2, n_pad = w_pad.shape
    assert K == K2 and b_pad.shape == (1, n_pad) and n_pad % (n_split * 128) == 0
    tn = n_pad // n_split
    return pl.pallas_call(
        _fc_kernel,
        out_shape=jax.ShapeDtypeStruct((B, n_pad), jnp.float32),
        grid_spec=pltpu.PrefetchScalarGridSpec(
            num_scalar_prefetch=0,
            grid=(n_split,),
            in_specs=[pl.BlockSpec((B, K), lambda j: (0, 0)),
                      pl.BlockSpec((K, tn), lambda j: (0, j)),
                      pl.BlockSpec((1, tn), lambda j: (0, j))],
            out_specs=pl.BlockSpec((B, tn), lambda j: (0, j))),
        compiler_params=pltpu.CompilerParams(
            dimension_semantics=("parallel",),
            vmem_limit_bytes=_VMEM_LIMIT_BYTES),
    )(h, w_pad, b_pad)


# ---------------------------------------------------------------------------
# Kernel 2: the whole ConvTranspose2d stack fused, one grid step per batch element.
# ---------------------------------------------------------------------------
def _tconv3x3_rows(src_ref, dst_ref, w_ref, b_ref, *, hout, wout, cin, dst_off):
    """One stride-1 ConvTranspose2d = 9-tap dense conv over the padded src scratch;
    relu(out) rows are written into the interior of the pre-zeroed padded dst."""
    w_taps = [w_ref[t * cin:(t + 1) * cin, :] for t in range(9)]   # hoisted (Cin,Cout)
    bias = b_ref[...]                                              # (1, Cout)
    cout = w_taps[0].shape[1]

    def body(y, carry):
        acc = jnp.zeros((wout, cout), jnp.float32)
        for ky in range(3):
            for kx in range(3):
                win = src_ref[y + ky, kx:kx + wout, :]             # (wout, Cin)
                acc = acc + jnp.dot(win, w_taps[ky * 3 + kx],
                                    preferred_element_type=jnp.float32)
        acc = jnp.maximum(acc + bias, 0.0)
        dst_ref[y + dst_off, dst_off:dst_off + wout, :] = acc
        return carry

    lax.fori_loop(0, hout, body, 0)


def _tconv3x3_s2_phases(src_ref, w_ref, b_ref, o_ref, *, mout, cin):
    """Final ConvTranspose2d (stride=2, output_padding=1) via sub-pixel phases:
    each output parity (oy%2, ox%2) is a 2x2-tap conv over the pad-1 src buffer;
    the 4 phase weights are concatenated along the output-channel axis of w_ref."""
    w_taps = [w_ref[t * cin:(t + 1) * cin, :] for t in range(4)]   # (Cin, 4*Cout)
    bias = b_ref[...]                                              # (1, 4*Cout)
    cout4 = w_taps[0].shape[1]

    def body(m, carry):
        acc = jnp.zeros((mout, cout4), jnp.float32)
        for dy in range(2):
            for dx in range(2):
                win = src_ref[m + dy, dx:dx + mout, :]             # (mout, Cin)
                acc = acc + jnp.dot(win, w_taps[dy * 2 + dx],
                                    preferred_element_type=jnp.float32)
        o_ref[m, :, :] = (acc + bias).astype(o_ref.dtype)          # no relu
        return carry

    lax.fori_loop(0, mout, body, 0)


def _make_stack_kernel(out_dim, n_sconv, nf):
    def kernel(*refs):
        x_ref = refs[0]
        wb = refs[1:1 + 2 * n_sconv]
        w4_ref = refs[1 + 2 * n_sconv]
        b4_ref = refs[2 + 2 * n_sconv]
        o_ref = refs[3 + 2 * n_sconv]
        scratches = refs[4 + 2 * n_sconv:]

        # zero the padded activation scratches (borders must be exact zeros).
        for s_ref in scratches:
            s_ref[...] = jnp.zeros(s_ref.shape, jnp.float32)

        src = x_ref                                    # fc output, already pad-2 NHWC
        for j in range(n_sconv):
            hout = out_dim + 2 * (j + 1)               # layer output spatial size
            dst_off = 2 if j < n_sconv - 1 else 1      # last scratch is the pad-1 buffer
            _tconv3x3_rows(src, scratches[j], wb[2 * j], wb[2 * j + 1],
                           hout=hout, wout=hout, cin=nf, dst_off=dst_off)
            src = scratches[j]

        _tconv3x3_s2_phases(src, w4_ref, b4_ref, o_ref,
                            mout=out_dim + 2 * n_sconv + 1, cin=nf)
    return kernel


def deconv_stack(x_grid, deconv_params, w4, b4, *, out_dim, num_channels):
    B, hg, wg, nf = x_grid.shape
    n_sconv = len(deconv_params)
    m = out_dim + 2 * n_sconv + 1                      # phase grid size (obs = 2*m)

    inputs = [x_grid]
    in_specs = [pl.BlockSpec((None, hg, wg, nf), lambda b: (b, 0, 0, 0))]
    for w_mat, b_row in deconv_params:
        inputs += [w_mat, b_row]
        in_specs += [pl.BlockSpec(w_mat.shape, lambda b: (0, 0)),
                     pl.BlockSpec(b_row.shape, lambda b: (0, 0))]
    inputs += [w4, b4]
    in_specs += [pl.BlockSpec(w4.shape, lambda b: (0, 0)),
                 pl.BlockSpec(b4.shape, lambda b: (0, 0))]

    scratch_shapes = []
    for j in range(n_sconv):
        pad = 4 if j < n_sconv - 1 else 2              # pad-2 for next 3x3, pad-1 for phases
        size = out_dim + 2 * (j + 1) + pad
        scratch_shapes.append(pltpu.VMEM((size, size, nf), jnp.float32))

    kernel = _make_stack_kernel(out_dim, n_sconv, nf)
    return pl.pallas_call(
        kernel,
        out_shape=jax.ShapeDtypeStruct((B, m, m, 4 * num_channels), jnp.float32),
        grid_spec=pltpu.PrefetchScalarGridSpec(
            num_scalar_prefetch=0,
            grid=(B,),
            in_specs=in_specs,
            out_specs=pl.BlockSpec((None, m, m, 4 * num_channels),
                                   lambda b: (b, 0, 0, 0)),
            scratch_shapes=scratch_shapes),
        compiler_params=pltpu.CompilerParams(
            dimension_semantics=("parallel",),
            vmem_limit_bytes=_VMEM_LIMIT_BYTES),
    )(*inputs)


# ---------------------------------------------------------------------------
# Parameters (permutation / flipping / phase packing done once at init) + forward
# ---------------------------------------------------------------------------
def _fc_grid_geometry(out_dim, num_filters):
    wg = out_dim + 4                                   # pad-2 grid width of deconv 1
    hg = out_dim + 4
    while (hg * wg * num_filters) % 128 != 0:          # lane-dense fc output
        hg += 1
    n_pad = hg * wg * num_filters
    n_split = max(d for d in range(1, 9) if (n_pad // 128) % d == 0)
    return hg, wg, n_pad, n_split


def init_decoder_params(key, num_channels, feature_dim, num_layers=4, num_filters=32):
    out_dim = OUT_DIM[num_layers]
    n_sconv = num_layers - 1
    keys = jax.random.split(key, 2 + 2 * num_layers)
    params = {}

    # fc: columns permuted to NHWC and scattered into the zero-padded (hg, wg) grid.
    hg, wg, n_pad, _ = _fc_grid_geometry(out_dim, num_filters)
    fc_out = num_filters * out_dim * out_dim
    bound = 1.0 / (feature_dim ** 0.5)
    fc_w = jax.random.uniform(keys[0], (feature_dim, fc_out), jnp.float32, -bound, bound)
    fc_b = jax.random.uniform(keys[1], (fc_out,), jnp.float32, -bound, bound)

    w_nhwc = jnp.transpose(
        fc_w.reshape(feature_dim, num_filters, out_dim, out_dim), (0, 2, 3, 1))
    w_grid = jnp.zeros((feature_dim, hg, wg, num_filters), jnp.float32)
    w_grid = w_grid.at[:, 2:2 + out_dim, 2:2 + out_dim, :].set(w_nhwc)
    b_nhwc = jnp.transpose(fc_b.reshape(num_filters, out_dim, out_dim), (1, 2, 0))
    b_grid = jnp.zeros((hg, wg, num_filters), jnp.float32)
    b_grid = b_grid.at[2:2 + out_dim, 2:2 + out_dim, :].set(b_nhwc)
    params["fc_w"] = w_grid.reshape(feature_dim, n_pad)
    params["fc_b"] = b_grid.reshape(1, n_pad)

    # stride-1 deconvs: dense-conv equivalent (spatial flip), laid out (9*Cin, Cout).
    deconvs = []
    for i in range(n_sconv):
        cin = cout = num_filters
        bnd = 1.0 / ((cout * 9) ** 0.5)                # ConvTranspose2d fan_in = cout*k*k
        w = jax.random.uniform(keys[2 + 2 * i], (cin, cout, 3, 3), jnp.float32, -bnd, bnd)
        b = jax.random.uniform(keys[3 + 2 * i], (cout,), jnp.float32, -bnd, bnd)
        w_mat = jnp.transpose(w[:, :, ::-1, ::-1], (2, 3, 0, 1)).reshape(9 * cin, cout)
        deconvs.append((w_mat, b.reshape(1, cout)))
    params["deconvs"] = deconvs

    # final stride-2 deconv, packed as 4 sub-pixel phases:
    #   phase (py,px) at (m,n) = sum_{dy,dx} PA[m+dy, n+dx] @ T[py,px,dy,dx],
    #   PA = last activation padded by 1; T picks the matching original 3x3 taps.
    cin, cout = num_filters, num_channels
    bnd = 1.0 / ((cout * 9) ** 0.5)
    w = jax.random.uniform(keys[2 + 2 * n_sconv], (cin, cout, 3, 3), jnp.float32, -bnd, bnd)
    b = jax.random.uniform(keys[3 + 2 * n_sconv], (cout,), jnp.float32, -bnd, bnd)

    def _k(parity, d):                                 # kernel index used by (parity, tap d)
        if parity == 0:
            return 2 - 2 * d
        return 1 if d == 1 else None

    w4 = jnp.zeros((4 * cin, 4 * cout), jnp.float32)
    for py in range(2):
        for px in range(2):
            p = py * 2 + px
            for dy in range(2):
                for dx in range(2):
                    ky, kx = _k(py, dy), _k(px, dx)
                    if ky is None or kx is None:
                        continue
                    t = dy * 2 + dx
                    w4 = w4.at[t * cin:(t + 1) * cin,
                               p * cout:(p + 1) * cout].set(w[:, :, ky, kx])
    params["w4"] = w4
    params["b4"] = jnp.tile(b, 4).reshape(1, 4 * cout)
    return params


def decoder_forward(params, h, *, num_layers, num_filters, num_channels):
    out_dim = OUT_DIM[num_layers]
    n_sconv = num_layers - 1
    B = h.shape[0]
    hg, wg, _, n_split = _fc_grid_geometry(out_dim, num_filters)

    # relu(fc(h)), already laid out as the zero-padded NHWC input of deconv 1.
    y = fc_relu(h, params["fc_w"], params["fc_b"], n_split)
    x_grid = y.reshape(B, hg, wg, num_filters)                     # free reshape

    # all ConvTranspose2d layers fused in one kernel; output = 4 sub-pixel phases.
    phases = deconv_stack(x_grid, params["deconvs"], params["w4"], params["b4"],
                          out_dim=out_dim, num_channels=num_channels)

    # pixel-shuffle the phases and emit NCHW like the PyTorch module.
    m = out_dim + 2 * n_sconv + 1
    obs = phases.reshape(B, m, m, 2, 2, num_channels)
    obs = jnp.transpose(obs, (0, 5, 1, 3, 2, 4)).reshape(B, num_channels, 2 * m, 2 * m)
    return obs


if __name__ == "__main__":
    batch, feature_dim, num_channels = 2, 32, 3
    num_layers, num_filters = 4, 32          # out_dim = 35 -> final obs 84x84

    key = jax.random.PRNGKey(0)
    kp, kh = jax.random.split(key)
    params = init_decoder_params(kp, num_channels, feature_dim,
                                 num_layers, num_filters)
    h = jax.random.normal(kh, (batch, feature_dim), jnp.float32)

    fwd = jax.jit(functools.partial(
        decoder_forward, num_layers=num_layers,
        num_filters=num_filters, num_channels=num_channels))
    obs = fwd(params, h)
    jax.block_until_ready(obs)

    assert obs.shape == (batch, num_channels, 84, 84), obs.shape
    assert obs.dtype == jnp.float32
    print("KERNEL_OK")
</pallas_src>

<mosaic_0001>
module attributes {stable_mosaic.version = 11 : i64} {
  func.func @_fc_kernel(%arg0: i32, %arg1: memref<2x32xf32, #tpu.memory_space<vmem>>, %arg2: memref<32x8320xf32, #tpu.memory_space<vmem>>, %arg3: memref<1x8320xf32, #tpu.memory_space<vmem>>, %arg4: memref<2x8320xf32, #tpu.memory_space<vmem>>) attributes {dimension_semantics = [#tpu.dimension_semantics<parallel>], iteration_bounds = array<i64: 6>, scalar_prefetch = 0 : i64, scratch_operands = 0 : i64, tpu.core_type = #tpu.core_type<tc>, window_params = [{pipeline_mode = #tpu.pipeline_mode<synchronous>, transform_indices = @transform_0, window_bounds = array<i64: 2, 32>}, {transform_indices = @transform_1, window_bounds = array<i64: 32, 8320>}, {transform_indices = @transform_2, window_bounds = array<i64: 1, 8320>}, {transform_indices = @transform_3, window_bounds = array<i64: 2, 8320>}]} {
    %c0 = arith.constant 0 : index
    %c0_0 = arith.constant 0 : index
    %0 = vector.load %arg1[%c0, %c0_0] : memref<2x32xf32, #tpu.memory_space<vmem>>, vector<2x32xf32>
    %c0_1 = arith.constant 0 : index
    %c0_2 = arith.constant 0 : index
    %1 = vector.load %arg2[%c0_1, %c0_2] : memref<32x8320xf32, #tpu.memory_space<vmem>>, vector<32x8320xf32>
    %cst = arith.constant dense<0.000000e+00> : vector<2x8320xf32>
    %2 = tpu.matmul %0, %1, %cst {dimension_numbers = #tpu.dot_dimension_numbers<[1], [0], [0], [1], [0, 0, 1, 1], [], []>} : vector<2x32xf32>, vector<32x8320xf32>, vector<2x8320xf32> -> vector<2x8320xf32>
    %c0_3 = arith.constant 0 : index
    %c0_4 = arith.constant 0 : index
    %3 = vector.load %arg3[%c0_3, %c0_4] : memref<1x8320xf32, #tpu.memory_space<vmem>>, vector<1x8320xf32>
    %4 = vector.broadcast %3 : vector<1x8320xf32> to vector<2x8320xf32>
    %5 = arith.addf %2, %4 : vector<2x8320xf32>
    %cst_5 = arith.constant 0.000000e+00 : f32
    %6 = vector.broadcast %cst_5 : f32 to vector<2x8320xf32>
    %7 = arith.maximumf %5, %6 : vector<2x8320xf32>
    %c0_6 = arith.constant 0 : index
    %c0_7 = arith.constant 0 : index
    %8 = vector.load %arg4[%c0_6, %c0_7] : memref<2x8320xf32, #tpu.memory_space<vmem>>, vector<2x8320xf32>
    tpu.vector_store %arg4[%c0_6, %c0_7], %7 {strides = array<i32>} : memref<2x8320xf32, #tpu.memory_space<vmem>>, vector<2x8320xf32>,
    return
  }
  func.func @transform_0(%arg0: i32) -> (i32, i32) {
    %c0_i32 = arith.constant 0 : i32
    %c0_i32_0 = arith.constant 0 : i32
    %c0_i32_1 = arith.constant 0 : i32
    return %c0_i32, %c0_i32_0 : i32, i32
  }
  func.func @transform_1(%arg0: i32) -> (i32, i32) {
    %c0_i32 = arith.constant 0 : i32
    %c0_i32_0 = arith.constant 0 : i32
    return %c0_i32, %arg0 : i32, i32
  }
  func.func @transform_2(%arg0: i32) -> (i32, i32) {
    %c0_i32 = arith.constant 0 : i32
    %c0_i32_0 = arith.constant 0 : i32
    return %c0_i32, %arg0 : i32, i32
  }
  func.func @transform_3(%arg0: i32) -> (i32, i32) {
    %c0_i32 = arith.constant 0 : i32
    %c0_i32_0 = arith.constant 0 : i32
    return %c0_i32, %arg0 : i32, i32
  }
}

module attributes {stable_mosaic.version = 11 : i64} {
  func.func @kernel(%arg0: i32, %arg1: memref<1x40x39x32xf32, #tpu.memory_space<vmem>>, %arg2: memref<288x32xf32, #tpu.memory_space<vmem>>, %arg3: memref<1x32xf32, #tpu.memory_space<vmem>>, %arg4: memref<288x32xf32, #tpu.memory_space<vmem>>, %arg5: memref<1x32xf32, #tpu.memory_space<vmem>>, %arg6: memref<288x32xf32, #tpu.memory_space<vmem>>, %arg7: memref<1x32xf32, #tpu.memory_space<vmem>>, %arg8: memref<128x12xf32, #tpu.memory_space<vmem>>, %arg9: memref<1x12xf32, #tpu.memory_space<vmem>>, %arg10: memref<1x42x42x12xf32, #tpu.memory_space<vmem>>, %arg11: memref<41x41x32xf32, #tpu.memory_space<vmem>>, %arg12: memref<43x43x32xf32, #tpu.memory_space<vmem>>, %arg13: memref<43x43x32xf32, #tpu.memory_space<vmem>>) attributes {dimension_semantics = [#tpu.dimension_semantics<parallel>], iteration_bounds = array<i64: 2>, scalar_prefetch = 0 : i64, scratch_operands = 3 : i64, tpu.core_type = #tpu.core_type<tc>, window_params = [{transform_indices = @transform_0, window_bounds = array<i64: 1, 40, 39, 32>}, {pipeline_mode = #tpu.pipeline_mode<synchronous>, transform_indices = @transform_1, window_bounds = array<i64: 288, 32>}, {pipeline_mode = #tpu.pipeline_mode<synchronous>, transform_indices = @transform_2, window_bounds = array<i64: 1, 32>}, {pipeline_mode = #tpu.pipeline_mode<synchronous>, transform_indices = @transform_3, window_bounds = array<i64: 288, 32>}, {pipeline_mode = #tpu.pipeline_mode<synchronous>, transform_indices = @transform_4, window_bounds = array<i64: 1, 32>}, {pipeline_mode = #tpu.pipeline_mode<synchronous>, transform_indices = @transform_5, window_bounds = array<i64: 288, 32>}, {pipeline_mode = #tpu.pipeline_mode<synchronous>, transform_indices = @transform_6, window_bounds = array<i64: 1, 32>}, {pipeline_mode = #tpu.pipeline_mode<synchronous>, transform_indices = @transform_7, window_bounds = array<i64: 128, 12>}, {pipeline_mode = #tpu.pipeline_mode<synchronous>, transform_indices = @transform_8, window_bounds = array<i64: 1, 12>}, {transform_indices = @transform_9, window_bounds = array<i64: 1, 42, 42, 12>}]} {
    %cst = arith.constant 0.000000e+00 : f32
    %0 = vector.broadcast %cst : f32 to vector<41x41x32xf32>
    %c0 = arith.constant 0 : index
    %c0_0 = arith.constant 0 : index
    %c0_1 = arith.constant 0 : index
    %1 = vector.load %arg11[%c0, %c0_0, %c0_1] : memref<41x41x32xf32, #tpu.memory_space<vmem>>, vector<41x41x32xf32>
    tpu.vector_store %arg11[%c0, %c0_0, %c0_1], %0 {strides = array<i32>} : memref<41x41x32xf32, #tpu.memory_space<vmem>>, vector<41x41x32xf32>,
    %cst_2 = arith.constant 0.000000e+00 : f32
    %2 = vector.broadcast %cst_2 : f32 to vector<43x43x32xf32>
    %c0_3 = arith.constant 0 : index
    %c0_4 = arith.constant 0 : index
    %c0_5 = arith.constant 0 : index
    %3 = vector.load %arg12[%c0_3, %c0_4, %c0_5] : memref<43x43x32xf32, #tpu.memory_space<vmem>>, vector<43x43x32xf32>
    tpu.vector_store %arg12[%c0_3, %c0_4, %c0_5], %2 {strides = array<i32>} : memref<43x43x32xf32, #tpu.memory_space<vmem>>, vector<43x43x32xf32>,
    %cst_6 = arith.constant 0.000000e+00 : f32
    %4 = vector.broadcast %cst_6 : f32 to vector<43x43x32xf32>
    %c0_7 = arith.constant 0 : index
    %c0_8 = arith.constant 0 : index
    %c0_9 = arith.constant 0 : index
    %5 = vector.load %arg13[%c0_7, %c0_8, %c0_9] : memref<43x43x32xf32, #tpu.memory_space<vmem>>, vector<43x43x32xf32>
    tpu.vector_store %arg13[%c0_7, %c0_8, %c0_9], %4 {strides = array<i32>} : memref<43x43x32xf32, #tpu.memory_space<vmem>>, vector<43x43x32xf32>,
    %c0_10 = arith.constant 0 : index
    %c0_11 = arith.constant 0 : index
    %6 = vector.load %arg2[%c0_10, %c0_11] : memref<288x32xf32, #tpu.memory_space<vmem>>, vector<32x32xf32>
    %c32 = arith.constant 32 : index
    %c0_12 = arith.constant 0 : index
    %7 = vector.load %arg2[%c32, %c0_12] : memref<288x32xf32, #tpu.memory_space<vmem>>, vector<32x32xf32>
    %c64 = arith.constant 64 : index
    %c0_13 = arith.constant 0 : index
    %8 = vector.load %arg2[%c64, %c0_13] : memref<288x32xf32, #tpu.memory_space<vmem>>, vector<32x32xf32>
    %c96 = arith.constant 96 : index
    %c0_14 = arith.constant 0 : index
    %9 = vector.load %arg2[%c96, %c0_14] : memref<288x32xf32, #tpu.memory_space<vmem>>, vector<32x32xf32>
    %c128 = arith.constant 128 : index
    %c0_15 = arith.constant 0 : index
    %10 = vector.load %arg2[%c128, %c0_15] : memref<288x32xf32, #tpu.memory_space<vmem>>, vector<32x32xf32>
    %c160 = arith.constant 160 : index
    %c0_16 = arith.constant 0 : index
    %11 = vector.load %arg2[%c160, %c0_16] : memref<288x32xf32, #tpu.memory_space<vmem>>, vector<32x32xf32>
    %c192 = arith.constant 192 : index
    %c0_17 = arith.constant 0 : index
    %12 = vector.load %arg2[%c192, %c0_17] : memref<288x32xf32, #tpu.memory_space<vmem>>, vector<32x32xf32>
    %c224 = arith.constant 224 : index
    %c0_18 = arith.constant 0 : index
    %13 = vector.load %arg2[%c224, %c0_18] : memref<288x32xf32, #tpu.memory_space<vmem>>, vector<32x32xf32>
    %c256 = arith.constant 256 : index
    %c0_19 = arith.constant 0 : index
    %14 = vector.load %arg2[%c256, %c0_19] : memref<288x32xf32, #tpu.memory_space<vmem>>, vector<32x32xf32>
    %c0_20 = arith.constant 0 : index
    %c0_21 = arith.constant 0 : index
    %15 = vector.load %arg3[%c0_20, %c0_21] : memref<1x32xf32, #tpu.memory_space<vmem>>, vector<1x32xf32>
    %c0_i32 = arith.constant 0 : i32
    %c37_i32 = arith.constant 37 : i32
    %16 = arith.addi %c0_i32, %c37_i32 : i32
    %c1_i32 = arith.constant 1 : i32
    scf.for %arg14 = %c0_i32 to %16 step %c1_i32  : i32 {
      %cst_82 = arith.constant 0.000000e+00 : f32
      %45 = vector.broadcast %cst_82 : f32 to vector<37x32xf32>
      %c0_i32_83 = arith.constant 0 : i32
      %46 = arith.addi %arg14, %c0_i32_83 : i32
      %c0_84 = arith.constant 0 : index
      %47 = arith.index_cast %46 : i32 to index
      %c0_85 = arith.constant 0 : index
      %c0_86 = arith.constant 0 : index
      %48 = vector.load %arg1[%c0_84, %47, %c0_85, %c0_86] : memref<1x40x39x32xf32, #tpu.memory_space<vmem>>, vector<1x1x37x32xf32>
      %49 = vector.shape_cast %48 : vector<1x1x37x32xf32> to vector<37x32xf32>
      %cst_87 = arith.constant dense<0.000000e+00> : vector<37x32xf32>
      %50 = tpu.matmul %49, %6, %cst_87 {dimension_numbers = #tpu.dot_dimension_numbers<[1], [0], [0], [1], [0, 0, 1, 1], [], []>} : vector<37x32xf32>, vector<32x32xf32>, vector<37x32xf32> -> vector<37x32xf32>
      %51 = arith.addf %45, %50 : vector<37x32xf32>
      %c0_i32_88 = arith.constant 0 : i32
      %52 = arith.addi %arg14, %c0_i32_88 : i32
      %c0_89 = arith.constant 0 : index
      %53 = arith.index_cast %52 : i32 to index
      %c1 = arith.constant 1 : index
      %c0_90 = arith.constant 0 : index
      %54 = vector.load %arg1[%c0_89, %53, %c1, %c0_90] : memref<1x40x39x32xf32, #tpu.memory_space<vmem>>, vector<1x1x37x32xf32>
      %55 = vector.shape_cast %54 : vector<1x1x37x32xf32> to vector<37x32xf32>
      %cst_91 = arith.constant dense<0.000000e+00> : vector<37x32xf32>
      %56 = tpu.matmul %55, %7, %cst_91 {dimension_numbers = #tpu.dot_dimension_numbers<[1], [0], [0], [1], [0, 0, 1, 1], [], []>} : vector<37x32xf32>, vector<32x32xf32>, vector<37x32xf32> -> vector<37x32xf32>
      %57 = arith.addf %51, %56 : vector<37x32xf32>
      %c0_i32_92 = arith.constant 0 : i32
      %58 = arith.addi %arg14, %c0_i32_92 : i32
      %c0_93 = arith.constant 0 : index
      %59 = arith.index_cast %58 : i32 to index
      %c2 = arith.constant 2 : index
      %c0_94 = arith.constant 0 : index
      %60 = vector.load %arg1[%c0_93, %59, %c2, %c0_94] : memref<1x40x39x32xf32, #tpu.memory_space<vmem>>, vector<1x1x37x32xf32>
      %61 = vector.shape_cast %60 : vector<1x1x37x32xf32> to vector<37x32xf32>
      %cst_95 = arith.constant dense<0.000000e+00> : vector<37x32xf32>
      %62 = tpu.matmul %61, %8, %cst_95 {dimension_numbers = #tpu.dot_dimension_numbers<[1], [0], [0], [1], [0, 0, 1, 1], [], []>} : vector<37x32xf32>, vector<32x32xf32>, vector<37x32xf32> -> vector<37x32xf32>
      %63 = arith.addf %57, %62 : vector<37x32xf32>
      %c1_i32_96 = arith.constant 1 : i32
      %64 = arith.addi %arg14, %c1_i32_96 : i32
      %c0_97 = arith.constant 0 : index
      %65 = arith.index_cast %64 : i32 to index
      %c0_98 = arith.constant 0 : index
      %c0_99 = arith.constant 0 : index
      %66 = vector.load %arg1[%c0_97, %65, %c0_98, %c0_99] : memref<1x40x39x32xf32, #tpu.memory_space<vmem>>, vector<1x1x37x32xf32>
      %67 = vector.shape_cast %66 : vector<1x1x37x32xf32> to vector<37x32xf32>
      %cst_100 = arith.constant dense<0.000000e+00> : vector<37x32xf32>
      %68 = tpu.matmul %67, %9, %cst_100 {dimension_numbers = #tpu.dot_dimension_numbers<[1], [0], [0], [1], [0, 0, 1, 1], [], []>} : vector<37x32xf32>, vector<32x32xf32>, vector<37x32xf32> -> vector<37x32xf32>
      %69 = arith.addf %63, %68 : vector<37x32xf32>
      %c1_i32_101 = arith.constant 1 : i32
      %70 = arith.addi %arg14, %c1_i32_101 : i32
      %c0_102 = arith.constant 0 : index
      %71 = arith.index_cast %70 : i32 to index
      %c1_103 = arith.constant 1 : index
      %c0_104 = arith.constant 0 : index
      %72 = vector.load %arg1[%c0_102, %71, %c1_103, %c0_104] : memref<1x40x39x32xf32, #tpu.memory_space<vmem>>, vector<1x1x37x32xf32>
      %73 = vector.shape_cast %72 : vector<1x1x37x32xf32> to vector<37x32xf32>
      %cst_105 = arith.constant dense<0.000000e+00> : vector<37x32xf32>
      %74 = tpu.matmul %73, %10, %cst_105 {dimension_numbers = #tpu.dot_dimension_numbers<[1], [0], [0], [1], [0, 0, 1, 1], [], []>} : vector<37x32xf32>, vector<32x32xf32>, vector<37x32xf32> -> vector<37x32xf32>
      %75 = arith.addf %69, %74 : vector<37x32xf32>
      %c1_i32_106 = arith.constant 1 : i32
      %76 = arith.addi %arg14, %c1_i32_106 : i32
      %c0_107 = arith.constant 0 : index
      %77 = arith.index_cast %76 : i32 to index
      %c2_108 = arith.constant 2 : index
      %c0_109 = arith.constant 0 : index
      %78 = vector.load %arg1[%c0_107, %77, %c2_108, %c0_109] : memref<1x40x39x32xf32, #tpu.memory_space<vmem>>, vector<1x1x37x32xf32>
      %79 = vector.shape_cast %78 : vector<1x1x37x32xf32> to vector<37x32xf32>
      %cst_110 = arith.constant dense<0.000000e+00> : vector<37x32xf32>
      %80 = tpu.matmul %79, %11, %cst_110 {dimension_numbers = #tpu.dot_dimension_numbers<[1], [0], [0], [1], [0, 0, 1, 1], [], []>} : vector<37x32xf32>, vector<32x32xf32>, vector<37x32xf32> -> vector<37x32xf32>
      %81 = arith.addf %75, %80 : vector<37x32xf32>
      %c2_i32 = arith.constant 2 : i32
      %82 = arith.addi %arg14, %c2_i32 : i32
      %c0_111 = arith.constant 0 : index
      %83 = arith.index_cast %82 : i32 to index
      %c0_112 = arith.constant 0 : index
      %c0_113 = arith.constant 0 : index
      %84 = vector.load %arg1[%c0_111, %83, %c0_112, %c0_113] : memref<1x40x39x32xf32, #tpu.memory_space<vmem>>, vector<1x1x37x32xf32>
      %85 = vector.shape_cast %84 : vector<1x1x37x32xf32> to vector<37x32xf32>
      %cst_114 = arith.constant dense<0.000000e+00> : vector<37x32xf32>
      %86 = tpu.matmul %85, %12, %cst_114 {dimension_numbers = #tpu.dot_dimension_numbers<[1], [0], [0], [1], [0, 0, 1, 1], [], []>} : vector<37x32xf32>, vector<32x32xf32>, vector<37x32xf32> -> vector<37x32xf32>
      %87 = arith.addf %81, %86 : vector<37x32xf32>
      %c2_i32_115 = arith.constant 2 : i32
      %88 = arith.addi %arg14, %c2_i32_115 : i32
      %c0_116 = arith.constant 0 : index
      %89 = arith.index_cast %88 : i32 to index
      %c1_117 = arith.constant 1 : index
      %c0_118 = arith.constant 0 : index
      %90 = vector.load %arg1[%c0_116, %89, %c1_117, %c0_118] : memref<1x40x39x32xf32, #tpu.memory_space<vmem>>, vector<1x1x37x32xf32>
      %91 = vector.shape_cast %90 : vector<1x1x37x32xf32> to vector<37x32xf32>
      %cst_119 = arith.constant dense<0.000000e+00> : vector<37x32xf32>
      %92 = tpu.matmul %91, %13, %cst_119 {dimension_numbers = #tpu.dot_dimension_numbers<[1], [0], [0], [1], [0, 0, 1, 1], [], []>} : vector<37x32xf32>, vector<32x32xf32>, vector<37x32xf32> -> vector<37x32xf32>
      %93 = arith.addf %87, %92 : vector<37x32xf32>
      %c2_i32_120 = arith.constant 2 : i32
      %94 = arith.addi %arg14, %c2_i32_120 : i32
      %c0_121 = arith.constant 0 : index
      %95 = arith.index_cast %94 : i32 to index
      %c2_122 = arith.constant 2 : index
      %c0_123 = arith.constant 0 : index
      %96 = vector.load %arg1[%c0_121, %95, %c2_122, %c0_123] : memref<1x40x39x32xf32, #tpu.memory_space<vmem>>, vector<1x1x37x32xf32>
      %97 = vector.shape_cast %96 : vector<1x1x37x32xf32> to vector<37x32xf32>
      %cst_124 = arith.constant dense<0.000000e+00> : vector<37x32xf32>
      %98 = tpu.matmul %97, %14, %cst_124 {dimension_numbers = #tpu.dot_dimension_numbers<[1], [0], [0], [1], [0, 0, 1, 1], [], []>} : vector<37x32xf32>, vector<32x32xf32>, vector<37x32xf32> -> vector<37x32xf32>
      %99 = arith.addf %93, %98 : vector<37x32xf32>
      %100 = vector.broadcast %15 : vector<1x32xf32> to vector<37x32xf32>
      %101 = arith.addf %99, %100 : vector<37x32xf32>
      %cst_125 = arith.constant 0.000000e+00 : f32
      %102 = vector.broadcast %cst_125 : f32 to vector<37x32xf32>
      %103 = arith.maximumf %101, %102 : vector<37x32xf32>
      %c2_i32_126 = arith.constant 2 : i32
      %104 = arith.addi %arg14, %c2_i32_126 : i32
      %105 = arith.index_cast %104 : i32 to index
      %c2_127 = arith.constant 2 : index
      %c0_128 = arith.constant 0 : index
      %106 = vector.load %arg11[%105, %c2_127, %c0_128] : memref<41x41x32xf32, #tpu.memory_space<vmem>>, vector<1x37x32xf32>
      %107 = vector.shape_cast %106 : vector<1x37x32xf32> to vector<37x32xf32>
      %108 = vector.shape_cast %103 : vector<37x32xf32> to vector<1x37x32xf32>
      tpu.vector_store %arg11[%105, %c2_127, %c0_128], %108 {strides = array<i32>} : memref<41x41x32xf32, #tpu.memory_space<vmem>>, vector<1x37x32xf32>,
    }
    %c37_i32_22 = arith.constant 37 : i32
    %c0_23 = arith.constant 0 : index
    %c0_24 = arith.constant 0 : index
    %17 = vector.load %arg4[%c0_23, %c0_24] : memref<288x32xf32, #tpu.memory_space<vmem>>, vector<32x32xf32>
    %c32_25 = arith.constant 32 : index
    %c0_26 = arith.constant 0 : index
    %18 = vector.load %arg4[%c32_25, %c0_26] : memref<288x32xf32, #tpu.memory_space<vmem>>, vector<32x32xf32>
    %c64_27 = arith.constant 64 : index
    %c0_28 = arith.constant 0 : index
    %19 = vector.load %arg4[%c64_27, %c0_28] : memref<288x32xf32, #tpu.memory_space<vmem>>, vector<32x32xf32>
    %c96_29 = arith.constant 96 : index
    %c0_30 = arith.constant 0 : index
    %20 = vector.load %arg4[%c96_29, %c0_30] : memref<288x32xf32, #tpu.memory_space<vmem>>, vector<32x32xf32>
    %c128_31 = arith.constant 128 : index
    %c0_32 = arith.constant 0 : index
    %21 = vector.load %arg4[%c128_31, %c0_32] : memref<288x32xf32, #tpu.memory_space<vmem>>, vector<32x32xf32>
    %c160_33 = arith.constant 160 : index
    %c0_34 = arith.constant 0 : index
    %22 = vector.load %arg4[%c160_33, %c0_34] : memref<288x32xf32, #tpu.memory_space<vmem>>, vector<32x32xf32>
    %c192_35 = arith.constant 192 : index
    %c0_36 = arith.constant 0 : index
    %23 = vector.load %arg4[%c192_35, %c0_36] : memref<288x32xf32, #tpu.memory_space<vmem>>, vector<32x32xf32>
    %c224_37 = arith.constant 224 : index
    %c0_38 = arith.constant 0 : index
    %24 = vector.load %arg4[%c224_37, %c0_38] : memref<288x32xf32, #tpu.memory_space<vmem>>, vector<32x32xf32>
    %c256_39 = arith.constant 256 : index
    %c0_40 = arith.constant 0 : index
    %25 = vector.load %arg4[%c256_39, %c0_40] : memref<288x32xf32, #tpu.memory_space<vmem>>, vector<32x32xf32>
    %c0_41 = arith.constant 0 : index
    %c0_42 = arith.constant 0 : index
    %26 = vector.load %arg5[%c0_41, %c0_42] : memref<1x32xf32, #tpu.memory_space<vmem>>, vector<1x32xf32>
    %c0_i32_43 = arith.constant 0 : i32
    %c39_i32 = arith.constant 39 : i32
    %27 = arith.addi %c0_i32_43, %c39_i32 : i32
    %c1_i32_44 = arith.constant 1 : i32
    scf.for %arg14 = %c0_i32_43 to %27 step %c1_i32_44  : i32 {
      %cst_82 = arith.constant 0.000000e+00 : f32
      %45 = vector.broadcast %cst_82 : f32 to vector<39x32xf32>
      %c0_i32_83 = arith.constant 0 : i32
      %46 = arith.addi %arg14, %c0_i32_83 : i32
      %47 = arith.index_cast %46 : i32 to index
      %c0_84 = arith.constant 0 : index
      %c0_85 = arith.constant 0 : index
      %48 = vector.load %arg11[%47, %c0_84, %c0_85] : memref<41x41x32xf32, #tpu.memory_space<vmem>>, vector<1x39x32xf32>
      %49 = vector.shape_cast %48 : vector<1x39x32xf32> to vector<39x32xf32>
      %cst_86 = arith.constant dense<0.000000e+00> : vector<39x32xf32>
      %50 = tpu.matmul %49, %17, %cst_86 {dimension_numbers = #tpu.dot_dimension_numbers<[1], [0], [0], [1], [0, 0, 1, 1], [], []>} : vector<39x32xf32>, vector<32x32xf32>, vector<39x32xf32> -> vector<39x32xf32>
      %51 = arith.addf %45, %50 : vector<39x32xf32>
      %c0_i32_87 = arith.constant 0 : i32
      %52 = arith.addi %arg14, %c0_i32_87 : i32
      %53 = arith.index_cast %52 : i32 to index
      %c1 = arith.constant 1 : index
      %c0_88 = arith.constant 0 : index
      %54 = vector.load %arg11[%53, %c1, %c0_88] : memref<41x41x32xf32, #tpu.memory_space<vmem>>, vector<1x39x32xf32>
      %55 = vector.shape_cast %54 : vector<1x39x32xf32> to vector<39x32xf32>
      %cst_89 = arith.constant dense<0.000000e+00> : vector<39x32xf32>
      %56 = tpu.matmul %55, %18, %cst_89 {dimension_numbers = #tpu.dot_dimension_numbers<[1], [0], [0], [1], [0, 0, 1, 1], [], []>} : vector<39x32xf32>, vector<32x32xf32>, vector<39x32xf32> -> vector<39x32xf32>
      %57 = arith.addf %51, %56 : vector<39x32xf32>
      %c0_i32_90 = arith.constant 0 : i32
      %58 = arith.addi %arg14, %c0_i32_90 : i32
      %59 = arith.index_cast %58 : i32 to index
      %c2 = arith.constant 2 : index
      %c0_91 = arith.constant 0 : index
      %60 = vector.load %arg11[%59, %c2, %c0_91] : memref<41x41x32xf32, #tpu.memory_space<vmem>>, vector<1x39x32xf32>
      %61 = vector.shape_cast %60 : vector<1x39x32xf32> to vector<39x32xf32>
      %cst_92 = arith.constant dense<0.000000e+00> : vector<39x32xf32>
      %62 = tpu.matmul %61, %19, %cst_92 {dimension_numbers = #tpu.dot_dimension_numbers<[1], [0], [0], [1], [0, 0, 1, 1], [], []>} : vector<39x32xf32>, vector<32x32xf32>, vector<39x32xf32> -> vector<39x32xf32>
      %63 = arith.addf %57, %62 : vector<39x32xf32>
      %c1_i32_93 = arith.constant 1 : i32
      %64 = arith.addi %arg14, %c1_i32_93 : i32
      %65 = arith.index_cast %64 : i32 to index
      %c0_94 = arith.constant 0 : index
      %c0_95 = arith.constant 0 : index
      %66 = vector.load %arg11[%65, %c0_94, %c0_95] : memref<41x41x32xf32, #tpu.memory_space<vmem>>, vector<1x39x32xf32>
      %67 = vector.shape_cast %66 : vector<1x39x32xf32> to vector<39x32xf32>
      %cst_96 = arith.constant dense<0.000000e+00> : vector<39x32xf32>
      %68 = tpu.matmul %67, %20, %cst_96 {dimension_numbers = #tpu.dot_dimension_numbers<[1], [0], [0], [1], [0, 0, 1, 1], [], []>} : vector<39x32xf32>, vector<32x32xf32>, vector<39x32xf32> -> vector<39x32xf32>
      %69 = arith.addf %63, %68 : vector<39x32xf32>
      %c1_i32_97 = arith.constant 1 : i32
      %70 = arith.addi %arg14, %c1_i32_97 : i32
      %71 = arith.index_cast %70 : i32 to index
      %c1_98 = arith.constant 1 : index
      %c0_99 = arith.constant 0 : index
      %72 = vector.load %arg11[%71, %c1_98, %c0_99] : memref<41x41x32xf32, #tpu.memory_space<vmem>>, vector<1x39x32xf32>
      %73 = vector.shape_cast %72 : vector<1x39x32xf32> to vector<39x32xf32>
      %cst_100 = arith.constant dense<0.000000e+00> : vector<39x32xf32>
      %74 = tpu.matmul %73, %21, %cst_100 {dimension_numbers = #tpu.dot_dimension_numbers<[1], [0], [0], [1], [0, 0, 1, 1], [], []>} : vector<39x32xf32>, vector<32x32xf32>, vector<39x32xf32> -> vector<39x32xf32>
      %75 = arith.addf %69, %74 : vector<39x32xf32>
      %c1_i32_101 = arith.constant 1 : i32
      %76 = arith.addi %arg14, %c1_i32_101 : i32
      %77 = arith.index_cast %76 : i32 to index
      %c2_102 = arith.constant 2 : index
      %c0_103 = arith.constant 0 : index
      %78 = vector.load %arg11[%77, %c2_102, %c0_103] : memref<41x41x32xf32, #tpu.memory_space<vmem>>, vector<1x39x32xf32>
      %79 = vector.shape_cast %78 : vector<1x39x32xf32> to vector<39x32xf32>
      %cst_104 = arith.constant dense<0.000000e+00> : vector<39x32xf32>
      %80 = tpu.matmul %79, %22, %cst_104 {dimension_numbers = #tpu.dot_dimension_numbers<[1], [0], [0], [1], [0, 0, 1, 1], [], []>} : vector<39x32xf32>, vector<32x32xf32>, vector<39x32xf32> -> vector<39x32xf32>
      %81 = arith.addf %75, %80 : vector<39x32xf32>
      %c2_i32 = arith.constant 2 : i32
      %82 = arith.addi %arg14, %c2_i32 : i32
      %83 = arith.index_cast %82 : i32 to index
      %c0_105 = arith.constant 0 : index
      %c0_106 = arith.constant 0 : index
      %84 = vector.load %arg11[%83, %c0_105, %c0_106] : memref<41x41x32xf32, #tpu.memory_space<vmem>>, vector<1x39x32xf32>
      %85 = vector.shape_cast %84 : vector<1x39x32xf32> to vector<39x32xf32>
      %cst_107 = arith.constant dense<0.000000e+00> : vector<39x32xf32>
      %86 = tpu.matmul %85, %23, %cst_107 {dimension_numbers = #tpu.dot_dimension_numbers<[1], [0], [0], [1], [0, 0, 1, 1], [], []>} : vector<39x32xf32>, vector<32x32xf32>, vector<39x32xf32> -> vector<39x32xf32>
      %87 = arith.addf %81, %86 : vector<39x32xf32>
      %c2_i32_108 = arith.constant 2 : i32
      %88 = arith.addi %arg14, %c2_i32_108 : i32
      %89 = arith.index_cast %88 : i32 to index
      %c1_109 = arith.constant 1 : index
      %c0_110 = arith.constant 0 : index
      %90 = vector.load %arg11[%89, %c1_109, %c0_110] : memref<41x41x32xf32, #tpu.memory_space<vmem>>, vector<1x39x32xf32>
      %91 = vector.shape_cast %90 : vector<1x39x32xf32> to vector<39x32xf32>
      %cst_111 = arith.constant dense<0.000000e+00> : vector<39x32xf32>
      %92 = tpu.matmul %91, %24, %cst_111 {dimension_numbers = #tpu.dot_dimension_numbers<[1], [0], [0], [1], [0, 0, 1, 1], [], []>} : vector<39x32xf32>, vector<32x32xf32>, vector<39x32xf32> -> vector<39x32xf32>
      %93 = arith.addf %87, %92 : vector<39x32xf32>
      %c2_i32_112 = arith.constant 2 : i32
      %94 = arith.addi %arg14, %c2_i32_112 : i32
      %95 = arith.index_cast %94 : i32 to index
      %c2_113 = arith.constant 2 : index
      %c0_114 = arith.constant 0 : index
      %96 = vector.load %arg11[%95, %c2_113, %c0_114] : memref<41x41x32xf32, #tpu.memory_space<vmem>>, vector<1x39x32xf32>
      %97 = vector.shape_cast %96 : vector<1x39x32xf32> to vector<39x32xf32>
      %cst_115 = arith.constant dense<0.000000e+00> : vector<39x32xf32>
      %98 = tpu.matmul %97, %25, %cst_115 {dimension_numbers = #tpu.dot_dimension_numbers<[1], [0], [0], [1], [0, 0, 1, 1], [], []>} : vector<39x32xf32>, vector<32x32xf32>, vector<39x32xf32> -> vector<39x32xf32>
      %99 = arith.addf %93, %98 : vector<39x32xf32>
      %100 = vector.broadcast %26 : vector<1x32xf32> to vector<39x32xf32>
      %101 = arith.addf %99, %100 : vector<39x32xf32>
      %cst_116 = arith.constant 0.000000e+00 : f32
      %102 = vector.broadcast %cst_116 : f32 to vector<39x32xf32>
      %103 = arith.maximumf %101, %102 : vector<39x32xf32>
      %c2_i32_117 = arith.constant 2 : i32
      %104 = arith.addi %arg14, %c2_i32_117 : i32
      %105 = arith.index_cast %104 : i32 to index
      %c2_118 = arith.constant 2 : index
      %c0_119 = arith.constant 0 : index
      %106 = vector.load %arg12[%105, %c2_118, %c0_119] : memref<43x43x32xf32, #tpu.memory_space<vmem>>, vector<1x39x32xf32>
      %107 = vector.shape_cast %106 : vector<1x39x32xf32> to vector<39x32xf32>
      %108 = vector.shape_cast %103 : vector<39x32xf32> to vector<1x39x32xf32>
      tpu.vector_store %arg12[%105, %c2_118, %c0_119], %108 {strides = array<i32>} : memref<43x43x32xf32, #tpu.memory_space<vmem>>, vector<1x39x32xf32>,
    }
    %c39_i32_45 = arith.constant 39 : i32
    %c0_46 = arith.constant 0 : index
    %c0_47 = arith.constant 0 : index
    %28 = vector.load %arg6[%c0_46, %c0_47] : memref<288x32xf32, #tpu.memory_space<vmem>>, vector<32x32xf32>
    %c32_48 = arith.constant 32 : index
    %c0_49 = arith.constant 0 : index
    %29 = vector.load %arg6[%c32_48, %c0_49] : memref<288x32xf32, #tpu.memory_space<vmem>>, vector<32x32xf32>
    %c64_50 = arith.constant 64 : index
    %c0_51 = arith.constant 0 : index
    %30 = vector.load %arg6[%c64_50, %c0_51] : memref<288x32xf32, #tpu.memory_space<vmem>>, vector<32x32xf32>
    %c96_52 = arith.constant 96 : index
    %c0_53 = arith.constant 0 : index
    %31 = vector.load %arg6[%c96_52, %c0_53] : memref<288x32xf32, #tpu.memory_space<vmem>>, vector<32x32xf32>
    %c128_54 = arith.constant 128 : index
    %c0_55 = arith.constant 0 : index
    %32 = vector.load %arg6[%c128_54, %c0_55] : memref<288x32xf32, #tpu.memory_space<vmem>>, vector<32x32xf32>
    %c160_56 = arith.constant 160 : index
    %c0_57 = arith.constant 0 : index
    %33 = vector.load %arg6[%c160_56, %c0_57] : memref<288x32xf32, #tpu.memory_space<vmem>>, vector<32x32xf32>
    %c192_58 = arith.constant 192 : index
    %c0_59 = arith.constant 0 : index
    %34 = vector.load %arg6[%c192_58, %c0_59] : memref<288x32xf32, #tpu.memory_space<vmem>>, vector<32x32xf32>
    %c224_60 = arith.constant 224 : index
    %c0_61 = arith.constant 0 : index
    %35 = vector.load %arg6[%c224_60, %c0_61] : memref<288x32xf32, #tpu.memory_space<vmem>>, vector<32x32xf32>
    %c256_62 = arith.constant 256 : index
    %c0_63 = arith.constant 0 : index
    %36 = vector.load %arg6[%c256_62, %c0_63] : memref<288x32xf32, #tpu.memory_space<vmem>>, vector<32x32xf32>
    %c0_64 = arith.constant 0 : index
    %c0_65 = arith.constant 0 : index
    %37 = vector.load %arg7[%c0_64, %c0_65] : memref<1x32xf32, #tpu.memory_space<vmem>>, vector<1x32xf32>
    %c0_i32_66 = arith.constant 0 : i32
    %c41_i32 = arith.constant 41 : i32
    %38 = arith.addi %c0_i32_66, %c41_i32 : i32
    %c1_i32_67 = arith.constant 1 : i32
    scf.for %arg14 = %c0_i32_66 to %38 step %c1_i32_67  : i32 {
      %cst_82 = arith.constant 0.000000e+00 : f32
      %45 = vector.broadcast %cst_82 : f32 to vector<41x32xf32>
      %c0_i32_83 = arith.constant 0 : i32
      %46 = arith.addi %arg14, %c0_i32_83 : i32
      %47 = arith.index_cast %46 : i32 to index
      %c0_84 = arith.constant 0 : index
      %c0_85 = arith.constant 0 : index
      %48 = vector.load %arg12[%47, %c0_84, %c0_85] : memref<43x43x32xf32, #tpu.memory_space<vmem>>, vector<1x41x32xf32>
      %49 = vector.shape_cast %48 : vector<1x41x32xf32> to vector<41x32xf32>
      %cst_86 = arith.constant dense<0.000000e+00> : vector<41x32xf32>
      %50 = tpu.matmul %49, %28, %cst_86 {dimension_numbers = #tpu.dot_dimension_numbers<[1], [0], [0], [1], [0, 0, 1, 1], [], []>} : vector<41x32xf32>, vector<32x32xf32>, vector<41x32xf32> -> vector<41x32xf32>
      %51 = arith.addf %45, %50 : vector<41x32xf32>
      %c0_i32_87 = arith.constant 0 : i32
      %52 = arith.addi %arg14, %c0_i32_87 : i32
      %53 = arith.index_cast %52 : i32 to index
      %c1 = arith.constant 1 : index
      %c0_88 = arith.constant 0 : index
      %54 = vector.load %arg12[%53, %c1, %c0_88] : memref<43x43x32xf32, #tpu.memory_space<vmem>>, vector<1x41x32xf32>
      %55 = vector.shape_cast %54 : vector<1x41x32xf32> to vector<41x32xf32>
      %cst_89 = arith.constant dense<0.000000e+00> : vector<41x32xf32>
      %56 = tpu.matmul %55, %29, %cst_89 {dimension_numbers = #tpu.dot_dimension_numbers<[1], [0], [0], [1], [0, 0, 1, 1], [], []>} : vector<41x32xf32>, vector<32x32xf32>, vector<41x32xf32> -> vector<41x32xf32>
      %57 = arith.addf %51, %56 : vector<41x32xf32>
      %c0_i32_90 = arith.constant 0 : i32
      %58 = arith.addi %arg14, %c0_i32_90 : i32
      %59 = arith.index_cast %58 : i32 to index
      %c2 = arith.constant 2 : index
      %c0_91 = arith.constant 0 : index
      %60 = vector.load %arg12[%59, %c2, %c0_91] : memref<43x43x32xf32, #tpu.memory_space<vmem>>, vector<1x41x32xf32>
      %61 = vector.shape_cast %60 : vector<1x41x32xf32> to vector<41x32xf32>
      %cst_92 = arith.constant dense<0.000000e+00> : vector<41x32xf32>
      %62 = tpu.matmul %61, %30, %cst_92 {dimension_numbers = #tpu.dot_dimension_numbers<[1], [0], [0], [1], [0, 0, 1, 1], [], []>} : vector<41x32xf32>, vector<32x32xf32>, vector<41x32xf32> -> vector<41x32xf32>
      %63 = arith.addf %57, %62 : vector<41x32xf32>
      %c1_i32_93 = arith.constant 1 : i32
      %64 = arith.addi %arg14, %c1_i32_93 : i32
      %65 = arith.index_cast %64 : i32 to index
      %c0_94 = arith.constant 0 : index
      %c0_95 = arith.constant 0 : index
      %66 = vector.load %arg12[%65, %c0_94, %c0_95] : memref<43x43x32xf32, #tpu.memory_space<vmem>>, vector<1x41x32xf32>
      %67 = vector.shape_cast %66 : vector<1x41x32xf32> to vector<41x32xf32>
      %cst_96 = arith.constant dense<0.000000e+00> : vector<41x32xf32>
      %68 = tpu.matmul %67, %31, %cst_96 {dimension_numbers = #tpu.dot_dimension_numbers<[1], [0], [0], [1], [0, 0, 1, 1], [], []>} : vector<41x32xf32>, vector<32x32xf32>, vector<41x32xf32> -> vector<41x32xf32>
      %69 = arith.addf %63, %68 : vector<41x32xf32>
      %c1_i32_97 = arith.constant 1 : i32
      %70 = arith.addi %arg14, %c1_i32_97 : i32
      %71 = arith.index_cast %70 : i32 to index
      %c1_98 = arith.constant 1 : index
      %c0_99 = arith.constant 0 : index
      %72 = vector.load %arg12[%71, %c1_98, %c0_99] : memref<43x43x32xf32, #tpu.memory_space<vmem>>, vector<1x41x32xf32>
      %73 = vector.shape_cast %72 : vector<1x41x32xf32> to vector<41x32xf32>
      %cst_100 = arith.constant dense<0.000000e+00> : vector<41x32xf32>
      %74 = tpu.matmul %73, %32, %cst_100 {dimension_numbers = #tpu.dot_dimension_numbers<[1], [0], [0], [1], [0, 0, 1, 1], [], []>} : vector<41x32xf32>, vector<32x32xf32>, vector<41x32xf32> -> vector<41x32xf32>
      %75 = arith.addf %69, %74 : vector<41x32xf32>
      %c1_i32_101 = arith.constant 1 : i32
      %76 = arith.addi %arg14, %c1_i32_101 : i32
      %77 = arith.index_cast %76 : i32 to index
      %c2_102 = arith.constant 2 : index
      %c0_103 = arith.constant 0 : index
      %78 = vector.load %arg12[%77, %c2_102, %c0_103] : memref<43x43x32xf32, #tpu.memory_space<vmem>>, vector<1x41x32xf32>
      %79 = vector.shape_cast %78 : vector<1x41x32xf32> to vector<41x32xf32>
      %cst_104 = arith.constant dense<0.000000e+00> : vector<41x32xf32>
      %80 = tpu.matmul %79, %33, %cst_104 {dimension_numbers = #tpu.dot_dimension_numbers<[1], [0], [0], [1], [0, 0, 1, 1], [], []>} : vector<41x32xf32>, vector<32x32xf32>, vector<41x32xf32> -> vector<41x32xf32>
      %81 = arith.addf %75, %80 : vector<41x32xf32>
      %c2_i32 = arith.constant 2 : i32
      %82 = arith.addi %arg14, %c2_i32 : i32
      %83 = arith.index_cast %82 : i32 to index
      %c0_105 = arith.constant 0 : index
      %c0_106 = arith.constant 0 : index
      %84 = vector.load %arg12[%83, %c0_105, %c0_106] : memref<43x43x32xf32, #tpu.memory_space<vmem>>, vector<1x41x32xf32>
      %85 = vector.shape_cast %84 : vector<1x41x32xf32> to vector<41x32xf32>
      %cst_107 = arith.constant dense<0.000000e+00> : vector<41x32xf32>
      %86 = tpu.matmul %85, %34, %cst_107 {dimension_numbers = #tpu.dot_dimension_numbers<[1], [0], [0], [1], [0, 0, 1, 1], [], []>} : vector<41x32xf32>, vector<32x32xf32>, vector<41x32xf32> -> vector<41x32xf32>
      %87 = arith.addf %81, %86 : vector<41x32xf32>
      %c2_i32_108 = arith.constant 2 : i32
      %88 = arith.addi %arg14, %c2_i32_108 : i32
      %89 = arith.index_cast %88 : i32 to index
      %c1_109 = arith.constant 1 : index
      %c0_110 = arith.constant 0 : index
      %90 = vector.load %arg12[%89, %c1_109, %c0_110] : memref<43x43x32xf32, #tpu.memory_space<vmem>>, vector<1x41x32xf32>
      %91 = vector.shape_cast %90 : vector<1x41x32xf32> to vector<41x32xf32>
      %cst_111 = arith.constant dense<0.000000e+00> : vector<41x32xf32>
      %92 = tpu.matmul %91, %35, %cst_111 {dimension_numbers = #tpu.dot_dimension_numbers<[1], [0], [0], [1], [0, 0, 1, 1], [], []>} : vector<41x32xf32>, vector<32x32xf32>, vector<41x32xf32> -> vector<41x32xf32>
      %93 = arith.addf %87, %92 : vector<41x32xf32>
      %c2_i32_112 = arith.constant 2 : i32
      %94 = arith.addi %arg14, %c2_i32_112 : i32
      %95 = arith.index_cast %94 : i32 to index
      %c2_113 = arith.constant 2 : index
      %c0_114 = arith.constant 0 : index
      %96 = vector.load %arg12[%95, %c2_113, %c0_114] : memref<43x43x32xf32, #tpu.memory_space<vmem>>, vector<1x41x32xf32>
      %97 = vector.shape_cast %96 : vector<1x41x32xf32> to vector<41x32xf32>
      %cst_115 = arith.constant dense<0.000000e+00> : vector<41x32xf32>
      %98 = tpu.matmul %97, %36, %cst_115 {dimension_numbers = #tpu.dot_dimension_numbers<[1], [0], [0], [1], [0, 0, 1, 1], [], []>} : vector<41x32xf32>, vector<32x32xf32>, vector<41x32xf32> -> vector<41x32xf32>
      %99 = arith.addf %93, %98 : vector<41x32xf32>
      %100 = vector.broadcast %37 : vector<1x32xf32> to vector<41x32xf32>
      %101 = arith.addf %99, %100 : vector<41x32xf32>
      %cst_116 = arith.constant 0.000000e+00 : f32
      %102 = vector.broadcast %cst_116 : f32 to vector<41x32xf32>
      %103 = arith.maximumf %101, %102 : vector<41x32xf32>
      %c1_i32_117 = arith.constant 1 : i32
      %104 = arith.addi %arg14, %c1_i32_117 : i32
      %105 = arith.index_cast %104 : i32 to index
      %c1_118 = arith.constant 1 : index
      %c0_119 = arith.constant 0 : index
      %106 = vector.load %arg13[%105, %c1_118, %c0_119] : memref<43x43x32xf32, #tpu.memory_space<vmem>>, vector<1x41x32xf32>
      %107 = vector.shape_cast %106 : vector<1x41x32xf32> to vector<41x32xf32>
      %108 = vector.shape_cast %103 : vector<41x32xf32> to vector<1x41x32xf32>
      tpu.vector_store %arg13[%105, %c1_118, %c0_119], %108 {strides = array<i32>} : memref<43x43x32xf32, #tpu.memory_space<vmem>>, vector<1x41x32xf32>,
    }
    %c41_i32_68 = arith.constant 41 : i32
    %c0_69 = arith.constant 0 : index
    %c0_70 = arith.constant 0 : index
    %39 = vector.load %arg8[%c0_69, %c0_70] : memref<128x12xf32, #tpu.memory_space<vmem>>, vector<32x12xf32>
    %c32_71 = arith.constant 32 : index
    %c0_72 = arith.constant 0 : index
    %40 = vector.load %arg8[%c32_71, %c0_72] : memref<128x12xf32, #tpu.memory_space<vmem>>, vector<32x12xf32>
    %c64_73 = arith.constant 64 : index
    %c0_74 = arith.constant 0 : index
    %41 = vector.load %arg8[%c64_73, %c0_74] : memref<128x12xf32, #tpu.memory_space<vmem>>, vector<32x12xf32>
    %c96_75 = arith.constant 96 : index
    %c0_76 = arith.constant 0 : index
    %42 = vector.load %arg8[%c96_75, %c0_76] : memref<128x12xf32, #tpu.memory_space<vmem>>, vector<32x12xf32>
    %c0_77 = arith.constant 0 : index
    %c0_78 = arith.constant 0 : index
    %43 = vector.load %arg9[%c0_77, %c0_78] : memref<1x12xf32, #tpu.memory_space<vmem>>, vector<1x12xf32>
    %c0_i32_79 = arith.constant 0 : i32
    %c42_i32 = arith.constant 42 : i32
    %44 = arith.addi %c0_i32_79, %c42_i32 : i32
    %c1_i32_80 = arith.constant 1 : i32
    scf.for %arg14 = %c0_i32_79 to %44 step %c1_i32_80  : i32 {
      %cst_82 = arith.constant 0.000000e+00 : f32
      %45 = vector.broadcast %cst_82 : f32 to vector<42x12xf32>
      %c0_i32_83 = arith.constant 0 : i32
      %46 = arith.addi %arg14, %c0_i32_83 : i32
      %47 = arith.index_cast %46 : i32 to index
      %c0_84 = arith.constant 0 : index
      %c0_85 = arith.constant 0 : index
      %48 = vector.load %arg13[%47, %c0_84, %c0_85] : memref<43x43x32xf32, #tpu.memory_space<vmem>>, vector<1x42x32xf32>
      %49 = vector.shape_cast %48 : vector<1x42x32xf32> to vector<42x32xf32>
      %cst_86 = arith.constant dense<0.000000e+00> : vector<42x12xf32>
      %50 = tpu.matmul %49, %39, %cst_86 {dimension_numbers = #tpu.dot_dimension_numbers<[1], [0], [0], [1], [0, 0, 1, 1], [], []>} : vector<42x32xf32>, vector<32x12xf32>, vector<42x12xf32> -> vector<42x12xf32>
      %51 = arith.addf %45, %50 : vector<42x12xf32>
      %c0_i32_87 = arith.constant 0 : i32
      %52 = arith.addi %arg14, %c0_i32_87 : i32
      %53 = arith.index_cast %52 : i32 to index
      %c1 = arith.constant 1 : index
      %c0_88 = arith.constant 0 : index
      %54 = vector.load %arg13[%53, %c1, %c0_88] : memref<43x43x32xf32, #tpu.memory_space<vmem>>, vector<1x42x32xf32>
      %55 = vector.shape_cast %54 : vector<1x42x32xf32> to vector<42x32xf32>
      %cst_89 = arith.constant dense<0.000000e+00> : vector<42x12xf32>
      %56 = tpu.matmul %55, %40, %cst_89 {dimension_numbers = #tpu.dot_dimension_numbers<[1], [0], [0], [1], [0, 0, 1, 1], [], []>} : vector<42x32xf32>, vector<32x12xf32>, vector<42x12xf32> -> vector<42x12xf32>
      %57 = arith.addf %51, %56 : vector<42x12xf32>
      %c1_i32_90 = arith.constant 1 : i32
      %58 = arith.addi %arg14, %c1_i32_90 : i32
      %59 = arith.index_cast %58 : i32 to index
      %c0_91 = arith.constant 0 : index
      %c0_92 = arith.constant 0 : index
      %60 = vector.load %arg13[%59, %c0_91, %c0_92] : memref<43x43x32xf32, #tpu.memory_space<vmem>>, vector<1x42x32xf32>
      %61 = vector.shape_cast %60 : vector<1x42x32xf32> to vector<42x32xf32>
      %cst_93 = arith.constant dense<0.000000e+00> : vector<42x12xf32>
      %62 = tpu.matmul %61, %41, %cst_93 {dimension_numbers = #tpu.dot_dimension_numbers<[1], [0], [0], [1], [0, 0, 1, 1], [], []>} : vector<42x32xf32>, vector<32x12xf32>, vector<42x12xf32> -> vector<42x12xf32>
      %63 = arith.addf %57, %62 : vector<42x12xf32>
      %c1_i32_94 = arith.constant 1 : i32
      %64 = arith.addi %arg14, %c1_i32_94 : i32
      %65 = arith.index_cast %64 : i32 to index
      %c1_95 = arith.constant 1 : index
      %c0_96 = arith.constant 0 : index
      %66 = vector.load %arg13[%65, %c1_95, %c0_96] : memref<43x43x32xf32, #tpu.memory_space<vmem>>, vector<1x42x32xf32>
      %67 = vector.shape_cast %66 : vector<1x42x32xf32> to vector<42x32xf32>
      %cst_97 = arith.constant dense<0.000000e+00> : vector<42x12xf32>
      %68 = tpu.matmul %67, %42, %cst_97 {dimension_numbers = #tpu.dot_dimension_numbers<[1], [0], [0], [1], [0, 0, 1, 1], [], []>} : vector<42x32xf32>, vector<32x12xf32>, vector<42x12xf32> -> vector<42x12xf32>
      %69 = arith.addf %63, %68 : vector<42x12xf32>
      %70 = vector.broadcast %43 : vector<1x12xf32> to vector<42x12xf32>
      %71 = arith.addf %69, %70 : vector<42x12xf32>
      %c0_98 = arith.constant 0 : index
      %72 = arith.index_cast %arg14 : i32 to index
      %c0_99 = arith.constant 0 : index
      %c0_100 = arith.constant 0 : index
      %73 = vector.load %arg10[%c0_98, %72, %c0_99, %c0_100] : memref<1x42x42x12xf32, #tpu.memory_space<vmem>>, vector<1x1x42x12xf32>
      %74 = vector.shape_cast %73 : vector<1x1x42x12xf32> to vector<42x12xf32>
      %75 = vector.shape_cast %71 : vector<42x12xf32> to vector<1x1x42x12xf32>
      tpu.vector_store %arg10[%c0_98, %72, %c0_99, %c0_100], %75 {strides = array<i32>} : memref<1x42x42x12xf32, #tpu.memory_space<vmem>>, vector<1x1x42x12xf32>,
    }
    %c42_i32_81 = arith.constant 42 : i32
    return
  }
  func.func @transform_0(%arg0: i32) -> (i32, i32, i32, i32) {
    %c0_i32 = arith.constant 0 : i32
    %c0_i32_0 = arith.constant 0 : i32
    %c0_i32_1 = arith.constant 0 : i32
    %c0_i32_2 = arith.constant 0 : i32
    return %arg0, %c0_i32, %c0_i32_0, %c0_i32_1 : i32, i32, i32, i32
  }
  func.func @transform_1(%arg0: i32) -> (i32, i32) {
    %c0_i32 = arith.constant 0 : i32
    %c0_i32_0 = arith.constant 0 : i32
    %c0_i32_1 = arith.constant 0 : i32
    return %c0_i32, %c0_i32_0 : i32, i32
  }
  func.func @transform_2(%arg0: i32) -> (i32, i32) {
    %c0_i32 = arith.constant 0 : i32
    %c0_i32_0 = arith.constant 0 : i32
    %c0_i32_1 = arith.constant 0 : i32
    return %c0_i32, %c0_i32_0 : i32, i32
  }
  func.func @transform_3(%arg0: i32) -> (i32, i32) {
    %c0_i32 = arith.constant 0 : i32
    %c0_i32_0 = arith.constant 0 : i32
    %c0_i32_1 = arith.constant 0 : i32
    return %c0_i32, %c0_i32_0 : i32, i32
  }
  func.func @transform_4(%arg0: i32) -> (i32, i32) {
    %c0_i32 = arith.constant 0 : i32
    %c0_i32_0 = arith.constant 0 : i32
    %c0_i32_1 = arith.constant 0 : i32
    return %c0_i32, %c0_i32_0 : i32, i32
  }
  func.func @transform_5(%arg0: i32) -> (i32, i32) {
    %c0_i32 = arith.constant 0 : i32
    %c0_i32_0 = arith.constant 0 : i32
    %c0_i32_1 = arith.constant 0 : i32
    return %c0_i32, %c0_i32_0 : i32, i32
  }
  func.func @transform_6(%arg0: i32) -> (i32, i32) {
    %c0_i32 = arith.constant 0 : i32
    %c0_i32_0 = arith.constant 0 : i32
    %c0_i32_1 = arith.constant 0 : i32
    return %c0_i32, %c0_i32_0 : i32, i32
  }
  func.func @transform_7(%arg0: i32) -> (i32, i32) {
    %c0_i32 = arith.constant 0 : i32
    %c0_i32_0 = arith.constant 0 : i32
    %c0_i32_1 = arith.constant 0 : i32
    return %c0_i32, %c0_i32_0 : i32, i32
  }
  func.func @transform_8(%arg0: i32) -> (i32, i32) {
    %c0_i32 = arith.constant 0 : i32
    %c0_i32_0 = arith.constant 0 : i32
    %c0_i32_1 = arith.constant 0 : i32
    return %c0_i32, %c0_i32_0 : i32, i32
  }
  func.func @transform_9(%arg0: i32) -> (i32, i32, i32, i32) {
    %c0_i32 = arith.constant 0 : i32
    %c0_i32_0 = arith.constant 0 : i32
    %c0_i32_1 = arith.constant 0 : i32
    %c0_i32_2 = arith.constant 0 : i32
    return %arg0, %c0_i32, %c0_i32_0, %c0_i32_1 : i32, i32, i32, i32
  }
}

</mosaic_0001>

<bundles_post_ra>
// kernel: decoder_forward.2
= control target key start
LH: loop header
LB: loop body
LE: loop exit
PB: predicated region body
PF: predicated region fallthrough
CT: control target
= control target key end

     0   :  { %8 = vsyncpa [#allocation3], 0  ;;  %s4980_s0 = inlined_call_operand.hbm [shape: f32[2,32], index: 0, kind: input, shape index: {}]   ;;  %s4981_s1 = inlined_call_operand.hbm [shape: f32[32,49920], index: 1, kind: input, shape index: {}]   ;;  %s4982_s2 = inlined_call_operand.hbm [shape: f32[1,49920], index: 2, kind: input, shape index: {}]   ;;  %s4983_s3 = inlined_call_operand.vmem [shape: f32[2,49920], index: 3, kind: output, shape index: {}]  }
   0x1   :  { %9 = vsyncpa [#allocation5], 0 }
   0x2   :  { %11 = vsyncpa [#allocation5 + $0x1], 0  ;;  %s4286_s12 = smov 0   ;;  %s4288_s13 = smov 0  }
   0x3   :  { %s4290_s14 = smov 0   ;;  %s4292_s15 = smov 0  }
   0x4 LB: > { %s4307_s16 = sadd.s32 1, %s4254_s15   ;;  %s45_s17 = sadd.s32 1, %s4250_s14  ;;  %s4254_s15 = sphi %s4292_s15, %s5005_s15   ;;  %s4250_s14 = sphi %s4290_s14, %s5004_s14   ;;  %s4246_s13 = sphi %s4288_s13, %s5003_s13   ;;  %s4242_s12 = sphi %s4286_s12, %s5002_s12  }
   0x5   : > { %s42_s18 = ssub.s32 %s4254_s15, %s4307_s16  ;;  %p52_p0 = scmp.ne.s32.totalorder %s4250_s14, %s4246_s13 }
   0x6   : > { %p43_p1 = scmp.eq.s32.totalorder %s42_s18, 0  ;;  %p53_p2 = scmp.eq.s32.totalorder %s4254_s15, 0 }
   0x7   : > { %p4085_p3 = scmp.lt.s32.totalorder %s4254_s15, 6  ;;  %s145_s20 = sand.u32 1, %s4254_s15  }
   0x8   : > { %s4317_s19 = scalar_select %p43_p1, %s4250_s14, %s45_s17  }
   0x9   : > { %p54_p4 = por %p53_p2, %p52_p0  ;;  %s147_s21 = sand.u32 1, %s4250_s14  }
   0xa   : > { %s4061_s22 = smul.u32 2080, %s147_s21  ;;  %s4335_s30 = scalar_lea.sflag [#allocation5], %s145_s20 }
   0xb   : > { %p4323_p5 = pnand %p4085_p3, %p54_p4  ;;  %s3781_s24 = smul.u32 8320, %s4254_s15 }
   0xc   : > { %s149_s28 = scalar_lea.vmem [#allocation4], %s4061_s22  ;;  %s4133_s7 = scalar_lea.hbm %s4981_s1, 199680 }
   0xd   : > { %s4990_s23 = scalar_select %p4323_p5, 1, 0 }
   0xe   : > { %s4331_s27 = scalar_lea.hbm %s4981_s1, %s3781_s24  ;;  %s156_s29 = sshll.u32 %s149_s28, 4  ;;  %s4333_s29 = int_to_ptr.vmem [resolvable:$true] %s156_s29 }
   0xf   : > { %s4128_s4 = scalar_lea.hbm %s4331_s27, 33280  ;;  %p4985_p7 = pneg %p4323_p5 }
  0x10   : > { %p4129_p6 = scmp.ne.s32.totalorder %s4331_s27, %s4128_s4  ;;  %p4134_p10 = scmp.lt.u32.totalorder %s4331_s27, %s4981_s1 }
  0x11   : > { %p4135_p11 = scmp.lt.u32.totalorder %s4133_s7, %s4128_s4  ;;  %p4137_p13 = scmp.lt.u32.totalorder %s4128_s4, %s4331_s27 }
  0x12   : > { %p4131_p8 = pnand %p4985_p7, %p4129_p6 }
  0x13   : > { %p4136_p12 = por %p4135_p11, %p4134_p10 }
  0x14   : > { %p4132_p9 = pneg %p4131_p8 }
  0x15   : > { %p4138_p0 = por %p4137_p13, %p4136_p12 }
  0x17   : > { %p4139_p1 = pnand %p4138_p0, %p4132_p9 }
  0x19   : > { %4142 = shalt.err (!%p4139_p1)
}
  0x1a   : > { %s4143_s10 = scalar_lea.vmem %s4333_s29, 33280  ;;  %s4256_s11 = smov [#allocation4]  }
  0x1b   : > { %p4144_p2 = scmp.ne.s32.totalorder %s4333_s29, %s4143_s10  ;;  %s4148_s17 = sshll.u32 %s4256_s11, 4  ;;  %s4149_s17 = int_to_ptr.vmem [resolvable:$false] %s4148_s17 }
  0x1c   : > { %s4150_s18 = scalar_lea.vmem %s4149_s17, 66560  ;;  %p4151_p6 = scmp.lt.s32.totalorder %s4333_s29, %s4149_s17 }
  0x1d   : > { %p4146_p3 = pnand %p4144_p2, %p4985_p7  ;;  %p4152_p8 = scmp.lt.s32.totalorder %s4150_s18, %s4143_s10 }
  0x1f   : > { %p4147_p4 = pneg %p4146_p3  ;;  %p4153_p10 = por %p4152_p8, %p4151_p6 }
  0x21   : > { %p4154_p11 = pnand %p4153_p10, %p4147_p4 }
  0x23   : > { %4157 = shalt.err (!%p4154_p11)
}
  0x24   : > { %s4257_s20 = smov 49920   ;;  %s4258_s22 = smov 8320  }
  0x25   : > { %s4259_s24 = smov 520   ;;  %s4364_s25 = sadd.s32 4294967295, %s4254_s15  }
  0x26   : > { %4080 = dma.hbm_to_vmem [thread:$0]  (!%p4323_p5), %s4331_s27, 33280, %s4333_s29, %s4335_s30, %s4257_s20, %s4258_s22, %s4259_s24  }
  0x27   : > { %p58_p9 = scmp.ne.s32.totalorder %s4246_s13, %s4242_s12  ;;  %p4984_p12 = scmp.eq.s32.totalorder %s4364_s25, 0 }
  0x28   : > { %p3736_p13 = scmp.ge.s32.totalorder %s4254_s15, 1  ;;  %p121_p0 = scmp.lt.s32.totalorder %s4254_s15, 7 }
  0x29   : > { %p4373_p1 = por %p4984_p12, %p58_p9  ;;  %s4260_s27 = smov [#allocation2]  }
  0x2a   : > { %p4377_p2 = pnand %p3736_p13, %p121_p0  ;;  %s134_s29 = sshll.u32 %s4260_s27, 4  ;;  %s135_s29 = int_to_ptr.vmem [resolvable:$true] %s134_s29 }
  0x2b   : > { %s4991_s26 = scalar_select %p4373_p1, 1, 0 }
  0x2c   : > { %s4992_s28 = scalar_select %p4377_p2, 1, 0 }
  0x2d   : > { %s4062_s4 = smul.u32 65, %s147_s21  ;;  %p4073_p3 = pneg %p4377_p2 }
  0x2e   : > { %s3782_s12 = smul.u32 1040, %s4254_s15  ;;  %s4158_s17 = scalar_lea.hbm %s4980_s0, 32 }
  0x2f   : > { %p4388_p4 = pnand %p4073_p3, %p4984_p12  ;;  %s170_s6 = scalar_lea.vmem [#allocation6], %s4062_s4 }
  0x30   : > { %s178_s7 = sshll.u32 %s170_s6, 4  ;;  %s4395_s10 = scalar_lea.hbm %s4982_s2, %s3782_s12  ;;  %s4397_s7 = int_to_ptr.vmem [resolvable:$true] %s178_s7 }
  0x31   : > { %p4159_p6 = scmp.ne.s32.totalorder %s4980_s0, %s4158_s17  ;;  %p4160_p8 = pneg %p4388_p4 }
  0x32   : > { %p4165_p9 = scmp.lt.u32.totalorder %s4158_s17, %s4980_s0 }
  0x33   : > { %p4161_p10 = pnand %p4160_p8, %p4159_p6 }
  0x35   : > { %p4162_p11 = pneg %p4161_p10 }
  0x37   : > { %p4167_p13 = pnand %p4165_p9, %p4162_p11 }
  0x39   : > { %4170 = shalt.err (!%p4167_p13)
}
  0x3a   : > { %s4171_s24 = scalar_lea.vmem %s135_s29, 32  ;;  %p4179_p7 = scmp.lt.s32.totalorder %s135_s29, %s135_s29 }
  0x3b   : > { %p4172_p0 = scmp.ne.s32.totalorder %s135_s29, %s4171_s24  ;;  %p4180_p1 = scmp.lt.s32.totalorder %s4171_s24, %s4171_s24 }
  0x3d   : > { %p4174_p3 = pnand %p4172_p0, %p4160_p8  ;;  %p4181_p2 = por %p4180_p1, %p4179_p7 }
  0x3f   : > { %p4175_p12 = pneg %p4174_p3 }
  0x41   : > { %p4182_p5 = pnand %p4181_p2, %p4175_p12 }
  0x43   : > { %4185 = shalt.err (!%p4182_p5)
}
  0x44   : > { %4076 = dma.hbm_to_vmem [thread:$0]  (!%p4388_p4), %s4980_s0, 32, %s135_s29, [#allocation3]  }
  0x45   : > { %s4186_s12 = scalar_lea.hbm %s4395_s10, 1040  ;;  %p4994_p8 = scmp.ne.s32.totalorder %s4990_s23, 0 }
  0x46   : > { %p4187_p6 = scmp.ne.s32.totalorder %s4395_s10, %s4186_s12  ;;  %s4191_s9 = scalar_lea.hbm %s4982_s2, 6240 }
  0x47   : > { %p4995_p10 = pneg %p4994_p8  ;;  %p4192_p5 = scmp.lt.u32.totalorder %s4395_s10, %s4982_s2 }
  0x48   : > { %p4193_p7 = scmp.lt.u32.totalorder %s4191_s9, %s4186_s12  ;;  %p4195_p1 = scmp.lt.u32.totalorder %s4186_s12, %s4395_s10 }
  0x49   : > { %p4189_p11 = pnand %p4187_p6, %p4995_p10 }
  0x4a   : > { %p4194_p12 = por %p4193_p7, %p4192_p5 }
  0x4b   : > { %p4190_p9 = pneg %p4189_p11 }
  0x4c   : > { %p4196_p2 = por %p4195_p1, %p4194_p12 }
  0x4e   : > { %p4197_p13 = pnand %p4196_p2, %p4190_p9 }
  0x50   : > { %4200 = shalt.err (!%p4197_p13)
}
  0x51   : > { %s4201_s29 = scalar_lea.vmem %s4397_s7, 1040  ;;  %p4996_p0 = pmov %p4995_p10 }
  0x52   : > { %p4202_p4 = scmp.ne.s32.totalorder %s4397_s7, %s4201_s29  ;;  %s4261_s11 = smov [#allocation6]  }
  0x53   : > { %s4206_s17 = sshll.u32 %s4261_s11, 4  ;;  %s4207_s17 = int_to_ptr.vmem [resolvable:$false] %s4206_s17 }
  0x54   : > { %p4204_p3 = pnand %p4202_p4, %p4996_p0  ;;  %s4208_s15 = scalar_lea.vmem %s4207_s17, 2080 }
  0x55   : > { %p4209_p10 = scmp.lt.s32.totalorder %s4397_s7, %s4207_s17  ;;  %p4210_p11 = scmp.lt.s32.totalorder %s4208_s15, %s4201_s29 }
  0x56   : > { %p4205_p6 = pneg %p4204_p3 }
  0x57   : > { %p4211_p5 = por %p4210_p11, %p4209_p10 }
  0x59   : > { %p4212_p7 = pnand %p4211_p5, %p4205_p6 }
  0x5b   : > { %4215 = shalt.err (!%p4212_p7)
}
  0x5c   : > { %4083 = dma.hbm_to_vmem [thread:$0]  (!%p4994_p8), %s4395_s10, 1040, %s4397_s7, %s4335_s30  }
  0x5d   : > { %p4997_p9 = scmp.ne.s32.totalorder %s4992_s28, 0 }
  0x5e   : > { %p4998_p12 = scmp.eq.s32.totalorder (!%p4997_p9), %s4364_s25, 0 }
  0x5f   : > { %187 = sbr.rel (%p4997_p9) target bundleno = 465 (0x1d1), region = 32 }
  0x66   : > { %4233 = dma.done.wait (%p4998_p12), [#allocation3], 32   ;;  %p4999_p1 = pmov %p4998_p12 }
  0x67   : > { %s193_s18 = sand.u32 1, %s4364_s25   ;;  %s195_s20 = sand.u32 1, %s4246_s13  }
  0x68   : > { %4235 = vsyncadd (%p4999_p1), [#allocation3], 4294967264  ;;  %s4063_s23 = smul.u32 2080, %s195_s20  ;;  %s194_s22 = scalar_lea.sflag [#allocation5], %s193_s18 }
  0x69   : > { %p5000_p8 = scmp.ne.s32.totalorder %s4991_s26, 0 }
  0x6a   : > { %s4449_s24 = scalar_lea.vmem [#allocation4], %s4063_s23 }
  0x6b   : > { %4237 = dma.done.wait (%p5000_p8), %s194_s22, 34320  }
  0x6c   : > { %4239 = vsyncadd (%p5000_p8), %s194_s22, 4294932976  ;;  %v4262_v0 = vmov 0.0   ;;  %v244_v1 = vld [vmem:[%s4449_s24 + $0x8] sm:$0xff]  ;;  %v309_v2 = vld [vmem:[%s4449_s24 + $0x210] sm:$0xff]  ;;  %vm846_vm0 = vcmask 261120   ;;  %vm4264_vm1 = vmmov 0  }
  0x6d   : > { %914 = vmatprep.mubr.f32.mxu0 %v4262_v0  ;;  %985 = vmatprep.mubr.f32.mxu1 %v4262_v0  ;;  %v246_v3 = vld [vmem:[%s4449_s24 + $0x18] sm:$0xff]  ;;  %v3799_v4 = vpack.c.bf16 %v309_v2, %v244_v1  ;;  %v311_v5 = vld [vmem:[%s4449_s24 + $0x220] sm:$0xff]  ;;  %v308_v7 = vld [vmem:[%s4449_s24 + $0x208] sm:$0xff]  ;;  %s4064_s30 = smul.u32 65, %s195_s20 }
  0x6e   : > { %v243_v6 = vld [vmem:[%s4449_s24] sm:$0xff]  ;;  %v3807_v8 = vpack.c.bf16 %v311_v5, %v246_v3  ;;  %v245_v10 = vld [vmem:[%s4449_s24 + $0x10] sm:$0xff]  ;;  %v310_v11 = vld [vmem:[%s4449_s24 + $0x218] sm:$0xff]  ;;  %s236_s28 = smul.u32 65, %s4364_s25 }
  0x6f   : > { %v3801_v9 = vpack.c.bf16 %v308_v7, %v243_v6  ;;  %v374_v12 = vld [vmem:[%s4449_s24 + $0x418] sm:$0xff]  ;;  %3800 = vmatprep.subr.bf16.mxu0 %v3799_v4  ;;  %v3809_v13 = vpack.c.bf16 %v310_v11, %v245_v10  ;;  %v439_v14 = vld [vmem:[%s4449_s24 + $0x620] sm:$0xff]  ;;  %v376_v15 = vld [vmem:[%s4449_s24 + $0x428] sm:$0xff]  ;;  %s4815_s26 = scalar_lea.vmem [#allocation6], %s4064_s30 }
  0x70   : > { %v441_v16 = vld [vmem:[%s4449_s24 + $0x630] sm:$0xff]  ;;  %3808 = vmatprep.subr.bf16.mxu1 %v3807_v8  ;;  %v3803_v17 = vpack.c.bf16 %v439_v14, %v374_v12  ;;  %v438_v20 = vld [vmem:[%s4449_s24 + $0x618] sm:$0xff]  ;;  %v375_v21 = vld [vmem:[%s4449_s24 + $0x420] sm:$0xff]  ;;  %p4828_p2 = scmp.lt.s32.totalorder %s236_s28, 389 }
  0x71   : > { %3802 = vmatpush1.bf16.msra.mxu0 %v3801_v9  ;;  %v3811_v18 = vpack.c.bf16 %v441_v16, %v376_v15  ;;  %v373_v19 = vld [vmem:[%s4449_s24 + $0x410] sm:$0xff]  ;;  %3810 = vmatpush1.bf16.msra.mxu1 %v3809_v13  ;;  %v440_v23 = vld [vmem:[%s4449_s24 + $0x628] sm:$0xff]  ;;  %v4474_v26 = vld [vmem:[#allocation2] sm:$0x3] }
  0x72   : > { %v3805_v22 = vpack.c.bf16 %v438_v20, %v373_v19  ;;  %v248_v24 = vld [vmem:[%s4449_s24 + $0x28] sm:$0xff]  ;;  %3804 = vmatprep.subr.bf16.mxu0 %v3803_v17  ;;  %v3813_v25 = vpack.c.bf16 %v440_v23, %v375_v21  ;;  %v313_v27 = vld [vmem:[%s4449_s24 + $0x230] sm:$0xff]  ;;  %v250_v28 = vld [vmem:[%s4449_s24 + $0x38] sm:$0xff]  ;;  %s5007_s28 = smov (!%p4828_p2, %s236_s28), 389 }
  0x73   : > { %3812 = vmatprep.subr.bf16.mxu1 %v3811_v18  ;;  %v315_v29 = vld [vmem:[%s4449_s24 + $0x240] sm:$0xff]  ;;  %v3815_v30 = vpack.c.bf16 %v313_v27, %v248_v24  ;;  %v312_v33 = vld [vmem:[%s4449_s24 + $0x228] sm:$0xff]  ;;  %v249_v34 = vld [vmem:[%s4449_s24 + $0x30] sm:$0xff]  ;;  %s3743_s25 = sshll.u32 %s5007_s28, 1 }
  0x74   : > { %v3823_v31 = vpack.c.bf16 %v315_v29, %v250_v28  ;;  %v247_v32 = vld [vmem:[%s4449_s24 + $0x20] sm:$0xff]  ;;  %v314_v36 = vld [vmem:[%s4449_s24 + $0x238] sm:$0xff]  ;;  %v380_v41 = vld [vmem:[%s4449_s24 + $0x448] sm:$0xff]  ;;  %s4854_s4 = scalar_lea.vmem %s4983_s3, %s3743_s25 }
  0x75   : > { %3806 = vmatpush1.bf16.msra.mxu0 %v3805_v22  ;;  %v3817_v35 = vpack.c.bf16 %v312_v33, %v247_v32  ;;  %v378_v37 = vld [vmem:[%s4449_s24 + $0x438] sm:$0xff]  ;;  %v443_v38 = vld [vmem:[%s4449_s24 + $0x640] sm:$0xff]  ;;  %3814 = vmatpush1.bf16.msra.mxu1 %v3813_v25  ;;  %v3825_v39 = vpack.c.bf16 %v314_v36, %v249_v34  ;;  %v445_v42 = vld [vmem:[%s4449_s24 + $0x650] sm:$0xff] }
  0x76   : > { %3816 = vmatprep.subr.bf16.mxu0 %v3815_v30  ;;  %v3819_v40 = vpack.c.bf16 %v443_v38, %v378_v37  ;;  %v377_v43 = vld [vmem:[%s4449_s24 + $0x430] sm:$0xff]  ;;  %3824 = vmatprep.subr.bf16.mxu1 %v3823_v31  ;;  %v3827_v44 = vpack.c.bf16 %v445_v42, %v380_v41  ;;  %v442_v45 = vld [vmem:[%s4449_s24 + $0x638] sm:$0xff]  ;;  %v379_v46 = vld [vmem:[%s4449_s24 + $0x440] sm:$0xff] }
  0x77   : > { %v444_v47 = vld [vmem:[%s4449_s24 + $0x648] sm:$0xff]  ;;  %v317_v49 = vld [vmem:[%s4449_s24 + $0x250] sm:$0xff]  ;;  %v254_v50 = vld [vmem:[%s4449_s24 + $0x58] sm:$0xff]  ;;  %v3821_v51 = vpack.c.bf16 %v442_v45, %v377_v43 }
  0x78   : > { %3745 = vmatmul.mubr.msk.f32.vlgmr.msra.gmra.mrb[0].mxu0 %vm846_vm0, %v4474_v26  ;;  %v252_v48 = vld [vmem:[%s4449_s24 + $0x48] sm:$0xff]  ;;  %3746 = vmatmul.mubr.msk.f32.vlgmr.msra.gmra.mrb[0].mxu1 %vm846_vm0, %v4474_v26  ;;  %v319_v52 = vld [vmem:[%s4449_s24 + $0x260] sm:$0xff]  ;;  %v3829_v53 = vpack.c.bf16 %v444_v47, %v379_v46  ;;  %v253_v57 = vld [vmem:[%s4449_s24 + $0x50] sm:$0xff] }
  0x79   : > { %3818 = vmatpush1.bf16.msra.mxu0 %v3817_v35  ;;  %3826 = vmatpush1.bf16.msra.mxu1 %v3825_v39  ;;  %v3831_v54 = vpack.c.bf16 %v317_v49, %v252_v48  ;;  %v251_v55 = vld [vmem:[%s4449_s24 + $0x40] sm:$0xff]  ;;  %v316_v56 = vld [vmem:[%s4449_s24 + $0x248] sm:$0xff]  ;;  %v3839_v58 = vpack.c.bf16 %v319_v52, %v254_v50  ;;  %v318_v59 = vld [vmem:[%s4449_s24 + $0x258] sm:$0xff] }
  0x7a   : > { %3820 = vmatprep.subr.bf16.mxu0 %v3819_v40  ;;  %3828 = vmatprep.subr.bf16.mxu1 %v3827_v44  ;;  %v382_v60 = vld [vmem:[%s4449_s24 + $0x458] sm:$0xff]  ;;  %v447_v61 = vld [vmem:[%s4449_s24 + $0x660] sm:$0xff]  ;;  %v384_v62 = vld [vmem:[%s4449_s24 + $0x468] sm:$0xff]  ;;  %v3833_v1 = vpack.c.bf16 %v316_v56, %v251_v55  ;;  %v3841_v2 = vpack.c.bf16 %v318_v59, %v253_v57 }
  0x7b   : > { %1056 = vmatprep.mubr.f32.mxu0 %v4262_v0  ;;  %1127 = vmatprep.mubr.f32.mxu1 %v4262_v0  ;;  %v449_v63 = vld [vmem:[%s4449_s24 + $0x670] sm:$0xff]  ;;  %v3835_v3 = vpack.c.bf16 %v447_v61, %v382_v60  ;;  %v446_v5 = vld [vmem:[%s4449_s24 + $0x658] sm:$0xff]  ;;  %v383_v6 = vld [vmem:[%s4449_s24 + $0x460] sm:$0xff] }
  0x7c   : > { %v381_v4 = vld [vmem:[%s4449_s24 + $0x450] sm:$0xff]  ;;  %v3843_v7 = vpack.c.bf16 %v449_v63, %v384_v62  ;;  %v448_v8 = vld [vmem:[%s4449_s24 + $0x668] sm:$0xff]  ;;  %v258_v11 = vld [vmem:[%s4449_s24 + $0x78] sm:$0xff] }
  0x7d   : > { %3822 = vmatpush1.bf16.msra.mxu0 %v3821_v51  ;;  %3830 = vmatpush1.bf16.msra.mxu1 %v3829_v53  ;;  %v256_v9 = vld [vmem:[%s4449_s24 + $0x68] sm:$0xff]  ;;  %v321_v10 = vld [vmem:[%s4449_s24 + $0x270] sm:$0xff]  ;;  %v323_v12 = vld [vmem:[%s4449_s24 + $0x280] sm:$0xff]  ;;  %v3837_v13 = vpack.c.bf16 %v446_v5, %v381_v4  ;;  %v3845_v14 = vpack.c.bf16 %v448_v8, %v383_v6 }
  0x7e   : > { %3832 = vmatprep.subr.bf16.mxu0 %v3831_v54  ;;  %3840 = vmatprep.subr.bf16.mxu1 %v3839_v58  ;;  %v3847_v15 = vpack.c.bf16 %v321_v10, %v256_v9  ;;  %v255_v16 = vld [vmem:[%s4449_s24 + $0x60] sm:$0xff]  ;;  %v320_v17 = vld [vmem:[%s4449_s24 + $0x268] sm:$0xff]  ;;  %v257_v18 = vld [vmem:[%s4449_s24 + $0x70] sm:$0xff]  ;;  %v3855_v19 = vpack.c.bf16 %v323_v12, %v258_v11 }
  0x7f   : > { %v322_v20 = vld [vmem:[%s4449_s24 + $0x278] sm:$0xff]  ;;  %v451_v22 = vld [vmem:[%s4449_s24 + $0x680] sm:$0xff]  ;;  %v388_v23 = vld [vmem:[%s4449_s24 + $0x488] sm:$0xff]  ;;  %v3849_v25 = vpack.c.bf16 %v320_v17, %v255_v16 }
  0x80   : > { %3747 = vmatmul.mubr.msk.f32.vlgmr.msra.gmra.mrb[2].mxu0 %vm846_vm0, %v4474_v26  ;;  %3748 = vmatmul.mubr.msk.f32.vlgmr.msra.gmra.mrb[2].mxu1 %vm846_vm0, %v4474_v26  ;;  %v386_v21 = vld [vmem:[%s4449_s24 + $0x478] sm:$0xff]  ;;  %v453_v24 = vld [vmem:[%s4449_s24 + $0x690] sm:$0xff]  ;;  %v3857_v27 = vpack.c.bf16 %v322_v20, %v257_v18  ;;  %v387_v31 = vld [vmem:[%s4449_s24 + $0x480] sm:$0xff] }
  0x81   : > { %3834 = vmatpush1.bf16.msra.mxu0 %v3833_v1  ;;  %3842 = vmatpush1.bf16.msra.mxu1 %v3841_v2  ;;  %v3851_v28 = vpack.c.bf16 %v451_v22, %v386_v21  ;;  %v385_v29 = vld [vmem:[%s4449_s24 + $0x470] sm:$0xff]  ;;  %v450_v30 = vld [vmem:[%s4449_s24 + $0x678] sm:$0xff]  ;;  %v3859_v32 = vpack.c.bf16 %v453_v24, %v388_v23  ;;  %v452_v33 = vld [vmem:[%s4449_s24 + $0x688] sm:$0xff] }
  0x82   : > { %3836 = vmatprep.subr.bf16.mxu0 %v3835_v3  ;;  %3844 = vmatprep.subr.bf16.mxu1 %v3843_v7  ;;  %v260_v34 = vld [vmem:[%s4449_s24 + $0x88] sm:$0xff]  ;;  %v325_v35 = vld [vmem:[%s4449_s24 + $0x290] sm:$0xff]  ;;  %v262_v36 = vld [vmem:[%s4449_s24 + $0x98] sm:$0xff]  ;;  %v3853_v38 = vpack.c.bf16 %v450_v30, %v385_v29  ;;  %v3861_v39 = vpack.c.bf16 %v452_v33, %v387_v31 }
  0x83   : > { %1198 = vmatprep.mubr.f32.mxu0 %v4262_v0  ;;  %1269 = vmatprep.mubr.f32.mxu1 %v4262_v0  ;;  %v327_v37 = vld [vmem:[%s4449_s24 + $0x2a0] sm:$0xff]  ;;  %v3863_v40 = vpack.c.bf16 %v325_v35, %v260_v34  ;;  %v324_v42 = vld [vmem:[%s4449_s24 + $0x288] sm:$0xff]  ;;  %v261_v43 = vld [vmem:[%s4449_s24 + $0x90] sm:$0xff] }
  0x84   : > { %v259_v41 = vld [vmem:[%s4449_s24 + $0x80] sm:$0xff]  ;;  %v3871_v44 = vpack.c.bf16 %v327_v37, %v262_v36  ;;  %v326_v45 = vld [vmem:[%s4449_s24 + $0x298] sm:$0xff]  ;;  %v392_v48 = vld [vmem:[%s4449_s24 + $0x4a8] sm:$0xff] }
  0x85   : > { %3838 = vmatpush1.bf16.msra.mxu0 %v3837_v13  ;;  %3846 = vmatpush1.bf16.msra.mxu1 %v3845_v14  ;;  %v390_v46 = vld [vmem:[%s4449_s24 + $0x498] sm:$0xff]  ;;  %v455_v47 = vld [vmem:[%s4449_s24 + $0x6a0] sm:$0xff]  ;;  %v457_v49 = vld [vmem:[%s4449_s24 + $0x6b0] sm:$0xff]  ;;  %v3865_v50 = vpack.c.bf16 %v324_v42, %v259_v41  ;;  %v3873_v51 = vpack.c.bf16 %v326_v45, %v261_v43 }
  0x86   : > { %3848 = vmatprep.subr.bf16.mxu0 %v3847_v15  ;;  %3856 = vmatprep.subr.bf16.mxu1 %v3855_v19  ;;  %v3867_v52 = vpack.c.bf16 %v455_v47, %v390_v46  ;;  %v389_v53 = vld [vmem:[%s4449_s24 + $0x490] sm:$0xff]  ;;  %v454_v54 = vld [vmem:[%s4449_s24 + $0x698] sm:$0xff]  ;;  %v391_v55 = vld [vmem:[%s4449_s24 + $0x4a0] sm:$0xff]  ;;  %v3875_v56 = vpack.c.bf16 %v457_v49, %v392_v48 }
  0x87   : > { %v456_v57 = vld [vmem:[%s4449_s24 + $0x6a8] sm:$0xff]  ;;  %v329_v59 = vld [vmem:[%s4449_s24 + $0x2b0] sm:$0xff]  ;;  %v266_v60 = vld [vmem:[%s4449_s24 + $0xb8] sm:$0xff]  ;;  %v3869_v62 = vpack.c.bf16 %v454_v54, %v389_v53 }
  0x88   : > { %3749 = vmatmul.mubr.msk.f32.vlgmr.msra.gmra.mrb[4].mxu0 %vm846_vm0, %v4474_v26  ;;  %3750 = vmatmul.mubr.msk.f32.vlgmr.msra.gmra.mrb[4].mxu1 %vm846_vm0, %v4474_v26  ;;  %v264_v58 = vld [vmem:[%s4449_s24 + $0xa8] sm:$0xff]  ;;  %v331_v61 = vld [vmem:[%s4449_s24 + $0x2c0] sm:$0xff]  ;;  %v3877_v63 = vpack.c.bf16 %v456_v57, %v391_v55  ;;  %v265_v4 = vld [vmem:[%s4449_s24 + $0xb0] sm:$0xff] }
  0x89   : > { %3850 = vmatpush1.bf16.msra.mxu0 %v3849_v25  ;;  %3858 = vmatpush1.bf16.msra.mxu1 %v3857_v27  ;;  %v3879_v1 = vpack.c.bf16 %v329_v59, %v264_v58  ;;  %v263_v2 = vld [vmem:[%s4449_s24 + $0xa0] sm:$0xff]  ;;  %v328_v3 = vld [vmem:[%s4449_s24 + $0x2a8] sm:$0xff]  ;;  %v3887_v5 = vpack.c.bf16 %v331_v61, %v266_v60  ;;  %v330_v6 = vld [vmem:[%s4449_s24 + $0x2b8] sm:$0xff] }
  0x8a   : > { %3852 = vmatprep.subr.bf16.mxu0 %v3851_v28  ;;  %3860 = vmatprep.subr.bf16.mxu1 %v3859_v32  ;;  %v394_v7 = vld [vmem:[%s4449_s24 + $0x4b8] sm:$0xff]  ;;  %v459_v8 = vld [vmem:[%s4449_s24 + $0x6c0] sm:$0xff]  ;;  %v396_v9 = vld [vmem:[%s4449_s24 + $0x4c8] sm:$0xff]  ;;  %v3881_v11 = vpack.c.bf16 %v328_v3, %v263_v2  ;;  %v3889_v12 = vpack.c.bf16 %v330_v6, %v265_v4 }
  0x8b   : > { %1340 = vmatprep.mubr.f32.mxu0 %v4262_v0  ;;  %1411 = vmatprep.mubr.f32.mxu1 %v4262_v0  ;;  %v461_v10 = vld [vmem:[%s4449_s24 + $0x6d0] sm:$0xff]  ;;  %v3883_v13 = vpack.c.bf16 %v459_v8, %v394_v7  ;;  %v458_v15 = vld [vmem:[%s4449_s24 + $0x6b8] sm:$0xff]  ;;  %v395_v16 = vld [vmem:[%s4449_s24 + $0x4c0] sm:$0xff] }
  0x8c   : > { %v393_v14 = vld [vmem:[%s4449_s24 + $0x4b0] sm:$0xff]  ;;  %v3891_v17 = vpack.c.bf16 %v461_v10, %v396_v9  ;;  %v460_v18 = vld [vmem:[%s4449_s24 + $0x6c8] sm:$0xff]  ;;  %v270_v21 = vld [vmem:[%s4449_s24 + $0xd8] sm:$0xff] }
  0x8d   : > { %3854 = vmatpush1.bf16.msra.mxu0 %v3853_v38  ;;  %3862 = vmatpush1.bf16.msra.mxu1 %v3861_v39  ;;  %v268_v19 = vld [vmem:[%s4449_s24 + $0xc8] sm:$0xff]  ;;  %v333_v20 = vld [vmem:[%s4449_s24 + $0x2d0] sm:$0xff]  ;;  %v335_v22 = vld [vmem:[%s4449_s24 + $0x2e0] sm:$0xff]  ;;  %v3885_v23 = vpack.c.bf16 %v458_v15, %v393_v14  ;;  %v3893_v24 = vpack.c.bf16 %v460_v18, %v395_v16 }
  0x8e   : > { %3864 = vmatprep.subr.bf16.mxu0 %v3863_v40  ;;  %3872 = vmatprep.subr.bf16.mxu1 %v3871_v44  ;;  %v3895_v25 = vpack.c.bf16 %v333_v20, %v268_v19  ;;  %v267_v27 = vld [vmem:[%s4449_s24 + $0xc0] sm:$0xff]  ;;  %v332_v28 = vld [vmem:[%s4449_s24 + $0x2c8] sm:$0xff]  ;;  %v269_v29 = vld [vmem:[%s4449_s24 + $0xd0] sm:$0xff]  ;;  %v3903_v30 = vpack.c.bf16 %v335_v22, %v270_v21 }
  0x8f   : > { %v334_v31 = vld [vmem:[%s4449_s24 + $0x2d8] sm:$0xff]  ;;  %v463_v33 = vld [vmem:[%s4449_s24 + $0x6e0] sm:$0xff]  ;;  %v400_v34 = vld [vmem:[%s4449_s24 + $0x4e8] sm:$0xff]  ;;  %v3897_v36 = vpack.c.bf16 %v332_v28, %v267_v27 }
  0x90   : > { %3751 = vmatmul.mubr.msk.f32.vlgmr.msra.gmra.mrb[6].mxu0 %vm846_vm0, %v4474_v26  ;;  %3752 = vmatmul.mubr.msk.f32.vlgmr.msra.gmra.mrb[6].mxu1 %vm846_vm0, %v4474_v26  ;;  %v398_v32 = vld [vmem:[%s4449_s24 + $0x4d8] sm:$0xff]  ;;  %v465_v35 = vld [vmem:[%s4449_s24 + $0x6f0] sm:$0xff]  ;;  %v3905_v37 = vpack.c.bf16 %v334_v31, %v269_v29  ;;  %v399_v41 = vld [vmem:[%s4449_s24 + $0x4e0] sm:$0xff] }
  0x91   : > { %3866 = vmatpush1.bf16.msra.mxu0 %v3865_v50  ;;  %3874 = vmatpush1.bf16.msra.mxu1 %v3873_v51  ;;  %v3899_v38 = vpack.c.bf16 %v463_v33, %v398_v32  ;;  %v397_v39 = vld [vmem:[%s4449_s24 + $0x4d0] sm:$0xff]  ;;  %v462_v40 = vld [vmem:[%s4449_s24 + $0x6d8] sm:$0xff]  ;;  %v3907_v42 = vpack.c.bf16 %v465_v35, %v400_v34  ;;  %v464_v43 = vld [vmem:[%s4449_s24 + $0x6e8] sm:$0xff] }
  0x92   : > { %3868 = vmatprep.subr.bf16.mxu0 %v3867_v52  ;;  %3876 = vmatprep.subr.bf16.mxu1 %v3875_v56  ;;  %v272_v44 = vld [vmem:[%s4449_s24 + $0xe8] sm:$0xff]  ;;  %v337_v45 = vld [vmem:[%s4449_s24 + $0x2f0] sm:$0xff]  ;;  %v274_v46 = vld [vmem:[%s4449_s24 + $0xf8] sm:$0xff]  ;;  %v3901_v48 = vpack.c.bf16 %v462_v40, %v397_v39  ;;  %v3909_v49 = vpack.c.bf16 %v464_v43, %v399_v41 }
  0x93   : > { %1482 = vmatprep.mubr.f32.mxu0 %v4262_v0  ;;  %1553 = vmatprep.mubr.f32.mxu1 %v4262_v0  ;;  %v339_v47 = vld [vmem:[%s4449_s24 + $0x300] sm:$0xff]  ;;  %v3911_v50 = vpack.c.bf16 %v337_v45, %v272_v44  ;;  %v336_v52 = vld [vmem:[%s4449_s24 + $0x2e8] sm:$0xff]  ;;  %v273_v53 = vld [vmem:[%s4449_s24 + $0xf0] sm:$0xff] }
  0x94   : > { %v271_v51 = vld [vmem:[%s4449_s24 + $0xe0] sm:$0xff]  ;;  %v3919_v54 = vpack.c.bf16 %v339_v47, %v274_v46  ;;  %v338_v55 = vld [vmem:[%s4449_s24 + $0x2f8] sm:$0xff]  ;;  %v404_v58 = vld [vmem:[%s4449_s24 + $0x508] sm:$0xff] }
  0x95   : > { %3870 = vmatpush1.bf16.msra.mxu0 %v3869_v62  ;;  %3878 = vmatpush1.bf16.msra.mxu1 %v3877_v63  ;;  %v402_v56 = vld [vmem:[%s4449_s24 + $0x4f8] sm:$0xff]  ;;  %v467_v57 = vld [vmem:[%s4449_s24 + $0x700] sm:$0xff]  ;;  %v469_v59 = vld [vmem:[%s4449_s24 + $0x710] sm:$0xff]  ;;  %v3913_v60 = vpack.c.bf16 %v336_v52, %v271_v51  ;;  %v3921_v61 = vpack.c.bf16 %v338_v55, %v273_v53 }
  0x96   : > { %3880 = vmatprep.subr.bf16.mxu0 %v3879_v1  ;;  %3888 = vmatprep.subr.bf16.mxu1 %v3887_v5  ;;  %v3915_v62 = vpack.c.bf16 %v467_v57, %v402_v56  ;;  %v401_v63 = vld [vmem:[%s4449_s24 + $0x4f0] sm:$0xff]  ;;  %v466_v1 = vld [vmem:[%s4449_s24 + $0x6f8] sm:$0xff]  ;;  %v403_v2 = vld [vmem:[%s4449_s24 + $0x500] sm:$0xff]  ;;  %v3923_v3 = vpack.c.bf16 %v469_v59, %v404_v58 }
  0x97   : > { %v468_v4 = vld [vmem:[%s4449_s24 + $0x708] sm:$0xff]  ;;  %v341_v6 = vld [vmem:[%s4449_s24 + $0x310] sm:$0xff]  ;;  %v278_v7 = vld [vmem:[%s4449_s24 + $0x118] sm:$0xff]  ;;  %v3917_v9 = vpack.c.bf16 %v466_v1, %v401_v63 }
  0x98   : > { %3753 = vmatmul.mubr.msk.f32.vlgmr.msra.gmra.mrb[8].mxu0 %vm846_vm0, %v4474_v26  ;;  %3754 = vmatmul.mubr.msk.f32.vlgmr.msra.gmra.mrb[8].mxu1 %vm846_vm0, %v4474_v26  ;;  %v276_v5 = vld [vmem:[%s4449_s24 + $0x108] sm:$0xff]  ;;  %v343_v8 = vld [vmem:[%s4449_s24 + $0x320] sm:$0xff]  ;;  %v3925_v10 = vpack.c.bf16 %v468_v4, %v403_v2  ;;  %v277_v14 = vld [vmem:[%s4449_s24 + $0x110] sm:$0xff] }
  0x99   : > { %3882 = vmatpush1.bf16.msra.mxu0 %v3881_v11  ;;  %3890 = vmatpush1.bf16.msra.mxu1 %v3889_v12  ;;  %v3927_v11 = vpack.c.bf16 %v341_v6, %v276_v5  ;;  %v275_v12 = vld [vmem:[%s4449_s24 + $0x100] sm:$0xff]  ;;  %v3935_v15 = vpack.c.bf16 %v343_v8, %v278_v7  ;;  %v342_v16 = vld [vmem:[%s4449_s24 + $0x318] sm:$0xff]  ;;  %v408_v19 = vld [vmem:[%s4449_s24 + $0x528] sm:$0xff] }
  0x9a   : > { %3884 = vmatprep.subr.bf16.mxu0 %v3883_v13  ;;  %3892 = vmatprep.subr.bf16.mxu1 %v3891_v17  ;;  %v340_v13 = vld [vmem:[%s4449_s24 + $0x308] sm:$0xff]  ;;  %v406_v17 = vld [vmem:[%s4449_s24 + $0x518] sm:$0xff]  ;;  %v471_v18 = vld [vmem:[%s4449_s24 + $0x720] sm:$0xff]  ;;  %v3937_v22 = vpack.c.bf16 %v342_v16, %v277_v14 }
  0x9b   : > { %1624 = vmatprep.mubr.f32.mxu0 %v4262_v0  ;;  %1695 = vmatprep.mubr.f32.mxu1 %v4262_v0  ;;  %v473_v20 = vld [vmem:[%s4449_s24 + $0x730] sm:$0xff]  ;;  %v3929_v21 = vpack.c.bf16 %v340_v13, %v275_v12  ;;  %v407_v27 = vld [vmem:[%s4449_s24 + $0x520] sm:$0xff]  ;;  %v472_v29 = vld [vmem:[%s4449_s24 + $0x728] sm:$0xff] }
  0x9c   : > { %v3939_v28 = vpack.c.bf16 %v473_v20, %v408_v19  ;;  %v345_v31 = vld [vmem:[%s4449_s24 + $0x330] sm:$0xff]  ;;  %v282_v32 = vld [vmem:[%s4449_s24 + $0x138] sm:$0xff]  ;;  %v347_v33 = vld [vmem:[%s4449_s24 + $0x340] sm:$0xff]  ;;  %v3941_v35 = vpack.c.bf16 %v472_v29, %v407_v27 }
  0x9d   : > { %3886 = vmatpush1.bf16.msra.mxu0 %v3885_v23  ;;  %3894 = vmatpush1.bf16.msra.mxu1 %v3893_v24  ;;  %v3931_v23 = vpack.c.bf16 %v471_v18, %v406_v17  ;;  %v405_v24 = vld [vmem:[%s4449_s24 + $0x510] sm:$0xff]  ;;  %v3951_v40 = vpack.c.bf16 %v347_v33, %v282_v32  ;;  %v346_v41 = vld [vmem:[%s4449_s24 + $0x338] sm:$0xff]  ;;  %v475_v43 = vld [vmem:[%s4449_s24 + $0x740] sm:$0xff] }
  0x9e   : > { %3896 = vmatprep.subr.bf16.mxu0 %v3895_v25  ;;  %3904 = vmatprep.subr.bf16.mxu1 %v3903_v30  ;;  %v470_v25 = vld [vmem:[%s4449_s24 + $0x718] sm:$0xff]  ;;  %v280_v30 = vld [vmem:[%s4449_s24 + $0x128] sm:$0xff]  ;;  %v281_v39 = vld [vmem:[%s4449_s24 + $0x130] sm:$0xff] }
  0x9f   : > { %v3933_v34 = vpack.c.bf16 %v470_v25, %v405_v24  ;;  %v412_v44 = vld [vmem:[%s4449_s24 + $0x548] sm:$0xff]  ;;  %v477_v45 = vld [vmem:[%s4449_s24 + $0x750] sm:$0xff]  ;;  %v3953_v47 = vpack.c.bf16 %v346_v41, %v281_v39  ;;  %v411_v51 = vld [vmem:[%s4449_s24 + $0x540] sm:$0xff] }
  0xa0   : > { %3755 = vmatmul.mubr.msk.f32.vlgmr.msra.gmra.mrb[10].mxu0 %vm846_vm0, %v4474_v26  ;;  %3756 = vmatmul.mubr.msk.f32.vlgmr.msra.gmra.mrb[10].mxu1 %vm846_vm0, %v4474_v26  ;;  %v3955_v52 = vpack.c.bf16 %v477_v45, %v412_v44  ;;  %v476_v53 = vld [vmem:[%s4449_s24 + $0x748] sm:$0xff]  ;;  %v349_v55 = vld [vmem:[%s4449_s24 + $0x350] sm:$0xff]  ;;  %v286_v56 = vld [vmem:[%s4449_s24 + $0x158] sm:$0xff] }
  0xa1   : > { %3898 = vmatpush1.bf16.msra.mxu0 %v3897_v36  ;;  %3906 = vmatpush1.bf16.msra.mxu1 %v3905_v37  ;;  %v3943_v36 = vpack.c.bf16 %v345_v31, %v280_v30  ;;  %v279_v37 = vld [vmem:[%s4449_s24 + $0x120] sm:$0xff]  ;;  %v3957_v59 = vpack.c.bf16 %v476_v53, %v411_v51  ;;  %v285_v63 = vld [vmem:[%s4449_s24 + $0x150] sm:$0xff]  ;;  %v350_v2 = vld [vmem:[%s4449_s24 + $0x358] sm:$0xff] }
  0xa2   : > { %3900 = vmatprep.subr.bf16.mxu0 %v3899_v38  ;;  %3908 = vmatprep.subr.bf16.mxu1 %v3907_v42  ;;  %v344_v38 = vld [vmem:[%s4449_s24 + $0x328] sm:$0xff]  ;;  %v410_v42 = vld [vmem:[%s4449_s24 + $0x538] sm:$0xff]  ;;  %v351_v57 = vld [vmem:[%s4449_s24 + $0x360] sm:$0xff]  ;;  %v3969_v8 = vpack.c.bf16 %v350_v2, %v285_v63 }
  0xa3   : > { %1766 = vmatprep.mubr.f32.mxu0 %v4262_v0  ;;  %1837 = vmatprep.mubr.f32.mxu1 %v4262_v0  ;;  %v3945_v46 = vpack.c.bf16 %v344_v38, %v279_v37  ;;  %v3967_v1 = vpack.c.bf16 %v351_v57, %v286_v56  ;;  %v479_v4 = vld [vmem:[%s4449_s24 + $0x760] sm:$0xff]  ;;  %v416_v5 = vld [vmem:[%s4449_s24 + $0x568] sm:$0xff]  ;;  %v481_v6 = vld [vmem:[%s4449_s24 + $0x770] sm:$0xff] }
  0xa4   : > { %v415_v12 = vld [vmem:[%s4449_s24 + $0x560] sm:$0xff]  ;;  %v3971_v13 = vpack.c.bf16 %v481_v6, %v416_v5  ;;  %v480_v14 = vld [vmem:[%s4449_s24 + $0x768] sm:$0xff]  ;;  %v353_v16 = vld [vmem:[%s4449_s24 + $0x370] sm:$0xff] }
  0xa5   : > { %3902 = vmatpush1.bf16.msra.mxu0 %v3901_v48  ;;  %3910 = vmatpush1.bf16.msra.mxu1 %v3909_v49  ;;  %v3947_v48 = vpack.c.bf16 %v475_v43, %v410_v42  ;;  %v409_v49 = vld [vmem:[%s4449_s24 + $0x530] sm:$0xff]  ;;  %v290_v17 = vld [vmem:[%s4449_s24 + $0x178] sm:$0xff]  ;;  %v355_v18 = vld [vmem:[%s4449_s24 + $0x380] sm:$0xff]  ;;  %v3973_v20 = vpack.c.bf16 %v480_v14, %v415_v12 }
  0xa6   : > { %3912 = vmatprep.subr.bf16.mxu0 %v3911_v50  ;;  %3920 = vmatprep.subr.bf16.mxu1 %v3919_v54  ;;  %v474_v50 = vld [vmem:[%s4449_s24 + $0x738] sm:$0xff]  ;;  %v284_v54 = vld [vmem:[%s4449_s24 + $0x148] sm:$0xff]  ;;  %v289_v24 = vld [vmem:[%s4449_s24 + $0x170] sm:$0xff]  ;;  %v3983_v25 = vpack.c.bf16 %v355_v18, %v290_v17 }
  0xa7   : > { %v3949_v58 = vpack.c.bf16 %v474_v50, %v409_v49  ;;  %v354_v27 = vld [vmem:[%s4449_s24 + $0x378] sm:$0xff]  ;;  %v483_v29 = vld [vmem:[%s4449_s24 + $0x780] sm:$0xff]  ;;  %v420_v30 = vld [vmem:[%s4449_s24 + $0x588] sm:$0xff] }
  0xa8   : > { %3757 = vmatmul.mubr.msk.f32.vlgmr.msra.gmra.mrb[12].mxu0 %vm846_vm0, %v4474_v26  ;;  %3758 = vmatmul.mubr.msk.f32.vlgmr.msra.gmra.mrb[12].mxu1 %vm846_vm0, %v4474_v26  ;;  %v485_v31 = vld [vmem:[%s4449_s24 + $0x790] sm:$0xff]  ;;  %v3985_v33 = vpack.c.bf16 %v354_v27, %v289_v24  ;;  %v419_v37 = vld [vmem:[%s4449_s24 + $0x580] sm:$0xff]  ;;  %v484_v39 = vld [vmem:[%s4449_s24 + $0x788] sm:$0xff] }
  0xa9   : > { %3914 = vmatpush1.bf16.msra.mxu0 %v3913_v60  ;;  %3922 = vmatpush1.bf16.msra.mxu1 %v3921_v61  ;;  %v3959_v60 = vpack.c.bf16 %v349_v55, %v284_v54  ;;  %v283_v61 = vld [vmem:[%s4449_s24 + $0x140] sm:$0xff]  ;;  %v3987_v38 = vpack.c.bf16 %v485_v31, %v420_v30  ;;  %v357_v41 = vld [vmem:[%s4449_s24 + $0x390] sm:$0xff]  ;;  %v294_v42 = vld [vmem:[%s4449_s24 + $0x198] sm:$0xff]  ;;  %v3989_v45 = vpack.c.bf16 %v484_v39, %v419_v37 }
  0xaa   : > { %3916 = vmatprep.subr.bf16.mxu0 %v3915_v62  ;;  %3924 = vmatprep.subr.bf16.mxu1 %v3923_v3  ;;  %v348_v62 = vld [vmem:[%s4449_s24 + $0x348] sm:$0xff]  ;;  %v414_v3 = vld [vmem:[%s4449_s24 + $0x558] sm:$0xff]  ;;  %v359_v43 = vld [vmem:[%s4449_s24 + $0x3a0] sm:$0xff] }
  0xab   : > { %1908 = vmatprep.mubr.f32.mxu0 %v4262_v0  ;;  %1979 = vmatprep.mubr.f32.mxu1 %v4262_v0  ;;  %v3961_v7 = vpack.c.bf16 %v348_v62, %v283_v61  ;;  %v293_v49 = vld [vmem:[%s4449_s24 + $0x190] sm:$0xff]  ;;  %v3999_v50 = vpack.c.bf16 %v359_v43, %v294_v42  ;;  %v358_v51 = vld [vmem:[%s4449_s24 + $0x398] sm:$0xff]  ;;  %v487_v53 = vld [vmem:[%s4449_s24 + $0x7a0] sm:$0xff] }
  0xac   : > { %v424_v54 = vld [vmem:[%s4449_s24 + $0x5a8] sm:$0xff]  ;;  %v489_v55 = vld [vmem:[%s4449_s24 + $0x7b0] sm:$0xff]  ;;  %v4001_v57 = vpack.c.bf16 %v358_v51, %v293_v49  ;;  %v423_v61 = vld [vmem:[%s4449_s24 + $0x5a0] sm:$0xff] }
  0xad   : > { %3918 = vmatpush1.bf16.msra.mxu0 %v3917_v9  ;;  %3926 = vmatpush1.bf16.msra.mxu1 %v3925_v10  ;;  %v3963_v9 = vpack.c.bf16 %v479_v4, %v414_v3  ;;  %v413_v10 = vld [vmem:[%s4449_s24 + $0x550] sm:$0xff]  ;;  %v4003_v62 = vpack.c.bf16 %v489_v55, %v424_v54  ;;  %v488_v63 = vld [vmem:[%s4449_s24 + $0x7a8] sm:$0xff]  ;;  %v298_v3 = vld [vmem:[%s4449_s24 + $0x1b8] sm:$0xff] }
  0xae   : > { %3928 = vmatprep.subr.bf16.mxu0 %v3927_v11  ;;  %3936 = vmatprep.subr.bf16.mxu1 %v3935_v15  ;;  %v478_v11 = vld [vmem:[%s4449_s24 + $0x758] sm:$0xff]  ;;  %v288_v15 = vld [vmem:[%s4449_s24 + $0x168] sm:$0xff]  ;;  %v361_v2 = vld [vmem:[%s4449_s24 + $0x3b0] sm:$0xff]  ;;  %v4005_v6 = vpack.c.bf16 %v488_v63, %v423_v61 }
  0xaf   : > { %v3965_v19 = vpack.c.bf16 %v478_v11, %v413_v10  ;;  %v363_v4 = vld [vmem:[%s4449_s24 + $0x3c0] sm:$0xff]  ;;  %v297_v10 = vld [vmem:[%s4449_s24 + $0x1b0] sm:$0xff]  ;;  %v362_v12 = vld [vmem:[%s4449_s24 + $0x3b8] sm:$0xff] }
  0xb0   : > { %3759 = vmatmul.mubr.msk.f32.vlgmr.msra.gmra.mrb[14].mxu0 %vm846_vm0, %v4474_v26  ;;  %3760 = vmatmul.mubr.msk.f32.vlgmr.msra.gmra.mrb[14].mxu1 %vm846_vm0, %v4474_v26  ;;  %v4015_v11 = vpack.c.bf16 %v363_v4, %v298_v3  ;;  %v491_v14 = vld [vmem:[%s4449_s24 + $0x7c0] sm:$0xff]  ;;  %v4017_v18 = vpack.c.bf16 %v362_v12, %v297_v10  ;;  %v492_v24 = vld [vmem:[%s4449_s24 + $0x7c8] sm:$0xff]  ;;  %v365_v27 = vld [vmem:[%s4449_s24 + $0x3d0] sm:$0xff] }
  0xb1   : > { %3930 = vmatpush1.bf16.msra.mxu0 %v3929_v21  ;;  %3938 = vmatpush1.bf16.msra.mxu1 %v3937_v22  ;;  %v3975_v21 = vpack.c.bf16 %v353_v16, %v288_v15  ;;  %v287_v22 = vld [vmem:[%s4449_s24 + $0x160] sm:$0xff]  ;;  %v428_v15 = vld [vmem:[%s4449_s24 + $0x5c8] sm:$0xff]  ;;  %v493_v16 = vld [vmem:[%s4449_s24 + $0x7d0] sm:$0xff] }
  0xb2   : > { %3932 = vmatprep.subr.bf16.mxu0 %v3931_v23  ;;  %3940 = vmatprep.subr.bf16.mxu1 %v3939_v28  ;;  %v352_v23 = vld [vmem:[%s4449_s24 + $0x368] sm:$0xff]  ;;  %v418_v28 = vld [vmem:[%s4449_s24 + $0x578] sm:$0xff]  ;;  %v495_v39 = vld [vmem:[%s4449_s24 + $0x7e0] sm:$0xff] }
  0xb3   : > { %2050 = vmatprep.mubr.f32.mxu0 %v4262_v0  ;;  %2121 = vmatprep.mubr.f32.mxu1 %v4262_v0  ;;  %v3977_v32 = vpack.c.bf16 %v352_v23, %v287_v22  ;;  %v427_v22 = vld [vmem:[%s4449_s24 + $0x5c0] sm:$0xff]  ;;  %v4019_v23 = vpack.c.bf16 %v493_v16, %v428_v15  ;;  %v366_v37 = vld [vmem:[%s4449_s24 + $0x3d8] sm:$0xff]  ;;  %v496_v49 = vld [vmem:[%s4449_s24 + $0x7e8] sm:$0xff]  ;;  %v4263_v16 = vmov 0.0|0.0  }
  0xb4   : > { %v4021_v31 = vpack.c.bf16 %v492_v24, %v427_v22  ;;  %v369_v51 = vld [vmem:[%s4449_s24 + $0x3f0] sm:$0xff]  ;;  %v370_v61 = vld [vmem:[%s4449_s24 + $0x3f8] sm:$0xff]  ;;  %v436_v63 = vld [vmem:[%s4449_s24 + $0x608] sm:$0xff] }
  0xb5   : > { %3934 = vmatpush1.bf16.msra.mxu0 %v3933_v34  ;;  %3942 = vmatpush1.bf16.msra.mxu1 %v3941_v35  ;;  %v3979_v34 = vpack.c.bf16 %v483_v29, %v418_v28  ;;  %v417_v35 = vld [vmem:[%s4449_s24 + $0x570] sm:$0xff]  ;;  %v302_v28 = vld [vmem:[%s4449_s24 + $0x1d8] sm:$0xff]  ;;  %v367_v29 = vld [vmem:[%s4449_s24 + $0x3e0] sm:$0xff] }
  0xb6   : > { %3944 = vmatprep.subr.bf16.mxu0 %v3943_v36  ;;  %3952 = vmatprep.subr.bf16.mxu1 %v3951_v40  ;;  %v482_v36 = vld [vmem:[%s4449_s24 + $0x778] sm:$0xff]  ;;  %v292_v40 = vld [vmem:[%s4449_s24 + $0x188] sm:$0xff] }
  0xb7   : > { %v3981_v44 = vpack.c.bf16 %v482_v36, %v417_v35  ;;  %v301_v35 = vld [vmem:[%s4449_s24 + $0x1d0] sm:$0xff]  ;;  %v4031_v36 = vpack.c.bf16 %v367_v29, %v302_v28  ;;  %v4127_v10 = vld [vmem:[#allocation2] sm:$0x3] }
  0xb8   : > { %3761 = vmatmul.mubr.msk.f32.vlgmr.msra.gmra.mrb[16].mxu0 %vm846_vm0, %v4474_v26  ;;  %3762 = vmatmul.mubr.msk.f32.vlgmr.msra.gmra.mrb[16].mxu1 %vm846_vm0, %v4474_v26  ;;  %v4033_v43 = vpack.c.bf16 %v366_v37, %v301_v35 }
  0xb9   : > { %3946 = vmatpush1.bf16.msra.mxu0 %v3945_v46  ;;  %3954 = vmatpush1.bf16.msra.mxu1 %v3953_v47  ;;  %v3991_v46 = vpack.c.bf16 %v357_v41, %v292_v40  ;;  %v291_v47 = vld [vmem:[%s4449_s24 + $0x180] sm:$0xff]  ;;  %v432_v40 = vld [vmem:[%s4449_s24 + $0x5e8] sm:$0xff]  ;;  %v497_v41 = vld [vmem:[%s4449_s24 + $0x7f0] sm:$0xff] }
  0xba   : > { %3948 = vmatprep.subr.bf16.mxu0 %v3947_v48  ;;  %3956 = vmatprep.subr.bf16.mxu1 %v3955_v52  ;;  %v356_v48 = vld [vmem:[%s4449_s24 + $0x388] sm:$0xff]  ;;  %v422_v52 = vld [vmem:[%s4449_s24 + $0x598] sm:$0xff] }
  0xbb   : > { %2192 = vmatprep.mubr.f32.mxu0 %v4262_v0  ;;  %2263 = vmatprep.mubr.f32.mxu1 %v4262_v0  ;;  %v3993_v56 = vpack.c.bf16 %v356_v48, %v291_v47  ;;  %v431_v47 = vld [vmem:[%s4449_s24 + $0x5e0] sm:$0xff]  ;;  %v4035_v48 = vpack.c.bf16 %v497_v41, %v432_v40 }
  0xbc   : > { %v4037_v55 = vpack.c.bf16 %v496_v49, %v431_v47 }
  0xbd   : > { %3950 = vmatpush1.bf16.msra.mxu0 %v3949_v58  ;;  %3958 = vmatpush1.bf16.msra.mxu1 %v3957_v59  ;;  %v3995_v58 = vpack.c.bf16 %v487_v53, %v422_v52  ;;  %v421_v59 = vld [vmem:[%s4449_s24 + $0x590] sm:$0xff]  ;;  %v306_v52 = vld [vmem:[%s4449_s24 + $0x1f8] sm:$0xff]  ;;  %v371_v53 = vld [vmem:[%s4449_s24 + $0x400] sm:$0xff] }
  0xbe   : > { %3960 = vmatprep.subr.bf16.mxu0 %v3959_v60  ;;  %3968 = vmatprep.subr.bf16.mxu1 %v3967_v1  ;;  %v486_v60 = vld [vmem:[%s4449_s24 + $0x798] sm:$0xff]  ;;  %v296_v1 = vld [vmem:[%s4449_s24 + $0x1a8] sm:$0xff] }
  0xbf   : > { %v3997_v5 = vpack.c.bf16 %v486_v60, %v421_v59  ;;  %v305_v59 = vld [vmem:[%s4449_s24 + $0x1f0] sm:$0xff]  ;;  %v4047_v60 = vpack.c.bf16 %v371_v53, %v306_v52 }
  0xc0   : > { %3763 = vmatmul.mubr.msk.f32.vlgmr.msra.gmra.mrb[18].mxu0 %vm846_vm0, %v4474_v26  ;;  %3764 = vmatmul.mubr.msk.f32.vlgmr.msra.gmra.mrb[18].mxu1 %vm846_vm0, %v4474_v26  ;;  %v4049_v3 = vpack.c.bf16 %v370_v61, %v305_v59 }
  0xc1   : > { %3962 = vmatpush1.bf16.msra.mxu0 %v3961_v7  ;;  %3970 = vmatpush1.bf16.msra.mxu1 %v3969_v8  ;;  %v4007_v7 = vpack.c.bf16 %v361_v2, %v296_v1  ;;  %v295_v8 = vld [vmem:[%s4449_s24 + $0x1a0] sm:$0xff]  ;;  %v501_v1 = vld [vmem:[%s4449_s24 + $0x810] sm:$0xff] }
  0xc2   : > { %3964 = vmatprep.subr.bf16.mxu0 %v3963_v9  ;;  %3972 = vmatprep.subr.bf16.mxu1 %v3971_v13  ;;  %v360_v9 = vld [vmem:[%s4449_s24 + $0x3a8] sm:$0xff]  ;;  %v426_v13 = vld [vmem:[%s4449_s24 + $0x5b8] sm:$0xff] }
  0xc3   : > { %2334 = vmatprep.mubr.f32.mxu0 %v4262_v0  ;;  %2405 = vmatprep.mubr.f32.mxu1 %v4262_v0  ;;  %v4009_v17 = vpack.c.bf16 %v360_v9, %v295_v8  ;;  %v435_v8 = vld [vmem:[%s4449_s24 + $0x600] sm:$0xff]  ;;  %v500_v9 = vld [vmem:[%s4449_s24 + $0x808] sm:$0xff] }
  0xc4   : > { %v4053_v12 = vpack.c.bf16 %v500_v9, %v435_v8 }
  0xc5   : > { %3966 = vmatpush1.bf16.msra.mxu0 %v3965_v19  ;;  %3974 = vmatpush1.bf16.msra.mxu1 %v3973_v20  ;;  %v4011_v19 = vpack.c.bf16 %v491_v14, %v426_v13  ;;  %v425_v20 = vld [vmem:[%s4449_s24 + $0x5b0] sm:$0xff]  ;;  %v307_v13 = vld [vmem:[%s4449_s24 + $0x200] sm:$0xff]  ;;  %v372_v14 = vld [vmem:[%s4449_s24 + $0x408] sm:$0xff] }
  0xc6   : > { %3976 = vmatprep.subr.bf16.mxu0 %v3975_v21  ;;  %3984 = vmatprep.subr.bf16.mxu1 %v3983_v25  ;;  %v490_v21 = vld [vmem:[%s4449_s24 + $0x7b8] sm:$0xff]  ;;  %v300_v25 = vld [vmem:[%s4449_s24 + $0x1c8] sm:$0xff]  ;;  %v4056_v15 = vpack.c.bf16 %v372_v14, %v307_v13 }
  0xc7   : > { %v4013_v30 = vpack.c.bf16 %v490_v21, %v425_v20  ;;  %v521_v20 = vlaneseq }
  0xc8   : > { %3765 = vmatmul.mubr.msk.f32.vlgmr.msra.gmra.mrb[20].mxu0 %vm846_vm0, %v4474_v26  ;;  %3766 = vmatmul.mubr.msk.f32.vlgmr.msra.gmra.mrb[20].mxu1 %vm846_vm0, %v4474_v26 }
  0xc9   : > { %3978 = vmatpush1.bf16.msra.mxu0 %v3977_v32  ;;  %3986 = vmatpush1.bf16.msra.mxu1 %v3985_v33  ;;  %v4023_v32 = vpack.c.bf16 %v365_v27, %v300_v25  ;;  %v299_v33 = vld [vmem:[%s4449_s24 + $0x1c0] sm:$0xff]  ;;  %v522_v21 = vshrl.u32 %v521_v20, 7 }
  0xca   : > { %3980 = vmatprep.subr.bf16.mxu0 %v3979_v34  ;;  %3988 = vmatprep.subr.bf16.mxu1 %v3987_v38  ;;  %v364_v34 = vld [vmem:[%s4449_s24 + $0x3c8] sm:$0xff]  ;;  %v430_v38 = vld [vmem:[%s4449_s24 + $0x5d8] sm:$0xff] }
  0xcb   : > { %2476 = vmatprep.mubr.f32.mxu0 %v4262_v0  ;;  %2547 = vmatprep.mubr.f32.mxu1 %v4262_v0  ;;  %v4025_v42 = vpack.c.bf16 %v364_v34, %v299_v33  ;;  %v4813_v22 = vsub.s32 0, %v522_v21  ;;  %v4818_v24 = vsub.s32 2, %v522_v21  ;;  %v4820_v25 = vsub.s32 1, %v522_v21 }
  0xcc   : > { %v4823_v27 = vsub.s32 3, %v522_v21 }
  0xcd   : > { %3982 = vmatpush1.bf16.msra.mxu0 %v3981_v44  ;;  %3990 = vmatpush1.bf16.msra.mxu1 %v3989_v45  ;;  %v4027_v44 = vpack.c.bf16 %v495_v39, %v430_v38  ;;  %v429_v45 = vld [vmem:[%s4449_s24 + $0x5d0] sm:$0xff]  ;;  %v4833_v38 = vsub.s32 4, %v522_v21 }
  0xce   : > { %3992 = vmatprep.subr.bf16.mxu0 %v3991_v46  ;;  %4000 = vmatprep.subr.bf16.mxu1 %v3999_v50  ;;  %v494_v46 = vld [vmem:[%s4449_s24 + $0x7d8] sm:$0xff]  ;;  %v304_v50 = vld [vmem:[%s4449_s24 + $0x1e8] sm:$0xff] }
  0xcf   : > { %v4029_v54 = vpack.c.bf16 %v494_v46, %v429_v45  ;;  %v4841_v46 = vsub.s32 7, %v522_v21 }
  0xd0   : > { %3767 = vmatmul.mubr.msk.f32.vlgmr.msra.gmra.mrb[22].mxu0 %vm846_vm0, %v4474_v26  ;;  %3768 = vmatmul.mubr.msk.f32.vlgmr.msra.gmra.mrb[22].mxu1 %vm846_vm0, %v4474_v26 }
  0xd1   : > { %3994 = vmatpush1.bf16.msra.mxu0 %v3993_v56  ;;  %4002 = vmatpush1.bf16.msra.mxu1 %v4001_v57  ;;  %v4039_v56 = vpack.c.bf16 %v369_v51, %v304_v50  ;;  %v303_v57 = vld [vmem:[%s4449_s24 + $0x1e0] sm:$0xff] }
  0xd2   : > { %3996 = vmatprep.subr.bf16.mxu0 %v3995_v58  ;;  %4004 = vmatprep.subr.bf16.mxu1 %v4003_v62  ;;  %v368_v58 = vld [vmem:[%s4449_s24 + $0x3e8] sm:$0xff]  ;;  %v499_v62 = vld [vmem:[%s4449_s24 + $0x800] sm:$0xff] }
  0xd3   : > { %2618 = vmatprep.mubr.f32.mxu0 %v4262_v0  ;;  %2689 = vmatprep.mubr.f32.mxu1 %v4262_v0  ;;  %v4041_v2 = vpack.c.bf16 %v368_v58, %v303_v57 }
  0xd5   : > { %3998 = vmatpush1.bf16.msra.mxu0 %v3997_v5  ;;  %4006 = vmatpush1.bf16.msra.mxu1 %v4005_v6  ;;  %v433_v5 = vld [vmem:[%s4449_s24 + $0x5f0] sm:$0xff]  ;;  %v498_v6 = vld [vmem:[%s4449_s24 + $0x7f8] sm:$0xff] }
  0xd6   : > { %4008 = vmatprep.subr.bf16.mxu0 %v4007_v7  ;;  %4016 = vmatprep.subr.bf16.mxu1 %v4015_v11  ;;  %v4051_v7 = vpack.c.bf16 %v501_v1, %v436_v63  ;;  %v4045_v11 = vpack.c.bf16 %v498_v6, %v433_v5 }
  0xd8   : > { %3769 = vmatmul.mubr.msk.f32.vlgmr.msra.gmra.mrb[24].mxu0 %vm846_vm0, %v4474_v26  ;;  %3770 = vmatmul.mubr.msk.f32.vlgmr.msra.gmra.mrb[24].mxu1 %vm846_vm0, %v4474_v26 }
  0xd9   : > { %4010 = vmatpush1.bf16.msra.mxu0 %v4009_v17  ;;  %4018 = vmatpush1.bf16.msra.mxu1 %v4017_v18  ;;  %v437_v17 = vld [vmem:[%s4449_s24 + $0x610] sm:$0xff]  ;;  %v502_v18 = vld [vmem:[%s4449_s24 + $0x818] sm:$0xff] }
  0xda   : > { %4012 = vmatprep.subr.bf16.mxu0 %v4011_v19  ;;  %4020 = vmatprep.subr.bf16.mxu1 %v4019_v23  ;;  %v4059_v19 = vpack.c.bf16 %v502_v18, %v437_v17  ;;  %v503_v23 = vld [vmem:[%s4815_s26] sm:$0xff] }
  0xdb   : > { %2760 = vmatprep.mubr.f32.mxu0 %v4262_v0  ;;  %2831 = vmatprep.mubr.f32.mxu1 %v4262_v0  ;;  %v524_v29 = vrot.slane %v503_v23, %v4813_v22  ;;  %v540_v51 = vrot.slane %v503_v23, %v4833_v38 }
  0xdd   : > { %4014 = vmatpush1.bf16.msra.mxu0 %v4013_v30  ;;  %4022 = vmatpush1.bf16.msra.mxu1 %v4021_v31  ;;  %v532_v30 = vrot.slane %v503_v23, %v4818_v24  ;;  %v528_v31 = vrot.slane %v503_v23, %v4820_v25 }
  0xde   : > { %4024 = vmatprep.subr.bf16.mxu0 %v4023_v32  ;;  %4032 = vmatprep.subr.bf16.mxu1 %v4031_v36  ;;  %v536_v32 = vrot.slane %v503_v23, %v4823_v27 }
  0xe0   : > { %3771 = vmatmul.mubr.msk.f32.vlgmr.msra.gmra.mrb[26].mxu0 %vm846_vm0, %v4474_v26  ;;  %3772 = vmatmul.mubr.msk.f32.vlgmr.msra.gmra.mrb[26].mxu1 %vm846_vm0, %v4474_v26  ;;  %v434_v26 = vld [vmem:[%s4449_s24 + $0x5f8] sm:$0xff] }
  0xe1   : > { %4026 = vmatpush1.bf16.msra.mxu0 %v4025_v42  ;;  %4034 = vmatpush1.bf16.msra.mxu1 %v4033_v43  ;;  %v4043_v4 = vpack.c.bf16 %v499_v62, %v434_v26  ;;  %v4835_v42 = vsub.s32 6, %v522_v21  ;;  %v4837_v43 = vsub.s32 5, %v522_v21 }
  0xe2   : > { %4028 = vmatprep.subr.bf16.mxu0 %v4027_v44  ;;  %4036 = vmatprep.subr.bf16.mxu1 %v4035_v48 }
  0xe3   : > { %2902 = vmatprep.mubr.f32.mxu0 %v4262_v0  ;;  %2973 = vmatprep.mubr.f32.mxu1 %v4262_v0  ;;  %v548_v53 = vrot.slane %v503_v23, %v4835_v42 }
  0xe5   : > { %4030 = vmatpush1.bf16.msra.mxu0 %v4029_v54  ;;  %4038 = vmatpush1.bf16.msra.mxu1 %v4037_v55  ;;  %v544_v54 = vrot.slane %v503_v23, %v4837_v43 }
  0xe6   : > { %4040 = vmatprep.subr.bf16.mxu0 %v4039_v56  ;;  %4048 = vmatprep.subr.bf16.mxu1 %v4047_v60  ;;  %v552_v56 = vrot.slane %v503_v23, %v4841_v46 }
  0xe8   : > { %3773 = vmatmul.mubr.msk.f32.vlgmr.msra.gmra.mrb[28].mxu0 %vm846_vm0, %v4127_v10  ;;  %3774 = vmatmul.mubr.msk.f32.vlgmr.msra.gmra.mrb[28].mxu1 %vm846_vm0, %v4127_v10 }
  0xe9   : > { %4042 = vmatpush1.bf16.msra.mxu0 %v4041_v2  ;;  %4050 = vmatpush1.bf16.msra.mxu1 %v4049_v3  ;;  %v504_v2 = vld [vmem:[%s4815_s26 + $0x8] sm:$0xff] }
  0xea   : > { %4044 = vmatprep.subr.bf16.mxu0 %v4043_v4  ;;  %4052 = vmatprep.subr.bf16.mxu1 %v4051_v7  ;;  %v556_v9 = vrot.slane %v504_v2, %v4813_v22  ;;  %v568_v14 = vrot.slane %v504_v2, %v4823_v27 }
  0xeb   : > { %3044 = vmatprep.mubr.f32.mxu0 %v4262_v0  ;;  %3115 = vmatprep.mubr.f32.mxu1 %v4262_v0 }
  0xed   : > { %4046 = vmatpush1.bf16.msra.mxu0 %v4045_v11  ;;  %4054 = vmatpush1.bf16.msra.mxu1 %v4053_v12  ;;  %v564_v11 = vrot.slane %v504_v2, %v4818_v24  ;;  %v560_v12 = vrot.slane %v504_v2, %v4820_v25 }
  0xee   : > { %4055 = vmatprep.subr.bf16.mxu0 %v4263_v16 }
  0xf0   : > { %3775 = vmatmul.mubr.msk.f32.vlgmr.msra.gmra.mrb[30].mxu0 %vm846_vm0, %v4127_v10  ;;  %3776 = vmatmul.mubr.msk.f32.vlgmr.msra.gmra.mrb[30].mxu1 %vm846_vm0, %v4127_v10 }
  0xf1   : > { %4057 = vmatpush3.bf16.msra.mxu0 %v4056_v15  ;;  %3796 = vmatprep.mubr.msk.f32.mxu0 %vm4264_vm1, %v4262_v0  ;;  %v4265_v0 = vmov 1983009808  }
  0xf2   : > { %4058 = vmatprep.subr.bf16.mxu0 %v4263_v16  ;;  %v3325_v28 = vunpack.c.l.s4 %v4265_v0 }
  0xf4   : > { %v3326_v34 = vunpack.c.0.s8 %v3325_v28 }
  0xf5   : > { %4060 = vmatpush3.bf16.msra.mxu0 %v4059_v19 }
  0xf6   : > { %v4843_v49 = vsub.s32 %v3326_v34, %v522_v21  ;;  %v572_v34 = vrot.slane %v504_v2, %v4833_v38 }
  0xf8   : > { %3797 = vmatmul.mubr.msk.f32.vlgmr.msra.gmra.mrb[32].mxu0 %vm846_vm0, %v4127_v10 }
 0x14b   : > { %v916_v33 = vpop.f32.mrb[0].mxu0  ;;  %v987_v36 = vpop.f32.mrb[0].mxu1 }
 0x14c   : > { %v917_v35 = vadd.f32 %v916_v33, %v524_v29  ;;  %v918_v37 = vpop.f32.mrb[1].mxu0  ;;  %v988_v39 = vadd.f32 %v987_v36, %v532_v30  ;;  %v989_v41 = vpop.f32.mrb[1].mxu1  ;;  %v580_v36 = vrot.slane %v504_v2, %v4835_v42 }
 0x14d   : > { %v919_v40 = vadd.f32 %v918_v37, %v528_v31  ;;  %v990_v45 = vadd.f32 %v989_v41, %v536_v32  ;;  %v576_v37 = vrot.slane %v504_v2, %v4837_v43 }
 0x14e   : > { %v3192_v44 = vmax.f32 %v917_v35, 0.0  ;;  %v3194_v47 = vmax.f32 %v988_v39, 0.0 }
 0x14f   : > { %v3193_v48 = vmax.f32 %v919_v40, 0.0  ;;  %v3195_v50 = vmax.f32 %v990_v45, 0.0  ;;  %v584_v40 = vrot.slane %v504_v2, %v4841_v46 }
 0x151   : > { %v3322_v52 = vcombine.low %v3192_v44, %v3193_v48  ;;  %v3323_v55 = vcombine.low %v3194_v47, %v3195_v50 }
 0x153   : > { %v3330_v57 = vrot.slane %v3322_v52, %v4843_v49  ;;  %v1058_v58 = vpop.f32.mrb[2].mxu0  ;;  %v3337_v59 = vrot.slane %v3323_v55, %v4843_v49  ;;  %v1129_v61 = vpop.f32.mrb[2].mxu1 }
 0x154   : > { %v1059_v60 = vadd.f32 %v1058_v58, %v540_v51  ;;  %v1060_v26 = vpop.f32.mrb[3].mxu0  ;;  %v1130_v62 = vadd.f32 %v1129_v61, %v548_v53  ;;  %v1131_v1 = vpop.f32.mrb[3].mxu1 }
 0x155   : > { %v1061_v63 = vadd.f32 %v1060_v26, %v544_v54  ;;  %v3338_v3 = vcombine.low %v3330_v57, %v3337_v59  ;;  %v1132_v5 = vadd.f32 %v1131_v1, %v552_v56  ;;  %v505_v54 = vld [vmem:[%s4815_s26 + $0x10] sm:$0xff] }
 0x156   : > { %v3196_v4 = vmax.f32 %v1059_v60, 0.0  ;;  %v3198_v6 = vmax.f32 %v1130_v62, 0.0  ;;  %v588_v61 = vrot.slane %v505_v54, %v4813_v22  ;;  %v596_v62 = vrot.slane %v505_v54, %v4818_v24 }
 0x157   : > { %v3197_v7 = vmax.f32 %v1061_v63, 0.0  ;;  %3618 = vst [vmem:[%s4854_s4] sm:$0xff] %v3338_v3  ;;  %v3199_v8 = vmax.f32 %v1132_v5, 0.0  ;;  %v592_v63 = vrot.slane %v505_v54, %v4820_v25  ;;  %v600_v2 = vrot.slane %v505_v54, %v4823_v27 }
 0x159   : > { %v3339_v10 = vcombine.low %v3196_v4, %v3197_v7  ;;  %v3340_v13 = vcombine.low %v3198_v6, %v3199_v8 }
 0x15b   : > { %v3347_v15 = vrot.slane %v3339_v10, %v4843_v49  ;;  %v1200_v16 = vpop.f32.mrb[4].mxu0  ;;  %v3354_v17 = vrot.slane %v3340_v13, %v4843_v49  ;;  %v1271_v19 = vpop.f32.mrb[4].mxu1 }
 0x15c   : > { %v1201_v18 = vadd.f32 %v1200_v16, %v556_v9  ;;  %v1202_v20 = vpop.f32.mrb[5].mxu0  ;;  %v1272_v21 = vadd.f32 %v1271_v19, %v564_v11  ;;  %v1273_v0 = vpop.f32.mrb[5].mxu1 }
 0x15d   : > { %v1203_v23 = vadd.f32 %v1202_v20, %v560_v12  ;;  %v3355_v28 = vcombine.low %v3347_v15, %v3354_v17  ;;  %v1274_v30 = vadd.f32 %v1273_v0, %v568_v14  ;;  %v612_v20 = vrot.slane %v505_v54, %v4835_v42 }
 0x15e   : > { %v3200_v29 = vmax.f32 %v1201_v18, 0.0  ;;  %v3202_v31 = vmax.f32 %v1272_v21, 0.0  ;;  %v604_v18 = vrot.slane %v505_v54, %v4833_v38  ;;  %v608_v21 = vrot.slane %v505_v54, %v4837_v43 }
 0x15f   : > { %v3201_v32 = vmax.f32 %v1203_v23, 0.0  ;;  %3619 = vst [vmem:[%s4854_s4 + $0x8] sm:$0xff] %v3355_v28  ;;  %v3203_v33 = vmax.f32 %v1274_v30, 0.0  ;;  %v616_v0 = vrot.slane %v505_v54, %v4841_v46 }
 0x161   : > { %v3356_v35 = vcombine.low %v3200_v29, %v3201_v32  ;;  %v3357_v39 = vcombine.low %v3202_v31, %v3203_v33 }
 0x163   : > { %v3364_v41 = vrot.slane %v3356_v35, %v4843_v49  ;;  %v1342_v44 = vpop.f32.mrb[6].mxu0  ;;  %v3371_v45 = vrot.slane %v3357_v39, %v4843_v49  ;;  %v1413_v48 = vpop.f32.mrb[6].mxu1 }
 0x164   : > { %v1343_v47 = vadd.f32 %v1342_v44, %v572_v34  ;;  %v1344_v50 = vpop.f32.mrb[7].mxu0  ;;  %v1414_v51 = vadd.f32 %v1413_v48, %v580_v36  ;;  %v1415_v53 = vpop.f32.mrb[7].mxu1 }
 0x165   : > { %v1345_v52 = vadd.f32 %v1344_v50, %v576_v37  ;;  %v3372_v55 = vcombine.low %v3364_v41, %v3371_v45  ;;  %v1416_v57 = vadd.f32 %v1415_v53, %v584_v40  ;;  %v506_v37 = vld [vmem:[%s4815_s26 + $0x18] sm:$0xff] }
 0x166   : > { %v3204_v56 = vmax.f32 %v1343_v47, 0.0  ;;  %v3206_v58 = vmax.f32 %v1414_v51, 0.0  ;;  %v620_v48 = vrot.slane %v506_v37, %v4813_v22  ;;  %v628_v51 = vrot.slane %v506_v37, %v4818_v24 }
 0x167   : > { %v3205_v59 = vmax.f32 %v1345_v52, 0.0  ;;  %3620 = vst [vmem:[%s4854_s4 + $0x10] sm:$0xff] %v3372_v55  ;;  %v3207_v60 = vmax.f32 %v1416_v57, 0.0  ;;  %v624_v52 = vrot.slane %v506_v37, %v4820_v25  ;;  %v632_v54 = vrot.slane %v506_v37, %v4823_v27 }
 0x169   : > { %v3373_v26 = vcombine.low %v3204_v56, %v3205_v59  ;;  %v3374_v1 = vcombine.low %v3206_v58, %v3207_v60 }
 0x16b   : > { %v3381_v3 = vrot.slane %v3373_v26, %v4843_v49  ;;  %v1484_v4 = vpop.f32.mrb[8].mxu0  ;;  %v3388_v5 = vrot.slane %v3374_v1, %v4843_v49  ;;  %v1555_v7 = vpop.f32.mrb[8].mxu1 }
 0x16c   : > { %v1485_v6 = vadd.f32 %v1484_v4, %v588_v61  ;;  %v1486_v8 = vpop.f32.mrb[9].mxu0  ;;  %v1556_v9 = vadd.f32 %v1555_v7, %v596_v62  ;;  %v1557_v11 = vpop.f32.mrb[9].mxu1 }
 0x16d   : > { %v1487_v10 = vadd.f32 %v1486_v8, %v592_v63  ;;  %v3389_v12 = vcombine.low %v3381_v3, %v3388_v5  ;;  %v1558_v14 = vadd.f32 %v1557_v11, %v600_v2  ;;  %v644_v8 = vrot.slane %v506_v37, %v4835_v42 }
 0x16e   : > { %v3208_v13 = vmax.f32 %v1485_v6, 0.0  ;;  %v3210_v15 = vmax.f32 %v1556_v9, 0.0  ;;  %v636_v6 = vrot.slane %v506_v37, %v4833_v38  ;;  %v640_v9 = vrot.slane %v506_v37, %v4837_v43 }
 0x16f   : > { %v3209_v16 = vmax.f32 %v1487_v10, 0.0  ;;  %3621 = vst [vmem:[%s4854_s4 + $0x18] sm:$0xff] %v3389_v12  ;;  %v3211_v17 = vmax.f32 %v1558_v14, 0.0  ;;  %v648_v11 = vrot.slane %v506_v37, %v4841_v46 }
 0x171   : > { %v3390_v19 = vcombine.low %v3208_v13, %v3209_v16  ;;  %v3391_v23 = vcombine.low %v3210_v15, %v3211_v17 }
 0x173   : > { %v3398_v28 = vrot.slane %v3390_v19, %v4843_v49  ;;  %v1626_v29 = vpop.f32.mrb[10].mxu0  ;;  %v3405_v30 = vrot.slane %v3391_v23, %v4843_v49  ;;  %v1697_v32 = vpop.f32.mrb[10].mxu1 }
 0x174   : > { %v1627_v31 = vadd.f32 %v1626_v29, %v604_v18  ;;  %v1628_v33 = vpop.f32.mrb[11].mxu0  ;;  %v1698_v34 = vadd.f32 %v1697_v32, %v612_v20  ;;  %v1699_v36 = vpop.f32.mrb[11].mxu1 }
 0x175   : > { %v1629_v35 = vadd.f32 %v1628_v33, %v608_v21  ;;  %v3406_v39 = vcombine.low %v3398_v28, %v3405_v30  ;;  %v1700_v41 = vadd.f32 %v1699_v36, %v616_v0  ;;  %v507_v21 = vld [vmem:[%s4815_s26 + $0x20] sm:$0xff] }
 0x176   : > { %v3212_v40 = vmax.f32 %v1627_v31, 0.0  ;;  %v3214_v44 = vmax.f32 %v1698_v34, 0.0  ;;  %v652_v32 = vrot.slane %v507_v21, %v4813_v22  ;;  %v660_v34 = vrot.slane %v507_v21, %v4818_v24 }
 0x177   : > { %v3213_v45 = vmax.f32 %v1629_v35, 0.0  ;;  %3622 = vst [vmem:[%s4854_s4 + $0x20] sm:$0xff] %v3406_v39  ;;  %v3215_v47 = vmax.f32 %v1700_v41, 0.0  ;;  %v656_v35 = vrot.slane %v507_v21, %v4820_v25  ;;  %v664_v37 = vrot.slane %v507_v21, %v4823_v27 }
 0x179   : > { %v3407_v50 = vcombine.low %v3212_v40, %v3213_v45  ;;  %v3408_v53 = vcombine.low %v3214_v44, %v3215_v47 }
 0x17b   : > { %v3415_v55 = vrot.slane %v3407_v50, %v4843_v49  ;;  %v1768_v56 = vpop.f32.mrb[12].mxu0  ;;  %v3422_v57 = vrot.slane %v3408_v53, %v4843_v49  ;;  %v1839_v59 = vpop.f32.mrb[12].mxu1 }
 0x17c   : > { %v1769_v58 = vadd.f32 %v1768_v56, %v620_v48  ;;  %v1770_v60 = vpop.f32.mrb[13].mxu0  ;;  %v1840_v61 = vadd.f32 %v1839_v59, %v628_v51  ;;  %v1841_v62 = vpop.f32.mrb[13].mxu1 }
 0x17d   : > { %v1771_v26 = vadd.f32 %v1770_v60, %v624_v52  ;;  %v3423_v63 = vcombine.low %v3415_v55, %v3422_v57  ;;  %v1842_v2 = vadd.f32 %v1841_v62, %v632_v54  ;;  %v676_v60 = vrot.slane %v507_v21, %v4835_v42 }
 0x17e   : > { %v3216_v1 = vmax.f32 %v1769_v58, 0.0  ;;  %v3218_v3 = vmax.f32 %v1840_v61, 0.0  ;;  %v668_v58 = vrot.slane %v507_v21, %v4833_v38  ;;  %v672_v61 = vrot.slane %v507_v21, %v4837_v43 }
 0x17f   : > { %v3217_v4 = vmax.f32 %v1771_v26, 0.0  ;;  %3623 = vst [vmem:[%s4854_s4 + $0x28] sm:$0xff] %v3423_v63  ;;  %v3219_v5 = vmax.f32 %v1842_v2, 0.0  ;;  %v680_v62 = vrot.slane %v507_v21, %v4841_v46 }
 0x181   : > { %v3424_v7 = vcombine.low %v3216_v1, %v3217_v4  ;;  %v3425_v10 = vcombine.low %v3218_v3, %v3219_v5 }
 0x183   : > { %v3432_v12 = vrot.slane %v3424_v7, %v4843_v49  ;;  %v1910_v13 = vpop.f32.mrb[14].mxu0  ;;  %v3439_v14 = vrot.slane %v3425_v10, %v4843_v49  ;;  %v1981_v16 = vpop.f32.mrb[14].mxu1 }
 0x184   : > { %v1911_v15 = vadd.f32 %v1910_v13, %v636_v6  ;;  %v1912_v17 = vpop.f32.mrb[15].mxu0  ;;  %v1982_v18 = vadd.f32 %v1981_v16, %v644_v8  ;;  %v1983_v20 = vpop.f32.mrb[15].mxu1 }
 0x185   : > { %v1913_v19 = vadd.f32 %v1912_v17, %v640_v9  ;;  %v3440_v23 = vcombine.low %v3432_v12, %v3439_v14  ;;  %v1984_v28 = vadd.f32 %v1983_v20, %v648_v11  ;;  %v508_v9 = vld [vmem:[%s4815_s26 + $0x28] sm:$0xff] }
 0x186   : > { %v3220_v0 = vmax.f32 %v1911_v15, 0.0  ;;  %v3222_v29 = vmax.f32 %v1982_v18, 0.0  ;;  %v684_v16 = vrot.slane %v508_v9, %v4813_v22  ;;  %v692_v18 = vrot.slane %v508_v9, %v4818_v24 }
 0x187   : > { %v3221_v30 = vmax.f32 %v1913_v19, 0.0  ;;  %3624 = vst [vmem:[%s4854_s4 + $0x30] sm:$0xff] %v3440_v23  ;;  %v3223_v31 = vmax.f32 %v1984_v28, 0.0  ;;  %v688_v19 = vrot.slane %v508_v9, %v4820_v25  ;;  %v696_v21 = vrot.slane %v508_v9, %v4823_v27 }
 0x189   : > { %v3441_v33 = vcombine.low %v3220_v0, %v3221_v30  ;;  %v3442_v36 = vcombine.low %v3222_v29, %v3223_v31 }
 0x18b   : > { %v3449_v39 = vrot.slane %v3441_v33, %v4843_v49  ;;  %v2052_v40 = vpop.f32.mrb[16].mxu0  ;;  %v3456_v41 = vrot.slane %v3442_v36, %v4843_v49  ;;  %v2123_v45 = vpop.f32.mrb[16].mxu1 }
 0x18c   : > { %v2053_v44 = vadd.f32 %v2052_v40, %v652_v32  ;;  %v2054_v47 = vpop.f32.mrb[17].mxu0  ;;  %v2124_v48 = vadd.f32 %v2123_v45, %v660_v34  ;;  %v2125_v51 = vpop.f32.mrb[17].mxu1 }
 0x18d   : > { %v2055_v50 = vadd.f32 %v2054_v47, %v656_v35  ;;  %v3457_v52 = vcombine.low %v3449_v39, %v3456_v41  ;;  %v2126_v54 = vadd.f32 %v2125_v51, %v664_v37  ;;  %v708_v47 = vrot.slane %v508_v9, %v4835_v42 }
 0x18e   : > { %v3224_v53 = vmax.f32 %v2053_v44, 0.0  ;;  %v3226_v55 = vmax.f32 %v2124_v48, 0.0  ;;  %v700_v44 = vrot.slane %v508_v9, %v4833_v38  ;;  %v704_v48 = vrot.slane %v508_v9, %v4837_v43 }
 0x18f   : > { %v3225_v56 = vmax.f32 %v2055_v50, 0.0  ;;  %3625 = vst [vmem:[%s4854_s4 + $0x38] sm:$0xff] %v3457_v52  ;;  %v3227_v57 = vmax.f32 %v2126_v54, 0.0  ;;  %v712_v51 = vrot.slane %v508_v9, %v4841_v46 }
 0x191   : > { %v3458_v59 = vcombine.low %v3224_v53, %v3225_v56  ;;  %v3459_v26 = vcombine.low %v3226_v55, %v3227_v57 }
 0x193   : > { %v3466_v63 = vrot.slane %v3458_v59, %v4843_v49  ;;  %v2194_v1 = vpop.f32.mrb[18].mxu0  ;;  %v3473_v2 = vrot.slane %v3459_v26, %v4843_v49  ;;  %v2265_v4 = vpop.f32.mrb[18].mxu1 }
 0x194   : > { %v2195_v3 = vadd.f32 %v2194_v1, %v668_v58  ;;  %v2196_v5 = vpop.f32.mrb[19].mxu0  ;;  %v2266_v6 = vadd.f32 %v2265_v4, %v676_v60  ;;  %v2267_v8 = vpop.f32.mrb[19].mxu1 }
 0x195   : > { %v2197_v7 = vadd.f32 %v2196_v5, %v672_v61  ;;  %v3474_v10 = vcombine.low %v3466_v63, %v3473_v2  ;;  %v2268_v12 = vadd.f32 %v2267_v8, %v680_v62  ;;  %v509_v61 = vld [vmem:[%s4815_s26 + $0x30] sm:$0xff] }
 0x196   : > { %v3228_v11 = vmax.f32 %v2195_v3, 0.0  ;;  %v3230_v13 = vmax.f32 %v2266_v6, 0.0  ;;  %v716_v4 = vrot.slane %v509_v61, %v4813_v22  ;;  %v724_v6 = vrot.slane %v509_v61, %v4818_v24 }
 0x197   : > { %v3229_v14 = vmax.f32 %v2197_v7, 0.0  ;;  %3626 = vst [vmem:[%s4854_s4 + $0x40] sm:$0xff] %v3474_v10  ;;  %v3231_v15 = vmax.f32 %v2268_v12, 0.0  ;;  %v720_v7 = vrot.slane %v509_v61, %v4820_v25  ;;  %v728_v9 = vrot.slane %v509_v61, %v4823_v27 }
 0x199   : > { %v3475_v17 = vcombine.low %v3228_v11, %v3229_v14  ;;  %v3476_v20 = vcombine.low %v3230_v13, %v3231_v15 }
 0x19b   : > { %v3483_v23 = vrot.slane %v3475_v17, %v4843_v49  ;;  %v2336_v0 = vpop.f32.mrb[20].mxu0  ;;  %v3490_v28 = vrot.slane %v3476_v20, %v4843_v49  ;;  %v2407_v30 = vpop.f32.mrb[20].mxu1 }
 0x19c   : > { %v2337_v29 = vadd.f32 %v2336_v0, %v684_v16  ;;  %v2338_v31 = vpop.f32.mrb[21].mxu0  ;;  %v2408_v32 = vadd.f32 %v2407_v30, %v692_v18  ;;  %v2409_v34 = vpop.f32.mrb[21].mxu1 }
 0x19d   : > { %v2339_v33 = vadd.f32 %v2338_v31, %v688_v19  ;;  %v3491_v35 = vcombine.low %v3483_v23, %v3490_v28  ;;  %v2410_v37 = vadd.f32 %v2409_v34, %v696_v21  ;;  %v740_v31 = vrot.slane %v509_v61, %v4835_v42 }
 0x19e   : > { %v3232_v36 = vmax.f32 %v2337_v29, 0.0  ;;  %v3234_v39 = vmax.f32 %v2408_v32, 0.0  ;;  %v732_v29 = vrot.slane %v509_v61, %v4833_v38  ;;  %v736_v32 = vrot.slane %v509_v61, %v4837_v43 }
 0x19f   : > { %v3233_v40 = vmax.f32 %v2339_v33, 0.0  ;;  %3627 = vst [vmem:[%s4854_s4 + $0x48] sm:$0xff] %v3491_v35  ;;  %v3235_v41 = vmax.f32 %v2410_v37, 0.0  ;;  %v744_v34 = vrot.slane %v509_v61, %v4841_v46 }
 0x1a1   : > { %v3492_v45 = vcombine.low %v3232_v36, %v3233_v40  ;;  %v3493_v50 = vcombine.low %v3234_v39, %v3235_v41 }
 0x1a3   : > { %v3500_v52 = vrot.slane %v3492_v45, %v4843_v49  ;;  %v2478_v53 = vpop.f32.mrb[22].mxu0  ;;  %v3507_v54 = vrot.slane %v3493_v50, %v4843_v49  ;;  %v2549_v56 = vpop.f32.mrb[22].mxu1 }
 0x1a4   : > { %v2479_v55 = vadd.f32 %v2478_v53, %v700_v44  ;;  %v2480_v57 = vpop.f32.mrb[23].mxu0  ;;  %v2550_v58 = vadd.f32 %v2549_v56, %v708_v47  ;;  %v2551_v60 = vpop.f32.mrb[23].mxu1 }
 0x1a5   : > { %v2481_v59 = vadd.f32 %v2480_v57, %v704_v48  ;;  %v3508_v26 = vcombine.low %v3500_v52, %v3507_v54  ;;  %v2552_v63 = vadd.f32 %v2551_v60, %v712_v51  ;;  %v510_v48 = vld [vmem:[%s4815_s26 + $0x38] sm:$0xff] }
 0x1a6   : > { %v3236_v62 = vmax.f32 %v2479_v55, 0.0  ;;  %v3238_v1 = vmax.f32 %v2550_v58, 0.0  ;;  %v748_v56 = vrot.slane %v510_v48, %v4813_v22  ;;  %v756_v58 = vrot.slane %v510_v48, %v4818_v24 }
 0x1a7   : > { %v3237_v2 = vmax.f32 %v2481_v59, 0.0  ;;  %3628 = vst [vmem:[%s4854_s4 + $0x50] sm:$0xff] %v3508_v26  ;;  %v3239_v3 = vmax.f32 %v2552_v63, 0.0  ;;  %v752_v59 = vrot.slane %v510_v48, %v4820_v25  ;;  %v760_v61 = vrot.slane %v510_v48, %v4823_v27 }
 0x1a8   : > { %v764_v27 = vrot.slane %v510_v48, %v4833_v38 }
 0x1a9   : > { %v3509_v5 = vcombine.low %v3236_v62, %v3237_v2  ;;  %v3510_v8 = vcombine.low %v3238_v1, %v3239_v3 }
 0x1ab   : > { %v3517_v10 = vrot.slane %v3509_v5, %v4843_v49  ;;  %v2620_v11 = vpop.f32.mrb[24].mxu0  ;;  %v3524_v12 = vrot.slane %v3510_v8, %v4843_v49  ;;  %v2691_v14 = vpop.f32.mrb[24].mxu1 }
 0x1ac   : > { %v2621_v13 = vadd.f32 %v2620_v11, %v716_v4  ;;  %v2622_v15 = vpop.f32.mrb[25].mxu0  ;;  %v2692_v16 = vadd.f32 %v2691_v14, %v724_v6  ;;  %v2693_v18 = vpop.f32.mrb[25].mxu1  ;;  %v772_v11 = vrot.slane %v510_v48, %v4835_v42  ;;  %v776_v14 = vrot.slane %v510_v48, %v4841_v46 }
 0x1ad   : > { %v2623_v17 = vadd.f32 %v2622_v15, %v720_v7  ;;  %v3525_v19 = vcombine.low %v3517_v10, %v3524_v12  ;;  %v2694_v21 = vadd.f32 %v2693_v18, %v728_v9  ;;  %v768_v12 = vrot.slane %v510_v48, %v4837_v43 }
 0x1ae   : > { %v3240_v20 = vmax.f32 %v2621_v13, 0.0  ;;  %v3242_v23 = vmax.f32 %v2692_v16, 0.0 }
 0x1af   : > { %v3241_v0 = vmax.f32 %v2623_v17, 0.0  ;;  %3629 = vst [vmem:[%s4854_s4 + $0x58] sm:$0xff] %v3525_v19  ;;  %v3243_v28 = vmax.f32 %v2694_v21, 0.0 }
 0x1b1   : > { %v3526_v30 = vcombine.low %v3240_v20, %v3241_v0  ;;  %v3527_v33 = vcombine.low %v3242_v23, %v3243_v28 }
 0x1b3   : > { %v3534_v35 = vrot.slane %v3526_v30, %v4843_v49  ;;  %v2762_v36 = vpop.f32.mrb[26].mxu0  ;;  %v3541_v37 = vrot.slane %v3527_v33, %v4843_v49  ;;  %v2833_v40 = vpop.f32.mrb[26].mxu1 }
 0x1b4   : > { %v2763_v39 = vadd.f32 %v2762_v36, %v732_v29  ;;  %v2764_v41 = vpop.f32.mrb[27].mxu0  ;;  %v2834_v44 = vadd.f32 %v2833_v40, %v740_v31  ;;  %v2835_v47 = vpop.f32.mrb[27].mxu1  ;;  %v3744_v31 = vld [vmem:[%s4815_s26 + $0x40] ss:$0 sm:$0xff] }
 0x1b5   : > { %v2765_v45 = vadd.f32 %v2764_v41, %v736_v32  ;;  %v3542_v50 = vcombine.low %v3534_v35, %v3541_v37  ;;  %v2836_v52 = vadd.f32 %v2835_v47, %v744_v34 }
 0x1b6   : > { %v3244_v51 = vmax.f32 %v2763_v39, 0.0  ;;  %v3246_v53 = vmax.f32 %v2834_v44, 0.0 }
 0x1b7   : > { %v3245_v54 = vmax.f32 %v2765_v45, 0.0  ;;  %3630 = vst [vmem:[%s4854_s4 + $0x60] sm:$0xff] %v3542_v50  ;;  %v3247_v55 = vmax.f32 %v2836_v52, 0.0 }
 0x1b9   : > { %v3543_v57 = vcombine.low %v3244_v51, %v3245_v54  ;;  %v3544_v60 = vcombine.low %v3246_v53, %v3247_v55 }
 0x1bb   : > { %v3551_v26 = vrot.slane %v3543_v57, %v4843_v49  ;;  %v2904_v62 = vpop.f32.mrb[28].mxu0  ;;  %v3558_v63 = vrot.slane %v3544_v60, %v4843_v49  ;;  %v2975_v2 = vpop.f32.mrb[28].mxu1 }
 0x1bc   : > { %v2905_v1 = vadd.f32 %v2904_v62, %v748_v56  ;;  %v2906_v3 = vpop.f32.mrb[29].mxu0  ;;  %v2976_v4 = vadd.f32 %v2975_v2, %v756_v58  ;;  %v2977_v22 = vpop.f32.mrb[29].mxu1 }
 0x1bd   : > { %v2907_v5 = vadd.f32 %v2906_v3, %v752_v59  ;;  %v3559_v6 = vcombine.low %v3551_v26, %v3558_v63  ;;  %v2978_v24 = vadd.f32 %v2977_v22, %v760_v61 }
 0x1be   : > { %v3248_v7 = vmax.f32 %v2905_v1, 0.0  ;;  %v3250_v8 = vmax.f32 %v2976_v4, 0.0 }
 0x1bf   : > { %v3249_v25 = vmax.f32 %v2907_v5, 0.0  ;;  %3631 = vst [vmem:[%s4854_s4 + $0x68] sm:$0xff] %v3559_v6  ;;  %v3251_v9 = vmax.f32 %v2978_v24, 0.0 }
 0x1c1   : > { %v3560_v10 = vcombine.low %v3248_v7, %v3249_v25  ;;  %v3561_v13 = vcombine.low %v3250_v8, %v3251_v9 }
 0x1c3   : > { %v3568_v15 = vrot.slane %v3560_v10, %v4843_v49  ;;  %v3046_v16 = vpop.f32.mrb[30].mxu0  ;;  %v3575_v17 = vrot.slane %v3561_v13, %v4843_v49  ;;  %v3117_v19 = vpop.f32.mrb[30].mxu1 }
 0x1c4   : > { %v3047_v18 = vadd.f32 %v3046_v16, %v764_v27  ;;  %v3048_v20 = vpop.f32.mrb[31].mxu0  ;;  %v3118_v21 = vadd.f32 %v3117_v19, %v772_v11  ;;  %v3119_v23 = vpop.f32.mrb[31].mxu1 }
 0x1c5   : > { %v3049_v38 = vadd.f32 %v3048_v20, %v768_v12  ;;  %v3576_v0 = vcombine.low %v3568_v15, %v3575_v17  ;;  %v3120_v43 = vadd.f32 %v3119_v23, %v776_v14 }
 0x1c6   : > { %v3252_v42 = vmax.f32 %v3047_v18, 0.0  ;;  %v3254_v28 = vmax.f32 %v3118_v21, 0.0 }
 0x1c7   : > { %v3253_v29 = vmax.f32 %v3049_v38, 0.0  ;;  %3632 = vst [vmem:[%s4854_s4 + $0x70] sm:$0xff] %v3576_v0  ;;  %v3255_v46 = vmax.f32 %v3120_v43, 0.0 }
 0x1c9   : > { %v3577_v30 = vcombine.low %v3252_v42, %v3253_v29  ;;  %v3578_v32 = vcombine.low %v3254_v28, %v3255_v46 }
 0x1cb   : > { %v3585_v33 = vrot.slane %v3577_v30, %v4843_v49  ;;  %v3188_v34 = vpop.f32.mrb[32].mxu0  ;;  %v3592_v35 = vrot.slane %v3578_v32, %v4843_v49 }
 0x1cc   : > { %v3189_v36 = vadd.f32 %v3744_v31, %v3188_v34  ;;  %v3798_v37 = vpop.f32.mrb[33].mxu0 }
 0x1cd   : > { %v3593_v39 = vcombine.low %v3585_v33, %v3592_v35 }
 0x1ce   : > { %v3256_v40 = vmax.f32 %v3189_v36, 0.0 }
 0x1cf   : > { %3633 = vst [vmem:[%s4854_s4 + $0x78] sm:$0xff] %v3593_v39 }
 0x1d0   : > { %3778 = vst.sshfl [vmem:[%s4854_s4 + $0x80] sm:$0x3 pattern:$0x76325410] %v3256_v40 }
 0x1d1 PF: > { %p14_p13 = scmp.ge.s32.totalorder %s4307_s16, 8   ;;  %s5002_s12 = smov %s4246_s13 }
 0x1d2   : > { %s5003_s13 = smov %s4250_s14  ;;  %s5004_s14 = smov %s4317_s19 }
 0x1d3   : > { %s5005_s15 = smov %s4307_s16  ;;  %16 = sbr.rel (!%p14_p13) target bundleno = 4 (0x4), region = 88 }
 0x1da   :  { %3657 = vsyncpa [#allocation3], 1 }
 0x1db   :  { %3659 = vsyncpa [#allocation3 + $0x1], 1 }
 0x1dc   :  { %3660 = vsyncpa [#allocation5], 1 }
 0x1dd   :  { %3662 = vsyncpa [#allocation5 + $0x1], 1 }

// kernel: decoder_forward.3
= control target key start
LH: loop header
LB: loop body
LE: loop exit
PB: predicated region body
PF: predicated region fallthrough
CT: control target
= control target key end

     0   :  { %s6806_s30 = smov 0   ;;  %s9797_s0 = inlined_call_operand.vmem [shape: f32[2,40,39,32], index: 0, kind: input, shape index: {}]   ;;  %s9798_s1 = inlined_call_operand.vmem [shape: f32[288,32], index: 1, kind: input, shape index: {}]   ;;  %s9799_s2 = inlined_call_operand.vmem [shape: f32[1,32], index: 2, kind: input, shape index: {}]   ;;  %s9800_s3 = inlined_call_operand.vmem [shape: f32[288,32], index: 3, kind: input, shape index: {}]   ;;  %s9801_s4 = inlined_call_operand.vmem [shape: f32[1,32], index: 4, kind: input, shape index: {}]   ;;  %s9802_s5 = inlined_call_operand.vmem [shape: f32[288,32], index: 5, kind: input, shape index: {}]   ;;  %s9803_s6 = inlined_call_operand.vmem [shape: f32[1,32], index: 6, kind: input, shape index: {}]   ;;  %s9804_s7 = inlined_call_operand.vmem [shape: f32[128,12], index: 7, kind: input, shape index: {}]   ;;  %s9805_s8 = inlined_call_operand.vmem [shape: f32[1,12], index: 8, kind: input, shape index: {}]   ;;  %s9806_s9 = inlined_call_operand.vmem [shape: f32[2,42,42,12], index: 9, kind: output, shape index: {}]  }
   0x1 LB: > { %s5138_s10 = sadd.s32 4294967295, %s6731_s30   ;;  %p5142_p0 = scmp.ge.s32.totalorder %s6731_s30, 1  ;;  %s6731_s30 = sphi %s6806_s30, %s19_s30  }
   0x2   : > { %p287_p1 = scmp.lt.s32.totalorder %s6731_s30, 3 }
   0x4   : > { %p288_p2 = pnand %p5142_p0, %p287_p1 }
   0x5   : > { %p6816_p3 = scmp.lt.s32.totalorder (!%p288_p2), %s5138_s10, 1  ;;  %vm333_vm0 = vcmask (!%p288_p2), 261120   ;;  %v6823_v0 = vld [vmem:[%s9798_s1] sm:$0xff] (!%p288_p2)  ;;  %v6828_v1 = vld [vmem:[%s9798_s1 + $0x8] sm:$0xff] (!%p288_p2)  ;;  %v6833_v2 = vld [vmem:[%s9798_s1 + $0x10] sm:$0xff] (!%p288_p2)  ;;  %v6749_v3 = vmov (!%p288_p2), 0.0  }
   0x6   : > { %291 = sbr.rel (%p288_p2) target bundleno = 1556 (0x614), region = 56  ;;  %334 = vst.msk [vmem:[#allocation2] sm:$0xff] (!%p288_p2), %vm333_vm0, %v6749_v3  ;;  %335 = vst.msk [vmem:[#allocation2 + $0x8] sm:$0xff] (!%p288_p2), %vm333_vm0, %v6749_v3  ;;  %v8108_v4 = vld [vmem:[%s9798_s1 + $0x18] sm:$0xff] (!%p288_p2)  ;;  %v8113_v5 = vld [vmem:[%s9798_s1 + $0x20] sm:$0xff] (!%p288_p2)  ;;  %vm339_vm1 = vcmask (!%p288_p2), 253952  }
   0x7   : > { %336 = vst.msk [vmem:[#allocation2 + $0x10] sm:$0xff] (!%p288_p2), %vm333_vm0, %v6749_v3  ;;  %337 = vst.msk [vmem:[#allocation2 + $0x18] sm:$0xff] (!%p288_p2), %vm333_vm0, %v6749_v3  ;;  %v8118_v6 = vld [vmem:[%s9798_s1 + $0x28] sm:$0xff] (!%p288_p2)  ;;  %vm586_vm2 = vcmask (!%p288_p2), 256000   ;;  %v8129_v7 = vld [vmem:[%s9798_s1 + $0x30] sm:$0xff] (!%p288_p2)  ;;  %s8547_s19 = smov (!%p288_p2), 0  }
   0x8   : > { %338 = vst.msk [vmem:[#allocation2 + $0x20] sm:$0xff] (!%p288_p2), %vm333_vm0, %v6749_v3  ;;  %341 = vst.msk [vmem:[#allocation2 + $0x30] sm:$0xff] (!%p288_p2), %vm333_vm0, %v6749_v3  ;;  %v8134_v8 = vld [vmem:[%s9798_s1 + $0x38] sm:$0xff] (!%p288_p2)  ;;  %v8139_v9 = vld [vmem:[%s9798_s1 + $0x40] sm:$0xff] (!%p288_p2) }
   0x9   : > { %342 = vst.msk [vmem:[#allocation2 + $0x38] sm:$0xff] (!%p288_p2), %vm333_vm0, %v6749_v3  ;;  %343 = vst.msk [vmem:[#allocation2 + $0x40] sm:$0xff] (!%p288_p2), %vm333_vm0, %v6749_v3  ;;  %v8398_v10 = vld [vmem:[%s9798_s1 + $0x48] sm:$0xff] (!%p288_p2)  ;;  %v8403_v11 = vld [vmem:[%s9798_s1 + $0x50] sm:$0xff] (!%p288_p2) }
   0xa   : > { %344 = vst.msk [vmem:[#allocation2 + $0x48] sm:$0xff] (!%p288_p2), %vm333_vm0, %v6749_v3  ;;  %345 = vst.msk [vmem:[#allocation2 + $0x50] sm:$0xff] (!%p288_p2), %vm333_vm0, %v6749_v3  ;;  %v8408_v12 = vld [vmem:[%s9798_s1 + $0x58] sm:$0xff] (!%p288_p2)  ;;  %v8414_v13 = vld [vmem:[%s9798_s1 + $0x60] sm:$0xff] (!%p288_p2) }
   0xb   : > { %347 = vst.msk [vmem:[#allocation2 + $0x60] sm:$0xff] (!%p288_p2), %vm333_vm0, %v6749_v3  ;;  %348 = vst.msk [vmem:[#allocation2 + $0x68] sm:$0xff] (!%p288_p2), %vm333_vm0, %v6749_v3  ;;  %v8419_v14 = vld [vmem:[%s9798_s1 + $0x68] sm:$0xff] (!%p288_p2)  ;;  %v8424_v15 = vld [vmem:[%s9798_s1 + $0x70] sm:$0xff] (!%p288_p2) }
   0xc   : > { %349 = vst.msk [vmem:[#allocation2 + $0x70] sm:$0xff] (!%p288_p2), %vm333_vm0, %v6749_v3  ;;  %350 = vst.msk [vmem:[#allocation2 + $0x78] sm:$0xff] (!%p288_p2), %vm333_vm0, %v6749_v3  ;;  %v8430_v16 = vld [vmem:[%s9798_s1 + $0x78] sm:$0xff] (!%p288_p2)  ;;  %v8435_v17 = vld [vmem:[%s9798_s1 + $0x80] sm:$0xff] (!%p288_p2) }
   0xd   : > { %351 = vst.msk [vmem:[#allocation2 + $0x80] sm:$0xff] %vm333_vm0, %v6749_v3  ;;  %353 = vst.msk [vmem:[#allocation2 + $0x90] sm:$0xff] %vm333_vm0, %v6749_v3  ;;  %s9809_s10 = smov (!%p6816_p3, %s5138_s10), 1  ;;  %v8440_v18 = vld [vmem:[%s9798_s1 + $0x88] sm:$0xff]  ;;  %v8450_v19 = vld [vmem:[%s9798_s1 + $0x90] sm:$0xff] }
   0xe   : > { %354 = vst.msk [vmem:[#allocation2 + $0x98] sm:$0xff] %vm333_vm0, %v6749_v3  ;;  %355 = vst.msk [vmem:[#allocation2 + $0xa0] sm:$0xff] %vm333_vm0, %v6749_v3  ;;  %s6660_s17 = smul.u32 1600, %s9809_s10  ;;  %v8455_v20 = vld [vmem:[%s9798_s1 + $0x98] sm:$0xff]  ;;  %v8460_v21 = vld [vmem:[%s9798_s1 + $0xa0] sm:$0xff] }
   0xf   : > { %356 = vst.msk [vmem:[#allocation2 + $0xa8] sm:$0xff] %vm333_vm0, %v6749_v3  ;;  %357 = vst.msk [vmem:[#allocation2 + $0xb0] sm:$0xff] %vm333_vm0, %v6749_v3  ;;  %s6661_s24 = smul.u32 2016, %s9809_s10  ;;  %v8470_v22 = vld [vmem:[%s9798_s1 + $0xa8] sm:$0xff]  ;;  %v8475_v23 = vld [vmem:[%s9798_s1 + $0xb0] sm:$0xff] }
  0x10   : > { %359 = vst.msk [vmem:[#allocation2 + $0xc0] sm:$0xff] %vm333_vm0, %v6749_v3  ;;  %360 = vst.msk [vmem:[#allocation2 + $0xc8] sm:$0xff] %vm333_vm0, %v6749_v3  ;;  %s8445_s14 = scalar_lea.vmem %s9797_s0, %s6660_s17  ;;  %v8480_v24 = vld [vmem:[%s9798_s1 + $0xb8] sm:$0xff]  ;;  %v8485_v25 = vld [vmem:[%s9798_s1 + $0xc0] sm:$0xff] }
  0x11   : > { %361 = vst.msk [vmem:[#allocation2 + $0xd0] sm:$0xff] %vm333_vm0, %v6749_v3  ;;  %362 = vst.msk [vmem:[#allocation2 + $0xd8] sm:$0xff] %vm333_vm0, %v6749_v3  ;;  %s8465_s17 = scalar_lea.vmem %s9806_s9, %s6661_s24  ;;  %v8490_v26 = vld [vmem:[%s9798_s1 + $0xc8] sm:$0xff]  ;;  %v8495_v27 = vld [vmem:[%s9798_s1 + $0xd0] sm:$0xff] }
  0x12   : > { %363 = vst.msk [vmem:[#allocation2 + $0xe0] sm:$0xff] %vm333_vm0, %v6749_v3  ;;  %365 = vst.msk [vmem:[#allocation2 + $0xf0] sm:$0xff] %vm333_vm0, %v6749_v3  ;;  %v8500_v28 = vld [vmem:[%s9798_s1 + $0xd8] sm:$0xff]  ;;  %v8505_v29 = vld [vmem:[%s9798_s1 + $0xe0] sm:$0xff] }
  0x13   : > { %366 = vst.msk [vmem:[#allocation2 + $0xf8] sm:$0xff] %vm333_vm0, %v6749_v3  ;;  %367 = vst.msk [vmem:[#allocation2 + $0x100] sm:$0xff] %vm333_vm0, %v6749_v3  ;;  %v8510_v30 = vld [vmem:[%s9798_s1 + $0xe8] sm:$0xff]  ;;  %v8515_v31 = vld [vmem:[%s9798_s1 + $0xf0] sm:$0xff] }
  0x14   : > { %368 = vst.msk [vmem:[#allocation2 + $0x108] sm:$0xff] %vm333_vm0, %v6749_v3  ;;  %369 = vst.msk [vmem:[#allocation2 + $0x110] sm:$0xff] %vm333_vm0, %v6749_v3  ;;  %v8520_v32 = vld [vmem:[%s9798_s1 + $0xf8] sm:$0xff]  ;;  %v8525_v33 = vld [vmem:[%s9798_s1 + $0x100] sm:$0xff] }
  0x15   : > { %371 = vst.msk [vmem:[#allocation2 + $0x120] sm:$0xff] %vm333_vm0, %v6749_v3  ;;  %372 = vst.msk [vmem:[#allocation2 + $0x128] sm:$0xff] %vm333_vm0, %v6749_v3  ;;  %v8530_v34 = vld [vmem:[%s9798_s1 + $0x108] sm:$0xff]  ;;  %v8535_v35 = vld [vmem:[%s9798_s1 + $0x110] sm:$0xff] }
  0x16   : > { %373 = vst.msk [vmem:[#allocation2 + $0x130] sm:$0xff] %vm333_vm0, %v6749_v3  ;;  %374 = vst.msk [vmem:[#allocation2 + $0x138] sm:$0xff] %vm333_vm0, %v6749_v3  ;;  %v8540_v36 = vld [vmem:[%s9798_s1 + $0x118] sm:$0xff]  ;;  %v8545_v37 = vld [vmem:[%s9799_s2] ss:$0 sm:$0xff] }
  0x17   : > { %375 = vst.msk [vmem:[#allocation2 + $0x140] sm:$0xff] %vm333_vm0, %v6749_v3  ;;  %377 = vst.msk [vmem:[#allocation2 + $0x150] sm:$0xff] %vm333_vm0, %v6749_v3 }
  0x18   : > { %378 = vst.msk [vmem:[#allocation2 + $0x158] sm:$0xff] %vm333_vm0, %v6749_v3  ;;  %379 = vst.msk [vmem:[#allocation2 + $0x160] sm:$0xff] %vm333_vm0, %v6749_v3 }
  0x19   : > { %380 = vst.msk [vmem:[#allocation2 + $0x168] sm:$0xff] %vm333_vm0, %v6749_v3  ;;  %381 = vst.msk [vmem:[#allocation2 + $0x170] sm:$0xff] %vm333_vm0, %v6749_v3 }
  0x1a   : > { %383 = vst.msk [vmem:[#allocation2 + $0x180] sm:$0xff] %vm333_vm0, %v6749_v3  ;;  %384 = vst.msk [vmem:[#allocation2 + $0x188] sm:$0xff] %vm333_vm0, %v6749_v3 }
  0x1b   : > { %385 = vst.msk [vmem:[#allocation2 + $0x190] sm:$0xff] %vm333_vm0, %v6749_v3  ;;  %386 = vst.msk [vmem:[#allocation2 + $0x198] sm:$0xff] %vm333_vm0, %v6749_v3 }
  0x1c   : > { %387 = vst.msk [vmem:[#allocation2 + $0x1a0] sm:$0xff] %vm333_vm0, %v6749_v3  ;;  %389 = vst.msk [vmem:[#allocation2 + $0x1b0] sm:$0xff] %vm333_vm0, %v6749_v3 }
  0x1d   : > { %390 = vst.msk [vmem:[#allocation2 + $0x1b8] sm:$0xff] %vm333_vm0, %v6749_v3  ;;  %391 = vst.msk [vmem:[#allocation2 + $0x1c0] sm:$0xff] %vm333_vm0, %v6749_v3 }
  0x1e   : > { %392 = vst.msk [vmem:[#allocation2 + $0x1c8] sm:$0xff] %vm333_vm0, %v6749_v3  ;;  %393 = vst.msk [vmem:[#allocation2 + $0x1d0] sm:$0xff] %vm333_vm0, %v6749_v3 }
  0x1f   : > { %395 = vst.msk [vmem:[#allocation2 + $0x1e0] sm:$0xff] %vm333_vm0, %v6749_v3  ;;  %396 = vst.msk [vmem:[#allocation2 + $0x1e8] sm:$0xff] %vm333_vm0, %v6749_v3 }
  0x20   : > { %397 = vst.msk [vmem:[#allocation2 + $0x1f0] sm:$0xff] %vm333_vm0, %v6749_v3  ;;  %398 = vst.msk [vmem:[#allocation2 + $0x1f8] sm:$0xff] %vm333_vm0, %v6749_v3 }
  0x21   : > { %399 = vst.msk [vmem:[#allocation2 + $0x200] sm:$0xff] %vm333_vm0, %v6749_v3  ;;  %401 = vst.msk [vmem:[#allocation2 + $0x210] sm:$0xff] %vm333_vm0, %v6749_v3 }
  0x22   : > { %402 = vst.msk [vmem:[#allocation2 + $0x218] sm:$0xff] %vm333_vm0, %v6749_v3  ;;  %403 = vst.msk [vmem:[#allocation2 + $0x220] sm:$0xff] %vm333_vm0, %v6749_v3 }
  0x23   : > { %404 = vst.msk [vmem:[#allocation2 + $0x228] sm:$0xff] %vm333_vm0, %v6749_v3  ;;  %405 = vst.msk [vmem:[#allocation2 + $0x230] sm:$0xff] %vm333_vm0, %v6749_v3 }
  0x24   : > { %407 = vst.msk [vmem:[#allocation2 + $0x240] sm:$0xff] %vm333_vm0, %v6749_v3  ;;  %408 = vst.msk [vmem:[#allocation2 + $0x248] sm:$0xff] %vm333_vm0, %v6749_v3 }
  0x25   : > { %409 = vst.msk [vmem:[#allocation2 + $0x250] sm:$0xff] %vm333_vm0, %v6749_v3  ;;  %410 = vst.msk [vmem:[#allocation2 + $0x258] sm:$0xff] %vm333_vm0, %v6749_v3 }
  0x26   : > { %411 = vst.msk [vmem:[#allocation2 + $0x260] sm:$0xff] %vm333_vm0, %v6749_v3  ;;  %413 = vst.msk [vmem:[#allocation2 + $0x270] sm:$0xff] %vm333_vm0, %v6749_v3 }
  0x27   : > { %414 = vst.msk [vmem:[#allocation2 + $0x278] sm:$0xff] %vm333_vm0, %v6749_v3  ;;  %415 = vst.msk [vmem:[#allocation2 + $0x280] sm:$0xff] %vm333_vm0, %v6749_v3 }
  0x28   : > { %416 = vst.msk [vmem:[#allocation2 + $0x288] sm:$0xff] %vm333_vm0, %v6749_v3  ;;  %417 = vst.msk [vmem:[#allocation2 + $0x290] sm:$0xff] %vm333_vm0, %v6749_v3 }
  0x29   : > { %419 = vst.msk [vmem:[#allocation2 + $0x2a0] sm:$0xff] %vm333_vm0, %v6749_v3  ;;  %420 = vst.msk [vmem:[#allocation2 + $0x2a8] sm:$0xff] %vm333_vm0, %v6749_v3 }
  0x2a   : > { %421 = vst.msk [vmem:[#allocation2 + $0x2b0] sm:$0xff] %vm333_vm0, %v6749_v3  ;;  %422 = vst.msk [vmem:[#allocation2 + $0x2b8] sm:$0xff] %vm333_vm0, %v6749_v3 }
  0x2b   : > { %423 = vst.msk [vmem:[#allocation2 + $0x2c0] sm:$0xff] %vm333_vm0, %v6749_v3  ;;  %425 = vst.msk [vmem:[#allocation2 + $0x2d0] sm:$0xff] %vm333_vm0, %v6749_v3 }
  0x2c   : > { %426 = vst.msk [vmem:[#allocation2 + $0x2d8] sm:$0xff] %vm333_vm0, %v6749_v3  ;;  %427 = vst.msk [vmem:[#allocation2 + $0x2e0] sm:$0xff] %vm333_vm0, %v6749_v3 }
  0x2d   : > { %428 = vst.msk [vmem:[#allocation2 + $0x2e8] sm:$0xff] %vm333_vm0, %v6749_v3  ;;  %429 = vst.msk [vmem:[#allocation2 + $0x2f0] sm:$0xff] %vm333_vm0, %v6749_v3 }
  0x2e   : > { %431 = vst.msk [vmem:[#allocation2 + $0x300] sm:$0xff] %vm333_vm0, %v6749_v3  ;;  %432 = vst.msk [vmem:[#allocation2 + $0x308] sm:$0xff] %vm333_vm0, %v6749_v3 }
  0x2f   : > { %433 = vst.msk [vmem:[#allocation2 + $0x310] sm:$0xff] %vm333_vm0, %v6749_v3  ;;  %434 = vst.msk [vmem:[#allocation2 + $0x318] sm:$0xff] %vm333_vm0, %v6749_v3 }
  0x30   : > { %435 = vst.msk [vmem:[#allocation2 + $0x320] sm:$0xff] %vm333_vm0, %v6749_v3  ;;  %437 = vst.msk [vmem:[#allocation2 + $0x330] sm:$0xff] %vm333_vm0, %v6749_v3 }
  0x31   : > { %438 = vst.msk [vmem:[#allocation2 + $0x338] sm:$0xff] %vm333_vm0, %v6749_v3  ;;  %439 = vst.msk [vmem:[#allocation2 + $0x340] sm:$0xff] %vm333_vm0, %v6749_v3 }
  0x32   : > { %440 = vst.msk [vmem:[#allocation2 + $0x348] sm:$0xff] %vm333_vm0, %v6749_v3  ;;  %441 = vst.msk [vmem:[#allocation2 + $0x350] sm:$0xff] %vm333_vm0, %v6749_v3 }
  0x33   : > { %443 = vst.msk [vmem:[#allocation2 + $0x360] sm:$0xff] %vm333_vm0, %v6749_v3  ;;  %444 = vst.msk [vmem:[#allocation2 + $0x368] sm:$0xff] %vm333_vm0, %v6749_v3 }
  0x34   : > { %445 = vst.msk [vmem:[#allocation2 + $0x370] sm:$0xff] %vm333_vm0, %v6749_v3  ;;  %446 = vst.msk [vmem:[#allocation2 + $0x378] sm:$0xff] %vm333_vm0, %v6749_v3 }
  0x35   : > { %447 = vst.msk [vmem:[#allocation2 + $0x380] sm:$0xff] %vm333_vm0, %v6749_v3  ;;  %449 = vst.msk [vmem:[#allocation2 + $0x390] sm:$0xff] %vm333_vm0, %v6749_v3 }
  0x36   : > { %450 = vst.msk [vmem:[#allocation2 + $0x398] sm:$0xff] %vm333_vm0, %v6749_v3  ;;  %451 = vst.msk [vmem:[#allocation2 + $0x3a0] sm:$0xff] %vm333_vm0, %v6749_v3 }
  0x37   : > { %452 = vst.msk [vmem:[#allocation2 + $0x3a8] sm:$0xff] %vm333_vm0, %v6749_v3  ;;  %453 = vst.msk [vmem:[#allocation2 + $0x3b0] sm:$0xff] %vm333_vm0, %v6749_v3 }
  0x38   : > { %455 = vst.msk [vmem:[#allocation2 + $0x3c0] sm:$0xff] %vm333_vm0, %v6749_v3  ;;  %456 = vst.msk [vmem:[#allocation2 + $0x3c8] sm:$0xff] %vm333_vm0, %v6749_v3 }
  0x39   : > { %457 = vst.msk [vmem:[#allocation2 + $0x3d0] sm:$0xff] %vm333_vm0, %v6749_v3  ;;  %458 = vst.msk [vmem:[#allocation2 + $0x3d8] sm:$0xff] %vm333_vm0, %v6749_v3 }
  0x3a   : > { %459 = vst.msk [vmem:[#allocation2 + $0x3e0] sm:$0xff] %vm333_vm0, %v6749_v3  ;;  %461 = vst.msk [vmem:[#allocation2 + $0x3f0] sm:$0xff] %vm333_vm0, %v6749_v3 }
  0x3b   : > { %462 = vst.msk [vmem:[#allocation2 + $0x3f8] sm:$0xff] %vm333_vm0, %v6749_v3  ;;  %463 = vst.msk [vmem:[#allocation2 + $0x400] sm:$0xff] %vm333_vm0, %v6749_v3 }
  0x3c   : > { %464 = vst.msk [vmem:[#allocation2 + $0x408] sm:$0xff] %vm333_vm0, %v6749_v3  ;;  %465 = vst.msk [vmem:[#allocation2 + $0x410] sm:$0xff] %vm333_vm0, %v6749_v3 }
  0x3d   : > { %467 = vst.msk [vmem:[#allocation2 + $0x420] sm:$0xff] %vm333_vm0, %v6749_v3  ;;  %468 = vst.msk [vmem:[#allocation2 + $0x428] sm:$0xff] %vm333_vm0, %v6749_v3 }
  0x3e   : > { %469 = vst.msk [vmem:[#allocation2 + $0x430] sm:$0xff] %vm333_vm0, %v6749_v3  ;;  %470 = vst.msk [vmem:[#allocation2 + $0x438] sm:$0xff] %vm333_vm0, %v6749_v3 }
  0x3f   : > { %471 = vst.msk [vmem:[#allocation2 + $0x440] sm:$0xff] %vm333_vm0, %v6749_v3  ;;  %473 = vst.msk [vmem:[#allocation2 + $0x450] sm:$0xff] %vm333_vm0, %v6749_v3 }
  0x40   : > { %474 = vst.msk [vmem:[#allocation2 + $0x458] sm:$0xff] %vm333_vm0, %v6749_v3  ;;  %475 = vst.msk [vmem:[#allocation2 + $0x460] sm:$0xff] %vm333_vm0, %v6749_v3 }
  0x41   : > { %476 = vst.msk [vmem:[#allocation2 + $0x468] sm:$0xff] %vm333_vm0, %v6749_v3  ;;  %477 = vst.msk [vmem:[#allocation2 + $0x470] sm:$0xff] %vm333_vm0, %v6749_v3 }
  0x42   : > { %479 = vst.msk [vmem:[#allocation2 + $0x480] sm:$0xff] %vm333_vm0, %v6749_v3  ;;  %480 = vst.msk [vmem:[#allocation2 + $0x488] sm:$0xff] %vm333_vm0, %v6749_v3 }
  0x43   : > { %481 = vst.msk [vmem:[#allocation2 + $0x490] sm:$0xff] %vm333_vm0, %v6749_v3  ;;  %482 = vst.msk [vmem:[#allocation2 + $0x498] sm:$0xff] %vm333_vm0, %v6749_v3 }
  0x44   : > { %483 = vst.msk [vmem:[#allocation2 + $0x4a0] sm:$0xff] %vm333_vm0, %v6749_v3  ;;  %485 = vst.msk [vmem:[#allocation2 + $0x4b0] sm:$0xff] %vm333_vm0, %v6749_v3 }
  0x45   : > { %486 = vst.msk [vmem:[#allocation2 + $0x4b8] sm:$0xff] %vm333_vm0, %v6749_v3  ;;  %487 = vst.msk [vmem:[#allocation2 + $0x4c0] sm:$0xff] %vm333_vm0, %v6749_v3 }
  0x46   : > { %488 = vst.msk [vmem:[#allocation2 + $0x4c8] sm:$0xff] %vm333_vm0, %v6749_v3  ;;  %489 = vst.msk [vmem:[#allocation2 + $0x4d0] sm:$0xff] %vm333_vm0, %v6749_v3 }
  0x47   : > { %491 = vst.msk [vmem:[#allocation2 + $0x4e0] sm:$0xff] %vm333_vm0, %v6749_v3  ;;  %492 = vst.msk [vmem:[#allocation2 + $0x4e8] sm:$0xff] %vm333_vm0, %v6749_v3 }
  0x48   : > { %493 = vst.msk [vmem:[#allocation2 + $0x4f0] sm:$0xff] %vm333_vm0, %v6749_v3  ;;  %494 = vst.msk [vmem:[#allocation2 + $0x4f8] sm:$0xff] %vm333_vm0, %v6749_v3 }
  0x49   : > { %495 = vst.msk [vmem:[#allocation2 + $0x500] sm:$0xff] %vm333_vm0, %v6749_v3  ;;  %497 = vst.msk [vmem:[#allocation2 + $0x510] sm:$0xff] %vm333_vm0, %v6749_v3 }
  0x4a   : > { %498 = vst.msk [vmem:[#allocation2 + $0x518] sm:$0xff] %vm333_vm0, %v6749_v3  ;;  %499 = vst.msk [vmem:[#allocation2 + $0x520] sm:$0xff] %vm333_vm0, %v6749_v3 }
  0x4b   : > { %500 = vst.msk [vmem:[#allocation2 + $0x528] sm:$0xff] %vm333_vm0, %v6749_v3  ;;  %501 = vst.msk [vmem:[#allocation2 + $0x530] sm:$0xff] %vm333_vm0, %v6749_v3 }
  0x4c   : > { %503 = vst.msk [vmem:[#allocation2 + $0x540] sm:$0xff] %vm333_vm0, %v6749_v3  ;;  %504 = vst.msk [vmem:[#allocation2 + $0x548] sm:$0xff] %vm333_vm0, %v6749_v3 }
  0x4d   : > { %505 = vst.msk [vmem:[#allocation2 + $0x550] sm:$0xff] %vm333_vm0, %v6749_v3  ;;  %506 = vst.msk [vmem:[#allocation2 + $0x558] sm:$0xff] %vm333_vm0, %v6749_v3 }
  0x4e   : > { %507 = vst.msk [vmem:[#allocation2 + $0x560] sm:$0xff] %vm333_vm0, %v6749_v3  ;;  %509 = vst.msk [vmem:[#allocation2 + $0x570] sm:$0xff] %vm333_vm0, %v6749_v3 }
  0x4f   : > { %510 = vst.msk [vmem:[#allocation2 + $0x578] sm:$0xff] %vm333_vm0, %v6749_v3  ;;  %511 = vst.msk [vmem:[#allocation2 + $0x580] sm:$0xff] %vm333_vm0, %v6749_v3 }
  0x50   : > { %512 = vst.msk [vmem:[#allocation2 + $0x588] sm:$0xff] %vm333_vm0, %v6749_v3  ;;  %513 = vst.msk [vmem:[#allocation2 + $0x590] sm:$0xff] %vm333_vm0, %v6749_v3 }
  0x51   : > { %515 = vst.msk [vmem:[#allocation2 + $0x5a0] sm:$0xff] %vm333_vm0, %v6749_v3  ;;  %516 = vst.msk [vmem:[#allocation2 + $0x5a8] sm:$0xff] %vm333_vm0, %v6749_v3 }
  0x52   : > { %517 = vst.msk [vmem:[#allocation2 + $0x5b0] sm:$0xff] %vm333_vm0, %v6749_v3  ;;  %518 = vst.msk [vmem:[#allocation2 + $0x5b8] sm:$0xff] %vm333_vm0, %v6749_v3 }
  0x53   : > { %519 = vst.msk [vmem:[#allocation2 + $0x5c0] sm:$0xff] %vm333_vm0, %v6749_v3  ;;  %521 = vst.msk [vmem:[#allocation2 + $0x5d0] sm:$0xff] %vm333_vm0, %v6749_v3 }
  0x54   : > { %522 = vst.msk [vmem:[#allocation2 + $0x5d8] sm:$0xff] %vm333_vm0, %v6749_v3  ;;  %523 = vst.msk [vmem:[#allocation2 + $0x5e0] sm:$0xff] %vm333_vm0, %v6749_v3 }
  0x55   : > { %524 = vst.msk [vmem:[#allocation2 + $0x5e8] sm:$0xff] %vm333_vm0, %v6749_v3  ;;  %525 = vst.msk [vmem:[#allocation2 + $0x5f0] sm:$0xff] %vm333_vm0, %v6749_v3 }
  0x56   : > { %527 = vst.msk [vmem:[#allocation2 + $0x600] sm:$0xff] %vm333_vm0, %v6749_v3  ;;  %528 = vst.msk [vmem:[#allocation2 + $0x608] sm:$0xff] %vm333_vm0, %v6749_v3 }
  0x57   : > { %529 = vst.msk [vmem:[#allocation2 + $0x610] sm:$0xff] %vm333_vm0, %v6749_v3  ;;  %530 = vst.msk [vmem:[#allocation2 + $0x618] sm:$0xff] %vm333_vm0, %v6749_v3 }
  0x58   : > { %531 = vst.msk [vmem:[#allocation2 + $0x620] sm:$0xff] %vm333_vm0, %v6749_v3  ;;  %533 = vst.msk [vmem:[#allocation2 + $0x630] sm:$0xff] %vm333_vm0, %v6749_v3 }
  0x59   : > { %534 = vst.msk [vmem:[#allocation2 + $0x638] sm:$0xff] %vm333_vm0, %v6749_v3  ;;  %535 = vst.msk [vmem:[#allocation2 + $0x640] sm:$0xff] %vm333_vm0, %v6749_v3 }
  0x5a   : > { %536 = vst.msk [vmem:[#allocation2 + $0x648] sm:$0xff] %vm333_vm0, %v6749_v3  ;;  %537 = vst.msk [vmem:[#allocation2 + $0x650] sm:$0xff] %vm333_vm0, %v6749_v3 }
  0x5b   : > { %539 = vst.msk [vmem:[#allocation2 + $0x660] sm:$0xff] %vm333_vm0, %v6749_v3  ;;  %540 = vst.msk [vmem:[#allocation2 + $0x668] sm:$0xff] %vm333_vm0, %v6749_v3 }
  0x5c   : > { %541 = vst.msk [vmem:[#allocation2 + $0x670] sm:$0xff] %vm333_vm0, %v6749_v3  ;;  %542 = vst.msk [vmem:[#allocation2 + $0x678] sm:$0xff] %vm333_vm0, %v6749_v3 }
  0x5d   : > { %543 = vst.msk [vmem:[#allocation2 + $0x680] sm:$0xff] %vm333_vm0, %v6749_v3  ;;  %545 = vst.msk [vmem:[#allocation2 + $0x690] sm:$0xff] %vm333_vm0, %v6749_v3 }
  0x5e   : > { %546 = vst.msk [vmem:[#allocation2 + $0x698] sm:$0xff] %vm333_vm0, %v6749_v3  ;;  %547 = vst.msk [vmem:[#allocation2 + $0x6a0] sm:$0xff] %vm333_vm0, %v6749_v3 }
  0x5f   : > { %548 = vst.msk [vmem:[#allocation2 + $0x6a8] sm:$0xff] %vm333_vm0, %v6749_v3  ;;  %549 = vst.msk [vmem:[#allocation2 + $0x6b0] sm:$0xff] %vm333_vm0, %v6749_v3 }
  0x60   : > { %551 = vst.msk [vmem:[#allocation2 + $0x6c0] sm:$0xff] %vm333_vm0, %v6749_v3  ;;  %552 = vst.msk [vmem:[#allocation2 + $0x6c8] sm:$0xff] %vm333_vm0, %v6749_v3 }
  0x61   : > { %553 = vst.msk [vmem:[#allocation2 + $0x6d0] sm:$0xff] %vm333_vm0, %v6749_v3  ;;  %554 = vst.msk [vmem:[#allocation2 + $0x6d8] sm:$0xff] %vm333_vm0, %v6749_v3 }
  0x62   : > { %555 = vst.msk [vmem:[#allocation2 + $0x6e0] sm:$0xff] %vm333_vm0, %v6749_v3  ;;  %557 = vst.msk [vmem:[#allocation2 + $0x6f0] sm:$0xff] %vm333_vm0, %v6749_v3 }
  0x63   : > { %558 = vst.msk [vmem:[#allocation2 + $0x6f8] sm:$0xff] %vm333_vm0, %v6749_v3  ;;  %559 = vst.msk [vmem:[#allocation2 + $0x700] sm:$0xff] %vm333_vm0, %v6749_v3 }
  0x64   : > { %560 = vst.msk [vmem:[#allocation2 + $0x708] sm:$0xff] %vm333_vm0, %v6749_v3  ;;  %561 = vst.msk [vmem:[#allocation2 + $0x710] sm:$0xff] %vm333_vm0, %v6749_v3 }
  0x65   : > { %563 = vst.msk [vmem:[#allocation2 + $0x720] sm:$0xff] %vm333_vm0, %v6749_v3  ;;  %564 = vst.msk [vmem:[#allocation2 + $0x728] sm:$0xff] %vm333_vm0, %v6749_v3 }
  0x66   : > { %565 = vst.msk [vmem:[#allocation2 + $0x730] sm:$0xff] %vm333_vm0, %v6749_v3  ;;  %566 = vst.msk [vmem:[#allocation2 + $0x738] sm:$0xff] %vm333_vm0, %v6749_v3 }
  0x67   : > { %567 = vst.msk [vmem:[#allocation2 + $0x740] sm:$0xff] %vm333_vm0, %v6749_v3  ;;  %569 = vst.msk [vmem:[#allocation2 + $0x750] sm:$0xff] %vm333_vm0, %v6749_v3 }
  0x68   : > { %570 = vst.msk [vmem:[#allocation2 + $0x758] sm:$0xff] %vm333_vm0, %v6749_v3  ;;  %571 = vst.msk [vmem:[#allocation2 + $0x760] sm:$0xff] %vm333_vm0, %v6749_v3 }
  0x69   : > { %572 = vst.msk [vmem:[#allocation2 + $0x768] sm:$0xff] %vm333_vm0, %v6749_v3  ;;  %573 = vst.msk [vmem:[#allocation2 + $0x770] sm:$0xff] %vm333_vm0, %v6749_v3 }
  0x6a   : > { %575 = vst.msk [vmem:[#allocation2 + $0x780] sm:$0xff] %vm333_vm0, %v6749_v3  ;;  %576 = vst.msk [vmem:[#allocation2 + $0x788] sm:$0xff] %vm333_vm0, %v6749_v3 }
  0x6b   : > { %577 = vst.msk [vmem:[#allocation2 + $0x790] sm:$0xff] %vm333_vm0, %v6749_v3  ;;  %578 = vst.msk [vmem:[#allocation2 + $0x798] sm:$0xff] %vm333_vm0, %v6749_v3 }
  0x6c   : > { %579 = vst.msk [vmem:[#allocation2 + $0x7a0] sm:$0xff] %vm333_vm0, %v6749_v3  ;;  %581 = vst.msk [vmem:[#allocation3] sm:$0xff] %vm333_vm0, %v6749_v3 }
  0x6d   : > { %582 = vst.msk [vmem:[#allocation3 + $0x8] sm:$0xff] %vm333_vm0, %v6749_v3  ;;  %583 = vst.msk [vmem:[#allocation3 + $0x10] sm:$0xff] %vm333_vm0, %v6749_v3 }
  0x6e   : > { %584 = vst.msk [vmem:[#allocation3 + $0x18] sm:$0xff] %vm333_vm0, %v6749_v3  ;;  %585 = vst.msk [vmem:[#allocation3 + $0x20] sm:$0xff] %vm333_vm0, %v6749_v3 }
  0x6f   : > { %588 = vst.msk [vmem:[#allocation3 + $0x30] sm:$0xff] %vm333_vm0, %v6749_v3  ;;  %589 = vst.msk [vmem:[#allocation3 + $0x38] sm:$0xff] %vm333_vm0, %v6749_v3 }
  0x70   : > { %590 = vst.msk [vmem:[#allocation3 + $0x40] sm:$0xff] %vm333_vm0, %v6749_v3  ;;  %591 = vst.msk [vmem:[#allocation3 + $0x48] sm:$0xff] %vm333_vm0, %v6749_v3 }
  0x71   : > { %592 = vst.msk [vmem:[#allocation3 + $0x50] sm:$0xff] %vm333_vm0, %v6749_v3  ;;  %594 = vst.msk [vmem:[#allocation3 + $0x60] sm:$0xff] %vm333_vm0, %v6749_v3 }
  0x72   : > { %595 = vst.msk [vmem:[#allocation3 + $0x68] sm:$0xff] %vm333_vm0, %v6749_v3  ;;  %596 = vst.msk [vmem:[#allocation3 + $0x70] sm:$0xff] %vm333_vm0, %v6749_v3 }
  0x73   : > { %597 = vst.msk [vmem:[#allocation3 + $0x78] sm:$0xff] %vm333_vm0, %v6749_v3  ;;  %598 = vst.msk [vmem:[#allocation3 + $0x80] sm:$0xff] %vm333_vm0, %v6749_v3 }
  0x74   : > { %600 = vst.msk [vmem:[#allocation3 + $0x90] sm:$0xff] %vm333_vm0, %v6749_v3  ;;  %601 = vst.msk [vmem:[#allocation3 + $0x98] sm:$0xff] %vm333_vm0, %v6749_v3 }
  0x75   : > { %602 = vst.msk [vmem:[#allocation3 + $0xa0] sm:$0xff] %vm333_vm0, %v6749_v3  ;;  %603 = vst.msk [vmem:[#allocation3 + $0xa8] sm:$0xff] %vm333_vm0, %v6749_v3 }
  0x76   : > { %604 = vst.msk [vmem:[#allocation3 + $0xb0] sm:$0xff] %vm333_vm0, %v6749_v3  ;;  %606 = vst.msk [vmem:[#allocation3 + $0xc0] sm:$0xff] %vm333_vm0, %v6749_v3 }
  0x77   : > { %607 = vst.msk [vmem:[#allocation3 + $0xc8] sm:$0xff] %vm333_vm0, %v6749_v3  ;;  %608 = vst.msk [vmem:[#allocation3 + $0xd0] sm:$0xff] %vm333_vm0, %v6749_v3 }
  0x78   : > { %609 = vst.msk [vmem:[#allocation3 + $0xd8] sm:$0xff] %vm333_vm0, %v6749_v3  ;;  %610 = vst.msk [vmem:[#allocation3 + $0xe0] sm:$0xff] %vm333_vm0, %v6749_v3 }
  0x79   : > { %612 = vst.msk [vmem:[#allocation3 + $0xf0] sm:$0xff] %vm333_vm0, %v6749_v3  ;;  %613 = vst.msk [vmem:[#allocation3 + $0xf8] sm:$0xff] %vm333_vm0, %v6749_v3 }
  0x7a   : > { %614 = vst.msk [vmem:[#allocation3 + $0x100] sm:$0xff] %vm333_vm0, %v6749_v3  ;;  %615 = vst.msk [vmem:[#allocation3 + $0x108] sm:$0xff] %vm333_vm0, %v6749_v3 }
  0x7b   : > { %616 = vst.msk [vmem:[#allocation3 + $0x110] sm:$0xff] %vm333_vm0, %v6749_v3  ;;  %618 = vst.msk [vmem:[#allocation3 + $0x120] sm:$0xff] %vm333_vm0, %v6749_v3 }
  0x7c   : > { %619 = vst.msk [vmem:[#allocation3 + $0x128] sm:$0xff] %vm333_vm0, %v6749_v3  ;;  %620 = vst.msk [vmem:[#allocation3 + $0x130] sm:$0xff] %vm333_vm0, %v6749_v3 }
  0x7d   : > { %621 = vst.msk [vmem:[#allocation3 + $0x138] sm:$0xff] %vm333_vm0, %v6749_v3  ;;  %622 = vst.msk [vmem:[#allocation3 + $0x140] sm:$0xff] %vm333_vm0, %v6749_v3 }
  0x7e   : > { %624 = vst.msk [vmem:[#allocation3 + $0x150] sm:$0xff] %vm333_vm0, %v6749_v3  ;;  %625 = vst.msk [vmem:[#allocation3 + $0x158] sm:$0xff] %vm333_vm0, %v6749_v3 }
  0x7f   : > { %626 = vst.msk [vmem:[#allocation3 + $0x160] sm:$0xff] %vm333_vm0, %v6749_v3  ;;  %627 = vst.msk [vmem:[#allocation3 + $0x168] sm:$0xff] %vm333_vm0, %v6749_v3 }
  0x80   : > { %628 = vst.msk [vmem:[#allocation3 + $0x170] sm:$0xff] %vm333_vm0, %v6749_v3  ;;  %630 = vst.msk [vmem:[#allocation3 + $0x180] sm:$0xff] %vm333_vm0, %v6749_v3 }
  0x81   : > { %631 = vst.msk [vmem:[#allocation3 + $0x188] sm:$0xff] %vm333_vm0, %v6749_v3  ;;  %632 = vst.msk [vmem:[#allocation3 + $0x190] sm:$0xff] %vm333_vm0, %v6749_v3 }
  0x82   : > { %633 = vst.msk [vmem:[#allocation3 + $0x198] sm:$0xff] %vm333_vm0, %v6749_v3  ;;  %634 = vst.msk [vmem:[#allocation3 + $0x1a0] sm:$0xff] %vm333_vm0, %v6749_v3 }
  0x83   : > { %636 = vst.msk [vmem:[#allocation3 + $0x1b0] sm:$0xff] %vm333_vm0, %v6749_v3  ;;  %637 = vst.msk [vmem:[#allocation3 + $0x1b8] sm:$0xff] %vm333_vm0, %v6749_v3 }
  0x84   : > { %638 = vst.msk [vmem:[#allocation3 + $0x1c0] sm:$0xff] %vm333_vm0, %v6749_v3  ;;  %639 = vst.msk [vmem:[#allocation3 + $0x1c8] sm:$0xff] %vm333_vm0, %v6749_v3 }
  0x85   : > { %640 = vst.msk [vmem:[#allocation3 + $0x1d0] sm:$0xff] %vm333_vm0, %v6749_v3  ;;  %642 = vst.msk [vmem:[#allocation3 + $0x1e0] sm:$0xff] %vm333_vm0, %v6749_v3 }
  0x86   : > { %643 = vst.msk [vmem:[#allocation3 + $0x1e8] sm:$0xff] %vm333_vm0, %v6749_v3  ;;  %644 = vst.msk [vmem:[#allocation3 + $0x1f0] sm:$0xff] %vm333_vm0, %v6749_v3 }
  0x87   : > { %645 = vst.msk [vmem:[#allocation3 + $0x1f8] sm:$0xff] %vm333_vm0, %v6749_v3  ;;  %646 = vst.msk [vmem:[#allocation3 + $0x200] sm:$0xff] %vm333_vm0, %v6749_v3 }
  0x88   : > { %648 = vst.msk [vmem:[#allocation3 + $0x210] sm:$0xff] %vm333_vm0, %v6749_v3  ;;  %649 = vst.msk [vmem:[#allocation3 + $0x218] sm:$0xff] %vm333_vm0, %v6749_v3 }
  0x89   : > { %650 = vst.msk [vmem:[#allocation3 + $0x220] sm:$0xff] %vm333_vm0, %v6749_v3  ;;  %651 = vst.msk [vmem:[#allocation3 + $0x228] sm:$0xff] %vm333_vm0, %v6749_v3 }
  0x8a   : > { %652 = vst.msk [vmem:[#allocation3 + $0x230] sm:$0xff] %vm333_vm0, %v6749_v3  ;;  %654 = vst.msk [vmem:[#allocation3 + $0x240] sm:$0xff] %vm333_vm0, %v6749_v3 }
  0x8b   : > { %655 = vst.msk [vmem:[#allocation3 + $0x248] sm:$0xff] %vm333_vm0, %v6749_v3  ;;  %656 = vst.msk [vmem:[#allocation3 + $0x250] sm:$0xff] %vm333_vm0, %v6749_v3 }
  0x8c   : > { %657 = vst.msk [vmem:[#allocation3 + $0x258] sm:$0xff] %vm333_vm0, %v6749_v3  ;;  %658 = vst.msk [vmem:[#allocation3 + $0x260] sm:$0xff] %vm333_vm0, %v6749_v3 }
  0x8d   : > { %660 = vst.msk [vmem:[#allocation3 + $0x270] sm:$0xff] %vm333_vm0, %v6749_v3  ;;  %661 = vst.msk [vmem:[#allocation3 + $0x278] sm:$0xff] %vm333_vm0, %v6749_v3 }
  0x8e   : > { %662 = vst.msk [vmem:[#allocation3 + $0x280] sm:$0xff] %vm333_vm0, %v6749_v3  ;;  %663 = vst.msk [vmem:[#allocation3 + $0x288] sm:$0xff] %vm333_vm0, %v6749_v3 }
  0x8f   : > { %664 = vst.msk [vmem:[#allocation3 + $0x290] sm:$0xff] %vm333_vm0, %v6749_v3  ;;  %666 = vst.msk [vmem:[#allocation3 + $0x2a0] sm:$0xff] %vm333_vm0, %v6749_v3 }
  0x90   : > { %667 = vst.msk [vmem:[#allocation3 + $0x2a8] sm:$0xff] %vm333_vm0, %v6749_v3  ;;  %668 = vst.msk [vmem:[#allocation3 + $0x2b0] sm:$0xff] %vm333_vm0, %v6749_v3 }
  0x91   : > { %669 = vst.msk [vmem:[#allocation3 + $0x2b8] sm:$0xff] %vm333_vm0, %v6749_v3  ;;  %670 = vst.msk [vmem:[#allocation3 + $0x2c0] sm:$0xff] %vm333_vm0, %v6749_v3 }
  0x92   : > { %672 = vst.msk [vmem:[#allocation3 + $0x2d0] sm:$0xff] %vm333_vm0, %v6749_v3  ;;  %673 = vst.msk [vmem:[#allocation3 + $0x2d8] sm:$0xff] %vm333_vm0, %v6749_v3 }
  0x93   : > { %674 = vst.msk [vmem:[#allocation3 + $0x2e0] sm:$0xff] %vm333_vm0, %v6749_v3  ;;  %675 = vst.msk [vmem:[#allocation3 + $0x2e8] sm:$0xff] %vm333_vm0, %v6749_v3 }
  0x94   : > { %676 = vst.msk [vmem:[#allocation3 + $0x2f0] sm:$0xff] %vm333_vm0, %v6749_v3  ;;  %678 = vst.msk [vmem:[#allocation3 + $0x300] sm:$0xff] %vm333_vm0, %v6749_v3 }
  0x95   : > { %679 = vst.msk [vmem:[#allocation3 + $0x308] sm:$0xff] %vm333_vm0, %v6749_v3  ;;  %680 = vst.msk [vmem:[#allocation3 + $0x310] sm:$0xff] %vm333_vm0, %v6749_v3 }
  0x96   : > { %681 = vst.msk [vmem:[#allocation3 + $0x318] sm:$0xff] %vm333_vm0, %v6749_v3  ;;  %682 = vst.msk [vmem:[#allocation3 + $0x320] sm:$0xff] %vm333_vm0, %v6749_v3 }
  0x97   : > { %684 = vst.msk [vmem:[#allocation3 + $0x330] sm:$0xff] %vm333_vm0, %v6749_v3  ;;  %685 = vst.msk [vmem:[#allocation3 + $0x338] sm:$0xff] %vm333_vm0, %v6749_v3 }
  0x98   : > { %686 = vst.msk [vmem:[#allocation3 + $0x340] sm:$0xff] %vm333_vm0, %v6749_v3  ;;  %687 = vst.msk [vmem:[#allocation3 + $0x348] sm:$0xff] %vm333_vm0, %v6749_v3 }
  0x99   : > { %688 = vst.msk [vmem:[#allocation3 + $0x350] sm:$0xff] %vm333_vm0, %v6749_v3  ;;  %690 = vst.msk [vmem:[#allocation3 + $0x360] sm:$0xff] %vm333_vm0, %v6749_v3 }
  0x9a   : > { %691 = vst.msk [vmem:[#allocation3 + $0x368] sm:$0xff] %vm333_vm0, %v6749_v3  ;;  %692 = vst.msk [vmem:[#allocation3 + $0x370] sm:$0xff] %vm333_vm0, %v6749_v3 }
  0x9b   : > { %693 = vst.msk [vmem:[#allocation3 + $0x378] sm:$0xff] %vm333_vm0, %v6749_v3  ;;  %694 = vst.msk [vmem:[#allocation3 + $0x380] sm:$0xff] %vm333_vm0, %v6749_v3 }
  0x9c   : > { %696 = vst.msk [vmem:[#allocation3 + $0x390] sm:$0xff] %vm333_vm0, %v6749_v3  ;;  %697 = vst.msk [vmem:[#allocation3 + $0x398] sm:$0xff] %vm333_vm0, %v6749_v3 }
  0x9d   : > { %698 = vst.msk [vmem:[#allocation3 + $0x3a0] sm:$0xff] %vm333_vm0, %v6749_v3  ;;  %699 = vst.msk [vmem:[#allocation3 + $0x3a8] sm:$0xff] %vm333_vm0, %v6749_v3 }
  0x9e   : > { %700 = vst.msk [vmem:[#allocation3 + $0x3b0] sm:$0xff] %vm333_vm0, %v6749_v3  ;;  %702 = vst.msk [vmem:[#allocation3 + $0x3c0] sm:$0xff] %vm333_vm0, %v6749_v3 }
  0x9f   : > { %703 = vst.msk [vmem:[#allocation3 + $0x3c8] sm:$0xff] %vm333_vm0, %v6749_v3  ;;  %704 = vst.msk [vmem:[#allocation3 + $0x3d0] sm:$0xff] %vm333_vm0, %v6749_v3 }
  0xa0   : > { %705 = vst.msk [vmem:[#allocation3 + $0x3d8] sm:$0xff] %vm333_vm0, %v6749_v3  ;;  %706 = vst.msk [vmem:[#allocation3 + $0x3e0] sm:$0xff] %vm333_vm0, %v6749_v3 }
  0xa1   : > { %708 = vst.msk [vmem:[#allocation3 + $0x3f0] sm:$0xff] %vm333_vm0, %v6749_v3  ;;  %709 = vst.msk [vmem:[#allocation3 + $0x3f8] sm:$0xff] %vm333_vm0, %v6749_v3 }
  0xa2   : > { %710 = vst.msk [vmem:[#allocation3 + $0x400] sm:$0xff] %vm333_vm0, %v6749_v3  ;;  %711 = vst.msk [vmem:[#allocation3 + $0x408] sm:$0xff] %vm333_vm0, %v6749_v3 }
  0xa3   : > { %712 = vst.msk [vmem:[#allocation3 + $0x410] sm:$0xff] %vm333_vm0, %v6749_v3  ;;  %714 = vst.msk [vmem:[#allocation3 + $0x420] sm:$0xff] %vm333_vm0, %v6749_v3 }
  0xa4   : > { %715 = vst.msk [vmem:[#allocation3 + $0x428] sm:$0xff] %vm333_vm0, %v6749_v3  ;;  %716 = vst.msk [vmem:[#allocation3 + $0x430] sm:$0xff] %vm333_vm0, %v6749_v3 }
  0xa5   : > { %717 = vst.msk [vmem:[#allocation3 + $0x438] sm:$0xff] %vm333_vm0, %v6749_v3  ;;  %718 = vst.msk [vmem:[#allocation3 + $0x440] sm:$0xff] %vm333_vm0, %v6749_v3 }
  0xa6   : > { %720 = vst.msk [vmem:[#allocation3 + $0x450] sm:$0xff] %vm333_vm0, %v6749_v3  ;;  %721 = vst.msk [vmem:[#allocation3 + $0x458] sm:$0xff] %vm333_vm0, %v6749_v3 }
  0xa7   : > { %722 = vst.msk [vmem:[#allocation3 + $0x460] sm:$0xff] %vm333_vm0, %v6749_v3  ;;  %723 = vst.msk [vmem:[#allocation3 + $0x468] sm:$0xff] %vm333_vm0, %v6749_v3 }
  0xa8   : > { %724 = vst.msk [vmem:[#allocation3 + $0x470] sm:$0xff] %vm333_vm0, %v6749_v3  ;;  %726 = vst.msk [vmem:[#allocation3 + $0x480] sm:$0xff] %vm333_vm0, %v6749_v3 }
  0xa9   : > { %727 = vst.msk [vmem:[#allocation3 + $0x488] sm:$0xff] %vm333_vm0, %v6749_v3  ;;  %728 = vst.msk [vmem:[#allocation3 + $0x490] sm:$0xff] %vm333_vm0, %v6749_v3 }
  0xaa   : > { %729 = vst.msk [vmem:[#allocation3 + $0x498] sm:$0xff] %vm333_vm0, %v6749_v3  ;;  %730 = vst.msk [vmem:[#allocation3 + $0x4a0] sm:$0xff] %vm333_vm0, %v6749_v3 }
  0xab   : > { %732 = vst.msk [vmem:[#allocation3 + $0x4b0] sm:$0xff] %vm333_vm0, %v6749_v3  ;;  %733 = vst.msk [vmem:[#allocation3 + $0x4b8] sm:$0xff] %vm333_vm0, %v6749_v3 }
  0xac   : > { %734 = vst.msk [vmem:[#allocation3 + $0x4c0] sm:$0xff] %vm333_vm0, %v6749_v3  ;;  %735 = vst.msk [vmem:[#allocation3 + $0x4c8] sm:$0xff] %vm333_vm0, %v6749_v3 }
  0xad   : > { %736 = vst.msk [vmem:[#allocation3 + $0x4d0] sm:$0xff] %vm333_vm0, %v6749_v3  ;;  %738 = vst.msk [vmem:[#allocation3 + $0x4e0] sm:$0xff] %vm333_vm0, %v6749_v3 }
  0xae   : > { %739 = vst.msk [vmem:[#allocation3 + $0x4e8] sm:$0xff] %vm333_vm0, %v6749_v3  ;;  %740 = vst.msk [vmem:[#allocation3 + $0x4f0] sm:$0xff] %vm333_vm0, %v6749_v3 }
  0xaf   : > { %741 = vst.msk [vmem:[#allocation3 + $0x4f8] sm:$0xff] %vm333_vm0, %v6749_v3  ;;  %742 = vst.msk [vmem:[#allocation3 + $0x500] sm:$0xff] %vm333_vm0, %v6749_v3 }
  0xb0   : > { %744 = vst.msk [vmem:[#allocation3 + $0x510] sm:$0xff] %vm333_vm0, %v6749_v3  ;;  %745 = vst.msk [vmem:[#allocation3 + $0x518] sm:$0xff] %vm333_vm0, %v6749_v3 }
  0xb1   : > { %746 = vst.msk [vmem:[#allocation3 + $0x520] sm:$0xff] %vm333_vm0, %v6749_v3  ;;  %747 = vst.msk [vmem:[#allocation3 + $0x528] sm:$0xff] %vm333_vm0, %v6749_v3 }
  0xb2   : > { %748 = vst.msk [vmem:[#allocation3 + $0x530] sm:$0xff] %vm333_vm0, %v6749_v3  ;;  %750 = vst.msk [vmem:[#allocation3 + $0x540] sm:$0xff] %vm333_vm0, %v6749_v3 }
  0xb3   : > { %751 = vst.msk [vmem:[#allocation3 + $0x548] sm:$0xff] %vm333_vm0, %v6749_v3  ;;  %752 = vst.msk [vmem:[#allocation3 + $0x550] sm:$0xff] %vm333_vm0, %v6749_v3 }
  0xb4   : > { %753 = vst.msk [vmem:[#allocation3 + $0x558] sm:$0xff] %vm333_vm0, %v6749_v3  ;;  %754 = vst.msk [vmem:[#allocation3 + $0x560] sm:$0xff] %vm333_vm0, %v6749_v3 }
  0xb5   : > { %756 = vst.msk [vmem:[#allocation3 + $0x570] sm:$0xff] %vm333_vm0, %v6749_v3  ;;  %757 = vst.msk [vmem:[#allocation3 + $0x578] sm:$0xff] %vm333_vm0, %v6749_v3 }
  0xb6   : > { %758 = vst.msk [vmem:[#allocation3 + $0x580] sm:$0xff] %vm333_vm0, %v6749_v3  ;;  %759 = vst.msk [vmem:[#allocation3 + $0x588] sm:$0xff] %vm333_vm0, %v6749_v3 }
  0xb7   : > { %760 = vst.msk [vmem:[#allocation3 + $0x590] sm:$0xff] %vm333_vm0, %v6749_v3  ;;  %762 = vst.msk [vmem:[#allocation3 + $0x5a0] sm:$0xff] %vm333_vm0, %v6749_v3 }
  0xb8   : > { %763 = vst.msk [vmem:[#allocation3 + $0x5a8] sm:$0xff] %vm333_vm0, %v6749_v3  ;;  %764 = vst.msk [vmem:[#allocation3 + $0x5b0] sm:$0xff] %vm333_vm0, %v6749_v3 }
  0xb9   : > { %765 = vst.msk [vmem:[#allocation3 + $0x5b8] sm:$0xff] %vm333_vm0, %v6749_v3  ;;  %766 = vst.msk [vmem:[#allocation3 + $0x5c0] sm:$0xff] %vm333_vm0, %v6749_v3 }
  0xba   : > { %768 = vst.msk [vmem:[#allocation3 + $0x5d0] sm:$0xff] %vm333_vm0, %v6749_v3  ;;  %769 = vst.msk [vmem:[#allocation3 + $0x5d8] sm:$0xff] %vm333_vm0, %v6749_v3 }
  0xbb   : > { %770 = vst.msk [vmem:[#allocation3 + $0x5e0] sm:$0xff] %vm333_vm0, %v6749_v3  ;;  %771 = vst.msk [vmem:[#allocation3 + $0x5e8] sm:$0xff] %vm333_vm0, %v6749_v3 }
  0xbc   : > { %772 = vst.msk [vmem:[#allocation3 + $0x5f0] sm:$0xff] %vm333_vm0, %v6749_v3  ;;  %774 = vst.msk [vmem:[#allocation3 + $0x600] sm:$0xff] %vm333_vm0, %v6749_v3 }
  0xbd   : > { %775 = vst.msk [vmem:[#allocation3 + $0x608] sm:$0xff] %vm333_vm0, %v6749_v3  ;;  %776 = vst.msk [vmem:[#allocation3 + $0x610] sm:$0xff] %vm333_vm0, %v6749_v3 }
  0xbe   : > { %777 = vst.msk [vmem:[#allocation3 + $0x618] sm:$0xff] %vm333_vm0, %v6749_v3  ;;  %778 = vst.msk [vmem:[#allocation3 + $0x620] sm:$0xff] %vm333_vm0, %v6749_v3 }
  0xbf   : > { %780 = vst.msk [vmem:[#allocation3 + $0x630] sm:$0xff] %vm333_vm0, %v6749_v3  ;;  %781 = vst.msk [vmem:[#allocation3 + $0x638] sm:$0xff] %vm333_vm0, %v6749_v3 }
  0xc0   : > { %782 = vst.msk [vmem:[#allocation3 + $0x640] sm:$0xff] %vm333_vm0, %v6749_v3  ;;  %783 = vst.msk [vmem:[#allocation3 + $0x648] sm:$0xff] %vm333_vm0, %v6749_v3 }
  0xc1   : > { %784 = vst.msk [vmem:[#allocation3 + $0x650] sm:$0xff] %vm333_vm0, %v6749_v3  ;;  %786 = vst.msk [vmem:[#allocation3 + $0x660] sm:$0xff] %vm333_vm0, %v6749_v3 }
  0xc2   : > { %787 = vst.msk [vmem:[#allocation3 + $0x668] sm:$0xff] %vm333_vm0, %v6749_v3  ;;  %788 = vst.msk [vmem:[#allocation3 + $0x670] sm:$0xff] %vm333_vm0, %v6749_v3 }
  0xc3   : > { %789 = vst.msk [vmem:[#allocation3 + $0x678] sm:$0xff] %vm333_vm0, %v6749_v3  ;;  %790 = vst.msk [vmem:[#allocation3 + $0x680] sm:$0xff] %vm333_vm0, %v6749_v3 }
  0xc4   : > { %792 = vst.msk [vmem:[#allocation3 + $0x690] sm:$0xff] %vm333_vm0, %v6749_v3  ;;  %793 = vst.msk [vmem:[#allocation3 + $0x698] sm:$0xff] %vm333_vm0, %v6749_v3 }
  0xc5   : > { %794 = vst.msk [vmem:[#allocation3 + $0x6a0] sm:$0xff] %vm333_vm0, %v6749_v3  ;;  %795 = vst.msk [vmem:[#allocation3 + $0x6a8] sm:$0xff] %vm333_vm0, %v6749_v3 }
  0xc6   : > { %796 = vst.msk [vmem:[#allocation3 + $0x6b0] sm:$0xff] %vm333_vm0, %v6749_v3  ;;  %798 = vst.msk [vmem:[#allocation3 + $0x6c0] sm:$0xff] %vm333_vm0, %v6749_v3 }
  0xc7   : > { %799 = vst.msk [vmem:[#allocation3 + $0x6c8] sm:$0xff] %vm333_vm0, %v6749_v3  ;;  %800 = vst.msk [vmem:[#allocation3 + $0x6d0] sm:$0xff] %vm333_vm0, %v6749_v3 }
  0xc8   : > { %801 = vst.msk [vmem:[#allocation3 + $0x6d8] sm:$0xff] %vm333_vm0, %v6749_v3  ;;  %802 = vst.msk [vmem:[#allocation3 + $0x6e0] sm:$0xff] %vm333_vm0, %v6749_v3 }
  0xc9   : > { %804 = vst.msk [vmem:[#allocation3 + $0x6f0] sm:$0xff] %vm333_vm0, %v6749_v3  ;;  %805 = vst.msk [vmem:[#allocation3 + $0x6f8] sm:$0xff] %vm333_vm0, %v6749_v3 }
  0xca   : > { %806 = vst.msk [vmem:[#allocation3 + $0x700] sm:$0xff] %vm333_vm0, %v6749_v3  ;;  %807 = vst.msk [vmem:[#allocation3 + $0x708] sm:$0xff] %vm333_vm0, %v6749_v3 }
  0xcb   : > { %808 = vst.msk [vmem:[#allocation3 + $0x710] sm:$0xff] %vm333_vm0, %v6749_v3  ;;  %810 = vst.msk [vmem:[#allocation3 + $0x720] sm:$0xff] %vm333_vm0, %v6749_v3 }
  0xcc   : > { %811 = vst.msk [vmem:[#allocation3 + $0x728] sm:$0xff] %vm333_vm0, %v6749_v3  ;;  %812 = vst.msk [vmem:[#allocation3 + $0x730] sm:$0xff] %vm333_vm0, %v6749_v3 }
  0xcd   : > { %813 = vst.msk [vmem:[#allocation3 + $0x738] sm:$0xff] %vm333_vm0, %v6749_v3  ;;  %814 = vst.msk [vmem:[#allocation3 + $0x740] sm:$0xff] %vm333_vm0, %v6749_v3 }
  0xce   : > { %816 = vst.msk [vmem:[#allocation3 + $0x750] sm:$0xff] %vm333_vm0, %v6749_v3  ;;  %817 = vst.msk [vmem:[#allocation3 + $0x758] sm:$0xff] %vm333_vm0, %v6749_v3 }
  0xcf   : > { %818 = vst.msk [vmem:[#allocation3 + $0x760] sm:$0xff] %vm333_vm0, %v6749_v3  ;;  %819 = vst.msk [vmem:[#allocation3 + $0x768] sm:$0xff] %vm333_vm0, %v6749_v3 }
  0xd0   : > { %820 = vst.msk [vmem:[#allocation3 + $0x770] sm:$0xff] %vm333_vm0, %v6749_v3  ;;  %822 = vst.msk [vmem:[#allocation3 + $0x780] sm:$0xff] %vm333_vm0, %v6749_v3 }
  0xd1   : > { %823 = vst.msk [vmem:[#allocation3 + $0x788] sm:$0xff] %vm333_vm0, %v6749_v3  ;;  %824 = vst.msk [vmem:[#allocation3 + $0x790] sm:$0xff] %vm333_vm0, %v6749_v3 }
  0xd2   : > { %825 = vst.msk [vmem:[#allocation3 + $0x798] sm:$0xff] %vm333_vm0, %v6749_v3  ;;  %826 = vst.msk [vmem:[#allocation3 + $0x7a0] sm:$0xff] %vm333_vm0, %v6749_v3 }
  0xd3   : > { %828 = vst.msk [vmem:[#allocation3 + $0x7b0] sm:$0xff] %vm333_vm0, %v6749_v3  ;;  %829 = vst.msk [vmem:[#allocation3 + $0x7b8] sm:$0xff] %vm333_vm0, %v6749_v3 }
  0xd4   : > { %830 = vst.msk [vmem:[#allocation3 + $0x7c0] sm:$0xff] %vm333_vm0, %v6749_v3  ;;  %831 = vst.msk [vmem:[#allocation3 + $0x7c8] sm:$0xff] %vm333_vm0, %v6749_v3 }
  0xd5   : > { %832 = vst.msk [vmem:[#allocation3 + $0x7d0] sm:$0xff] %vm333_vm0, %v6749_v3  ;;  %834 = vst.msk [vmem:[#allocation3 + $0x7e0] sm:$0xff] %vm333_vm0, %v6749_v3 }
  0xd6   : > { %835 = vst.msk [vmem:[#allocation3 + $0x7e8] sm:$0xff] %vm333_vm0, %v6749_v3  ;;  %836 = vst.msk [vmem:[#allocation3 + $0x7f0] sm:$0xff] %vm333_vm0, %v6749_v3 }
  0xd7   : > { %837 = vst.msk [vmem:[#allocation3 + $0x7f8] sm:$0xff] %vm333_vm0, %v6749_v3  ;;  %838 = vst.msk [vmem:[#allocation3 + $0x800] sm:$0xff] %vm333_vm0, %v6749_v3 }
  0xd8   : > { %840 = vst.msk [vmem:[#allocation4] sm:$0xff] %vm333_vm0, %v6749_v3  ;;  %841 = vst.msk [vmem:[#allocation4 + $0x8] sm:$0xff] %vm333_vm0, %v6749_v3 }
  0xd9   : > { %842 = vst.msk [vmem:[#allocation4 + $0x10] sm:$0xff] %vm333_vm0, %v6749_v3  ;;  %843 = vst.msk [vmem:[#allocation4 + $0x18] sm:$0xff] %vm333_vm0, %v6749_v3 }
  0xda   : > { %844 = vst.msk [vmem:[#allocation4 + $0x20] sm:$0xff] %vm333_vm0, %v6749_v3  ;;  %846 = vst.msk [vmem:[#allocation4 + $0x30] sm:$0xff] %vm333_vm0, %v6749_v3 }
  0xdb   : > { %847 = vst.msk [vmem:[#allocation4 + $0x38] sm:$0xff] %vm333_vm0, %v6749_v3  ;;  %848 = vst.msk [vmem:[#allocation4 + $0x40] sm:$0xff] %vm333_vm0, %v6749_v3 }
  0xdc   : > { %849 = vst.msk [vmem:[#allocation4 + $0x48] sm:$0xff] %vm333_vm0, %v6749_v3  ;;  %850 = vst.msk [vmem:[#allocation4 + $0x50] sm:$0xff] %vm333_vm0, %v6749_v3 }
  0xdd   : > { %852 = vst.msk [vmem:[#allocation4 + $0x60] sm:$0xff] %vm333_vm0, %v6749_v3  ;;  %853 = vst.msk [vmem:[#allocation4 + $0x68] sm:$0xff] %vm333_vm0, %v6749_v3 }
  0xde   : > { %854 = vst.msk [vmem:[#allocation4 + $0x70] sm:$0xff] %vm333_vm0, %v6749_v3  ;;  %855 = vst.msk [vmem:[#allocation4 + $0x78] sm:$0xff] %vm333_vm0, %v6749_v3 }
  0xdf   : > { %856 = vst.msk [vmem:[#allocation4 + $0x80] sm:$0xff] %vm333_vm0, %v6749_v3  ;;  %858 = vst.msk [vmem:[#allocation4 + $0x90] sm:$0xff] %vm333_vm0, %v6749_v3 }
  0xe0   : > { %859 = vst.msk [vmem:[#allocation4 + $0x98] sm:$0xff] %vm333_vm0, %v6749_v3  ;;  %860 = vst.msk [vmem:[#allocation4 + $0xa0] sm:$0xff] %vm333_vm0, %v6749_v3 }
  0xe1   : > { %861 = vst.msk [vmem:[#allocation4 + $0xa8] sm:$0xff] %vm333_vm0, %v6749_v3  ;;  %862 = vst.msk [vmem:[#allocation4 + $0xb0] sm:$0xff] %vm333_vm0, %v6749_v3 }
  0xe2   : > { %864 = vst.msk [vmem:[#allocation4 + $0xc0] sm:$0xff] %vm333_vm0, %v6749_v3  ;;  %865 = vst.msk [vmem:[#allocation4 + $0xc8] sm:$0xff] %vm333_vm0, %v6749_v3 }
  0xe3   : > { %866 = vst.msk [vmem:[#allocation4 + $0xd0] sm:$0xff] %vm333_vm0, %v6749_v3  ;;  %867 = vst.msk [vmem:[#allocation4 + $0xd8] sm:$0xff] %vm333_vm0, %v6749_v3 }
  0xe4   : > { %868 = vst.msk [vmem:[#allocation4 + $0xe0] sm:$0xff] %vm333_vm0, %v6749_v3  ;;  %870 = vst.msk [vmem:[#allocation4 + $0xf0] sm:$0xff] %vm333_vm0, %v6749_v3 }
  0xe5   : > { %871 = vst.msk [vmem:[#allocation4 + $0xf8] sm:$0xff] %vm333_vm0, %v6749_v3  ;;  %872 = vst.msk [vmem:[#allocation4 + $0x100] sm:$0xff] %vm333_vm0, %v6749_v3 }
  0xe6   : > { %873 = vst.msk [vmem:[#allocation4 + $0x108] sm:$0xff] %vm333_vm0, %v6749_v3  ;;  %874 = vst.msk [vmem:[#allocation4 + $0x110] sm:$0xff] %vm333_vm0, %v6749_v3 }
  0xe7   : > { %876 = vst.msk [vmem:[#allocation4 + $0x120] sm:$0xff] %vm333_vm0, %v6749_v3  ;;  %877 = vst.msk [vmem:[#allocation4 + $0x128] sm:$0xff] %vm333_vm0, %v6749_v3 }
  0xe8   : > { %878 = vst.msk [vmem:[#allocation4 + $0x130] sm:$0xff] %vm333_vm0, %v6749_v3  ;;  %879 = vst.msk [vmem:[#allocation4 + $0x138] sm:$0xff] %vm333_vm0, %v6749_v3 }
  0xe9   : > { %880 = vst.msk [vmem:[#allocation4 + $0x140] sm:$0xff] %vm333_vm0, %v6749_v3  ;;  %882 = vst.msk [vmem:[#allocation4 + $0x150] sm:$0xff] %vm333_vm0, %v6749_v3 }
  0xea   : > { %883 = vst.msk [vmem:[#allocation4 + $0x158] sm:$0xff] %vm333_vm0, %v6749_v3  ;;  %884 = vst.msk [vmem:[#allocation4 + $0x160] sm:$0xff] %vm333_vm0, %v6749_v3 }
  0xeb   : > { %885 = vst.msk [vmem:[#allocation4 + $0x168] sm:$0xff] %vm333_vm0, %v6749_v3  ;;  %886 = vst.msk [vmem:[#allocation4 + $0x170] sm:$0xff] %vm333_vm0, %v6749_v3 }
  0xec   : > { %888 = vst.msk [vmem:[#allocation4 + $0x180] sm:$0xff] %vm333_vm0, %v6749_v3  ;;  %889 = vst.msk [vmem:[#allocation4 + $0x188] sm:$0xff] %vm333_vm0, %v6749_v3 }
  0xed   : > { %890 = vst.msk [vmem:[#allocation4 + $0x190] sm:$0xff] %vm333_vm0, %v6749_v3  ;;  %891 = vst.msk [vmem:[#allocation4 + $0x198] sm:$0xff] %vm333_vm0, %v6749_v3 }
  0xee   : > { %892 = vst.msk [vmem:[#allocation4 + $0x1a0] sm:$0xff] %vm333_vm0, %v6749_v3  ;;  %894 = vst.msk [vmem:[#allocation4 + $0x1b0] sm:$0xff] %vm333_vm0, %v6749_v3 }
  0xef   : > { %895 = vst.msk [vmem:[#allocation4 + $0x1b8] sm:$0xff] %vm333_vm0, %v6749_v3  ;;  %896 = vst.msk [vmem:[#allocation4 + $0x1c0] sm:$0xff] %vm333_vm0, %v6749_v3 }
  0xf0   : > { %897 = vst.msk [vmem:[#allocation4 + $0x1c8] sm:$0xff] %vm333_vm0, %v6749_v3  ;;  %898 = vst.msk [vmem:[#allocation4 + $0x1d0] sm:$0xff] %vm333_vm0, %v6749_v3 }
  0xf1   : > { %900 = vst.msk [vmem:[#allocation4 + $0x1e0] sm:$0xff] %vm333_vm0, %v6749_v3  ;;  %901 = vst.msk [vmem:[#allocation4 + $0x1e8] sm:$0xff] %vm333_vm0, %v6749_v3 }
  0xf2   : > { %902 = vst.msk [vmem:[#allocation4 + $0x1f0] sm:$0xff] %vm333_vm0, %v6749_v3  ;;  %903 = vst.msk [vmem:[#allocation4 + $0x1f8] sm:$0xff] %vm333_vm0, %v6749_v3 }
  0xf3   : > { %904 = vst.msk [vmem:[#allocation4 + $0x200] sm:$0xff] %vm333_vm0, %v6749_v3  ;;  %906 = vst.msk [vmem:[#allocation4 + $0x210] sm:$0xff] %vm333_vm0, %v6749_v3 }
  0xf4   : > { %907 = vst.msk [vmem:[#allocation4 + $0x218] sm:$0xff] %vm333_vm0, %v6749_v3  ;;  %908 = vst.msk [vmem:[#allocation4 + $0x220] sm:$0xff] %vm333_vm0, %v6749_v3 }
  0xf5   : > { %909 = vst.msk [vmem:[#allocation4 + $0x228] sm:$0xff] %vm333_vm0, %v6749_v3  ;;  %910 = vst.msk [vmem:[#allocation4 + $0x230] sm:$0xff] %vm333_vm0, %v6749_v3 }
  0xf6   : > { %912 = vst.msk [vmem:[#allocation4 + $0x240] sm:$0xff] %vm333_vm0, %v6749_v3  ;;  %913 = vst.msk [vmem:[#allocation4 + $0x248] sm:$0xff] %vm333_vm0, %v6749_v3 }
  0xf7   : > { %914 = vst.msk [vmem:[#allocation4 + $0x250] sm:$0xff] %vm333_vm0, %v6749_v3  ;;  %915 = vst.msk [vmem:[#allocation4 + $0x258] sm:$0xff] %vm333_vm0, %v6749_v3 }
  0xf8   : > { %916 = vst.msk [vmem:[#allocation4 + $0x260] sm:$0xff] %vm333_vm0, %v6749_v3  ;;  %918 = vst.msk [vmem:[#allocation4 + $0x270] sm:$0xff] %vm333_vm0, %v6749_v3 }
  0xf9   : > { %919 = vst.msk [vmem:[#allocation4 + $0x278] sm:$0xff] %vm333_vm0, %v6749_v3  ;;  %920 = vst.msk [vmem:[#allocation4 + $0x280] sm:$0xff] %vm333_vm0, %v6749_v3 }
  0xfa   : > { %921 = vst.msk [vmem:[#allocation4 + $0x288] sm:$0xff] %vm333_vm0, %v6749_v3  ;;  %922 = vst.msk [vmem:[#allocation4 + $0x290] sm:$0xff] %vm333_vm0, %v6749_v3 }
  0xfb   : > { %924 = vst.msk [vmem:[#allocation4 + $0x2a0] sm:$0xff] %vm333_vm0, %v6749_v3  ;;  %925 = vst.msk [vmem:[#allocation4 + $0x2a8] sm:$0xff] %vm333_vm0, %v6749_v3 }
  0xfc   : > { %926 = vst.msk [vmem:[#allocation4 + $0x2b0] sm:$0xff] %vm333_vm0, %v6749_v3  ;;  %927 = vst.msk [vmem:[#allocation4 + $0x2b8] sm:$0xff] %vm333_vm0, %v6749_v3 }
  0xfd   : > { %928 = vst.msk [vmem:[#allocation4 + $0x2c0] sm:$0xff] %vm333_vm0, %v6749_v3  ;;  %930 = vst.msk [vmem:[#allocation4 + $0x2d0] sm:$0xff] %vm333_vm0, %v6749_v3 }
  0xfe   : > { %931 = vst.msk [vmem:[#allocation4 + $0x2d8] sm:$0xff] %vm333_vm0, %v6749_v3  ;;  %932 = vst.msk [vmem:[#allocation4 + $0x2e0] sm:$0xff] %vm333_vm0, %v6749_v3 }
  0xff   : > { %933 = vst.msk [vmem:[#allocation4 + $0x2e8] sm:$0xff] %vm333_vm0, %v6749_v3  ;;  %934 = vst.msk [vmem:[#allocation4 + $0x2f0] sm:$0xff] %vm333_vm0, %v6749_v3 }
 0x100   : > { %936 = vst.msk [vmem:[#allocation4 + $0x300] sm:$0xff] %vm333_vm0, %v6749_v3  ;;  %937 = vst.msk [vmem:[#allocation4 + $0x308] sm:$0xff] %vm333_vm0, %v6749_v3 }
 0x101   : > { %938 = vst.msk [vmem:[#allocation4 + $0x310] sm:$0xff] %vm333_vm0, %v6749_v3  ;;  %939 = vst.msk [vmem:[#allocation4 + $0x318] sm:$0xff] %vm333_vm0, %v6749_v3 }
 0x102   : > { %940 = vst.msk [vmem:[#allocation4 + $0x320] sm:$0xff] %vm333_vm0, %v6749_v3  ;;  %942 = vst.msk [vmem:[#allocation4 + $0x330] sm:$0xff] %vm333_vm0, %v6749_v3 }
 0x103   : > { %943 = vst.msk [vmem:[#allocation4 + $0x338] sm:$0xff] %vm333_vm0, %v6749_v3  ;;  %944 = vst.msk [vmem:[#allocation4 + $0x340] sm:$0xff] %vm333_vm0, %v6749_v3 }
 0x104   : > { %945 = vst.msk [vmem:[#allocation4 + $0x348] sm:$0xff] %vm333_vm0, %v6749_v3  ;;  %946 = vst.msk [vmem:[#allocation4 + $0x350] sm:$0xff] %vm333_vm0, %v6749_v3 }
 0x105   : > { %948 = vst.msk [vmem:[#allocation4 + $0x360] sm:$0xff] %vm333_vm0, %v6749_v3  ;;  %949 = vst.msk [vmem:[#allocation4 + $0x368] sm:$0xff] %vm333_vm0, %v6749_v3 }
 0x106   : > { %950 = vst.msk [vmem:[#allocation4 + $0x370] sm:$0xff] %vm333_vm0, %v6749_v3  ;;  %951 = vst.msk [vmem:[#allocation4 + $0x378] sm:$0xff] %vm333_vm0, %v6749_v3 }
 0x107   : > { %952 = vst.msk [vmem:[#allocation4 + $0x380] sm:$0xff] %vm333_vm0, %v6749_v3  ;;  %954 = vst.msk [vmem:[#allocation4 + $0x390] sm:$0xff] %vm333_vm0, %v6749_v3 }
 0x108   : > { %955 = vst.msk [vmem:[#allocation4 + $0x398] sm:$0xff] %vm333_vm0, %v6749_v3  ;;  %956 = vst.msk [vmem:[#allocation4 + $0x3a0] sm:$0xff] %vm333_vm0, %v6749_v3 }
 0x109   : > { %957 = vst.msk [vmem:[#allocation4 + $0x3a8] sm:$0xff] %vm333_vm0, %v6749_v3  ;;  %958 = vst.msk [vmem:[#allocation4 + $0x3b0] sm:$0xff] %vm333_vm0, %v6749_v3 }
 0x10a   : > { %960 = vst.msk [vmem:[#allocation4 + $0x3c0] sm:$0xff] %vm333_vm0, %v6749_v3  ;;  %961 = vst.msk [vmem:[#allocation4 + $0x3c8] sm:$0xff] %vm333_vm0, %v6749_v3 }
 0x10b   : > { %962 = vst.msk [vmem:[#allocation4 + $0x3d0] sm:$0xff] %vm333_vm0, %v6749_v3  ;;  %963 = vst.msk [vmem:[#allocation4 + $0x3d8] sm:$0xff] %vm333_vm0, %v6749_v3 }
 0x10c   : > { %964 = vst.msk [vmem:[#allocation4 + $0x3e0] sm:$0xff] %vm333_vm0, %v6749_v3  ;;  %966 = vst.msk [vmem:[#allocation4 + $0x3f0] sm:$0xff] %vm333_vm0, %v6749_v3 }
 0x10d   : > { %967 = vst.msk [vmem:[#allocation4 + $0x3f8] sm:$0xff] %vm333_vm0, %v6749_v3  ;;  %968 = vst.msk [vmem:[#allocation4 + $0x400] sm:$0xff] %vm333_vm0, %v6749_v3 }
 0x10e   : > { %969 = vst.msk [vmem:[#allocation4 + $0x408] sm:$0xff] %vm333_vm0, %v6749_v3  ;;  %970 = vst.msk [vmem:[#allocation4 + $0x410] sm:$0xff] %vm333_vm0, %v6749_v3 }
 0x10f   : > { %972 = vst.msk [vmem:[#allocation4 + $0x420] sm:$0xff] %vm333_vm0, %v6749_v3  ;;  %973 = vst.msk [vmem:[#allocation4 + $0x428] sm:$0xff] %vm333_vm0, %v6749_v3 }
 0x110   : > { %974 = vst.msk [vmem:[#allocation4 + $0x430] sm:$0xff] %vm333_vm0, %v6749_v3  ;;  %975 = vst.msk [vmem:[#allocation4 + $0x438] sm:$0xff] %vm333_vm0, %v6749_v3 }
 0x111   : > { %976 = vst.msk [vmem:[#allocation4 + $0x440] sm:$0xff] %vm333_vm0, %v6749_v3  ;;  %978 = vst.msk [vmem:[#allocation4 + $0x450] sm:$0xff] %vm333_vm0, %v6749_v3 }
 0x112   : > { %979 = vst.msk [vmem:[#allocation4 + $0x458] sm:$0xff] %vm333_vm0, %v6749_v3  ;;  %980 = vst.msk [vmem:[#allocation4 + $0x460] sm:$0xff] %vm333_vm0, %v6749_v3 }
 0x113   : > { %981 = vst.msk [vmem:[#allocation4 + $0x468] sm:$0xff] %vm333_vm0, %v6749_v3  ;;  %982 = vst.msk [vmem:[#allocation4 + $0x470] sm:$0xff] %vm333_vm0, %v6749_v3 }
 0x114   : > { %984 = vst.msk [vmem:[#allocation4 + $0x480] sm:$0xff] %vm333_vm0, %v6749_v3  ;;  %985 = vst.msk [vmem:[#allocation4 + $0x488] sm:$0xff] %vm333_vm0, %v6749_v3 }
 0x115   : > { %986 = vst.msk [vmem:[#allocation4 + $0x490] sm:$0xff] %vm333_vm0, %v6749_v3  ;;  %987 = vst.msk [vmem:[#allocation4 + $0x498] sm:$0xff] %vm333_vm0, %v6749_v3 }
 0x116   : > { %988 = vst.msk [vmem:[#allocation4 + $0x4a0] sm:$0xff] %vm333_vm0, %v6749_v3  ;;  %990 = vst.msk [vmem:[#allocation4 + $0x4b0] sm:$0xff] %vm333_vm0, %v6749_v3 }
 0x117   : > { %991 = vst.msk [vmem:[#allocation4 + $0x4b8] sm:$0xff] %vm333_vm0, %v6749_v3  ;;  %992 = vst.msk [vmem:[#allocation4 + $0x4c0] sm:$0xff] %vm333_vm0, %v6749_v3 }
 0x118   : > { %993 = vst.msk [vmem:[#allocation4 + $0x4c8] sm:$0xff] %vm333_vm0, %v6749_v3  ;;  %994 = vst.msk [vmem:[#allocation4 + $0x4d0] sm:$0xff] %vm333_vm0, %v6749_v3 }
 0x119   : > { %996 = vst.msk [vmem:[#allocation4 + $0x4e0] sm:$0xff] %vm333_vm0, %v6749_v3  ;;  %997 = vst.msk [vmem:[#allocation4 + $0x4e8] sm:$0xff] %vm333_vm0, %v6749_v3 }
 0x11a   : > { %998 = vst.msk [vmem:[#allocation4 + $0x4f0] sm:$0xff] %vm333_vm0, %v6749_v3  ;;  %999 = vst.msk [vmem:[#allocation4 + $0x4f8] sm:$0xff] %vm333_vm0, %v6749_v3 }
 0x11b   : > { %1000 = vst.msk [vmem:[#allocation4 + $0x500] sm:$0xff] %vm333_vm0, %v6749_v3  ;;  %1002 = vst.msk [vmem:[#allocation4 + $0x510] sm:$0xff] %vm333_vm0, %v6749_v3 }
 0x11c   : > { %1003 = vst.msk [vmem:[#allocation4 + $0x518] sm:$0xff] %vm333_vm0, %v6749_v3  ;;  %1004 = vst.msk [vmem:[#allocation4 + $0x520] sm:$0xff] %vm333_vm0, %v6749_v3 }
 0x11d   : > { %1005 = vst.msk [vmem:[#allocation4 + $0x528] sm:$0xff] %vm333_vm0, %v6749_v3  ;;  %1006 = vst.msk [vmem:[#allocation4 + $0x530] sm:$0xff] %vm333_vm0, %v6749_v3 }
 0x11e   : > { %1008 = vst.msk [vmem:[#allocation4 + $0x540] sm:$0xff] %vm333_vm0, %v6749_v3  ;;  %1009 = vst.msk [vmem:[#allocation4 + $0x548] sm:$0xff] %vm333_vm0, %v6749_v3 }
 0x11f   : > { %1010 = vst.msk [vmem:[#allocation4 + $0x550] sm:$0xff] %vm333_vm0, %v6749_v3  ;;  %1011 = vst.msk [vmem:[#allocation4 + $0x558] sm:$0xff] %vm333_vm0, %v6749_v3 }
 0x120   : > { %1012 = vst.msk [vmem:[#allocation4 + $0x560] sm:$0xff] %vm333_vm0, %v6749_v3  ;;  %1014 = vst.msk [vmem:[#allocation4 + $0x570] sm:$0xff] %vm333_vm0, %v6749_v3 }
 0x121   : > { %1015 = vst.msk [vmem:[#allocation4 + $0x578] sm:$0xff] %vm333_vm0, %v6749_v3  ;;  %1016 = vst.msk [vmem:[#allocation4 + $0x580] sm:$0xff] %vm333_vm0, %v6749_v3 }
 0x122   : > { %1017 = vst.msk [vmem:[#allocation4 + $0x588] sm:$0xff] %vm333_vm0, %v6749_v3  ;;  %1018 = vst.msk [vmem:[#allocation4 + $0x590] sm:$0xff] %vm333_vm0, %v6749_v3 }
 0x123   : > { %1020 = vst.msk [vmem:[#allocation4 + $0x5a0] sm:$0xff] %vm333_vm0, %v6749_v3  ;;  %1021 = vst.msk [vmem:[#allocation4 + $0x5a8] sm:$0xff] %vm333_vm0, %v6749_v3 }
 0x124   : > { %1022 = vst.msk [vmem:[#allocation4 + $0x5b0] sm:$0xff] %vm333_vm0, %v6749_v3  ;;  %1023 = vst.msk [vmem:[#allocation4 + $0x5b8] sm:$0xff] %vm333_vm0, %v6749_v3 }
 0x125   : > { %1024 = vst.msk [vmem:[#allocation4 + $0x5c0] sm:$0xff] %vm333_vm0, %v6749_v3  ;;  %1026 = vst.msk [vmem:[#allocation4 + $0x5d0] sm:$0xff] %vm333_vm0, %v6749_v3 }
 0x126   : > { %1027 = vst.msk [vmem:[#allocation4 + $0x5d8] sm:$0xff] %vm333_vm0, %v6749_v3  ;;  %1028 = vst.msk [vmem:[#allocation4 + $0x5e0] sm:$0xff] %vm333_vm0, %v6749_v3 }
 0x127   : > { %1029 = vst.msk [vmem:[#allocation4 + $0x5e8] sm:$0xff] %vm333_vm0, %v6749_v3  ;;  %1030 = vst.msk [vmem:[#allocation4 + $0x5f0] sm:$0xff] %vm333_vm0, %v6749_v3 }
 0x128   : > { %1032 = vst.msk [vmem:[#allocation4 + $0x600] sm:$0xff] %vm333_vm0, %v6749_v3  ;;  %1033 = vst.msk [vmem:[#allocation4 + $0x608] sm:$0xff] %vm333_vm0, %v6749_v3 }
 0x129   : > { %1034 = vst.msk [vmem:[#allocation4 + $0x610] sm:$0xff] %vm333_vm0, %v6749_v3  ;;  %1035 = vst.msk [vmem:[#allocation4 + $0x618] sm:$0xff] %vm333_vm0, %v6749_v3 }
 0x12a   : > { %1036 = vst.msk [vmem:[#allocation4 + $0x620] sm:$0xff] %vm333_vm0, %v6749_v3  ;;  %1038 = vst.msk [vmem:[#allocation4 + $0x630] sm:$0xff] %vm333_vm0, %v6749_v3 }
 0x12b   : > { %1039 = vst.msk [vmem:[#allocation4 + $0x638] sm:$0xff] %vm333_vm0, %v6749_v3  ;;  %1040 = vst.msk [vmem:[#allocation4 + $0x640] sm:$0xff] %vm333_vm0, %v6749_v3 }
 0x12c   : > { %1041 = vst.msk [vmem:[#allocation4 + $0x648] sm:$0xff] %vm333_vm0, %v6749_v3  ;;  %1042 = vst.msk [vmem:[#allocation4 + $0x650] sm:$0xff] %vm333_vm0, %v6749_v3 }
 0x12d   : > { %1044 = vst.msk [vmem:[#allocation4 + $0x660] sm:$0xff] %vm333_vm0, %v6749_v3  ;;  %1045 = vst.msk [vmem:[#allocation4 + $0x668] sm:$0xff] %vm333_vm0, %v6749_v3 }
 0x12e   : > { %1046 = vst.msk [vmem:[#allocation4 + $0x670] sm:$0xff] %vm333_vm0, %v6749_v3  ;;  %1047 = vst.msk [vmem:[#allocation4 + $0x678] sm:$0xff] %vm333_vm0, %v6749_v3 }
 0x12f   : > { %1048 = vst.msk [vmem:[#allocation4 + $0x680] sm:$0xff] %vm333_vm0, %v6749_v3  ;;  %1050 = vst.msk [vmem:[#allocation4 + $0x690] sm:$0xff] %vm333_vm0, %v6749_v3 }
 0x130   : > { %1051 = vst.msk [vmem:[#allocation4 + $0x698] sm:$0xff] %vm333_vm0, %v6749_v3  ;;  %1052 = vst.msk [vmem:[#allocation4 + $0x6a0] sm:$0xff] %vm333_vm0, %v6749_v3 }
 0x131   : > { %1053 = vst.msk [vmem:[#allocation4 + $0x6a8] sm:$0xff] %vm333_vm0, %v6749_v3  ;;  %1054 = vst.msk [vmem:[#allocation4 + $0x6b0] sm:$0xff] %vm333_vm0, %v6749_v3 }
 0x132   : > { %1056 = vst.msk [vmem:[#allocation4 + $0x6c0] sm:$0xff] %vm333_vm0, %v6749_v3  ;;  %1057 = vst.msk [vmem:[#allocation4 + $0x6c8] sm:$0xff] %vm333_vm0, %v6749_v3 }
 0x133   : > { %1058 = vst.msk [vmem:[#allocation4 + $0x6d0] sm:$0xff] %vm333_vm0, %v6749_v3  ;;  %1059 = vst.msk [vmem:[#allocation4 + $0x6d8] sm:$0xff] %vm333_vm0, %v6749_v3 }
 0x134   : > { %1060 = vst.msk [vmem:[#allocation4 + $0x6e0] sm:$0xff] %vm333_vm0, %v6749_v3  ;;  %1062 = vst.msk [vmem:[#allocation4 + $0x6f0] sm:$0xff] %vm333_vm0, %v6749_v3 }
 0x135   : > { %1063 = vst.msk [vmem:[#allocation4 + $0x6f8] sm:$0xff] %vm333_vm0, %v6749_v3  ;;  %1064 = vst.msk [vmem:[#allocation4 + $0x700] sm:$0xff] %vm333_vm0, %v6749_v3 }
 0x136   : > { %1065 = vst.msk [vmem:[#allocation4 + $0x708] sm:$0xff] %vm333_vm0, %v6749_v3  ;;  %1066 = vst.msk [vmem:[#allocation4 + $0x710] sm:$0xff] %vm333_vm0, %v6749_v3 }
 0x137   : > { %1068 = vst.msk [vmem:[#allocation4 + $0x720] sm:$0xff] %vm333_vm0, %v6749_v3  ;;  %1069 = vst.msk [vmem:[#allocation4 + $0x728] sm:$0xff] %vm333_vm0, %v6749_v3 }
 0x138   : > { %1070 = vst.msk [vmem:[#allocation4 + $0x730] sm:$0xff] %vm333_vm0, %v6749_v3  ;;  %1071 = vst.msk [vmem:[#allocation4 + $0x738] sm:$0xff] %vm333_vm0, %v6749_v3 }
 0x139   : > { %1072 = vst.msk [vmem:[#allocation4 + $0x740] sm:$0xff] %vm333_vm0, %v6749_v3  ;;  %1074 = vst.msk [vmem:[#allocation4 + $0x750] sm:$0xff] %vm333_vm0, %v6749_v3 }
 0x13a   : > { %1075 = vst.msk [vmem:[#allocation4 + $0x758] sm:$0xff] %vm333_vm0, %v6749_v3  ;;  %1076 = vst.msk [vmem:[#allocation4 + $0x760] sm:$0xff] %vm333_vm0, %v6749_v3 }
 0x13b   : > { %1077 = vst.msk [vmem:[#allocation4 + $0x768] sm:$0xff] %vm333_vm0, %v6749_v3  ;;  %1078 = vst.msk [vmem:[#allocation4 + $0x770] sm:$0xff] %vm333_vm0, %v6749_v3 }
 0x13c   : > { %1080 = vst.msk [vmem:[#allocation4 + $0x780] sm:$0xff] %vm333_vm0, %v6749_v3  ;;  %1081 = vst.msk [vmem:[#allocation4 + $0x788] sm:$0xff] %vm333_vm0, %v6749_v3 }
 0x13d   : > { %1082 = vst.msk [vmem:[#allocation4 + $0x790] sm:$0xff] %vm333_vm0, %v6749_v3  ;;  %1083 = vst.msk [vmem:[#allocation4 + $0x798] sm:$0xff] %vm333_vm0, %v6749_v3 }
 0x13e   : > { %1084 = vst.msk [vmem:[#allocation4 + $0x7a0] sm:$0xff] %vm333_vm0, %v6749_v3  ;;  %1086 = vst.msk [vmem:[#allocation4 + $0x7b0] sm:$0xff] %vm333_vm0, %v6749_v3 }
 0x13f   : > { %1087 = vst.msk [vmem:[#allocation4 + $0x7b8] sm:$0xff] %vm333_vm0, %v6749_v3  ;;  %1088 = vst.msk [vmem:[#allocation4 + $0x7c0] sm:$0xff] %vm333_vm0, %v6749_v3 }
 0x140   : > { %1089 = vst.msk [vmem:[#allocation4 + $0x7c8] sm:$0xff] %vm333_vm0, %v6749_v3  ;;  %1090 = vst.msk [vmem:[#allocation4 + $0x7d0] sm:$0xff] %vm333_vm0, %v6749_v3 }
 0x141   : > { %1092 = vst.msk [vmem:[#allocation4 + $0x7e0] sm:$0xff] %vm333_vm0, %v6749_v3  ;;  %1093 = vst.msk [vmem:[#allocation4 + $0x7e8] sm:$0xff] %vm333_vm0, %v6749_v3 }
 0x142   : > { %1094 = vst.msk [vmem:[#allocation4 + $0x7f0] sm:$0xff] %vm333_vm0, %v6749_v3  ;;  %1095 = vst.msk [vmem:[#allocation4 + $0x7f8] sm:$0xff] %vm333_vm0, %v6749_v3 }
 0x143   : > { %1096 = vst.msk [vmem:[#allocation4 + $0x800] sm:$0xff] %vm333_vm0, %v6749_v3 }
 0x144   : > { %340 = vst.msk [vmem:[#allocation2 + $0x28] sm:$0x1] %vm339_vm1, %v6749_v3  ;;  %346 = vst.msk [vmem:[#allocation2 + $0x58] sm:$0x1] %vm339_vm1, %v6749_v3 }
 0x145   : > { %352 = vst.msk [vmem:[#allocation2 + $0x88] sm:$0x1] %vm339_vm1, %v6749_v3  ;;  %358 = vst.msk [vmem:[#allocation2 + $0xb8] sm:$0x1] %vm339_vm1, %v6749_v3 }
 0x146   : > { %364 = vst.msk [vmem:[#allocation2 + $0xe8] sm:$0x1] %vm339_vm1, %v6749_v3  ;;  %370 = vst.msk [vmem:[#allocation2 + $0x118] sm:$0x1] %vm339_vm1, %v6749_v3 }
 0x147   : > { %376 = vst.msk [vmem:[#allocation2 + $0x148] sm:$0x1] %vm339_vm1, %v6749_v3  ;;  %382 = vst.msk [vmem:[#allocation2 + $0x178] sm:$0x1] %vm339_vm1, %v6749_v3 }
 0x148   : > { %388 = vst.msk [vmem:[#allocation2 + $0x1a8] sm:$0x1] %vm339_vm1, %v6749_v3  ;;  %394 = vst.msk [vmem:[#allocation2 + $0x1d8] sm:$0x1] %vm339_vm1, %v6749_v3 }
 0x149   : > { %400 = vst.msk [vmem:[#allocation2 + $0x208] sm:$0x1] %vm339_vm1, %v6749_v3  ;;  %406 = vst.msk [vmem:[#allocation2 + $0x238] sm:$0x1] %vm339_vm1, %v6749_v3 }
 0x14a   : > { %412 = vst.msk [vmem:[#allocation2 + $0x268] sm:$0x1] %vm339_vm1, %v6749_v3  ;;  %418 = vst.msk [vmem:[#allocation2 + $0x298] sm:$0x1] %vm339_vm1, %v6749_v3 }
 0x14b   : > { %424 = vst.msk [vmem:[#allocation2 + $0x2c8] sm:$0x1] %vm339_vm1, %v6749_v3  ;;  %430 = vst.msk [vmem:[#allocation2 + $0x2f8] sm:$0x1] %vm339_vm1, %v6749_v3 }
 0x14c   : > { %436 = vst.msk [vmem:[#allocation2 + $0x328] sm:$0x1] %vm339_vm1, %v6749_v3  ;;  %442 = vst.msk [vmem:[#allocation2 + $0x358] sm:$0x1] %vm339_vm1, %v6749_v3 }
 0x14d   : > { %448 = vst.msk [vmem:[#allocation2 + $0x388] sm:$0x1] %vm339_vm1, %v6749_v3  ;;  %454 = vst.msk [vmem:[#allocation2 + $0x3b8] sm:$0x1] %vm339_vm1, %v6749_v3 }
 0x14e   : > { %460 = vst.msk [vmem:[#allocation2 + $0x3e8] sm:$0x1] %vm339_vm1, %v6749_v3  ;;  %466 = vst.msk [vmem:[#allocation2 + $0x418] sm:$0x1] %vm339_vm1, %v6749_v3 }
 0x14f   : > { %472 = vst.msk [vmem:[#allocation2 + $0x448] sm:$0x1] %vm339_vm1, %v6749_v3  ;;  %478 = vst.msk [vmem:[#allocation2 + $0x478] sm:$0x1] %vm339_vm1, %v6749_v3 }
 0x150   : > { %484 = vst.msk [vmem:[#allocation2 + $0x4a8] sm:$0x1] %vm339_vm1, %v6749_v3  ;;  %490 = vst.msk [vmem:[#allocation2 + $0x4d8] sm:$0x1] %vm339_vm1, %v6749_v3 }
 0x151   : > { %496 = vst.msk [vmem:[#allocation2 + $0x508] sm:$0x1] %vm339_vm1, %v6749_v3  ;;  %502 = vst.msk [vmem:[#allocation2 + $0x538] sm:$0x1] %vm339_vm1, %v6749_v3 }
 0x152   : > { %508 = vst.msk [vmem:[#allocation2 + $0x568] sm:$0x1] %vm339_vm1, %v6749_v3  ;;  %514 = vst.msk [vmem:[#allocation2 + $0x598] sm:$0x1] %vm339_vm1, %v6749_v3 }
 0x153   : > { %520 = vst.msk [vmem:[#allocation2 + $0x5c8] sm:$0x1] %vm339_vm1, %v6749_v3  ;;  %526 = vst.msk [vmem:[#allocation2 + $0x5f8] sm:$0x1] %vm339_vm1, %v6749_v3 }
 0x154   : > { %532 = vst.msk [vmem:[#allocation2 + $0x628] sm:$0x1] %vm339_vm1, %v6749_v3  ;;  %538 = vst.msk [vmem:[#allocation2 + $0x658] sm:$0x1] %vm339_vm1, %v6749_v3 }
 0x155   : > { %544 = vst.msk [vmem:[#allocation2 + $0x688] sm:$0x1] %vm339_vm1, %v6749_v3  ;;  %550 = vst.msk [vmem:[#allocation2 + $0x6b8] sm:$0x1] %vm339_vm1, %v6749_v3 }
 0x156   : > { %556 = vst.msk [vmem:[#allocation2 + $0x6e8] sm:$0x1] %vm339_vm1, %v6749_v3  ;;  %562 = vst.msk [vmem:[#allocation2 + $0x718] sm:$0x1] %vm339_vm1, %v6749_v3 }
 0x157   : > { %568 = vst.msk [vmem:[#allocation2 + $0x748] sm:$0x1] %vm339_vm1, %v6749_v3  ;;  %574 = vst.msk [vmem:[#allocation2 + $0x778] sm:$0x1] %vm339_vm1, %v6749_v3 }
 0x158   : > { %580 = vst.msk [vmem:[#allocation2 + $0x7a8] sm:$0x1] %vm339_vm1, %v6749_v3 }
 0x159   : > { %587 = vst.msk [vmem:[#allocation3 + $0x28] sm:$0x7] %vm586_vm2, %v6749_v3  ;;  %593 = vst.msk [vmem:[#allocation3 + $0x58] sm:$0x7] %vm586_vm2, %v6749_v3 }
 0x15a   : > { %599 = vst.msk [vmem:[#allocation3 + $0x88] sm:$0x7] %vm586_vm2, %v6749_v3  ;;  %605 = vst.msk [vmem:[#allocation3 + $0xb8] sm:$0x7] %vm586_vm2, %v6749_v3 }
 0x15b   : > { %611 = vst.msk [vmem:[#allocation3 + $0xe8] sm:$0x7] %vm586_vm2, %v6749_v3  ;;  %617 = vst.msk [vmem:[#allocation3 + $0x118] sm:$0x7] %vm586_vm2, %v6749_v3 }
 0x15c   : > { %623 = vst.msk [vmem:[#allocation3 + $0x148] sm:$0x7] %vm586_vm2, %v6749_v3  ;;  %629 = vst.msk [vmem:[#allocation3 + $0x178] sm:$0x7] %vm586_vm2, %v6749_v3 }
 0x15d   : > { %635 = vst.msk [vmem:[#allocation3 + $0x1a8] sm:$0x7] %vm586_vm2, %v6749_v3  ;;  %641 = vst.msk [vmem:[#allocation3 + $0x1d8] sm:$0x7] %vm586_vm2, %v6749_v3 }
 0x15e   : > { %647 = vst.msk [vmem:[#allocation3 + $0x208] sm:$0x7] %vm586_vm2, %v6749_v3  ;;  %653 = vst.msk [vmem:[#allocation3 + $0x238] sm:$0x7] %vm586_vm2, %v6749_v3 }
 0x15f   : > { %659 = vst.msk [vmem:[#allocation3 + $0x268] sm:$0x7] %vm586_vm2, %v6749_v3  ;;  %665 = vst.msk [vmem:[#allocation3 + $0x298] sm:$0x7] %vm586_vm2, %v6749_v3 }
 0x160   : > { %671 = vst.msk [vmem:[#allocation3 + $0x2c8] sm:$0x7] %vm586_vm2, %v6749_v3  ;;  %677 = vst.msk [vmem:[#allocation3 + $0x2f8] sm:$0x7] %vm586_vm2, %v6749_v3 }
 0x161   : > { %683 = vst.msk [vmem:[#allocation3 + $0x328] sm:$0x7] %vm586_vm2, %v6749_v3  ;;  %689 = vst.msk [vmem:[#allocation3 + $0x358] sm:$0x7] %vm586_vm2, %v6749_v3 }
 0x162   : > { %695 = vst.msk [vmem:[#allocation3 + $0x388] sm:$0x7] %vm586_vm2, %v6749_v3  ;;  %701 = vst.msk [vmem:[#allocation3 + $0x3b8] sm:$0x7] %vm586_vm2, %v6749_v3 }
 0x163   : > { %707 = vst.msk [vmem:[#allocation3 + $0x3e8] sm:$0x7] %vm586_vm2, %v6749_v3  ;;  %713 = vst.msk [vmem:[#allocation3 + $0x418] sm:$0x7] %vm586_vm2, %v6749_v3 }
 0x164   : > { %719 = vst.msk [vmem:[#allocation3 + $0x448] sm:$0x7] %vm586_vm2, %v6749_v3  ;;  %725 = vst.msk [vmem:[#allocation3 + $0x478] sm:$0x7] %vm586_vm2, %v6749_v3 }
 0x165   : > { %731 = vst.msk [vmem:[#allocation3 + $0x4a8] sm:$0x7] %vm586_vm2, %v6749_v3  ;;  %737 = vst.msk [vmem:[#allocation3 + $0x4d8] sm:$0x7] %vm586_vm2, %v6749_v3 }
 0x166   : > { %743 = vst.msk [vmem:[#allocation3 + $0x508] sm:$0x7] %vm586_vm2, %v6749_v3  ;;  %749 = vst.msk [vmem:[#allocation3 + $0x538] sm:$0x7] %vm586_vm2, %v6749_v3 }
 0x167   : > { %755 = vst.msk [vmem:[#allocation3 + $0x568] sm:$0x7] %vm586_vm2, %v6749_v3  ;;  %761 = vst.msk [vmem:[#allocation3 + $0x598] sm:$0x7] %vm586_vm2, %v6749_v3 }
 0x168   : > { %767 = vst.msk [vmem:[#allocation3 + $0x5c8] sm:$0x7] %vm586_vm2, %v6749_v3  ;;  %773 = vst.msk [vmem:[#allocation3 + $0x5f8] sm:$0x7] %vm586_vm2, %v6749_v3 }
 0x169   : > { %779 = vst.msk [vmem:[#allocation3 + $0x628] sm:$0x7] %vm586_vm2, %v6749_v3  ;;  %785 = vst.msk [vmem:[#allocation3 + $0x658] sm:$0x7] %vm586_vm2, %v6749_v3 }
 0x16a   : > { %791 = vst.msk [vmem:[#allocation3 + $0x688] sm:$0x7] %vm586_vm2, %v6749_v3  ;;  %797 = vst.msk [vmem:[#allocation3 + $0x6b8] sm:$0x7] %vm586_vm2, %v6749_v3 }
 0x16b   : > { %803 = vst.msk [vmem:[#allocation3 + $0x6e8] sm:$0x7] %vm586_vm2, %v6749_v3  ;;  %809 = vst.msk [vmem:[#allocation3 + $0x718] sm:$0x7] %vm586_vm2, %v6749_v3 }
 0x16c   : > { %815 = vst.msk [vmem:[#allocation3 + $0x748] sm:$0x7] %vm586_vm2, %v6749_v3  ;;  %821 = vst.msk [vmem:[#allocation3 + $0x778] sm:$0x7] %vm586_vm2, %v6749_v3 }
 0x16d   : > { %827 = vst.msk [vmem:[#allocation3 + $0x7a8] sm:$0x7] %vm586_vm2, %v6749_v3  ;;  %833 = vst.msk [vmem:[#allocation3 + $0x7d8] sm:$0x7] %vm586_vm2, %v6749_v3 }
 0x16e   : > { %839 = vst.msk [vmem:[#allocation3 + $0x808] sm:$0x7] %vm586_vm2, %v6749_v3  ;;  %845 = vst.msk [vmem:[#allocation4 + $0x28] sm:$0x7] %vm586_vm2, %v6749_v3 }
 0x16f   : > { %851 = vst.msk [vmem:[#allocation4 + $0x58] sm:$0x7] %vm586_vm2, %v6749_v3  ;;  %857 = vst.msk [vmem:[#allocation4 + $0x88] sm:$0x7] %vm586_vm2, %v6749_v3 }
 0x170   : > { %863 = vst.msk [vmem:[#allocation4 + $0xb8] sm:$0x7] %vm586_vm2, %v6749_v3  ;;  %869 = vst.msk [vmem:[#allocation4 + $0xe8] sm:$0x7] %vm586_vm2, %v6749_v3 }
 0x171   : > { %875 = vst.msk [vmem:[#allocation4 + $0x118] sm:$0x7] %vm586_vm2, %v6749_v3  ;;  %881 = vst.msk [vmem:[#allocation4 + $0x148] sm:$0x7] %vm586_vm2, %v6749_v3 }
 0x172   : > { %887 = vst.msk [vmem:[#allocation4 + $0x178] sm:$0x7] %vm586_vm2, %v6749_v3  ;;  %893 = vst.msk [vmem:[#allocation4 + $0x1a8] sm:$0x7] %vm586_vm2, %v6749_v3 }
 0x173   : > { %899 = vst.msk [vmem:[#allocation4 + $0x1d8] sm:$0x7] %vm586_vm2, %v6749_v3  ;;  %905 = vst.msk [vmem:[#allocation4 + $0x208] sm:$0x7] %vm586_vm2, %v6749_v3 }
 0x174   : > { %911 = vst.msk [vmem:[#allocation4 + $0x238] sm:$0x7] %vm586_vm2, %v6749_v3  ;;  %917 = vst.msk [vmem:[#allocation4 + $0x268] sm:$0x7] %vm586_vm2, %v6749_v3 }
 0x175   : > { %923 = vst.msk [vmem:[#allocation4 + $0x298] sm:$0x7] %vm586_vm2, %v6749_v3  ;;  %929 = vst.msk [vmem:[#allocation4 + $0x2c8] sm:$0x7] %vm586_vm2, %v6749_v3 }
 0x176   : > { %935 = vst.msk [vmem:[#allocation4 + $0x2f8] sm:$0x7] %vm586_vm2, %v6749_v3  ;;  %941 = vst.msk [vmem:[#allocation4 + $0x328] sm:$0x7] %vm586_vm2, %v6749_v3 }
 0x177   : > { %947 = vst.msk [vmem:[#allocation4 + $0x358] sm:$0x7] %vm586_vm2, %v6749_v3  ;;  %953 = vst.msk [vmem:[#allocation4 + $0x388] sm:$0x7] %vm586_vm2, %v6749_v3 }
 0x178   : > { %959 = vst.msk [vmem:[#allocation4 + $0x3b8] sm:$0x7] %vm586_vm2, %v6749_v3  ;;  %965 = vst.msk [vmem:[#allocation4 + $0x3e8] sm:$0x7] %vm586_vm2, %v6749_v3 }
 0x179   : > { %971 = vst.msk [vmem:[#allocation4 + $0x418] sm:$0x7] %vm586_vm2, %v6749_v3  ;;  %977 = vst.msk [vmem:[#allocation4 + $0x448] sm:$0x7] %vm586_vm2, %v6749_v3 }
 0x17a   : > { %983 = vst.msk [vmem:[#allocation4 + $0x478] sm:$0x7] %vm586_vm2, %v6749_v3  ;;  %989 = vst.msk [vmem:[#allocation4 + $0x4a8] sm:$0x7] %vm586_vm2, %v6749_v3 }
 0x17b   : > { %995 = vst.msk [vmem:[#allocation4 + $0x4d8] sm:$0x7] %vm586_vm2, %v6749_v3  ;;  %1001 = vst.msk [vmem:[#allocation4 + $0x508] sm:$0x7] %vm586_vm2, %v6749_v3 }
 0x17c   : > { %1007 = vst.msk [vmem:[#allocation4 + $0x538] sm:$0x7] %vm586_vm2, %v6749_v3  ;;  %1013 = vst.msk [vmem:[#allocation4 + $0x568] sm:$0x7] %vm586_vm2, %v6749_v3 }
 0x17d   : > { %1019 = vst.msk [vmem:[#allocation4 + $0x598] sm:$0x7] %vm586_vm2, %v6749_v3  ;;  %1025 = vst.msk [vmem:[#allocation4 + $0x5c8] sm:$0x7] %vm586_vm2, %v6749_v3 }
 0x17e   : > { %1031 = vst.msk [vmem:[#allocation4 + $0x5f8] sm:$0x7] %vm586_vm2, %v6749_v3  ;;  %1037 = vst.msk [vmem:[#allocation4 + $0x628] sm:$0x7] %vm586_vm2, %v6749_v3 }
 0x17f   : > { %1043 = vst.msk [vmem:[#allocation4 + $0x658] sm:$0x7] %vm586_vm2, %v6749_v3  ;;  %1049 = vst.msk [vmem:[#allocation4 + $0x688] sm:$0x7] %vm586_vm2, %v6749_v3 }
 0x180   : > { %1055 = vst.msk [vmem:[#allocation4 + $0x6b8] sm:$0x7] %vm586_vm2, %v6749_v3  ;;  %1061 = vst.msk [vmem:[#allocation4 + $0x6e8] sm:$0x7] %vm586_vm2, %v6749_v3 }
 0x181   : > { %1067 = vst.msk [vmem:[#allocation4 + $0x718] sm:$0x7] %vm586_vm2, %v6749_v3  ;;  %1073 = vst.msk [vmem:[#allocation4 + $0x748] sm:$0x7] %vm586_vm2, %v6749_v3 }
 0x182   : > { %1079 = vst.msk [vmem:[#allocation4 + $0x778] sm:$0x7] %vm586_vm2, %v6749_v3  ;;  %1085 = vst.msk [vmem:[#allocation4 + $0x7a8] sm:$0x7] %vm586_vm2, %v6749_v3 }
 0x183   : > { %1091 = vst.msk [vmem:[#allocation4 + $0x7d8] sm:$0x7] %vm586_vm2, %v6749_v3  ;;  %1097 = vst.msk [vmem:[#allocation4 + $0x808] sm:$0x7] %vm586_vm2, %v6749_v3 }
 0x184 LB: >> { %v6371_v38 = vpack.c.bf16 %v8118_v6, %v8113_v5  ;;  %v6750_v39 = vmov 0.0|0.0   ;;  %v6374_v40 = vpack.c.bf16 %v8134_v8, %v8129_v7  ;;  %s1141_s20 = smul.u32 40, %s6735_s19  ;;  %vm6751_vm3 = vmmov 0   ;;  %s6735_s19 = sphi %s8547_s19, %s1140_s19  }
 0x185   : >> { %6582 = vmatprep.subr.bf16.mxu1 %v6750_v39  ;;  %6370 = vmatprep.subr.bf16.mxu0 %v6750_v39  ;;  %v6752_v41 = vmov 0.0   ;;  %v6377_v43 = vpack.c.bf16 %v6828_v1, %v6823_v0  ;;  %v6383_v45 = vpack.c.bf16 %v8398_v10, %v8139_v9  ;;  %v6380_v47 = vpack.c.bf16 %v8108_v4, %v6833_v2  ;;  %s5062_s22 = smul.u32 48, %s6735_s19  ;;  %s1140_s19 = sadd.s32 1, %s6735_s19  }
 0x186   : >> { %6584 = vmatpush3.bf16.msra.mxu1 %v6371_v38  ;;  %6372 = vmatpush3.bf16.msra.mxu0 %v6371_v38  ;;  %s8563_s21 = scalar_lea.vmem %s8445_s14, %s1141_s20  ;;  %v6386_v49 = vpack.c.bf16 %v8408_v12, %v8403_v11  ;;  %v6395_v52 = vpack.c.bf16 %v8440_v18, %v8435_v17  ;;  %v6389_v54 = vpack.c.bf16 %v8419_v14, %v8414_v13  ;;  %vm2196_vm4 = vcmask 258048   ;;  %p1137_p4 = scmp.ge.s32.totalorder %s1140_s19, 37  }
 0x187   : >> { %6583 = vmatprep.subr.bf16.mxu1 %v6750_v39  ;;  %5749 = vmatprep.mubr.msk.f32.mxu1 %vm6751_vm3, %v6752_v41  ;;  %v1150_v42 = vld [vmem:[%s8563_s21 + $0x11] sm:$0xff]  ;;  %v1148_v44 = vld [vmem:[%s8563_s21 + $0x1] sm:$0xff]  ;;  %v1151_v46 = vld [vmem:[%s8563_s21 + $0x19] sm:$0xff]  ;;  %v6398_v56 = vpack.c.bf16 %v8455_v20, %v8450_v19  ;;  %v6392_v58 = vpack.c.bf16 %v8430_v16, %v8424_v15  ;;  %s5063_s23 = scalar_lea.vmem [#allocation2], %s5062_s22  ;;  %s8990_s22 = smov (%p1137_p4), 0  }
 0x188   : >> { %6373 = vmatprep.subr.bf16.mxu0 %v6750_v39  ;;  %5743 = vmatprep.mubr.msk.f32.mxu0 %vm6751_vm3, %v6752_v41  ;;  %v1149_v48 = vld [vmem:[%s8563_s21 + $0x9] sm:$0xff]  ;;  %v1152_v50 = vld [vmem:[%s8563_s21 + $0x21] sm:$0x1f]  ;;  %v1365_v59 = vld [vmem:[%s8563_s21 + $0x12] sm:$0xff] }
 0x189   : >> { %v1363_v51 = vld [vmem:[%s8563_s21 + $0x2] sm:$0xff]  ;;  %v1364_v55 = vld [vmem:[%s8563_s21 + $0xa] sm:$0xff]  ;;  %v1366_v61 = vld [vmem:[%s8563_s21 + $0x1a] sm:$0xff] }
 0x18a   : >> { %6585 = vmatpush3.bf16.msra.mxu1 %v6374_v40  ;;  %6375 = vmatpush3.bf16.msra.mxu0 %v6374_v40  ;;  %v1143_v53 = vld [vmem:[%s8563_s21] sm:$0xff]  ;;  %v1144_v57 = vld [vmem:[%s8563_s21 + $0x8] sm:$0xff]  ;;  %v1145_v60 = vld [vmem:[%s8563_s21 + $0x10] sm:$0xff]  ;;  %v6407_v40 = vpack.c.bf16 %v8490_v26, %v8485_v25 }
 0x18b   : >> { %6376 = vmatprep.subr.bf16.mxu1 %v6750_v39  ;;  %6382 = vmatprep.subr.bf16.mxu0 %v6750_v39  ;;  %v1146_v62 = vld [vmem:[%s8563_s21 + $0x18] sm:$0xff]  ;;  %v1367_v63 = vld [vmem:[%s8563_s21 + $0x22] sm:$0x1f]  ;;  %v5170_v38 = vld [vmem:[%s8563_s21 + $0x29] sm:$0xff] }
 0x18c   : >> { %v1147_v3 = vld [vmem:[%s8563_s21 + $0x20] sm:$0x1f]  ;;  %v8833_v1 = vld [vmem:[%s9800_s3 + $0x28] sm:$0xff] (%p1137_p4)  ;;  %v8838_v2 = vld [vmem:[%s9800_s3 + $0x30] sm:$0xff] (%p1137_p4) }
 0x18d   : >> { %5750 = vmatmul.mubr.msk.f32.vlgmr.msra.gmra.mrb[0].mxu1 %vm333_vm0, %v1150_v42  ;;  %5744 = vmatmul.mubr.msk.f32.vlgmr.msra.gmra.mrb[0].mxu0 %vm333_vm0, %v1148_v44  ;;  %v5160_v42 = vld [vmem:[%s8563_s21 + $0x28] sm:$0xff]  ;;  %v5171_v44 = vld [vmem:[%s8563_s21 + $0x31] sm:$0xff]  ;;  %v8828_v0 = vld [vmem:[%s9800_s3 + $0x20] sm:$0xff] (%p1137_p4) }
 0x18e   : >> { %6378 = vmatpush3.bf16.msra.mxu1 %v6377_v43  ;;  %5752 = vmatprep.mubr.msk.f32.mxu1 %vm6751_vm3, %v6752_v41  ;;  %v6401_v43 = vpack.c.bf16 %v8470_v22, %v8460_v21  ;;  %v8843_v4 = vld [vmem:[%s9800_s3 + $0x38] sm:$0xff] (%p1137_p4)  ;;  %v8848_v5 = vld [vmem:[%s9800_s3 + $0x40] sm:$0xff] (%p1137_p4)  ;;  %v8853_v6 = vld [vmem:[%s9800_s3 + $0x48] sm:$0xff] (%p1137_p4) }
 0x18f   : >> { %6379 = vmatprep.subr.bf16.mxu1 %v6750_v39  ;;  %6384 = vmatpush3.bf16.msra.mxu0 %v6383_v45  ;;  %v6410_v45 = vpack.c.bf16 %v8500_v28, %v8495_v27  ;;  %v8858_v7 = vld [vmem:[%s9800_s3 + $0x50] sm:$0xff] (%p1137_p4)  ;;  %v8863_v8 = vld [vmem:[%s9800_s3 + $0x58] sm:$0xff] (%p1137_p4)  ;;  %v8868_v9 = vld [vmem:[%s9800_s3 + $0x60] sm:$0xff] (%p1137_p4) }
 0x190   : >> { %5746 = vmatprep.mubr.msk.f32.mxu0 %vm6751_vm3, %v6752_v41  ;;  %6385 = vmatprep.subr.bf16.mxu0 %v6750_v39  ;;  %v8873_v10 = vld [vmem:[%s9800_s3 + $0x68] sm:$0xff] (%p1137_p4)  ;;  %v8878_v11 = vld [vmem:[%s9800_s3 + $0x70] sm:$0xff] (%p1137_p4)  ;;  %v8883_v12 = vld [vmem:[%s9800_s3 + $0x78] sm:$0xff] (%p1137_p4) }
 0x191   : >> { %5753 = vmatmul.mubr.msk.f32.gmra.mrb[2].mxu1 %vm333_vm0, %v1151_v46  ;;  %5747 = vmatmul.mubr.msk.f32.gmra.mrb[2].mxu0 %vm333_vm0, %v1149_v48  ;;  %v5161_v46 = vld [vmem:[%s8563_s21 + $0x30] sm:$0xff]  ;;  %v5172_v48 = vld [vmem:[%s8563_s21 + $0x39] sm:$0xff]  ;;  %v8893_v14 = vld [vmem:[%s9800_s3 + $0x88] sm:$0xff] (%p1137_p4) }
 0x192   : >> { %5755 = vmatprep.mubr.msk.f32.mxu1 %vm6751_vm3, %v6752_v41  ;;  %6381 = vmatpush3.bf16.msra.mxu1 %v6380_v47  ;;  %v6404_v47 = vpack.c.bf16 %v8480_v24, %v8475_v23  ;;  %v8888_v13 = vld [vmem:[%s9800_s3 + $0x80] sm:$0xff] (%p1137_p4)  ;;  %v8898_v15 = vld [vmem:[%s9800_s3 + $0x90] sm:$0xff] (%p1137_p4)  ;;  %v8903_v16 = vld [vmem:[%s9800_s3 + $0x98] sm:$0xff] (%p1137_p4) }
 0x193   : >> { %6387 = vmatpush3.bf16.msra.mxu0 %v6386_v49  ;;  %6388 = vmatprep.subr.bf16.mxu1 %v6750_v39  ;;  %v5162_v49 = vld [vmem:[%s8563_s21 + $0x38] sm:$0xff]  ;;  %v8908_v17 = vld [vmem:[%s9800_s3 + $0xa0] sm:$0xff] (%p1137_p4)  ;;  %v8913_v18 = vld [vmem:[%s9800_s3 + $0xa8] sm:$0xff] (%p1137_p4) }
 0x194   : >> { %5789 = vmatprep.mubr.msk.f32.mxu0 %vm6751_vm3, %v6752_v41  ;;  %6394 = vmatprep.subr.bf16.mxu0 %v6750_v39  ;;  %v8918_v19 = vld [vmem:[%s9800_s3 + $0xb0] sm:$0xff] (%p1137_p4)  ;;  %v8923_v20 = vld [vmem:[%s9800_s3 + $0xb8] sm:$0xff] (%p1137_p4)  ;;  %v8928_v21 = vld [vmem:[%s9800_s3 + $0xc0] sm:$0xff] (%p1137_p4) }
 0x195   : >> { %5756 = vmatmul.mubr.msk.f32.gmra.mrb[4].mxu1 %vm333_vm0, %v1152_v50  ;;  %v5173_v50 = vld [vmem:[%s8563_s21 + $0x41] sm:$0xff]  ;;  %v8938_v23 = vld [vmem:[%s9800_s3 + $0xd0] sm:$0xff] (%p1137_p4)  ;;  %v8943_v24 = vld [vmem:[%s9800_s3 + $0xd8] sm:$0xff] (%p1137_p4) }
 0x196   : >> { %5766 = vmatprep.mubr.msk.f32.mxu1 %vm6751_vm3, %v6752_v41  ;;  %5790 = vmatmul.mubr.msk.f32.vlgmr.msra.gmra.mrb[4].mxu0 %vm333_vm0, %v1363_v51  ;;  %v5163_v51 = vld [vmem:[%s8563_s21 + $0x40] sm:$0xff]  ;;  %v8933_v22 = vld [vmem:[%s9800_s3 + $0xc8] sm:$0xff] (%p1137_p4)  ;;  %v8958_v27 = vld [vmem:[%s9800_s3 + $0xf0] sm:$0xff] (%p1137_p4) }
 0x197   : >> { %6396 = vmatpush3.bf16.msra.mxu0 %v6395_v52  ;;  %5792 = vmatprep.mubr.msk.f32.mxu0 %vm6751_vm3, %v6752_v41  ;;  %v5174_v52 = vld [vmem:[%s8563_s21 + $0x49] sm:$0x1f]  ;;  %v8948_v25 = vld [vmem:[%s9800_s3 + $0xe0] sm:$0xff] (%p1137_p4)  ;;  %v8963_v28 = vld [vmem:[%s9800_s3 + $0xf8] sm:$0xff] (%p1137_p4) }
 0x198   : >> { %6397 = vmatprep.subr.bf16.mxu0 %v6750_v39  ;;  %v8953_v26 = vld [vmem:[%s9800_s3 + $0xe8] sm:$0xff] (%p1137_p4) }
 0x199   : >> { %5767 = vmatmul.mubr.msk.f32.vlgmr.msra.gmra.mrb[6].mxu1 %vm333_vm0, %v1143_v53  ;;  %v5164_v53 = vld [vmem:[%s8563_s21 + $0x48] sm:$0x1f] }
 0x19a   : >> { %6390 = vmatpush3.bf16.msra.mxu1 %v6389_v54  ;;  %5769 = vmatprep.mubr.msk.f32.mxu1 %vm6751_vm3, %v6752_v41  ;;  %v5190_v54 = vld [vmem:[%s8563_s21 + $0x50] sm:$0xff] }
 0x19b   : >> { %5793 = vmatmul.mubr.msk.f32.gmra.mrb[6].mxu0 %vm333_vm0, %v1364_v55  ;;  %6391 = vmatprep.subr.bf16.mxu1 %v6750_v39  ;;  %v6419_v55 = vpack.c.bf16 %v8530_v34, %v8525_v33  ;;  %v8988_v33 = vld [vmem:[%s9801_s4] ss:$0 sm:$0xff] (%p1137_p4) }
 0x19c   : >> { %5795 = vmatprep.mubr.msk.f32.mxu0 %vm6751_vm3, %v6752_v41  ;;  %6399 = vmatpush3.bf16.msra.mxu0 %v6398_v56  ;;  %v5180_v56 = vld [vmem:[%s8563_s21 + $0x2a] sm:$0xff] }
 0x19d   : >> { %5770 = vmatmul.mubr.msk.f32.gmra.mrb[8].mxu1 %vm333_vm0, %v1144_v57  ;;  %6406 = vmatprep.subr.bf16.mxu0 %v6750_v39  ;;  %v6413_v57 = vpack.c.bf16 %v8510_v30, %v8505_v29  ;;  %v8968_v29 = vld [vmem:[%s9800_s3 + $0x100] sm:$0xff] (%p1137_p4)  ;;  %v8973_v30 = vld [vmem:[%s9800_s3 + $0x108] sm:$0xff] (%p1137_p4) }
 0x19e   : >> { %5772 = vmatprep.mubr.msk.f32.mxu1 %vm6751_vm3, %v6752_v41  ;;  %6393 = vmatpush3.bf16.msra.mxu1 %v6392_v58  ;;  %v5191_v58 = vld [vmem:[%s8563_s21 + $0x58] sm:$0xff] }
 0x19f   : >> { %5796 = vmatmul.mubr.msk.f32.gmra.mrb[8].mxu0 %vm333_vm0, %v1365_v59  ;;  %6400 = vmatprep.subr.bf16.mxu1 %v6750_v39  ;;  %v6422_v59 = vpack.c.bf16 %v8540_v36, %v8535_v35 }
 0x1a0   : >> { %5798 = vmatprep.mubr.msk.f32.mxu0 %vm6751_vm3, %v6752_v41 }
 0x1a1   : >> { %5773 = vmatmul.mubr.msk.f32.gmra.mrb[10].mxu1 %vm333_vm0, %v1145_v60  ;;  %v5181_v60 = vld [vmem:[%s8563_s21 + $0x32] sm:$0xff] }
 0x1a2   : >> { %5775 = vmatprep.mubr.msk.f32.mxu1 %vm6751_vm3, %v6752_v41 }
 0x1a3   : >> { %5799 = vmatmul.mubr.msk.f32.gmra.mrb[10].mxu0 %vm333_vm0, %v1366_v61  ;;  %v6416_v61 = vpack.c.bf16 %v8520_v32, %v8515_v31  ;;  %v8978_v31 = vld [vmem:[%s9800_s3 + $0x110] sm:$0xff] (%p1137_p4)  ;;  %v8983_v32 = vld [vmem:[%s9800_s3 + $0x118] sm:$0xff] (%p1137_p4) }
 0x1a4   : >> { %5801 = vmatprep.mubr.msk.f32.mxu0 %vm6751_vm3, %v6752_v41 }
 0x1a5   : >> { %5776 = vmatmul.mubr.msk.f32.gmra.mrb[12].mxu1 %vm333_vm0, %v1146_v62  ;;  %v5192_v62 = vld [vmem:[%s8563_s21 + $0x60] sm:$0xff] }
 0x1a6   : >> { %5778 = vmatprep.mubr.msk.f32.mxu1 %vm6751_vm3, %v6752_v41 }
 0x1a7   : >> { %5802 = vmatmul.mubr.msk.f32.gmra.mrb[12].mxu0 %vm333_vm0, %v1367_v63  ;;  %v5182_v63 = vld [vmem:[%s8563_s21 + $0x3a] sm:$0xff] }
 0x1a8   : >> { %5835 = vmatprep.mubr.msk.f32.mxu0 %vm6751_vm3, %v6752_v41 }
 0x1a9   : >> { %5779 = vmatmul.mubr.msk.f32.gmra.mrb[14].mxu1 %vm333_vm0, %v1147_v3  ;;  %v5183_v3 = vld [vmem:[%s8563_s21 + $0x42] sm:$0xff] }
 0x1aa   : >> { %5812 = vmatprep.mubr.msk.f32.mxu1 %vm6751_vm3, %v6752_v41 }
 0x1ab   : >> { %5836 = vmatmul.mubr.msk.f32.vlgmr.msra.gmra.mrb[14].mxu0 %vm333_vm0, %v5170_v38  ;;  %v5194_v38 = vld [vmem:[%s8563_s21 + $0x70] sm:$0x1f] }
 0x1ac   : >> { %6408 = vmatpush3.bf16.msra.mxu0 %v6407_v40  ;;  %5838 = vmatprep.mubr.msk.f32.mxu0 %vm6751_vm3, %v6752_v41  ;;  %v5184_v40 = vld [vmem:[%s8563_s21 + $0x4a] sm:$0x1f] }
 0x1ad   : >> { %5813 = vmatmul.mubr.msk.f32.vlgmr.msra.gmra.mrb[16].mxu1 %vm333_vm0, %v5160_v42  ;;  %6409 = vmatprep.subr.bf16.mxu0 %v6750_v39  ;;  %v5210_v42 = vld [vmem:[%s8563_s21 + $0x52] sm:$0xff] }
 0x1ae   : >> { %6402 = vmatpush3.bf16.msra.mxu1 %v6401_v43  ;;  %5815 = vmatprep.mubr.msk.f32.mxu1 %vm6751_vm3, %v6752_v41  ;;  %v5200_v43 = vld [vmem:[%s8563_s21 + $0x51] sm:$0xff] }
 0x1af   : >> { %5839 = vmatmul.mubr.msk.f32.gmra.mrb[16].mxu0 %vm333_vm0, %v5171_v44  ;;  %6403 = vmatprep.subr.bf16.mxu1 %v6750_v39  ;;  %v5211_v44 = vld [vmem:[%s8563_s21 + $0x5a] sm:$0xff] }
 0x1b0   : >> { %5841 = vmatprep.mubr.msk.f32.mxu0 %vm6751_vm3, %v6752_v41  ;;  %6411 = vmatpush3.bf16.msra.mxu0 %v6410_v45  ;;  %v5201_v45 = vld [vmem:[%s8563_s21 + $0x59] sm:$0xff] }
 0x1b1   : >> { %5816 = vmatmul.mubr.msk.f32.gmra.mrb[18].mxu1 %vm333_vm0, %v5161_v46  ;;  %6418 = vmatprep.subr.bf16.mxu0 %v6750_v39  ;;  %v5212_v46 = vld [vmem:[%s8563_s21 + $0x62] sm:$0xff] }
 0x1b2   : >> { %5818 = vmatprep.mubr.msk.f32.mxu1 %vm6751_vm3, %v6752_v41  ;;  %6405 = vmatpush3.bf16.msra.mxu1 %v6404_v47  ;;  %v5202_v47 = vld [vmem:[%s8563_s21 + $0x61] sm:$0xff] }
 0x1b3   : >> { %5842 = vmatmul.mubr.msk.f32.gmra.mrb[18].mxu0 %vm333_vm0, %v5172_v48  ;;  %6412 = vmatprep.subr.bf16.mxu1 %v6750_v39  ;;  %v5213_v48 = vld [vmem:[%s8563_s21 + $0x6a] sm:$0xff] }
 0x1b4   : >> { %5844 = vmatprep.mubr.msk.f32.mxu0 %vm6751_vm3, %v6752_v41 }
 0x1b5   : >> { %5819 = vmatmul.mubr.msk.f32.gmra.mrb[20].mxu1 %vm333_vm0, %v5162_v49  ;;  %v5203_v49 = vld [vmem:[%s8563_s21 + $0x69] sm:$0xff] }
 0x1b6   : >> { %5821 = vmatprep.mubr.msk.f32.mxu1 %vm6751_vm3, %v6752_v41 }
 0x1b7   : >> { %5845 = vmatmul.mubr.msk.f32.gmra.mrb[20].mxu0 %vm333_vm0, %v5173_v50  ;;  %v5214_v50 = vld [vmem:[%s8563_s21 + $0x72] sm:$0x1f] }
 0x1b8   : >> { %5847 = vmatprep.mubr.msk.f32.mxu0 %vm6751_vm3, %v6752_v41 }
 0x1b9   : >> { %5822 = vmatmul.mubr.msk.f32.gmra.mrb[22].mxu1 %vm333_vm0, %v5163_v51  ;;  %v5204_v51 = vld [vmem:[%s8563_s21 + $0x71] sm:$0x1f] }
 0x1ba   : >> { %5824 = vmatprep.mubr.msk.f32.mxu1 %vm6751_vm3, %v6752_v41 }
 0x1bb   : >> { %5848 = vmatmul.mubr.msk.f32.gmra.mrb[22].mxu0 %vm333_vm0, %v5174_v52 }
 0x1bc   : >> { %5881 = vmatprep.mubr.msk.f32.mxu0 %vm6751_vm3, %v6752_v41 }
 0x1bd   : >> { %5825 = vmatmul.mubr.msk.f32.gmra.mrb[24].mxu1 %vm333_vm0, %v5164_v53 }
 0x1be   : >> { %5858 = vmatprep.mubr.msk.f32.mxu1 %vm6751_vm3, %v6752_v41 }
 0x1bf   : >> { %5882 = vmatmul.mubr.msk.f32.vlgmr.msra.gmra.mrb[24].mxu0 %vm333_vm0, %v5190_v54 }
 0x1c0   : >> { %6420 = vmatpush3.bf16.msra.mxu0 %v6419_v55  ;;  %5884 = vmatprep.mubr.msk.f32.mxu0 %vm6751_vm3, %v6752_v41 }
 0x1c1   : >> { %5859 = vmatmul.mubr.msk.f32.vlgmr.msra.gmra.mrb[26].mxu1 %vm333_vm0, %v5180_v56  ;;  %6421 = vmatprep.subr.bf16.mxu0 %v6750_v39 }
 0x1c2   : >> { %6414 = vmatpush3.bf16.msra.mxu1 %v6413_v57  ;;  %5861 = vmatprep.mubr.msk.f32.mxu1 %vm6751_vm3, %v6752_v41 }
 0x1c3   : >> { %5885 = vmatmul.mubr.msk.f32.gmra.mrb[26].mxu0 %vm333_vm0, %v5191_v58  ;;  %6415 = vmatprep.subr.bf16.mxu1 %v6750_v39  ;;  %v5193_v39 = vld [vmem:[%s8563_s21 + $0x68] sm:$0xff] }
 0x1c4   : >> { %5887 = vmatprep.mubr.msk.f32.mxu0 %vm6751_vm3, %v6752_v41  ;;  %6423 = vmatpush3.bf16.msra.mxu0 %v6422_v59 }
 0x1c5   : >> { %5862 = vmatmul.mubr.msk.f32.gmra.mrb[28].mxu1 %vm333_vm0, %v5181_v60 }
 0x1c6   : >> { %5864 = vmatprep.mubr.msk.f32.mxu1 %vm6751_vm3, %v6752_v41  ;;  %6417 = vmatpush3.bf16.msra.mxu1 %v6416_v61 }
 0x1c7   : >> { %5888 = vmatmul.mubr.msk.f32.gmra.mrb[28].mxu0 %vm333_vm0, %v5192_v62 }
 0x1c8   : >> { %5890 = vmatprep.mubr.msk.f32.mxu0 %vm6751_vm3, %v6752_v41 }
 0x1c9   : >> { %5865 = vmatmul.mubr.msk.f32.gmra.mrb[30].mxu1 %vm333_vm0, %v5182_v63 }
 0x1ca   : >> { %5867 = vmatprep.mubr.msk.f32.mxu1 %vm6751_vm3, %v6752_v41 }
 0x1cb   : >> { %5891 = vmatmul.mubr.msk.f32.gmra.mrb[30].mxu0 %vm333_vm0, %v5193_v39 }
 0x1cc   : >> { %5893 = vmatprep.mubr.msk.f32.mxu0 %vm6751_vm3, %v6752_v41 }
 0x1cd   : >> { %5868 = vmatmul.mubr.msk.f32.gmra.mrb[32].mxu1 %vm333_vm0, %v5183_v3 }
 0x1ce   : >> { %5870 = vmatprep.mubr.msk.f32.mxu1 %vm6751_vm3, %v6752_v41 }
 0x1cf   : >> { %5894 = vmatmul.mubr.msk.f32.gmra.mrb[32].mxu0 %vm333_vm0, %v5194_v38 }
 0x1d0   : >> { %5927 = vmatprep.mubr.msk.f32.mxu0 %vm6751_vm3, %v6752_v41 }
 0x1d1   : >> { %5871 = vmatmul.mubr.msk.f32.gmra.mrb[34].mxu1 %vm333_vm0, %v5184_v40 }
 0x1d2   : >> { %5904 = vmatprep.mubr.msk.f32.mxu1 %vm6751_vm3, %v6752_v41 }
 0x1d3   : >> { %5928 = vmatmul.mubr.msk.f32.vlgmr.msra.gmra.mrb[34].mxu0 %vm333_vm0, %v5210_v42 }
 0x1d4   : >> { %5930 = vmatprep.mubr.msk.f32.mxu0 %vm6751_vm3, %v6752_v41 }
 0x1d5   : >> { %5905 = vmatmul.mubr.msk.f32.vlgmr.msra.gmra.mrb[36].mxu1 %vm333_vm0, %v5200_v43 }
 0x1d6   : >> { %5907 = vmatprep.mubr.msk.f32.mxu1 %vm6751_vm3, %v6752_v41 }
 0x1d7   : >> { %5931 = vmatmul.mubr.msk.f32.gmra.mrb[36].mxu0 %vm333_vm0, %v5211_v44 }
 0x1d8   : >> { %5933 = vmatprep.mubr.msk.f32.mxu0 %vm6751_vm3, %v6752_v41 }
 0x1d9   : >> { %5908 = vmatmul.mubr.msk.f32.gmra.mrb[38].mxu1 %vm333_vm0, %v5201_v45 }
 0x1da   : >> { %5910 = vmatprep.mubr.msk.f32.mxu1 %vm6751_vm3, %v6752_v41 }
 0x1db   : >> { %5934 = vmatmul.mubr.msk.f32.gmra.mrb[38].mxu0 %vm333_vm0, %v5212_v46 }
 0x1dc   : >> { %5936 = vmatprep.mubr.msk.f32.mxu0 %vm6751_vm3, %v6752_v41 }
 0x1dd   : >> { %5911 = vmatmul.mubr.msk.f32.gmra.mrb[40].mxu1 %vm333_vm0, %v5202_v47 }
 0x1de   : >> { %5913 = vmatprep.mubr.msk.f32.mxu1 %vm6751_vm3, %v6752_v41 }
 0x1df   : >> { %5937 = vmatmul.mubr.msk.f32.gmra.mrb[40].mxu0 %vm333_vm0, %v5213_v48 }
 0x1e0   : >> { %5939 = vmatprep.mubr.msk.f32.mxu0 %vm6751_vm3, %v6752_v41 }
 0x1e1   : >> { %5914 = vmatmul.mubr.msk.f32.gmra.mrb[42].mxu1 %vm333_vm0, %v5203_v49 }
 0x1e2   : >> { %5916 = vmatprep.mubr.msk.f32.mxu1 %vm6751_vm3, %v6752_v41 }
 0x1e3   : >> { %5940 = vmatmul.mubr.msk.f32.gmra.mrb[42].mxu0 %vm333_vm0, %v5214_v50 }
 0x1e5   : >> { %5917 = vmatmul.mubr.msk.f32.gmra.mrb[44].mxu1 %vm333_vm0, %v5204_v51 }
 0x260   : >> { %v1244_v52 = vpop.f32.mrb[0].mxu1  ;;  %v1234_v53 = vpop.f32.mrb[0].mxu0 }
 0x261   : >> { %v5751_v54 = vpop.f32.mrb[1].mxu1  ;;  %v5745_v55 = vpop.f32.mrb[1].mxu0 }
 0x264   : >> { %v1249_v56 = vpop.f32.mrb[2].mxu1  ;;  %v1239_v57 = vpop.f32.mrb[2].mxu0 }
 0x265   : >> { %v5754_v58 = vpop.f32.mrb[3].mxu1  ;;  %v5748_v59 = vpop.f32.mrb[3].mxu0 }
 0x268   : >> { %v1254_v60 = vpop.f32.mrb[4].mxu1 }
 0x269   : >> { %v5757_v61 = vpop.f32.mrb[5].mxu1  ;;  %v1449_v62 = vpop.f32.mrb[4].mxu0 }
 0x26a   : >> { %v5791_v63 = vpop.f32.mrb[5].mxu0 }
 0x26c   : >> { %v1339_v39 = vpop.f32.mrb[6].mxu1 }
 0x26d   : >> { %v1340_v3 = vadd.f32 %v1339_v39, %v1234_v53  ;;  %v5768_v41 = vpop.f32.mrb[7].mxu1 }
 0x26e   : >> { %v1454_v38 = vpop.f32.mrb[6].mxu0 }
 0x26f   : >> { %v1473_v40 = vadd.f32 %v1449_v62, %v1340_v3  ;;  %v5794_v42 = vpop.f32.mrb[7].mxu0 }
 0x270   : >> { %v1344_v43 = vpop.f32.mrb[8].mxu1 }
 0x271   : >> { %v1345_v44 = vadd.f32 %v1344_v43, %v1239_v57  ;;  %v5771_v45 = vpop.f32.mrb[9].mxu1 }
 0x272   : >> { %v1459_v46 = vpop.f32.mrb[8].mxu0 }
 0x273   : >> { %v1474_v47 = vadd.f32 %v1454_v38, %v1345_v44  ;;  %v5797_v48 = vpop.f32.mrb[9].mxu0 }
 0x274   : >> { %v1349_v49 = vpop.f32.mrb[10].mxu1 }
 0x275   : >> { %v1350_v50 = vadd.f32 %v1349_v49, %v1244_v52  ;;  %v5774_v51 = vpop.f32.mrb[11].mxu1 }
 0x276   : >> { %v1464_v54 = vpop.f32.mrb[10].mxu0 }
 0x277   : >> { %v1475_v55 = vadd.f32 %v1459_v46, %v1350_v50  ;;  %v5800_v58 = vpop.f32.mrb[11].mxu0 }
 0x278   : >> { %v1354_v59 = vpop.f32.mrb[12].mxu1 }
 0x279   : >> { %v1355_v61 = vadd.f32 %v1354_v59, %v1249_v56  ;;  %v5777_v63 = vpop.f32.mrb[13].mxu1 }
 0x27a   : >> { %v1469_v53 = vpop.f32.mrb[12].mxu0 }
 0x27b   : >> { %v1476_v39 = vadd.f32 %v1464_v54, %v1355_v61  ;;  %v5803_v41 = vpop.f32.mrb[13].mxu0 }
 0x27c   : >> { %v1359_v62 = vpop.f32.mrb[14].mxu1 }
 0x27d   : >> { %v1360_v3 = vadd.f32 %v1359_v62, %v1254_v60  ;;  %v5780_v42 = vpop.f32.mrb[15].mxu1 }
 0x27e   : >> { %v1682_v57 = vpop.f32.mrb[14].mxu0 }
 0x27f   : >> { %v1477_v43 = vadd.f32 %v1469_v53, %v1360_v3  ;;  %v5837_v45 = vpop.f32.mrb[15].mxu0 }
 0x280   : >> { %v1567_v38 = vpop.f32.mrb[16].mxu1 }
 0x281   : >> { %v1591_v44 = vadd.f32 %v1567_v38, %v1473_v40  ;;  %v5814_v48 = vpop.f32.mrb[17].mxu1 }
 0x282   : >> { %v1687_v52 = vpop.f32.mrb[16].mxu0 }
 0x283   : >> { %v1706_v49 = vadd.f32 %v1682_v57, %v1591_v44  ;;  %v5840_v51 = vpop.f32.mrb[17].mxu0 }
 0x284   : >> { %v1572_v46 = vpop.f32.mrb[18].mxu1 }
 0x285   : >> { %v1592_v50 = vadd.f32 %v1572_v46, %v1474_v47  ;;  %v5817_v58 = vpop.f32.mrb[19].mxu1 }
 0x286   : >> { %v1692_v56 = vpop.f32.mrb[18].mxu0 }
 0x287   : >> { %v1707_v59 = vadd.f32 %v1687_v52, %v1592_v50  ;;  %v5843_v63 = vpop.f32.mrb[19].mxu0 }
 0x288   : >> { %v1577_v54 = vpop.f32.mrb[20].mxu1 }
 0x289   : >> { %v1593_v61 = vadd.f32 %v1577_v54, %v1475_v55  ;;  %v5820_v41 = vpop.f32.mrb[21].mxu1 }
 0x28a   : >> { %v1697_v60 = vpop.f32.mrb[20].mxu0 }
 0x28b   : >> { %v1708_v62 = vadd.f32 %v1692_v56, %v1593_v61  ;;  %v5846_v42 = vpop.f32.mrb[21].mxu0 }
 0x28c   : >> { %v1582_v53 = vpop.f32.mrb[22].mxu1 }
 0x28d   : >> { %v1594_v3 = vadd.f32 %v1582_v53, %v1476_v39  ;;  %v5823_v45 = vpop.f32.mrb[23].mxu1 }
 0x28e   : >> { %v1702_v40 = vpop.f32.mrb[22].mxu0 }
 0x28f   : >> { %v1709_v38 = vadd.f32 %v1697_v60, %v1594_v3  ;;  %v5849_v48 = vpop.f32.mrb[23].mxu0 }
 0x290   : >> { %v1587_v57 = vpop.f32.mrb[24].mxu1 }
 0x291   : >> { %v1595_v44 = vadd.f32 %v1587_v57, %v1477_v43  ;;  %v5826_v51 = vpop.f32.mrb[25].mxu1 }
 0x292   : >> { %v1915_v47 = vpop.f32.mrb[24].mxu0 }
 0x293   : >> { %v1710_v46 = vadd.f32 %v1702_v40, %v1595_v44  ;;  %v5883_v58 = vpop.f32.mrb[25].mxu0 }
 0x294   : >> { %v1797_v52 = vpop.f32.mrb[26].mxu1 }
 0x295   : >> { %v1821_v50 = vadd.f32 %v1797_v52, %v1706_v49  ;;  %v5860_v63 = vpop.f32.mrb[27].mxu1 }
 0x296   : >> { %v1920_v55 = vpop.f32.mrb[26].mxu0 }
 0x297   : >> { %v1939_v54 = vadd.f32 %v1915_v47, %v1821_v50  ;;  %v5886_v41 = vpop.f32.mrb[27].mxu0 }
 0x298   : >> { %v1802_v56 = vpop.f32.mrb[28].mxu1 }
 0x299   : >> { %v1822_v61 = vadd.f32 %v1802_v56, %v1707_v59  ;;  %v5863_v42 = vpop.f32.mrb[29].mxu1 }
 0x29a   : >> { %v1925_v39 = vpop.f32.mrb[28].mxu0 }
 0x29b   : >> { %v1940_v53 = vadd.f32 %v1920_v55, %v1822_v61  ;;  %v5889_v45 = vpop.f32.mrb[29].mxu0 }
 0x29c   : >> { %v1807_v60 = vpop.f32.mrb[30].mxu1 }
 0x29d   : >> { %v1823_v3 = vadd.f32 %v1807_v60, %v1708_v62  ;;  %v5866_v48 = vpop.f32.mrb[31].mxu1 }
 0x29e   : >> { %v1930_v43 = vpop.f32.mrb[30].mxu0 }
 0x29f   : >> { %v1941_v57 = vadd.f32 %v1925_v39, %v1823_v3  ;;  %v5892_v51 = vpop.f32.mrb[31].mxu0 }
 0x2a0   : >> { %v1812_v40 = vpop.f32.mrb[32].mxu1 }
 0x2a1   : >> { %v1824_v44 = vadd.f32 %v1812_v40, %v1709_v38  ;;  %v5869_v49 = vpop.f32.mrb[33].mxu1 }
 0x2a2   : >> { %v1935_v58 = vpop.f32.mrb[32].mxu0 }
 0x2a3   : >> { %v1942_v52 = vadd.f32 %v1930_v43, %v1824_v44  ;;  %v5895_v47 = vpop.f32.mrb[33].mxu0 }
 0x2a4   : >> { %v1817_v50 = vpop.f32.mrb[34].mxu1 }
 0x2a5   : >> { %v1825_v63 = vadd.f32 %v1817_v50, %v1710_v46  ;;  %v5872_v59 = vpop.f32.mrb[35].mxu1 }
 0x2a6   : >> { %v2145_v41 = vpop.f32.mrb[34].mxu0 }
 0x2a7   : >> { %v1943_v56 = vadd.f32 %v1935_v58, %v1825_v63  ;;  %v5929_v55 = vpop.f32.mrb[35].mxu0 }
 0x2a8   : >> { %v2030_v61 = vpop.f32.mrb[36].mxu1 }
 0x2a9   : >> { %v2054_v42 = vadd.f32 %v2030_v61, %v1939_v54  ;;  %v5906_v62 = vpop.f32.mrb[37].mxu1 }
 0x2aa   : >> { %v2150_v45 = vpop.f32.mrb[36].mxu0 }
 0x2ab   : >> { %v2169_v39 = vadd.f32 %v2145_v41, %v2054_v42  ;;  %v5932_v60 = vpop.f32.mrb[37].mxu0 }
 0x2ac   : >> { %v2035_v3 = vpop.f32.mrb[38].mxu1 }
 0x2ad   : >> { %v2180_v38 = vadd.f32 %v8545_v37, %v2169_v39  ;;  %v2055_v48 = vadd.f32 %v2035_v3, %v1940_v53  ;;  %v5909_v51 = vpop.f32.mrb[39].mxu1 }
 0x2ae   : >> { %v2155_v43 = vpop.f32.mrb[38].mxu0 }
 0x2af   : >> { %v2185_v40 = vmax.f32 %v2180_v38, 0.0  ;;  %v2170_v44 = vadd.f32 %v2150_v45, %v2055_v48  ;;  %v5935_v46 = vpop.f32.mrb[39].mxu0 }
 0x2b0   : >> { %v2040_v49 = vpop.f32.mrb[40].mxu1  ;;  %v8818_v46 = vld [vmem:[%s9800_s3 + $0x10] sm:$0xff] (%p1137_p4) }
 0x2b1   : >> { %5221 = vst.msk [vmem:[%s5063_s23 + $0x62] sm:$0xff] %vm333_vm0, %v2185_v40  ;;  %v2181_v54 = vadd.f32 %v8545_v37, %v2170_v44  ;;  %v2056_v58 = vadd.f32 %v2040_v49, %v1941_v57  ;;  %v5912_v47 = vpop.f32.mrb[41].mxu1  ;;  %v8813_v44 = vld [vmem:[%s9800_s3 + $0x8] sm:$0xff] (%p1137_p4)  ;;  %v8823_v49 = vld [vmem:[%s9800_s3 + $0x18] sm:$0xff] (%p1137_p4) }
 0x2b2   : >> { %v2160_v50 = vpop.f32.mrb[40].mxu0 }
 0x2b3   : >> { %v2186_v63 = vmax.f32 %v2181_v54, 0.0  ;;  %v2171_v59 = vadd.f32 %v2155_v43, %v2056_v58  ;;  %v5938_v41 = vpop.f32.mrb[41].mxu0 }
 0x2b4   : >> { %v2045_v55 = vpop.f32.mrb[42].mxu1 }
 0x2b5   : >> { %5222 = vst.msk [vmem:[%s5063_s23 + $0x6a] sm:$0xff] %vm333_vm0, %v2186_v63  ;;  %v2182_v53 = vadd.f32 %v8545_v37, %v2171_v59  ;;  %v2057_v61 = vadd.f32 %v2045_v55, %v1942_v52  ;;  %v5915_v42 = vpop.f32.mrb[43].mxu1 }
 0x2b6   : >> { %v2165_v62 = vpop.f32.mrb[42].mxu0 }
 0x2b7   : >> { %v2187_v45 = vmax.f32 %v2182_v53, 0.0  ;;  %v2172_v39 = vadd.f32 %v2160_v50, %v2057_v61  ;;  %v5941_v60 = vpop.f32.mrb[43].mxu0 }
 0x2b8   : >> { %v2050_v3 = vpop.f32.mrb[44].mxu1 }
 0x2b9   : >> { %5223 = vst.msk [vmem:[%s5063_s23 + $0x72] sm:$0xff] %vm333_vm0, %v2187_v45  ;;  %v2183_v57 = vadd.f32 %v8545_v37, %v2172_v39  ;;  %v2058_v38 = vadd.f32 %v2050_v3, %v1943_v56  ;;  %v5918_v48 = vpop.f32.mrb[45].mxu1  ;;  %v8808_v56 = vld [vmem:[%s9800_s3] sm:$0xff] (%p1137_p4) }
 0x2bb   : >> { %v2188_v51 = vmax.f32 %v2183_v57, 0.0  ;;  %v2173_v43 = vadd.f32 %v2165_v62, %v2058_v38  ;;  %1139 = sbr.rel (!%p1137_p4) target bundleno = 388 (0x184), region = 129 }
 0x2bd   : >> { %5224 = vst.msk [vmem:[%s5063_s23 + $0x7a] sm:$0xff] %vm333_vm0, %v2188_v51  ;;  %v2184_v40 = vadd.f32 %v8545_v37, %v2173_v43 }
 0x2bf   : >> { %v2189_v52 = vmax.f32 %v2184_v40, 0.0 }
 0x2c1   : >> { %5225 = vst.msk [vmem:[%s5063_s23 + $0x82] sm:$0x1f] %vm2196_vm4, %v2189_v52 }
 0x2c2 LB: >> { %v6425_v34 = vpack.c.bf16 %v8833_v1, %v8828_v0  ;;  %v6753_v35 = vmov 0.0|0.0   ;;  %v6428_v36 = vpack.c.bf16 %v8843_v4, %v8838_v2  ;;  %s2241_s23 = smul.u32 48, %s6739_s22  ;;  %vm6754_vm5 = vmmov 0   ;;  %s2240_s22 = sadd.s32 1, %s6739_s22   ;;  %s6739_s22 = sphi %s8990_s22, %s2240_s22  }
 0x2c3   : >> { %6586 = vmatprep.subr.bf16.mxu1 %v6753_v35  ;;  %6424 = vmatprep.subr.bf16.mxu0 %v6753_v35  ;;  %v6755_v37 = vmov 0.0   ;;  %v6431_v58 = vpack.c.bf16 %v8813_v44, %v8808_v56  ;;  %v6437_v50 = vpack.c.bf16 %v8853_v6, %v8848_v5  ;;  %v6434_v59 = vpack.c.bf16 %v8823_v49, %v8818_v46  ;;  %p2237_p5 = scmp.ge.s32.totalorder %s2240_s22, 39  }
 0x2c4   : >> { %6588 = vmatpush3.bf16.msra.mxu1 %v6425_v34  ;;  %6426 = vmatpush3.bf16.msra.mxu0 %v6425_v34  ;;  %s9010_s25 = scalar_lea.vmem [#allocation2], %s2241_s23  ;;  %v6440_v55 = vpack.c.bf16 %v8863_v8, %v8858_v7  ;;  %v6449_v42 = vpack.c.bf16 %v8893_v14, %v8888_v13  ;;  %v6443_v45 = vpack.c.bf16 %v8873_v10, %v8868_v9  ;;  %s5074_s26 = scalar_lea.vmem [#allocation3], %s2241_s23  ;;  %vm3295_vm6 = vcmask 260096   ;;  %v9273_v56 = vld [vmem:[%s9802_s5 + $0x20] sm:$0xff] (%p2237_p5)  ;;  %v9278_v44 = vld [vmem:[%s9802_s5 + $0x28] sm:$0xff] (%p2237_p5)  ;;  %v9283_v46 = vld [vmem:[%s9802_s5 + $0x30] sm:$0xff] (%p2237_p5) }
 0x2c5   : >> { %6587 = vmatprep.subr.bf16.mxu1 %v6753_v35  ;;  %5956 = vmatprep.mubr.msk.f32.mxu1 %vm6754_vm5, %v6755_v37  ;;  %v6452_v60 = vpack.c.bf16 %v8903_v16, %v8898_v15  ;;  %v6446_v57 = vpack.c.bf16 %v8883_v12, %v8878_v11  ;;  %v9288_v49 = vld [vmem:[%s9802_s5 + $0x38] sm:$0xff] (%p2237_p5)  ;;  %v9293_v0 = vld [vmem:[%s9802_s5 + $0x40] sm:$0xff] (%p2237_p5)  ;;  %v9298_v1 = vld [vmem:[%s9802_s5 + $0x48] sm:$0xff] (%p2237_p5) }
 0x2c6   : >> { %6427 = vmatprep.subr.bf16.mxu0 %v6753_v35  ;;  %5950 = vmatprep.mubr.msk.f32.mxu0 %vm6754_vm5, %v6755_v37  ;;  %v9303_v2 = vld [vmem:[%s9802_s5 + $0x50] sm:$0xff] (%p2237_p5)  ;;  %v9308_v4 = vld [vmem:[%s9802_s5 + $0x58] sm:$0xff] (%p2237_p5)  ;;  %v9313_v5 = vld [vmem:[%s9802_s5 + $0x60] sm:$0xff] (%p2237_p5) }
 0x2c7   : > { %v9318_v6 = vld [vmem:[%s9802_s5 + $0x68] sm:$0xff] (%p2237_p5)  ;;  %v9323_v7 = vld [vmem:[%s9802_s5 + $0x70] sm:$0xff] (%p2237_p5)  ;;  %v9328_v8 = vld [vmem:[%s9802_s5 + $0x78] sm:$0xff] (%p2237_p5) }
 0x2c8   : >> { %6589 = vmatpush3.bf16.msra.mxu1 %v6428_v36  ;;  %v2250_v54 = vld [vmem:[%s9010_s25 + $0x11] sm:$0xff]  ;;  %6429 = vmatpush3.bf16.msra.mxu0 %v6428_v36  ;;  %v2248_v47 = vld [vmem:[%s9010_s25 + $0x1] sm:$0xff]  ;;  %v2251_v63 = vld [vmem:[%s9010_s25 + $0x19] sm:$0xff]  ;;  %v6461_v36 = vpack.c.bf16 %v8933_v22, %v8928_v21 }
 0x2c9   : >> { %6430 = vmatprep.subr.bf16.mxu1 %v6753_v35  ;;  %6436 = vmatprep.subr.bf16.mxu0 %v6753_v35  ;;  %v2249_v41 = vld [vmem:[%s9010_s25 + $0x9] sm:$0xff]  ;;  %v2252_v53 = vld [vmem:[%s9010_s25 + $0x21] sm:$0x7f]  ;;  %v2465_v38 = vld [vmem:[%s9010_s25 + $0x12] sm:$0xff] }
 0x2ca   : >> { %v2463_v61 = vld [vmem:[%s9010_s25 + $0x2] sm:$0xff]  ;;  %v2464_v39 = vld [vmem:[%s9010_s25 + $0xa] sm:$0xff]  ;;  %v2466_v51 = vld [vmem:[%s9010_s25 + $0x1a] sm:$0xff] }
 0x2cb   : >> { %5957 = vmatmul.mubr.msk.f32.vlgmr.msra.gmra.mrb[0].mxu1 %vm333_vm0, %v2250_v54  ;;  %5951 = vmatmul.mubr.msk.f32.vlgmr.msra.gmra.mrb[0].mxu0 %vm333_vm0, %v2248_v47  ;;  %v2243_v62 = vld [vmem:[%s9010_s25] sm:$0xff]  ;;  %v2244_v3 = vld [vmem:[%s9010_s25 + $0x8] sm:$0xff]  ;;  %v2245_v48 = vld [vmem:[%s9010_s25 + $0x10] sm:$0xff] }
 0x2cc   : >> { %6432 = vmatpush3.bf16.msra.mxu1 %v6431_v58  ;;  %5959 = vmatprep.mubr.msk.f32.mxu1 %vm6754_vm5, %v6755_v37  ;;  %v2246_v43 = vld [vmem:[%s9010_s25 + $0x18] sm:$0xff]  ;;  %v2467_v40 = vld [vmem:[%s9010_s25 + $0x22] sm:$0x7f]  ;;  %v5241_v54 = vld [vmem:[%s9010_s25 + $0x30] sm:$0xff]  ;;  %v6455_v58 = vpack.c.bf16 %v8913_v18, %v8908_v17 }
 0x2cd   : >> { %6433 = vmatprep.subr.bf16.mxu1 %v6753_v35  ;;  %6438 = vmatpush3.bf16.msra.mxu0 %v6437_v50  ;;  %v2247_v52 = vld [vmem:[%s9010_s25 + $0x20] sm:$0x7f]  ;;  %v5251_v34 = vld [vmem:[%s9010_s25 + $0x31] sm:$0xff]  ;;  %v6464_v50 = vpack.c.bf16 %v8943_v24, %v8938_v23  ;;  %v9338_v10 = vld [vmem:[%s9802_s5 + $0x88] sm:$0xff] (%p2237_p5) }
 0x2ce   : >> { %5953 = vmatprep.mubr.msk.f32.mxu0 %vm6754_vm5, %v6755_v37  ;;  %6439 = vmatprep.subr.bf16.mxu0 %v6753_v35  ;;  %v5252_v47 = vld [vmem:[%s9010_s25 + $0x39] sm:$0xff]  ;;  %v9343_v11 = vld [vmem:[%s9802_s5 + $0x90] sm:$0xff] (%p2237_p5)  ;;  %v9358_v14 = vld [vmem:[%s9802_s5 + $0xa8] sm:$0xff] (%p2237_p5) }
 0x2cf   : >> { %5960 = vmatmul.mubr.msk.f32.gmra.mrb[2].mxu1 %vm333_vm0, %v2251_v63  ;;  %5954 = vmatmul.mubr.msk.f32.gmra.mrb[2].mxu0 %vm333_vm0, %v2249_v41  ;;  %v5242_v63 = vld [vmem:[%s9010_s25 + $0x38] sm:$0xff]  ;;  %v5253_v41 = vld [vmem:[%s9010_s25 + $0x41] sm:$0xff]  ;;  %v9363_v15 = vld [vmem:[%s9802_s5 + $0xb0] sm:$0xff] (%p2237_p5) }
 0x2d0   : >> { %5962 = vmatprep.mubr.msk.f32.mxu1 %vm6754_vm5, %v6755_v37  ;;  %6435 = vmatpush3.bf16.msra.mxu1 %v6434_v59  ;;  %v6458_v59 = vpack.c.bf16 %v8923_v20, %v8918_v19  ;;  %v9333_v9 = vld [vmem:[%s9802_s5 + $0x80] sm:$0xff] (%p2237_p5)  ;;  %v9348_v12 = vld [vmem:[%s9802_s5 + $0x98] sm:$0xff] (%p2237_p5)  ;;  %v9378_v18 = vld [vmem:[%s9802_s5 + $0xc8] sm:$0xff] (%p2237_p5) }
 0x2d1   : >> { %6441 = vmatpush3.bf16.msra.mxu0 %v6440_v55  ;;  %6442 = vmatprep.subr.bf16.mxu1 %v6753_v35  ;;  %v5243_v55 = vld [vmem:[%s9010_s25 + $0x40] sm:$0xff]  ;;  %v9368_v16 = vld [vmem:[%s9802_s5 + $0xb8] sm:$0xff] (%p2237_p5)  ;;  %v9383_v19 = vld [vmem:[%s9802_s5 + $0xd0] sm:$0xff] (%p2237_p5) }
 0x2d2   : >> { %5996 = vmatprep.mubr.msk.f32.mxu0 %vm6754_vm5, %v6755_v37  ;;  %6448 = vmatprep.subr.bf16.mxu0 %v6753_v35  ;;  %v9353_v13 = vld [vmem:[%s9802_s5 + $0xa0] sm:$0xff] (%p2237_p5)  ;;  %v9388_v20 = vld [vmem:[%s9802_s5 + $0xd8] sm:$0xff] (%p2237_p5)  ;;  %v9398_v22 = vld [vmem:[%s9802_s5 + $0xe8] sm:$0xff] (%p2237_p5) }
 0x2d3   : >> { %5963 = vmatmul.mubr.msk.f32.gmra.mrb[4].mxu1 %vm333_vm0, %v2252_v53  ;;  %v5254_v53 = vld [vmem:[%s9010_s25 + $0x49] sm:$0xff]  ;;  %v9373_v17 = vld [vmem:[%s9802_s5 + $0xc0] sm:$0xff] (%p2237_p5)  ;;  %v9408_v24 = vld [vmem:[%s9802_s5 + $0xf8] sm:$0xff] (%p2237_p5) }
 0x2d4   : >> { %5973 = vmatprep.mubr.msk.f32.mxu1 %vm6754_vm5, %v6755_v37  ;;  %5997 = vmatmul.mubr.msk.f32.vlgmr.msra.gmra.mrb[4].mxu0 %vm333_vm0, %v2463_v61  ;;  %v5244_v61 = vld [vmem:[%s9010_s25 + $0x48] sm:$0xff]  ;;  %v9393_v21 = vld [vmem:[%s9802_s5 + $0xe0] sm:$0xff] (%p2237_p5)  ;;  %v9403_v23 = vld [vmem:[%s9802_s5 + $0xf0] sm:$0xff] (%p2237_p5) }
 0x2d5   : >> { %6450 = vmatpush3.bf16.msra.mxu0 %v6449_v42  ;;  %5999 = vmatprep.mubr.msk.f32.mxu0 %vm6754_vm5, %v6755_v37  ;;  %v5255_v42 = vld [vmem:[%s9010_s25 + $0x51] sm:$0x7f] }
 0x2d6   : >> { %6451 = vmatprep.subr.bf16.mxu0 %v6753_v35 }
 0x2d7   : >> { %5974 = vmatmul.mubr.msk.f32.vlgmr.msra.gmra.mrb[6].mxu1 %vm333_vm0, %v2243_v62  ;;  %v5245_v62 = vld [vmem:[%s9010_s25 + $0x50] sm:$0x7f] }
 0x2d8   : >> { %6444 = vmatpush3.bf16.msra.mxu1 %v6443_v45  ;;  %5976 = vmatprep.mubr.msk.f32.mxu1 %vm6754_vm5, %v6755_v37  ;;  %v5271_v45 = vld [vmem:[%s9010_s25 + $0x60] sm:$0xff] }
 0x2d9   : >> { %6000 = vmatmul.mubr.msk.f32.gmra.mrb[6].mxu0 %vm333_vm0, %v2464_v39  ;;  %6445 = vmatprep.subr.bf16.mxu1 %v6753_v35  ;;  %v6473_v39 = vpack.c.bf16 %v8973_v30, %v8968_v29  ;;  %v9433_v29 = vld [vmem:[%s9803_s6] ss:$0 sm:$0xff] (%p2237_p5) }
 0x2da   : >> { %6002 = vmatprep.mubr.msk.f32.mxu0 %vm6754_vm5, %v6755_v37  ;;  %6453 = vmatpush3.bf16.msra.mxu0 %v6452_v60  ;;  %v5261_v60 = vld [vmem:[%s9010_s25 + $0x32] sm:$0xff] }
 0x2db   : >> { %5977 = vmatmul.mubr.msk.f32.gmra.mrb[8].mxu1 %vm333_vm0, %v2244_v3  ;;  %6460 = vmatprep.subr.bf16.mxu0 %v6753_v35  ;;  %v6467_v3 = vpack.c.bf16 %v8953_v26, %v8948_v25  ;;  %v9413_v25 = vld [vmem:[%s9802_s5 + $0x100] sm:$0xff] (%p2237_p5)  ;;  %v9418_v26 = vld [vmem:[%s9802_s5 + $0x108] sm:$0xff] (%p2237_p5) }
 0x2dc   : >> { %5979 = vmatprep.mubr.msk.f32.mxu1 %vm6754_vm5, %v6755_v37  ;;  %6447 = vmatpush3.bf16.msra.mxu1 %v6446_v57  ;;  %v5272_v57 = vld [vmem:[%s9010_s25 + $0x68] sm:$0xff] }
 0x2dd   : >> { %6003 = vmatmul.mubr.msk.f32.gmra.mrb[8].mxu0 %vm333_vm0, %v2465_v38  ;;  %6454 = vmatprep.subr.bf16.mxu1 %v6753_v35  ;;  %v6476_v38 = vpack.c.bf16 %v8983_v32, %v8978_v31 }
 0x2de   : >> { %6005 = vmatprep.mubr.msk.f32.mxu0 %vm6754_vm5, %v6755_v37 }
 0x2df   : >> { %5980 = vmatmul.mubr.msk.f32.gmra.mrb[10].mxu1 %vm333_vm0, %v2245_v48  ;;  %v5262_v48 = vld [vmem:[%s9010_s25 + $0x3a] sm:$0xff] }
 0x2e0   : >> { %5982 = vmatprep.mubr.msk.f32.mxu1 %vm6754_vm5, %v6755_v37 }
 0x2e1   : >> { %6006 = vmatmul.mubr.msk.f32.gmra.mrb[10].mxu0 %vm333_vm0, %v2466_v51  ;;  %v6470_v51 = vpack.c.bf16 %v8963_v28, %v8958_v27  ;;  %v9423_v27 = vld [vmem:[%s9802_s5 + $0x110] sm:$0xff] (%p2237_p5)  ;;  %v9428_v28 = vld [vmem:[%s9802_s5 + $0x118] sm:$0xff] (%p2237_p5) }
 0x2e2   : >> { %6008 = vmatprep.mubr.msk.f32.mxu0 %vm6754_vm5, %v6755_v37 }
 0x2e3   : >> { %5983 = vmatmul.mubr.msk.f32.gmra.mrb[12].mxu1 %vm333_vm0, %v2246_v43  ;;  %v5273_v43 = vld [vmem:[%s9010_s25 + $0x70] sm:$0xff] }
 0x2e4   : >> { %5985 = vmatprep.mubr.msk.f32.mxu1 %vm6754_vm5, %v6755_v37 }
 0x2e5   : >> { %6009 = vmatmul.mubr.msk.f32.gmra.mrb[12].mxu0 %vm333_vm0, %v2467_v40  ;;  %v5263_v40 = vld [vmem:[%s9010_s25 + $0x42] sm:$0xff] }
 0x2e6   : >> { %6042 = vmatprep.mubr.msk.f32.mxu0 %vm6754_vm5, %v6755_v37 }
 0x2e7   : >> { %5986 = vmatmul.mubr.msk.f32.gmra.mrb[14].mxu1 %vm333_vm0, %v2247_v52  ;;  %v5264_v52 = vld [vmem:[%s9010_s25 + $0x4a] sm:$0xff] }
 0x2e8   : >> { %6019 = vmatprep.mubr.msk.f32.mxu1 %vm6754_vm5, %v6755_v37 }
 0x2e9   : >> { %6043 = vmatmul.mubr.msk.f32.vlgmr.msra.gmra.mrb[14].mxu0 %vm333_vm0, %v5251_v34  ;;  %v5275_v34 = vld [vmem:[%s9010_s25 + $0x80] sm:$0x7f] }
 0x2ea   : >> { %6462 = vmatpush3.bf16.msra.mxu0 %v6461_v36  ;;  %6045 = vmatprep.mubr.msk.f32.mxu0 %vm6754_vm5, %v6755_v37  ;;  %v5265_v36 = vld [vmem:[%s9010_s25 + $0x52] sm:$0x7f] }
 0x2eb   : >> { %6020 = vmatmul.mubr.msk.f32.vlgmr.msra.gmra.mrb[16].mxu1 %vm333_vm0, %v5241_v54  ;;  %6463 = vmatprep.subr.bf16.mxu0 %v6753_v35  ;;  %v5291_v54 = vld [vmem:[%s9010_s25 + $0x62] sm:$0xff] }
 0x2ec   : >> { %6456 = vmatpush3.bf16.msra.mxu1 %v6455_v58  ;;  %6022 = vmatprep.mubr.msk.f32.mxu1 %vm6754_vm5, %v6755_v37  ;;  %v5281_v58 = vld [vmem:[%s9010_s25 + $0x61] sm:$0xff] }
 0x2ed   : >> { %6046 = vmatmul.mubr.msk.f32.gmra.mrb[16].mxu0 %vm333_vm0, %v5252_v47  ;;  %6457 = vmatprep.subr.bf16.mxu1 %v6753_v35  ;;  %v5292_v47 = vld [vmem:[%s9010_s25 + $0x6a] sm:$0xff] }
 0x2ee   : >> { %6048 = vmatprep.mubr.msk.f32.mxu0 %vm6754_vm5, %v6755_v37  ;;  %6465 = vmatpush3.bf16.msra.mxu0 %v6464_v50  ;;  %v5282_v50 = vld [vmem:[%s9010_s25 + $0x69] sm:$0xff] }
 0x2ef   : >> { %6023 = vmatmul.mubr.msk.f32.gmra.mrb[18].mxu1 %vm333_vm0, %v5242_v63  ;;  %6472 = vmatprep.subr.bf16.mxu0 %v6753_v35  ;;  %v5293_v63 = vld [vmem:[%s9010_s25 + $0x72] sm:$0xff] }
 0x2f0   : >> { %6025 = vmatprep.mubr.msk.f32.mxu1 %vm6754_vm5, %v6755_v37  ;;  %6459 = vmatpush3.bf16.msra.mxu1 %v6458_v59  ;;  %v5283_v59 = vld [vmem:[%s9010_s25 + $0x71] sm:$0xff] }
 0x2f1   : >> { %6049 = vmatmul.mubr.msk.f32.gmra.mrb[18].mxu0 %vm333_vm0, %v5253_v41  ;;  %6466 = vmatprep.subr.bf16.mxu1 %v6753_v35  ;;  %v5294_v41 = vld [vmem:[%s9010_s25 + $0x7a] sm:$0xff] }
 0x2f2   : >> { %6051 = vmatprep.mubr.msk.f32.mxu0 %vm6754_vm5, %v6755_v37 }
 0x2f3   : >> { %6026 = vmatmul.mubr.msk.f32.gmra.mrb[20].mxu1 %vm333_vm0, %v5243_v55  ;;  %v5284_v55 = vld [vmem:[%s9010_s25 + $0x79] sm:$0xff] }
 0x2f4   : >> { %6028 = vmatprep.mubr.msk.f32.mxu1 %vm6754_vm5, %v6755_v37 }
 0x2f5   : >> { %6052 = vmatmul.mubr.msk.f32.gmra.mrb[20].mxu0 %vm333_vm0, %v5254_v53  ;;  %v5295_v53 = vld [vmem:[%s9010_s25 + $0x82] sm:$0x7f] }
 0x2f6   : >> { %6054 = vmatprep.mubr.msk.f32.mxu0 %vm6754_vm5, %v6755_v37 }
 0x2f7   : >> { %6029 = vmatmul.mubr.msk.f32.gmra.mrb[22].mxu1 %vm333_vm0, %v5244_v61  ;;  %v5285_v61 = vld [vmem:[%s9010_s25 + $0x81] sm:$0x7f] }
 0x2f8   : >> { %6031 = vmatprep.mubr.msk.f32.mxu1 %vm6754_vm5, %v6755_v37 }
 0x2f9   : >> { %6055 = vmatmul.mubr.msk.f32.gmra.mrb[22].mxu0 %vm333_vm0, %v5255_v42 }
 0x2fa   : >> { %6088 = vmatprep.mubr.msk.f32.mxu0 %vm6754_vm5, %v6755_v37 }
 0x2fb   : >> { %6032 = vmatmul.mubr.msk.f32.gmra.mrb[24].mxu1 %vm333_vm0, %v5245_v62 }
 0x2fc   : >> { %6065 = vmatprep.mubr.msk.f32.mxu1 %vm6754_vm5, %v6755_v37 }
 0x2fd   : >> { %6089 = vmatmul.mubr.msk.f32.vlgmr.msra.gmra.mrb[24].mxu0 %vm333_vm0, %v5271_v45 }
 0x2fe   : >> { %6474 = vmatpush3.bf16.msra.mxu0 %v6473_v39  ;;  %6091 = vmatprep.mubr.msk.f32.mxu0 %vm6754_vm5, %v6755_v37 }
 0x2ff   : >> { %6066 = vmatmul.mubr.msk.f32.vlgmr.msra.gmra.mrb[26].mxu1 %vm333_vm0, %v5261_v60  ;;  %6475 = vmatprep.subr.bf16.mxu0 %v6753_v35 }
 0x300   : >> { %6468 = vmatpush3.bf16.msra.mxu1 %v6467_v3  ;;  %6068 = vmatprep.mubr.msk.f32.mxu1 %vm6754_vm5, %v6755_v37 }
 0x301   : >> { %6092 = vmatmul.mubr.msk.f32.gmra.mrb[26].mxu0 %vm333_vm0, %v5272_v57  ;;  %6469 = vmatprep.subr.bf16.mxu1 %v6753_v35  ;;  %v5274_v35 = vld [vmem:[%s9010_s25 + $0x78] sm:$0xff]  ;;  %s9435_s25 = smov (%p2237_p5), 0  }
 0x302   : >> { %6094 = vmatprep.mubr.msk.f32.mxu0 %vm6754_vm5, %v6755_v37  ;;  %6477 = vmatpush3.bf16.msra.mxu0 %v6476_v38 }
 0x303   : >> { %6069 = vmatmul.mubr.msk.f32.gmra.mrb[28].mxu1 %vm333_vm0, %v5262_v48 }
 0x304   : >> { %6071 = vmatprep.mubr.msk.f32.mxu1 %vm6754_vm5, %v6755_v37  ;;  %6471 = vmatpush3.bf16.msra.mxu1 %v6470_v51 }
 0x305   : >> { %6095 = vmatmul.mubr.msk.f32.gmra.mrb[28].mxu0 %vm333_vm0, %v5273_v43 }
 0x306   : >> { %6097 = vmatprep.mubr.msk.f32.mxu0 %vm6754_vm5, %v6755_v37 }
 0x307   : >> { %6072 = vmatmul.mubr.msk.f32.gmra.mrb[30].mxu1 %vm333_vm0, %v5263_v40 }
 0x308   : >> { %6074 = vmatprep.mubr.msk.f32.mxu1 %vm6754_vm5, %v6755_v37 }
 0x309   : >> { %6098 = vmatmul.mubr.msk.f32.gmra.mrb[30].mxu0 %vm333_vm0, %v5274_v35 }
 0x30a   : >> { %6100 = vmatprep.mubr.msk.f32.mxu0 %vm6754_vm5, %v6755_v37 }
 0x30b   : >> { %6075 = vmatmul.mubr.msk.f32.gmra.mrb[32].mxu1 %vm333_vm0, %v5264_v52 }
 0x30c   : >> { %6077 = vmatprep.mubr.msk.f32.mxu1 %vm6754_vm5, %v6755_v37 }
 0x30d   : >> { %6101 = vmatmul.mubr.msk.f32.gmra.mrb[32].mxu0 %vm333_vm0, %v5275_v34 }
 0x30e   : >> { %6134 = vmatprep.mubr.msk.f32.mxu0 %vm6754_vm5, %v6755_v37 }
 0x30f   : >> { %6078 = vmatmul.mubr.msk.f32.gmra.mrb[34].mxu1 %vm333_vm0, %v5265_v36 }
 0x310   : >> { %6111 = vmatprep.mubr.msk.f32.mxu1 %vm6754_vm5, %v6755_v37 }
 0x311   : >> { %6135 = vmatmul.mubr.msk.f32.vlgmr.msra.gmra.mrb[34].mxu0 %vm333_vm0, %v5291_v54 }
 0x312   : >> { %6137 = vmatprep.mubr.msk.f32.mxu0 %vm6754_vm5, %v6755_v37 }
 0x313   : >> { %6112 = vmatmul.mubr.msk.f32.vlgmr.msra.gmra.mrb[36].mxu1 %vm333_vm0, %v5281_v58 }
 0x314   : >> { %6114 = vmatprep.mubr.msk.f32.mxu1 %vm6754_vm5, %v6755_v37 }
 0x315   : >> { %6138 = vmatmul.mubr.msk.f32.gmra.mrb[36].mxu0 %vm333_vm0, %v5292_v47 }
 0x316   : >> { %6140 = vmatprep.mubr.msk.f32.mxu0 %vm6754_vm5, %v6755_v37 }
 0x317   : >> { %6115 = vmatmul.mubr.msk.f32.gmra.mrb[38].mxu1 %vm333_vm0, %v5282_v50 }
 0x318   : >> { %6117 = vmatprep.mubr.msk.f32.mxu1 %vm6754_vm5, %v6755_v37 }
 0x319   : >> { %6141 = vmatmul.mubr.msk.f32.gmra.mrb[38].mxu0 %vm333_vm0, %v5293_v63 }
 0x31a   : >> { %6143 = vmatprep.mubr.msk.f32.mxu0 %vm6754_vm5, %v6755_v37 }
 0x31b   : >> { %6118 = vmatmul.mubr.msk.f32.gmra.mrb[40].mxu1 %vm333_vm0, %v5283_v59 }
 0x31c   : >> { %6120 = vmatprep.mubr.msk.f32.mxu1 %vm6754_vm5, %v6755_v37 }
 0x31d   : >> { %6144 = vmatmul.mubr.msk.f32.gmra.mrb[40].mxu0 %vm333_vm0, %v5294_v41 }
 0x31e   : >> { %6146 = vmatprep.mubr.msk.f32.mxu0 %vm6754_vm5, %v6755_v37 }
 0x31f   : >> { %6121 = vmatmul.mubr.msk.f32.gmra.mrb[42].mxu1 %vm333_vm0, %v5284_v55 }
 0x320   : >> { %6123 = vmatprep.mubr.msk.f32.mxu1 %vm6754_vm5, %v6755_v37 }
 0x321   : >> { %6147 = vmatmul.mubr.msk.f32.gmra.mrb[42].mxu0 %vm333_vm0, %v5295_v53 }
 0x323   : >> { %6124 = vmatmul.mubr.msk.f32.gmra.mrb[44].mxu1 %vm333_vm0, %v5285_v61 }
 0x39e   : >> { %v2344_v42 = vpop.f32.mrb[0].mxu1  ;;  %v2334_v62 = vpop.f32.mrb[0].mxu0 }
 0x39f   : >> { %v5958_v45 = vpop.f32.mrb[1].mxu1  ;;  %v5952_v39 = vpop.f32.mrb[1].mxu0 }
 0x3a2   : >> { %v2349_v60 = vpop.f32.mrb[2].mxu1  ;;  %v2339_v3 = vpop.f32.mrb[2].mxu0 }
 0x3a3   : >> { %v5961_v57 = vpop.f32.mrb[3].mxu1  ;;  %v5955_v38 = vpop.f32.mrb[3].mxu0 }
 0x3a6   : >> { %v2354_v48 = vpop.f32.mrb[4].mxu1 }
 0x3a7   : >> { %v5964_v51 = vpop.f32.mrb[5].mxu1  ;;  %v2549_v43 = vpop.f32.mrb[4].mxu0 }
 0x3a8   : >> { %v5998_v40 = vpop.f32.mrb[5].mxu0 }
 0x3aa   : >> { %v2439_v35 = vpop.f32.mrb[6].mxu1 }
 0x3ab   : >> { %v2440_v52 = vadd.f32 %v2439_v35, %v2334_v62  ;;  %v5975_v37 = vpop.f32.mrb[7].mxu1 }
 0x3ac   : >> { %v2554_v34 = vpop.f32.mrb[6].mxu0 }
 0x3ad   : >> { %v2573_v36 = vadd.f32 %v2549_v43, %v2440_v52  ;;  %v6001_v54 = vpop.f32.mrb[7].mxu0 }
 0x3ae   : >> { %v2444_v58 = vpop.f32.mrb[8].mxu1 }
 0x3af   : >> { %v2445_v47 = vadd.f32 %v2444_v58, %v2339_v3  ;;  %v5978_v50 = vpop.f32.mrb[9].mxu1 }
 0x3b0   : >> { %v2559_v63 = vpop.f32.mrb[8].mxu0 }
 0x3b1   : >> { %v2574_v59 = vadd.f32 %v2554_v34, %v2445_v47  ;;  %v6004_v41 = vpop.f32.mrb[9].mxu0 }
 0x3b2   : >> { %v2449_v55 = vpop.f32.mrb[10].mxu1 }
 0x3b3   : >> { %v2450_v53 = vadd.f32 %v2449_v55, %v2344_v42  ;;  %v5981_v61 = vpop.f32.mrb[11].mxu1 }
 0x3b4   : >> { %v2564_v45 = vpop.f32.mrb[10].mxu0 }
 0x3b5   : >> { %v2575_v39 = vadd.f32 %v2559_v63, %v2450_v53  ;;  %v6007_v57 = vpop.f32.mrb[11].mxu0 }
 0x3b6   : >> { %v2454_v38 = vpop.f32.mrb[12].mxu1 }
 0x3b7   : >> { %v2455_v51 = vadd.f32 %v2454_v38, %v2349_v60  ;;  %v5984_v40 = vpop.f32.mrb[13].mxu1 }
 0x3b8   : >> { %v2569_v62 = vpop.f32.mrb[12].mxu0 }
 0x3b9   : >> { %v2576_v35 = vadd.f32 %v2564_v45, %v2455_v51  ;;  %v6010_v37 = vpop.f32.mrb[13].mxu0 }
 0x3ba   : >> { %v2459_v43 = vpop.f32.mrb[14].mxu1 }
 0x3bb   : >> { %v2460_v52 = vadd.f32 %v2459_v43, %v2354_v48  ;;  %v5987_v54 = vpop.f32.mrb[15].mxu1 }
 0x3bc   : >> { %v2782_v3 = vpop.f32.mrb[14].mxu0 }
 0x3bd   : >> { %v2577_v58 = vadd.f32 %v2569_v62, %v2460_v52  ;;  %v6044_v50 = vpop.f32.mrb[15].mxu0 }
 0x3be   : >> { %v2667_v34 = vpop.f32.mrb[16].mxu1 }
 0x3bf   : >> { %v2691_v47 = vadd.f32 %v2667_v34, %v2573_v36  ;;  %v6021_v41 = vpop.f32.mrb[17].mxu1 }
 0x3c0   : >> { %v2787_v42 = vpop.f32.mrb[16].mxu0 }
 0x3c1   : >> { %v2806_v55 = vadd.f32 %v2782_v3, %v2691_v47  ;;  %v6047_v61 = vpop.f32.mrb[17].mxu0 }
 0x3c2   : >> { %v2672_v63 = vpop.f32.mrb[18].mxu1 }
 0x3c3   : >> { %v2692_v53 = vadd.f32 %v2672_v63, %v2574_v59  ;;  %v6024_v57 = vpop.f32.mrb[19].mxu1 }
 0x3c4   : >> { %v2792_v60 = vpop.f32.mrb[18].mxu0 }
 0x3c5   : >> { %v2807_v38 = vadd.f32 %v2787_v42, %v2692_v53  ;;  %v6050_v40 = vpop.f32.mrb[19].mxu0 }
 0x3c6   : >> { %v2677_v45 = vpop.f32.mrb[20].mxu1 }
 0x3c7   : >> { %v2693_v51 = vadd.f32 %v2677_v45, %v2575_v39  ;;  %v6027_v37 = vpop.f32.mrb[21].mxu1 }
 0x3c8   : >> { %v2797_v48 = vpop.f32.mrb[20].mxu0 }
 0x3c9   : >> { %v2808_v43 = vadd.f32 %v2792_v60, %v2693_v51  ;;  %v6053_v54 = vpop.f32.mrb[21].mxu0 }
 0x3ca   : >> { %v2682_v62 = vpop.f32.mrb[22].mxu1 }
 0x3cb   : >> { %v2694_v52 = vadd.f32 %v2682_v62, %v2576_v35  ;;  %v6030_v50 = vpop.f32.mrb[23].mxu1 }
 0x3cc   : >> { %v2802_v36 = vpop.f32.mrb[22].mxu0 }
 0x3cd   : >> { %v2809_v34 = vadd.f32 %v2797_v48, %v2694_v52  ;;  %v6056_v41 = vpop.f32.mrb[23].mxu0 }
 0x3ce   : >> { %v2687_v3 = vpop.f32.mrb[24].mxu1 }
 0x3cf   : >> { %v2695_v47 = vadd.f32 %v2687_v3, %v2577_v58  ;;  %v6033_v61 = vpop.f32.mrb[25].mxu1 }
 0x3d0   : >> { %v3015_v59 = vpop.f32.mrb[24].mxu0 }
 0x3d1   : >> { %v2810_v63 = vadd.f32 %v2802_v36, %v2695_v47  ;;  %v6090_v57 = vpop.f32.mrb[25].mxu0 }
 0x3d2   : >> { %v2897_v42 = vpop.f32.mrb[26].mxu1 }
 0x3d3   : >> { %v2921_v53 = vadd.f32 %v2897_v42, %v2806_v55  ;;  %v6067_v40 = vpop.f32.mrb[27].mxu1 }
 0x3d4   : >> { %v3020_v39 = vpop.f32.mrb[26].mxu0 }
 0x3d5   : >> { %v3039_v45 = vadd.f32 %v3015_v59, %v2921_v53  ;;  %v6093_v37 = vpop.f32.mrb[27].mxu0 }
 0x3d6   : >> { %v2902_v60 = vpop.f32.mrb[28].mxu1 }
 0x3d7   : >> { %v2922_v51 = vadd.f32 %v2902_v60, %v2807_v38  ;;  %v6070_v54 = vpop.f32.mrb[29].mxu1 }
 0x3d8   : >> { %v3025_v35 = vpop.f32.mrb[28].mxu0 }
 0x3d9   : >> { %v3040_v62 = vadd.f32 %v3020_v39, %v2922_v51  ;;  %v6096_v50 = vpop.f32.mrb[29].mxu0 }
 0x3da   : >> { %v2907_v48 = vpop.f32.mrb[30].mxu1 }
 0x3db   : >> { %v2923_v52 = vadd.f32 %v2907_v48, %v2808_v43  ;;  %v6073_v41 = vpop.f32.mrb[31].mxu1 }
 0x3dc   : >> { %v3030_v58 = vpop.f32.mrb[30].mxu0 }
 0x3dd   : >> { %v3041_v3 = vadd.f32 %v3025_v35, %v2923_v52  ;;  %v6099_v61 = vpop.f32.mrb[31].mxu0 }
 0x3de   : >> { %v2912_v36 = vpop.f32.mrb[32].mxu1 }
 0x3df   : >> { %v2924_v47 = vadd.f32 %v2912_v36, %v2809_v34  ;;  %v6076_v57 = vpop.f32.mrb[33].mxu1 }
 0x3e0   : >> { %v3035_v55 = vpop.f32.mrb[32].mxu0 }
 0x3e1   : >> { %v3042_v42 = vadd.f32 %v3030_v58, %v2924_v47  ;;  %v6102_v40 = vpop.f32.mrb[33].mxu0 }
 0x3e2   : >> { %v2917_v59 = vpop.f32.mrb[34].mxu1 }
 0x3e3   : >> { %v2925_v53 = vadd.f32 %v2917_v59, %v2810_v63  ;;  %v6079_v37 = vpop.f32.mrb[35].mxu1 }
 0x3e4   : >> { %v3245_v38 = vpop.f32.mrb[34].mxu0 }
 0x3e5   : >> { %v3043_v60 = vadd.f32 %v3035_v55, %v2925_v53  ;;  %v6136_v54 = vpop.f32.mrb[35].mxu0 }
 0x3e6   : >> { %v3130_v39 = vpop.f32.mrb[36].mxu1 }
 0x3e7   : >> { %v3154_v51 = vadd.f32 %v3130_v39, %v3039_v45  ;;  %v6113_v43 = vpop.f32.mrb[37].mxu1 }
 0x3e8   : >> { %v3250_v50 = vpop.f32.mrb[36].mxu0 }
 0x3e9   : >> { %v3269_v48 = vadd.f32 %v3245_v38, %v3154_v51  ;;  %v6139_v35 = vpop.f32.mrb[37].mxu0 }
 0x3ea   : >> { %v3135_v52 = vpop.f32.mrb[38].mxu1 }
 0x3eb   : >> { %v3280_v34 = vadd.f32 %v8988_v33, %v3269_v48  ;;  %v3155_v41 = vadd.f32 %v3135_v52, %v3040_v62  ;;  %v6116_v61 = vpop.f32.mrb[39].mxu1 }
 0x3ec   : >> { %v3255_v58 = vpop.f32.mrb[38].mxu0 }
 0x3ed   : >> { %v3285_v36 = vmax.f32 %v3280_v34, 0.0  ;;  %v3270_v47 = vadd.f32 %v3250_v50, %v3155_v41  ;;  %v6142_v63 = vpop.f32.mrb[39].mxu0 }
 0x3ee   : >> { %v3140_v57 = vpop.f32.mrb[40].mxu1  ;;  %v9263_v63 = vld [vmem:[%s9802_s5 + $0x10] sm:$0xff] (%p2237_p5) }
 0x3ef   : >> { %5302 = vst.msk [vmem:[%s5074_s26 + $0x62] sm:$0xff] %vm333_vm0, %v3285_v36  ;;  %v3281_v45 = vadd.f32 %v8988_v33, %v3270_v47  ;;  %v3156_v55 = vadd.f32 %v3140_v57, %v3041_v3  ;;  %v6119_v40 = vpop.f32.mrb[41].mxu1  ;;  %v9258_v47 = vld [vmem:[%s9802_s5 + $0x8] sm:$0xff] (%p2237_p5)  ;;  %v9268_v57 = vld [vmem:[%s9802_s5 + $0x18] sm:$0xff] (%p2237_p5) }
 0x3f0   : >> { %v3260_v59 = vpop.f32.mrb[40].mxu0 }
 0x3f1   : >> { %v3286_v53 = vmax.f32 %v3281_v45, 0.0  ;;  %v3271_v37 = vadd.f32 %v3255_v58, %v3156_v55  ;;  %v6145_v38 = vpop.f32.mrb[41].mxu0 }
 0x3f2   : >> { %v3145_v54 = vpop.f32.mrb[42].mxu1 }
 0x3f3   : >> { %5303 = vst.msk [vmem:[%s5074_s26 + $0x6a] sm:$0xff] %vm333_vm0, %v3286_v53  ;;  %v3282_v62 = vadd.f32 %v8988_v33, %v3271_v37  ;;  %v3157_v39 = vadd.f32 %v3145_v54, %v3042_v42  ;;  %v6122_v51 = vpop.f32.mrb[43].mxu1 }
 0x3f4   : >> { %v3265_v43 = vpop.f32.mrb[42].mxu0 }
 0x3f5   : >> { %v3287_v50 = vmax.f32 %v3282_v62, 0.0  ;;  %v3272_v48 = vadd.f32 %v3260_v59, %v3157_v39  ;;  %v6148_v35 = vpop.f32.mrb[43].mxu0 }
 0x3f6   : >> { %v3150_v52 = vpop.f32.mrb[44].mxu1 }
 0x3f7   : >> { %5304 = vst.msk [vmem:[%s5074_s26 + $0x72] sm:$0xff] %vm333_vm0, %v3287_v50  ;;  %v3283_v3 = vadd.f32 %v8988_v33, %v3272_v48  ;;  %v3158_v34 = vadd.f32 %v3150_v52, %v3043_v60  ;;  %v6125_v41 = vpop.f32.mrb[45].mxu1  ;;  %v9253_v60 = vld [vmem:[%s9802_s5] sm:$0xff] (%p2237_p5) }
 0x3f9   : >> { %v3288_v61 = vmax.f32 %v3283_v3, 0.0  ;;  %v3273_v58 = vadd.f32 %v3265_v43, %v3158_v34  ;;  %2239 = sbr.rel (!%p2237_p5) target bundleno = 706 (0x2c2), region = 140 }
 0x3fb   : >> { %5305 = vst.msk [vmem:[%s5074_s26 + $0x7a] sm:$0xff] %vm333_vm0, %v3288_v61  ;;  %v3284_v36 = vadd.f32 %v8988_v33, %v3273_v58 }
 0x3fd   : >> { %v3289_v42 = vmax.f32 %v3284_v36, 0.0 }
 0x3ff   : >> { %5306 = vst.msk [vmem:[%s5074_s26 + $0x82] sm:$0x7f] %vm3295_vm6, %v3289_v42 }
 0x400 LB: >> { %v6478_v30 = vpack.c.bf16 %v9278_v44, %v9273_v56  ;;  %v9444_v31 = vpack.c.bf16 %v9338_v10, %v9333_v9  ;;  %v6482_v32 = vpack.c.bf16 %v9288_v49, %v9283_v46  ;;  %v9450_v33 = vpack.c.bf16 %v9348_v12, %v9343_v11  ;;  %s3340_s26 = smul.u32 48, %s6743_s25  ;;  %s3339_s25 = sadd.s32 1, %s6743_s25   ;;  %s6743_s25 = sphi %s9435_s25, %s3339_s25  }
 0x401   : >> { %v6486_v45 = vpack.c.bf16 %v9258_v47, %v9253_v60  ;;  %v6518_v55 = vpack.c.bf16 %v9358_v14, %v9353_v13  ;;  %v6522_v62 = vpack.c.bf16 %v9368_v16, %v9363_v15  ;;  %v6490_v39 = vpack.c.bf16 %v9268_v57, %v9263_v63  ;;  %p3336_p6 = scmp.ge.s32.totalorder %s3339_s25, 41  }
 0x402   : >> { %6479 = vmatprep.subr.bf16.mxu1 %v6478_v30  ;;  %6511 = vmatprep.subr.bf16.mxu0 %v9444_v31  ;;  %s9462_s27 = scalar_lea.vmem [#allocation3], %s3340_s26  ;;  %v6526_v35 = vpack.c.bf16 %v9378_v18, %v9373_v17  ;;  %v6494_v52 = vpack.c.bf16 %v9298_v1, %v9293_v0  ;;  %v6530_v61 = vpack.c.bf16 %v9388_v20, %v9383_v19  ;;  %s5085_s28 = scalar_lea.vmem [#allocation4], %s3340_s26  ;;  %v9641_v60 = vld [vmem:[%s9804_s7 + $0x20] sm:$0xff] (%p3336_p6)  ;;  %v9646_v47 = vld [vmem:[%s9804_s7 + $0x28] sm:$0xff] (%p3336_p6)  ;;  %v9651_v63 = vld [vmem:[%s9804_s7 + $0x30] sm:$0xff] (%p3336_p6) }
 0x403   : >> { %6481 = vmatpush3.bf16.msra.mxu1 %v6478_v30  ;;  %6513 = vmatpush3.bf16.msra.mxu0 %v9444_v31  ;;  %v9656_v57 = vld [vmem:[%s9804_s7 + $0x38] sm:$0xff] (%p3336_p6)  ;;  %v9661_v56 = vld [vmem:[%s9804_s7 + $0x40] sm:$0xff] (%p3336_p6)  ;;  %v9666_v44 = vld [vmem:[%s9804_s7 + $0x48] sm:$0xff] (%p3336_p6)  ;;  %s9703_s25 = smov (%p3336_p6), 0  }
 0x404   : >> { %6483 = vmatprep.subr.bf16.mxu1 %v6482_v32  ;;  %6515 = vmatprep.subr.bf16.mxu0 %v9450_v33  ;;  %v9671_v46 = vld [vmem:[%s9804_s7 + $0x50] sm:$0xff] (%p3336_p6)  ;;  %v9676_v49 = vld [vmem:[%s9804_s7 + $0x58] sm:$0xff] (%p3336_p6)  ;;  %v9681_v0 = vld [vmem:[%s9804_s7 + $0x60] sm:$0xff] (%p3336_p6) }
 0x405   : > { %v9686_v1 = vld [vmem:[%s9804_s7 + $0x68] sm:$0xff] (%p3336_p6) }
 0x406   : >> { %v3348_v40 = vld [vmem:[%s9462_s27 + $0x1] sm:$0xff]  ;;  %v5337_v59 = vld [vmem:[%s9462_s27 + $0x31] sm:$0xff]  ;;  %v3349_v53 = vld [vmem:[%s9462_s27 + $0x9] sm:$0xff] }
 0x407   : >> { %6157 = vmatprep.mubr.msk.f32.mxu1 %vm333_vm0, %v3348_v40  ;;  %6225 = vmatprep.mubr.msk.f32.mxu0 %vm333_vm0, %v5337_v59  ;;  %v5338_v37 = vld [vmem:[%s9462_s27 + $0x39] sm:$0xff]  ;;  %v3350_v38 = vld [vmem:[%s9462_s27 + $0x11] sm:$0xff]  ;;  %v5339_v54 = vld [vmem:[%s9462_s27 + $0x41] sm:$0xff] }
 0x408   : >> { %6485 = vmatpush3.bf16.msra.mxu1 %v6482_v32  ;;  %6517 = vmatpush3.bf16.msra.mxu0 %v9450_v33  ;;  %v3351_v51 = vld [vmem:[%s9462_s27 + $0x19] sm:$0xff]  ;;  %v5340_v43 = vld [vmem:[%s9462_s27 + $0x49] sm:$0xff]  ;;  %v3352_v50 = vld [vmem:[%s9462_s27 + $0x21] sm:$0xff] }
 0x409   : >> { %6487 = vmatprep.subr.bf16.mxu1 %v6486_v45  ;;  %6519 = vmatprep.subr.bf16.mxu0 %v6518_v55  ;;  %v5349_v48 = vld [vmem:[%s9462_s27 + $0x32] sm:$0xff]  ;;  %v3353_v3 = vld [vmem:[%s9462_s27 + $0x29] sm:$0x1]  ;;  %v5350_v34 = vld [vmem:[%s9462_s27 + $0x3a] sm:$0xff] }
 0x40a   : >> { %v3342_v41 = vld [vmem:[%s9462_s27] sm:$0xff]  ;;  %v3343_v36 = vld [vmem:[%s9462_s27 + $0x8] sm:$0xff]  ;;  %v3344_v30 = vld [vmem:[%s9462_s27 + $0x10] sm:$0xff] }
 0x40b   : >> { %6158 = vmatmul.mubr.msk.f32.vlgmr.msra.gmra.mrb[0].mxu1 %vm333_vm0, %v3349_v53  ;;  %6226 = vmatmul.mubr.msk.f32.vlgmr.msra.gmra.mrb[0].mxu0 %vm333_vm0, %v5338_v37  ;;  %v5351_v58 = vld [vmem:[%s9462_s27 + $0x42] sm:$0xff]  ;;  %v5352_v42 = vld [vmem:[%s9462_s27 + $0x4a] sm:$0xff]  ;;  %v5353_v32 = vld [vmem:[%s9462_s27 + $0x52] sm:$0xff]  ;;  %v6502_v37 = vpack.c.bf16 %v9318_v6, %v9313_v5 }
 0x40c   : >> { %6489 = vmatpush3.bf16.msra.mxu1 %v6486_v45  ;;  %6521 = vmatpush3.bf16.msra.mxu0 %v6518_v55  ;;  %v6498_v45 = vpack.c.bf16 %v9308_v4, %v9303_v2  ;;  %v6534_v55 = vpack.c.bf16 %v9398_v22, %v9393_v21  ;;  %v3345_v40 = vld [vmem:[%s9462_s27 + $0x18] sm:$0xff]  ;;  %v3346_v53 = vld [vmem:[%s9462_s27 + $0x20] sm:$0xff]  ;;  %v9691_v2 = vld [vmem:[%s9804_s7 + $0x70] sm:$0xff] (%p3336_p6) }
 0x40d   : >> { %6160 = vmatprep.mubr.msk.f32.mxu1 %vm333_vm0, %v3350_v38  ;;  %6228 = vmatprep.mubr.msk.f32.mxu0 %vm333_vm0, %v5339_v54  ;;  %v5354_v59 = vld [vmem:[%s9462_s27 + $0x5a] sm:$0x1]  ;;  %v5361_v38 = vld [vmem:[%s9462_s27 + $0x60] sm:$0xff]  ;;  %v3347_v54 = vld [vmem:[%s9462_s27 + $0x28] sm:$0x1] }
 0x40e   : >> { %6523 = vmatprep.subr.bf16.mxu0 %v6522_v62  ;;  %6491 = vmatprep.subr.bf16.mxu1 %v6490_v39  ;;  %v9696_v4 = vld [vmem:[%s9804_s7 + $0x78] sm:$0xff] (%p3336_p6)  ;;  %v9701_v5 = vld [vmem:[%s9805_s8] ss:$0 sm:$0xff] (%p3336_p6) }
 0x40f   : >> { %6161 = vmatmul.mubr.msk.f32.gmra.mrb[2].mxu1 %vm333_vm0, %v3351_v51  ;;  %6229 = vmatmul.mubr.msk.f32.gmra.mrb[2].mxu0 %vm333_vm0, %v5340_v43  ;;  %v6538_v51 = vpack.c.bf16 %v9408_v24, %v9403_v23  ;;  %v5363_v43 = vld [vmem:[%s9462_s27 + $0x70] sm:$0xff] }
 0x410   : >> { %6525 = vmatpush3.bf16.msra.mxu0 %v6522_v62  ;;  %6163 = vmatprep.mubr.msk.f32.mxu1 %vm333_vm0, %v3352_v50  ;;  %v5362_v62 = vld [vmem:[%s9462_s27 + $0x68] sm:$0xff] }
 0x411   : >> { %6493 = vmatpush3.bf16.msra.mxu1 %v6490_v39  ;;  %6242 = vmatprep.mubr.msk.f32.mxu0 %vm333_vm0, %v5349_v48  ;;  %v3580_v39 = vld [vmem:[%s9462_s27 + $0x2] sm:$0xff]  ;;  %v3581_v50 = vld [vmem:[%s9462_s27 + $0xa] sm:$0xff]  ;;  %v5364_v48 = vld [vmem:[%s9462_s27 + $0x78] sm:$0xff] }
 0x412   : >> { %6527 = vmatprep.subr.bf16.mxu0 %v6526_v35  ;;  %6495 = vmatprep.subr.bf16.mxu1 %v6494_v52 }
 0x413   : >> { %6164 = vmatmul.mubr.msk.f32.gmra.mrb[4].mxu1 %vm333_vm0, %v3353_v3  ;;  %6243 = vmatmul.mubr.msk.f32.vlgmr.msra.gmra.mrb[0].mxu0 %vm333_vm0, %v5350_v34  ;;  %v6506_v3 = vpack.c.bf16 %v9328_v8, %v9323_v7  ;;  %v6542_v34 = vpack.c.bf16 %v9418_v26, %v9413_v25 }
 0x414   : >> { %6529 = vmatpush3.bf16.msra.mxu0 %v6526_v35  ;;  %6174 = vmatprep.mubr.msk.f32.mxu1 %vm333_vm0, %v3342_v41  ;;  %v3582_v35 = vld [vmem:[%s9462_s27 + $0x12] sm:$0xff]  ;;  %v3583_v41 = vld [vmem:[%s9462_s27 + $0x1a] sm:$0xff] }
 0x415   : >> { %6245 = vmatprep.mubr.msk.f32.mxu0 %vm333_vm0, %v5351_v58  ;;  %6531 = vmatprep.subr.bf16.mxu0 %v6530_v61  ;;  %v3584_v58 = vld [vmem:[%s9462_s27 + $0x22] sm:$0xff] }
 0x417   : >> { %6175 = vmatmul.mubr.msk.f32.vlgmr.msra.gmra.mrb[0].mxu1 %vm333_vm0, %v3343_v36  ;;  %6246 = vmatmul.mubr.msk.f32.gmra.mrb[2].mxu0 %vm333_vm0, %v5352_v42  ;;  %v5373_v36 = vld [vmem:[%s9462_s27 + $0x61] sm:$0xff]  ;;  %v3585_v42 = vld [vmem:[%s9462_s27 + $0x2a] sm:$0x1] }
 0x418   : >> { %6497 = vmatpush3.bf16.msra.mxu1 %v6494_v52  ;;  %6177 = vmatprep.mubr.msk.f32.mxu1 %vm333_vm0, %v3344_v30  ;;  %v5365_v52 = vld [vmem:[%s9462_s27 + $0x80] sm:$0xff]  ;;  %v5374_v30 = vld [vmem:[%s9462_s27 + $0x69] sm:$0xff] }
 0x419   : >> { %6248 = vmatprep.mubr.msk.f32.mxu0 %vm333_vm0, %v5353_v32  ;;  %6533 = vmatpush3.bf16.msra.mxu0 %v6530_v61  ;;  %v5366_v61 = vld [vmem:[%s9462_s27 + $0x88] sm:$0x1]  ;;  %v5325_v32 = vld [vmem:[%s9462_s27 + $0x30] sm:$0xff] }
 0x41a   : >> { %6499 = vmatprep.subr.bf16.mxu1 %v6498_v45  ;;  %6535 = vmatprep.subr.bf16.mxu0 %v6534_v55 }
 0x41b   : >> { %6178 = vmatmul.mubr.msk.f32.gmra.mrb[2].mxu1 %vm333_vm0, %v3345_v40  ;;  %6249 = vmatmul.mubr.msk.f32.gmra.mrb[4].mxu0 %vm333_vm0, %v5354_v59  ;;  %v5326_v40 = vld [vmem:[%s9462_s27 + $0x38] sm:$0xff] }
 0x41c   : >> { %6180 = vmatprep.mubr.msk.f32.mxu1 %vm333_vm0, %v3346_v53  ;;  %6501 = vmatpush3.bf16.msra.mxu1 %v6498_v45  ;;  %v6546_v45 = vpack.c.bf16 %v9428_v28, %v9423_v27  ;;  %v5376_v59 = vld [vmem:[%s9462_s27 + $0x79] sm:$0xff] }
 0x41d   : >> { %6259 = vmatprep.mubr.msk.f32.mxu0 %vm333_vm0, %v5361_v38  ;;  %6503 = vmatprep.subr.bf16.mxu1 %v6502_v37  ;;  %v5327_v53 = vld [vmem:[%s9462_s27 + $0x40] sm:$0xff]  ;;  %v5328_v38 = vld [vmem:[%s9462_s27 + $0x48] sm:$0xff] }
 0x41f   : >> { %6181 = vmatmul.mubr.msk.f32.gmra.mrb[4].mxu1 %vm333_vm0, %v3347_v54  ;;  %6260 = vmatmul.mubr.msk.f32.vlgmr.msra.gmra.mrb[0].mxu0 %vm333_vm0, %v5362_v62  ;;  %v5378_v54 = vld [vmem:[%s9462_s27 + $0x89] sm:$0x1]  ;;  %v5329_v62 = vld [vmem:[%s9462_s27 + $0x50] sm:$0xff] }
 0x420   : >> { %6537 = vmatpush3.bf16.msra.mxu0 %v6534_v55  ;;  %6191 = vmatprep.mubr.msk.f32.mxu1 %vm333_vm0, %v3580_v39  ;;  %v5375_v55 = vld [vmem:[%s9462_s27 + $0x71] sm:$0xff]  ;;  %v5385_v39 = vld [vmem:[%s9462_s27 + $0x62] sm:$0xff] }
 0x421   : >> { %6262 = vmatprep.mubr.msk.f32.mxu0 %vm333_vm0, %v5363_v43  ;;  %6539 = vmatprep.subr.bf16.mxu0 %v6538_v51  ;;  %v5387_v43 = vld [vmem:[%s9462_s27 + $0x72] sm:$0xff] }
 0x423   : >> { %6192 = vmatmul.mubr.msk.f32.vlgmr.msra.gmra.mrb[0].mxu1 %vm333_vm0, %v3581_v50  ;;  %6263 = vmatmul.mubr.msk.f32.gmra.mrb[2].mxu0 %vm333_vm0, %v5364_v48  ;;  %v5341_v50 = vld [vmem:[%s9462_s27 + $0x51] sm:$0xff]  ;;  %v5388_v48 = vld [vmem:[%s9462_s27 + $0x7a] sm:$0xff] }
 0x424   : >> { %6505 = vmatpush3.bf16.msra.mxu1 %v6502_v37  ;;  %6194 = vmatprep.mubr.msk.f32.mxu1 %vm333_vm0, %v3582_v35  ;;  %v5377_v37 = vld [vmem:[%s9462_s27 + $0x81] sm:$0xff] }
 0x425   : >> { %6265 = vmatprep.mubr.msk.f32.mxu0 %vm333_vm0, %v5365_v52  ;;  %6541 = vmatpush3.bf16.msra.mxu0 %v6538_v51  ;;  %v5386_v51 = vld [vmem:[%s9462_s27 + $0x6a] sm:$0xff]  ;;  %v5389_v35 = vld [vmem:[%s9462_s27 + $0x82] sm:$0xff]  ;;  %v5342_v52 = vld [vmem:[%s9462_s27 + $0x59] sm:$0x1] }
 0x426   : >> { %6507 = vmatprep.subr.bf16.mxu1 %v6506_v3  ;;  %6543 = vmatprep.subr.bf16.mxu0 %v6542_v34 }
 0x427   : >> { %6195 = vmatmul.mubr.msk.f32.gmra.mrb[2].mxu1 %vm333_vm0, %v3583_v41  ;;  %6266 = vmatmul.mubr.msk.f32.gmra.mrb[4].mxu0 %vm333_vm0, %v5366_v61 }
 0x428   : >> { %6197 = vmatprep.mubr.msk.f32.mxu1 %vm333_vm0, %v3584_v58  ;;  %6509 = vmatpush3.bf16.msra.mxu1 %v6506_v3  ;;  %v5390_v3 = vld [vmem:[%s9462_s27 + $0x8a] sm:$0x1] }
 0x429   : >> { %6276 = vmatprep.mubr.msk.f32.mxu0 %vm333_vm0, %v5373_v36  ;;  %6590 = vmatprep.subr.bf16.mxu1 %v9444_v31 }
 0x42b   : >> { %6198 = vmatmul.mubr.msk.f32.gmra.mrb[4].mxu1 %vm333_vm0, %v3585_v42  ;;  %6277 = vmatmul.mubr.msk.f32.vlgmr.msra.gmra.mrb[0].mxu0 %vm333_vm0, %v5374_v30 }
 0x42c   : >> { %6545 = vmatpush3.bf16.msra.mxu0 %v6542_v34  ;;  %6208 = vmatprep.mubr.msk.f32.mxu1 %vm333_vm0, %v5325_v32 }
 0x42d   : >> { %6279 = vmatprep.mubr.msk.f32.mxu0 %vm333_vm0, %v5375_v55  ;;  %6547 = vmatprep.subr.bf16.mxu0 %v6546_v45 }
 0x42f   : >> { %6209 = vmatmul.mubr.msk.f32.vlgmr.msra.gmra.mrb[0].mxu1 %vm333_vm0, %v5326_v40  ;;  %6280 = vmatmul.mubr.msk.f32.gmra.mrb[2].mxu0 %vm333_vm0, %v5376_v59 }
 0x430   : >> { %6592 = vmatpush3.bf16.msra.mxu1 %v9444_v31  ;;  %6211 = vmatprep.mubr.msk.f32.mxu1 %vm333_vm0, %v5327_v53  ;;  %v5330_v31 = vld [vmem:[%s9462_s27 + $0x58] sm:$0x1] }
 0x431   : >> { %6282 = vmatprep.mubr.msk.f32.mxu0 %vm333_vm0, %v5377_v37  ;;  %6549 = vmatpush3.bf16.msra.mxu0 %v6546_v45 }
 0x432   : >> { %6591 = vmatprep.subr.bf16.mxu1 %v9450_v33 }
 0x433   : >> { %6212 = vmatmul.mubr.msk.f32.gmra.mrb[2].mxu1 %vm333_vm0, %v5328_v38  ;;  %6283 = vmatmul.mubr.msk.f32.gmra.mrb[4].mxu0 %vm333_vm0, %v5378_v54 }
 0x434   : >> { %6214 = vmatprep.mubr.msk.f32.mxu1 %vm333_vm0, %v5329_v62  ;;  %6293 = vmatprep.mubr.msk.f32.mxu0 %vm333_vm0, %v5385_v39 }
 0x435   : >> { %6593 = vmatpush3.bf16.msra.mxu1 %v9450_v33 }
 0x437   : >> { %6215 = vmatmul.mubr.msk.f32.gmra.mrb[4].mxu1 %vm333_vm0, %v5330_v31  ;;  %6294 = vmatmul.mubr.msk.f32.vlgmr.msra.gmra.mrb[0].mxu0 %vm333_vm0, %v5386_v51 }
 0x438   : >> { %6296 = vmatprep.mubr.msk.f32.mxu0 %vm333_vm0, %v5387_v43  ;;  %6231 = vmatprep.mubr.msk.f32.mxu1 %vm333_vm0, %v5341_v50 }
 0x43b   : >> { %6297 = vmatmul.mubr.msk.f32.gmra.mrb[2].mxu0 %vm333_vm0, %v5388_v48 }
 0x43c   : >> { %6299 = vmatprep.mubr.msk.f32.mxu0 %vm333_vm0, %v5389_v35 }
 0x43f   : >> { %6232 = vmatmul.mubr.msk.f32.vlgmr.msra.gmra.mrb[4].mxu1 %vm333_vm0, %v5342_v52  ;;  %6300 = vmatmul.mubr.msk.f32.gmra.mrb[4].mxu0 %vm333_vm0, %v5390_v3 }
 0x502   : >> { %v6210_v33 = vpop.f32.mrb[0].mxu1 }
 0x503   : >> { %v3798_v34 = vpop.f32.mrb[1].mxu1 }
 0x506   : >> { %v6213_v41 = vpop.f32.mrb[2].mxu1 }
 0x507   : >> { %v3808_v61 = vpop.f32.mrb[3].mxu1 }
 0x50a   : >> { %v6295_v58 = vpop.f32.mrb[0].mxu0 }
 0x50b   : >> { %v6594_v36 = vadd.f32 %v6295_v58, %v6210_v33  ;;  %v4426_v42 = vpop.f32.mrb[1].mxu0  ;;  %v9626_v58 = vld [vmem:[%s9804_s7 + $0x8] sm:$0xff] (%p3336_p6) }
 0x50c   : >> { %v6595_v30 = vadd.f32 %v4426_v42, %v3798_v34  ;;  %v9636_v42 = vld [vmem:[%s9804_s7 + $0x18] sm:$0xff] (%p3336_p6) }
 0x50d   : >> { %v4468_v32 = vadd.f32 %v6594_v36, %v9433_v29  ;;  %v9631_v36 = vld [vmem:[%s9804_s7 + $0x10] sm:$0xff] (%p3336_p6) }
 0x50e   : >> { %v4467_v45 = vadd.f32 %v6595_v30, %v9433_v29  ;;  %v6298_v55 = vpop.f32.mrb[2].mxu0 }
 0x50f   : >> { %v4474_v40 = vmax.f32 %v4468_v32, 0.0  ;;  %v6596_v59 = vadd.f32 %v6298_v55, %v6213_v41  ;;  %v4436_v53 = vpop.f32.mrb[3].mxu0 }
 0x510   : >> { %v4473_v37 = vmax.f32 %v4467_v45, 0.0  ;;  %v6597_v38 = vadd.f32 %v4436_v53, %v3808_v61  ;;  %v9621_v61 = vld [vmem:[%s9804_s7] sm:$0xff] (%p3336_p6) }
 0x511   : >> { %5399 = vst.msk [vmem:[%s5085_s28 + $0x39] sm:$0xff] %vm333_vm0, %v4474_v40  ;;  %v4470_v54 = vadd.f32 %v6596_v59, %v9433_v29 }
 0x512   : >> { %5398 = vst.msk [vmem:[%s5085_s28 + $0x31] sm:$0xff] %vm333_vm0, %v4473_v37  ;;  %v4469_v62 = vadd.f32 %v6597_v38, %v9433_v29  ;;  %v6233_v39 = vpop.f32.mrb[4].mxu1  ;;  %v6301_v31 = vpop.f32.mrb[4].mxu0 }
 0x513   : >> { %v4476_v51 = vmax.f32 %v4470_v54, 0.0  ;;  %v6598_v43 = vadd.f32 %v6301_v31, %v6233_v39  ;;  %v3943_v50 = vpop.f32.mrb[5].mxu1  ;;  %v4446_v48 = vpop.f32.mrb[5].mxu0 }
 0x514   : >> { %v4475_v35 = vmax.f32 %v4469_v62, 0.0  ;;  %v6599_v52 = vadd.f32 %v4446_v48, %v3943_v50  ;;  %3338 = sbr.rel (!%p3336_p6) target bundleno = 1024 (0x400), region = 151 }
 0x515   : >> { %5401 = vst.msk [vmem:[%s5085_s28 + $0x49] sm:$0xff] %vm333_vm0, %v4476_v51  ;;  %v4472_v3 = vadd.f32 %v6598_v43, %v9433_v29 }
 0x516   : >> { %5400 = vst.msk [vmem:[%s5085_s28 + $0x41] sm:$0xff] %vm333_vm0, %v4475_v35  ;;  %v4471_v33 = vadd.f32 %v6599_v52, %v9433_v29 }
 0x517   : >> { %v4478_v34 = vmax.f32 %v4472_v3, 0.0 }
 0x518   : >> { %v4477_v41 = vmax.f32 %v4471_v33, 0.0 }
 0x519   : >> { %5403 = vst.msk [vmem:[%s5085_s28 + $0x59] sm:$0x1] %vm339_vm1, %v4478_v34 }
 0x51a   : >> { %5402 = vst.msk [vmem:[%s5085_s28 + $0x51] sm:$0xff] %vm333_vm0, %v4477_v41 }
 0x51b LB: >> { %v6550_v6 = vpack.c.bf16 %v9646_v47, %v9641_v60  ;;  %v6566_v7 = vpack.c.bf16 %v9666_v44, %v9661_v56  ;;  %v6554_v8 = vpack.c.bf16 %v9656_v57, %v9651_v63  ;;  %v6570_v9 = vpack.c.bf16 %v9676_v49, %v9671_v46  ;;  %s4509_s26 = smul.u32 48, %s6747_s25  ;;  %s4508_s25 = sadd.s32 1, %s6747_s25   ;;  %s6747_s25 = sphi %s9703_s25, %s4508_s25  }
 0x51c   : >> { %v6558_v10 = vpack.c.bf16 %v9626_v58, %v9621_v61  ;;  %v6574_v11 = vpack.c.bf16 %v9686_v1, %v9681_v0  ;;  %v6562_v18 = vpack.c.bf16 %v9636_v42, %v9631_v36  ;;  %v6578_v19 = vpack.c.bf16 %v9696_v4, %v9691_v2  ;;  %p4505_p7 = scmp.ge.s32.totalorder %s4508_s25, 42  }
 0x51d   : >> { %6551 = vmatprep.subr.bf16.mxu1 %v6550_v6  ;;  %6567 = vmatprep.subr.bf16.mxu0 %v6566_v7  ;;  %s9723_s27 = scalar_lea.vmem [#allocation4], %s4509_s26  ;;  %s5014_s28 = scalar_lea.vmem %s8465_s17, %s4509_s26  ;;  %vm5015_vm7 = vcmask 97280   ;;  %vm5021_vm8 = vcmask 91136  }
 0x51e   : >> { %6553 = vmatpush3.bf16.msra.mxu1 %v6550_v6  ;;  %6569 = vmatpush3.bf16.msra.mxu0 %v6566_v7 }
 0x51f   : >> { %6555 = vmatprep.subr.bf16.mxu1 %v6554_v8  ;;  %6571 = vmatprep.subr.bf16.mxu0 %v6570_v9 }
 0x521   : >> { %v4517_v12 = vld [vmem:[%s9723_s27 + $0x1] sm:$0xff]  ;;  %v5416_v13 = vld [vmem:[%s9723_s27 + $0x30] sm:$0xff]  ;;  %v5417_v15 = vld [vmem:[%s9723_s27 + $0x38] sm:$0xff] }
 0x522   : >> { %6310 = vmatprep.mubr.msk.f32.mxu1 %vm333_vm0, %v4517_v12  ;;  %6344 = vmatprep.mubr.msk.f32.mxu0 %vm333_vm0, %v5416_v13  ;;  %v4518_v14 = vld [vmem:[%s9723_s27 + $0x9] sm:$0xff]  ;;  %v4519_v16 = vld [vmem:[%s9723_s27 + $0x11] sm:$0xff]  ;;  %v5418_v17 = vld [vmem:[%s9723_s27 + $0x40] sm:$0xff] }
 0x523   : >> { %6557 = vmatpush3.bf16.msra.mxu1 %v6554_v8  ;;  %6573 = vmatpush3.bf16.msra.mxu0 %v6570_v9  ;;  %v4520_v20 = vld [vmem:[%s9723_s27 + $0x19] sm:$0xff]  ;;  %v5419_v21 = vld [vmem:[%s9723_s27 + $0x48] sm:$0xff]  ;;  %v5420_v23 = vld [vmem:[%s9723_s27 + $0x50] sm:$0xff] }
 0x524   : >> { %6559 = vmatprep.subr.bf16.mxu1 %v6558_v10  ;;  %6575 = vmatprep.subr.bf16.mxu0 %v6574_v11  ;;  %v4521_v22 = vld [vmem:[%s9723_s27 + $0x21] sm:$0xff]  ;;  %v4522_v24 = vld [vmem:[%s9723_s27 + $0x29] sm:$0x3]  ;;  %v5421_v25 = vld [vmem:[%s9723_s27 + $0x58] sm:$0x3] }
 0x525   : >> { %v4511_v26 = vld [vmem:[%s9723_s27] sm:$0xff]  ;;  %v5428_v27 = vld [vmem:[%s9723_s27 + $0x31] sm:$0xff]  ;;  %v4512_v28 = vld [vmem:[%s9723_s27 + $0x8] sm:$0xff] }
 0x526   : >> { %6311 = vmatmul.mubr.msk.f32.vlgmr.msra.gmra.mrb[0].mxu1 %vm333_vm0, %v4518_v14  ;;  %6345 = vmatmul.mubr.msk.f32.vlgmr.msra.gmra.mrb[0].mxu0 %vm333_vm0, %v5417_v15  ;;  %v5429_v29 = vld [vmem:[%s9723_s27 + $0x39] sm:$0xff]  ;;  %v4513_v30 = vld [vmem:[%s9723_s27 + $0x10] sm:$0xff]  ;;  %v5430_v32 = vld [vmem:[%s9723_s27 + $0x41] sm:$0xff] }
 0x527   : >> { %6561 = vmatpush3.bf16.msra.mxu1 %v6558_v10  ;;  %6577 = vmatpush3.bf16.msra.mxu0 %v6574_v11  ;;  %v4514_v45 = vld [vmem:[%s9723_s27 + $0x18] sm:$0xff]  ;;  %v5431_v55 = vld [vmem:[%s9723_s27 + $0x49] sm:$0xff]  ;;  %v4515_v40 = vld [vmem:[%s9723_s27 + $0x20] sm:$0xff] }
 0x528   : >> { %6313 = vmatprep.mubr.msk.f32.mxu1 %vm333_vm0, %v4519_v16  ;;  %6347 = vmatprep.mubr.msk.f32.mxu0 %vm333_vm0, %v5418_v17  ;;  %v5432_v59 = vld [vmem:[%s9723_s27 + $0x51] sm:$0xff]  ;;  %v4516_v53 = vld [vmem:[%s9723_s27 + $0x28] sm:$0x3]  ;;  %v5433_v37 = vld [vmem:[%s9723_s27 + $0x59] sm:$0x3] }
 0x529   : >> { %6563 = vmatprep.subr.bf16.mxu1 %v6562_v18  ;;  %6579 = vmatprep.subr.bf16.mxu0 %v6578_v19 }
 0x52a   : >> { %6314 = vmatmul.mubr.msk.f32.gmra.mrb[2].mxu1 %vm333_vm0, %v4520_v20  ;;  %6348 = vmatmul.mubr.msk.f32.gmra.mrb[2].mxu0 %vm333_vm0, %v5419_v21 }
 0x52b   : >> { %6316 = vmatprep.mubr.msk.f32.mxu1 %vm333_vm0, %v4521_v22  ;;  %6565 = vmatpush3.bf16.msra.mxu1 %v6562_v18 }
 0x52c   : >> { %6350 = vmatprep.mubr.msk.f32.mxu0 %vm333_vm0, %v5420_v23  ;;  %6581 = vmatpush3.bf16.msra.mxu0 %v6578_v19 }
 0x52e   : >> { %6317 = vmatmul.mubr.msk.f32.gmra.mrb[4].mxu1 %vm333_vm0, %v4522_v24  ;;  %6351 = vmatmul.mubr.msk.f32.gmra.mrb[4].mxu0 %vm333_vm0, %v5421_v25 }
 0x52f   : >> { %6327 = vmatprep.mubr.msk.f32.mxu1 %vm333_vm0, %v4511_v26  ;;  %6361 = vmatprep.mubr.msk.f32.mxu0 %vm333_vm0, %v5428_v27 }
 0x532   : >> { %6328 = vmatmul.mubr.msk.f32.vlgmr.msra.gmra.mrb[0].mxu1 %vm333_vm0, %v4512_v28  ;;  %6362 = vmatmul.mubr.msk.f32.vlgmr.msra.gmra.mrb[0].mxu0 %vm333_vm0, %v5429_v29 }
 0x533   : >> { %6330 = vmatprep.mubr.msk.f32.mxu1 %vm333_vm0, %v4513_v30  ;;  %6364 = vmatprep.mubr.msk.f32.mxu0 %vm333_vm0, %v5430_v32 }
 0x536   : >> { %6331 = vmatmul.mubr.msk.f32.gmra.mrb[2].mxu1 %vm333_vm0, %v4514_v45  ;;  %6365 = vmatmul.mubr.msk.f32.gmra.mrb[2].mxu0 %vm333_vm0, %v5431_v55 }
 0x537   : >> { %6333 = vmatprep.mubr.msk.f32.mxu1 %vm333_vm0, %v4515_v40  ;;  %6367 = vmatprep.mubr.msk.f32.mxu0 %vm333_vm0, %v5432_v59 }
 0x53a   : >> { %6334 = vmatmul.mubr.msk.f32.gmra.mrb[4].mxu1 %vm333_vm0, %v4516_v53  ;;  %6368 = vmatmul.mubr.msk.f32.gmra.mrb[4].mxu0 %vm333_vm0, %v5433_v37 }
 0x605   : >> { %v6329_v38 = vpop.f32.mrb[0].mxu1  ;;  %v6363_v54 = vpop.f32.mrb[0].mxu0 }
 0x606   : >> { %v6642_v62 = vadd.f32 %v6363_v54, %v6329_v38  ;;  %v4720_v39 = vpop.f32.mrb[1].mxu1  ;;  %v4967_v31 = vpop.f32.mrb[1].mxu0 }
 0x607   : >> { %v6643_v51 = vadd.f32 %v4967_v31, %v4720_v39 }
 0x608   : >> { %v5009_v43 = vadd.f32 %v6642_v62, %v9701_v5 }
 0x609   : >> { %v5008_v50 = vadd.f32 %v6643_v51, %v9701_v5  ;;  %v6332_v48 = vpop.f32.mrb[2].mxu1  ;;  %v6366_v35 = vpop.f32.mrb[2].mxu0 }
 0x60a   : >> { %5017 = vst.msk [vmem:[%s5014_s28 + $0x8] sm:$0xff] %vm5015_vm7, %v5009_v43  ;;  %v6644_v52 = vadd.f32 %v6366_v35, %v6332_v48  ;;  %v4730_v3 = vpop.f32.mrb[3].mxu1  ;;  %v4977_v33 = vpop.f32.mrb[3].mxu0 }
 0x60b   : >> { %5016 = vst.msk [vmem:[%s5014_s28] sm:$0xff] %vm5015_vm7, %v5008_v50  ;;  %v6645_v34 = vadd.f32 %v4977_v33, %v4730_v3 }
 0x60c   : >> { %v5011_v41 = vadd.f32 %v6644_v52, %v9701_v5 }
 0x60d   : >> { %v5010_v6 = vadd.f32 %v6645_v34, %v9701_v5  ;;  %v6335_v7 = vpop.f32.mrb[4].mxu1  ;;  %v6369_v8 = vpop.f32.mrb[4].mxu0  ;;  %4507 = sbr.rel (!%p4505_p7) target bundleno = 1307 (0x51b), region = 162 }
 0x60e   : >> { %5019 = vst.msk [vmem:[%s5014_s28 + $0x18] sm:$0xff] %vm5015_vm7, %v5011_v41  ;;  %v6646_v9 = vadd.f32 %v6369_v8, %v6335_v7  ;;  %v4740_v10 = vpop.f32.mrb[5].mxu1  ;;  %v4987_v11 = vpop.f32.mrb[5].mxu0 }
 0x60f   : >> { %5018 = vst.msk [vmem:[%s5014_s28 + $0x10] sm:$0xff] %vm5015_vm7, %v5010_v6  ;;  %v6647_v12 = vadd.f32 %v4987_v11, %v4740_v10 }
 0x610   : >> { %v5013_v13 = vadd.f32 %v6646_v9, %v9701_v5 }
 0x611   : >> { %v5012_v14 = vadd.f32 %v6647_v12, %v9701_v5 }
 0x612   : >> { %5022 = vst.msk [vmem:[%s5014_s28 + $0x28] sm:$0x3] %vm5021_vm8, %v5013_v13 }
 0x613   : >> { %5020 = vst.msk [vmem:[%s5014_s28 + $0x20] sm:$0xff] %vm5015_vm7, %v5012_v14 }
 0x614 PF: > { %s19_s30 = sadd.s32 1, %s6731_s30  }
 0x615   : > { %p16_p8 = scmp.ge.s32.totalorder %s19_s30, 4  }
 0x617   :  { %18 = sbr.rel (!%p16_p8) target bundleno = 1 (0x1), region = 173 }

</bundles_post_ra>
